<compile_context>
chip_gen: v6e
topology: v6e:2x2x1
jax: 0.10.0
libtpu: 0.0.40
codegen_flags: <defaults>
</compile_context>

<pallas_src>
import jax
import jax.numpy as jnp
from jax.experimental import pallas as pl
from jax.experimental.pallas import tpu as pltpu

HIDDEN = 512


def _mlp_kernel(x_ref,            # (F, TB)   bf16  -- batch on lanes
                w1_ref, b1_ref,   # (H, F)  bf16 , (H, 1) f32
                w2_ref, b2_ref,   # (H, H)  bf16 , (H, 1) f32
                w3_ref, b3_ref,   # (H, H)  bf16 , (H, 1) f32
                w4_ref, b4_ref,   # (H, 1)  f32  , (1, 1) f32
                o_ref):           # (1, TB) f32
    # layer 1: (H, F) @ (F, TB) -> f32 accum; bias + ReLU in f32; bf16 for next MXU pass
    h = jnp.dot(w1_ref[...], x_ref[...], preferred_element_type=jnp.float32)
    h = jnp.maximum(h + b1_ref[...], 0.0).astype(jnp.bfloat16)
    # layer 2: (H, H) @ (H, TB)
    h = jnp.dot(w2_ref[...], h, preferred_element_type=jnp.float32)
    h = jnp.maximum(h + b2_ref[...], 0.0).astype(jnp.bfloat16)
    # layer 3: (H, H) @ (H, TB) -- keep f32 for the VPU/XLU epilogue below
    h = jnp.dot(w3_ref[...], h, preferred_element_type=jnp.float32)
    h = jnp.maximum(h + b3_ref[...], 0.0)
    # layer 4 as an epilogue: broadcast-mul by the (H,1) weight column (VPU) and
    # reduce over the sublane axis (XLU) -> (1, TB); MXU stays off this path.
    y = jnp.sum(h * w4_ref[...], axis=0, keepdims=True)
    o_ref[...] = jnp.tanh(y + b4_ref[...]).astype(o_ref.dtype)


def prepare_params(params):
    """One-time (out-of-hot-path) conversion of PyTorch-layout params to kernel form.

    params: [(w1,b1),...,(w4,b4)], weights (out, in), biases (out,).
    Returns a flat tuple: bf16 weights for layers 1-3, f32 (out,1) biases, the final
    layer's weight as an f32 (HIDDEN, 1) column and its bias as f32 (1, 1).
    """
    (w1, b1), (w2, b2), (w3, b3), (w4, b4) = params
    col = lambda b: jnp.asarray(b, jnp.float32).reshape(-1, 1)
    return (w1.astype(jnp.bfloat16), col(b1),
            w2.astype(jnp.bfloat16), col(b2),
            w3.astype(jnp.bfloat16), col(b3),
            jnp.asarray(w4, jnp.float32).reshape(-1, 1),     # (H, 1) column
            jnp.asarray(b4, jnp.float32).reshape(1, 1))


def _pick_tile_b(batch, max_tile_b=1024):
    """Batch tile: multiple of 128, <= max_tile_b, and (when batch allows) chosen so
    the grid has >= 2 (almost always even) steps so v7x's two TensorCores both work."""
    if batch <= 128:
        return 128
    pairs = max(1, pl.cdiv(pl.cdiv(batch, 2), max_tile_b))   # number of tile pairs
    tile = pl.cdiv(batch, 2 * pairs)
    tile = ((tile + 127) // 128) * 128
    return min(tile, max_tile_b)


def latent_nn_forward_fb(x_t, prepared, *, tile_b):
    """Fast path: x_t is (F, B_pad) bf16 with B_pad % tile_b == 0.  Returns (1, B_pad) f32.
    No wrapper-side pad / transpose / cast — just the pallas_call."""
    feat, b_pad = x_t.shape
    assert tile_b % 128 == 0 and b_pad % tile_b == 0
    num_tiles = b_pad // tile_b
    (w1, b1, w2, b2, w3, b3, w4, b4) = prepared

    full = lambda shape: pl.BlockSpec(shape, lambda i: (0, 0))   # resident operand

    flops = 2 * b_pad * (feat * HIDDEN + 2 * HIDDEN * HIDDEN + HIDDEN)
    bytes_accessed = (
        b_pad * feat * 2                                  # x tile traffic (bf16)
        + (feat * HIDDEN + 2 * HIDDEN * HIDDEN) * 2       # bf16 weights
        + (4 * HIDDEN + 1) * 4                            # f32 biases + w4 column
        + b_pad * 4)                                      # f32 output

    return pl.pallas_call(
        _mlp_kernel,
        out_shape=jax.ShapeDtypeStruct((1, b_pad), jnp.float32),
        grid=(num_tiles,),
        in_specs=[
            pl.BlockSpec((feat, tile_b), lambda i: (0, i)),      # x^T batch tile
            full((HIDDEN, feat)), full((HIDDEN, 1)),             # w1, b1 (resident)
            full((HIDDEN, HIDDEN)), full((HIDDEN, 1)),           # w2, b2
            full((HIDDEN, HIDDEN)), full((HIDDEN, 1)),           # w3, b3
            full((HIDDEN, 1)), full((1, 1)),                     # w4 column, b4
        ],
        out_specs=pl.BlockSpec((1, tile_b), lambda i: (0, i)),   # lane-dense row blocks
        compiler_params=pltpu.CompilerParams(
            dimension_semantics=("parallel",),                   # batch tiles across TCs
            vmem_limit_bytes=48 * 1024 * 1024),
        cost_estimate=pl.CostEstimate(
            flops=flops, transcendentals=b_pad, bytes_accessed=bytes_accessed),
    )(x_t, w1, b1, w2, b2, w3, b3, w4, b4)


def latent_nn_forward(x, prepared, *, max_tile_b=1024):
    """Forward pass of NN2.

    x: (B, F) floating point, F = z_dim (+1 if with_yawRate).
    prepared: output of prepare_params(params).
    Returns (B, 1) float32.
    """
    batch, _ = x.shape
    tile_b = _pick_tile_b(batch, max_tile_b)
    num_tiles = pl.cdiv(batch, tile_b)
    b_pad = num_tiles * tile_b

    x_t = x.T.astype(jnp.bfloat16)                       # (F, B), batch on lanes
    if b_pad != batch:
        x_t = jnp.pad(x_t, ((0, 0), (0, b_pad - batch)))  # zero-pad: benign rows

    out = latent_nn_forward_fb(x_t, prepared, tile_b=tile_b)   # (1, b_pad) f32
    out = out.reshape(b_pad, 1)
    return out[:batch] if b_pad != batch else out


def init_latent_nn_params(key, z_dim, with_yawRate=True, dtype=jnp.float32):
    """Deterministic init. Weights (out_features, in_features), biases (out_features,)
    — native PyTorch nn.Linear layout (uniform(-1/sqrt(in), 1/sqrt(in)))."""
    in_dim = z_dim + 1 if with_yawRate else z_dim
    dims = [(HIDDEN, in_dim), (HIDDEN, HIDDEN), (HIDDEN, HIDDEN), (1, HIDDEN)]
    params = []
    for (dout, din) in dims:
        key, kw, kb = jax.random.split(key, 3)
        bound = 1.0 / jnp.sqrt(jnp.asarray(din, dtype))
        w = jax.random.uniform(kw, (dout, din), dtype, -bound, bound)
        b = jax.random.uniform(kb, (dout,), dtype, -bound, bound)
        params.append((w, b))
    return params


def latent_nn_ref(x, params, matmul_dtype=jnp.float32):
    """Pure-JAX reference.  matmul_dtype=bf16 mirrors the kernel's numerics
    (bf16 MXU for layers 1-3, f32 epilogue for layer 4)."""
    def linear(h, w, b):
        return jnp.dot(h.astype(matmul_dtype), w.T.astype(matmul_dtype),
                       preferred_element_type=jnp.float32) + b
    (w1, b1), (w2, b2), (w3, b3), (w4, b4) = params
    h = jnp.maximum(linear(x, w1, b1), 0.0)
    h = jnp.maximum(linear(h, w2, b2), 0.0)
    h = jnp.maximum(linear(h, w3, b3), 0.0)
    # final layer in f32 (matches the kernel's f32 VPU/XLU epilogue)
    return jnp.tanh(jnp.dot(h, w4.T.astype(jnp.float32),
                            preferred_element_type=jnp.float32) + b4)


if __name__ == "__main__":
    key = jax.random.PRNGKey(0)
    k_x, k_p = jax.random.split(key)

    z_dim = 31
    with_yawRate = True
    F = z_dim + 1 if with_yawRate else z_dim    # 32
    B = 384                                     # -> 2 tiles of 256, grid (2,)

    x = jax.random.normal(k_x, (B, F), jnp.float32)
    params = init_latent_nn_params(k_p, z_dim, with_yawRate)
    prepared = prepare_params(params)           # one-time, outside the hot path

    fwd = jax.jit(lambda xx: latent_nn_forward(xx, prepared))
    y = jax.block_until_ready(fwd(x))
    assert y.shape == (B, 1)
    assert y.dtype == jnp.float32

    # Check against a reference that mirrors the kernel's numerics
    # (bf16 MXU matmuls / f32 accum for layers 1-3, f32 final layer).
    y_bf16_ref = latent_nn_ref(x, params, matmul_dtype=jnp.bfloat16)
    err_bf16 = float(jnp.max(jnp.abs(y - y_bf16_ref)))
    assert jnp.allclose(y, y_bf16_ref, atol=1e-2, rtol=1e-2), err_bf16

    # Loose check against the full-f32 reference (PyTorch semantics).
    y_f32_ref = latent_nn_ref(x, params, matmul_dtype=jnp.float32)
    err_f32 = float(jnp.max(jnp.abs(y - y_f32_ref)))
    assert jnp.allclose(y, y_f32_ref, atol=1e-1), err_f32

    print("KERNEL_OK")
</pallas_src>

<mosaic_0001>
module attributes {stable_mosaic.version = 11 : i64} {
  func.func @_mlp_kernel(%arg0: i32, %arg1: memref<32x256xbf16, #tpu.memory_space<vmem>>, %arg2: memref<512x32xbf16, #tpu.memory_space<vmem>>, %arg3: memref<512x1xf32, #tpu.memory_space<vmem>>, %arg4: memref<512x512xbf16, #tpu.memory_space<vmem>>, %arg5: memref<512x1xf32, #tpu.memory_space<vmem>>, %arg6: memref<512x512xbf16, #tpu.memory_space<vmem>>, %arg7: memref<512x1xf32, #tpu.memory_space<vmem>>, %arg8: memref<512x1xf32, #tpu.memory_space<vmem>>, %arg9: memref<1x1xf32, #tpu.memory_space<vmem>>, %arg10: memref<1x256xf32, #tpu.memory_space<vmem>>) attributes {dimension_semantics = [#tpu.dimension_semantics<parallel>], iteration_bounds = array<i64: 2>, scalar_prefetch = 0 : i64, scratch_operands = 0 : i64, tpu.core_type = #tpu.core_type<tc>, window_params = [{transform_indices = @transform_0, window_bounds = array<i64: 32, 256>}, {pipeline_mode = #tpu.pipeline_mode<synchronous>, transform_indices = @transform_1, window_bounds = array<i64: 512, 32>}, {pipeline_mode = #tpu.pipeline_mode<synchronous>, transform_indices = @transform_2, window_bounds = array<i64: 512, 1>}, {pipeline_mode = #tpu.pipeline_mode<synchronous>, transform_indices = @transform_3, window_bounds = array<i64: 512, 512>}, {pipeline_mode = #tpu.pipeline_mode<synchronous>, transform_indices = @transform_4, window_bounds = array<i64: 512, 1>}, {pipeline_mode = #tpu.pipeline_mode<synchronous>, transform_indices = @transform_5, window_bounds = array<i64: 512, 512>}, {pipeline_mode = #tpu.pipeline_mode<synchronous>, transform_indices = @transform_6, window_bounds = array<i64: 512, 1>}, {pipeline_mode = #tpu.pipeline_mode<synchronous>, transform_indices = @transform_7, window_bounds = array<i64: 512, 1>}, {pipeline_mode = #tpu.pipeline_mode<synchronous>, transform_indices = @transform_8, window_bounds = array<i64: 1, 1>}, {transform_indices = @transform_9, window_bounds = array<i64: 1, 256>}]} {
    %c0 = arith.constant 0 : index
    %c0_0 = arith.constant 0 : index
    %0 = vector.load %arg2[%c0, %c0_0] : memref<512x32xbf16, #tpu.memory_space<vmem>>, vector<512x32xbf16>
    %c0_1 = arith.constant 0 : index
    %c0_2 = arith.constant 0 : index
    %1 = vector.load %arg1[%c0_1, %c0_2] : memref<32x256xbf16, #tpu.memory_space<vmem>>, vector<32x256xbf16>
    %cst = arith.constant dense<0.000000e+00> : vector<512x256xf32>
    %2 = tpu.matmul %0, %1, %cst {dimension_numbers = #tpu.dot_dimension_numbers<[1], [0], [0], [1], [0, 0, 1, 1], [], []>} : vector<512x32xbf16>, vector<32x256xbf16>, vector<512x256xf32> -> vector<512x256xf32>
    %c0_3 = arith.constant 0 : index
    %c0_4 = arith.constant 0 : index
    %3 = vector.load %arg3[%c0_3, %c0_4] : memref<512x1xf32, #tpu.memory_space<vmem>>, vector<512x1xf32>
    %4 = vector.broadcast %3 : vector<512x1xf32> to vector<512x256xf32>
    %5 = arith.addf %2, %4 : vector<512x256xf32>
    %cst_5 = arith.constant 0.000000e+00 : f32
    %6 = vector.broadcast %cst_5 : f32 to vector<512x256xf32>
    %7 = arith.maximumf %5, %6 : vector<512x256xf32>
    %8 = arith.truncf %7 : vector<512x256xf32> to vector<512x256xbf16>
    %c0_6 = arith.constant 0 : index
    %c0_7 = arith.constant 0 : index
    %9 = vector.load %arg4[%c0_6, %c0_7] : memref<512x512xbf16, #tpu.memory_space<vmem>>, vector<512x512xbf16>
    %cst_8 = arith.constant dense<0.000000e+00> : vector<512x256xf32>
    %10 = tpu.matmul %9, %8, %cst_8 {dimension_numbers = #tpu.dot_dimension_numbers<[1], [0], [0], [1], [0, 0, 1, 1], [], []>} : vector<512x512xbf16>, vector<512x256xbf16>, vector<512x256xf32> -> vector<512x256xf32>
    %c0_9 = arith.constant 0 : index
    %c0_10 = arith.constant 0 : index
    %11 = vector.load %arg5[%c0_9, %c0_10] : memref<512x1xf32, #tpu.memory_space<vmem>>, vector<512x1xf32>
    %12 = vector.broadcast %11 : vector<512x1xf32> to vector<512x256xf32>
    %13 = arith.addf %10, %12 : vector<512x256xf32>
    %cst_11 = arith.constant 0.000000e+00 : f32
    %14 = vector.broadcast %cst_11 : f32 to vector<512x256xf32>
    %15 = arith.maximumf %13, %14 : vector<512x256xf32>
    %16 = arith.truncf %15 : vector<512x256xf32> to vector<512x256xbf16>
    %c0_12 = arith.constant 0 : index
    %c0_13 = arith.constant 0 : index
    %17 = vector.load %arg6[%c0_12, %c0_13] : memref<512x512xbf16, #tpu.memory_space<vmem>>, vector<512x512xbf16>
    %cst_14 = arith.constant dense<0.000000e+00> : vector<512x256xf32>
    %18 = tpu.matmul %17, %16, %cst_14 {dimension_numbers = #tpu.dot_dimension_numbers<[1], [0], [0], [1], [0, 0, 1, 1], [], []>} : vector<512x512xbf16>, vector<512x256xbf16>, vector<512x256xf32> -> vector<512x256xf32>
    %c0_15 = arith.constant 0 : index
    %c0_16 = arith.constant 0 : index
    %19 = vector.load %arg7[%c0_15, %c0_16] : memref<512x1xf32, #tpu.memory_space<vmem>>, vector<512x1xf32>
    %20 = vector.broadcast %19 : vector<512x1xf32> to vector<512x256xf32>
    %21 = arith.addf %18, %20 : vector<512x256xf32>
    %cst_17 = arith.constant 0.000000e+00 : f32
    %22 = vector.broadcast %cst_17 : f32 to vector<512x256xf32>
    %23 = arith.maximumf %21, %22 : vector<512x256xf32>
    %c0_18 = arith.constant 0 : index
    %c0_19 = arith.constant 0 : index
    %24 = vector.load %arg8[%c0_18, %c0_19] : memref<512x1xf32, #tpu.memory_space<vmem>>, vector<512x1xf32>
    %25 = vector.broadcast %24 : vector<512x1xf32> to vector<512x256xf32>
    %26 = arith.mulf %23, %25 : vector<512x256xf32>
    %cst_20 = arith.constant dense<0.000000e+00> : vector<256xf32>
    %27 = vector.multi_reduction <add>, %26, %cst_20 [0] : vector<512x256xf32> to vector<256xf32>
    %28 = vector.shape_cast %27 : vector<256xf32> to vector<1x256xf32>
    %c0_21 = arith.constant 0 : index
    %c0_22 = arith.constant 0 : index
    %29 = vector.load %arg9[%c0_21, %c0_22] : memref<1x1xf32, #tpu.memory_space<vmem>>, vector<1x1xf32>
    %30 = vector.broadcast %29 : vector<1x1xf32> to vector<1x256xf32>
    %31 = arith.addf %28, %30 : vector<1x256xf32>
    %32 = math.tanh %31 : vector<1x256xf32>
    %c0_23 = arith.constant 0 : index
    %c0_24 = arith.constant 0 : index
    %33 = vector.load %arg10[%c0_23, %c0_24] : memref<1x256xf32, #tpu.memory_space<vmem>>, vector<1x256xf32>
    tpu.vector_store %arg10[%c0_23, %c0_24], %32 {strides = array<i32>} : memref<1x256xf32, #tpu.memory_space<vmem>>, vector<1x256xf32>,
    return
  }
  func.func @transform_0(%arg0: i32) -> (i32, i32) {
    %c0_i32 = arith.constant 0 : i32
    %c0_i32_0 = arith.constant 0 : i32
    return %c0_i32, %arg0 : i32, i32
  }
  func.func @transform_1(%arg0: i32) -> (i32, i32) {
    %c0_i32 = arith.constant 0 : i32
    %c0_i32_0 = arith.constant 0 : i32
    %c0_i32_1 = arith.constant 0 : i32
    return %c0_i32, %c0_i32_0 : i32, i32
  }
  func.func @transform_2(%arg0: i32) -> (i32, i32) {
    %c0_i32 = arith.constant 0 : i32
    %c0_i32_0 = arith.constant 0 : i32
    %c0_i32_1 = arith.constant 0 : i32
    return %c0_i32, %c0_i32_0 : i32, i32
  }
  func.func @transform_3(%arg0: i32) -> (i32, i32) {
    %c0_i32 = arith.constant 0 : i32
    %c0_i32_0 = arith.constant 0 : i32
    %c0_i32_1 = arith.constant 0 : i32
    return %c0_i32, %c0_i32_0 : i32, i32
  }
  func.func @transform_4(%arg0: i32) -> (i32, i32) {
    %c0_i32 = arith.constant 0 : i32
    %c0_i32_0 = arith.constant 0 : i32
    %c0_i32_1 = arith.constant 0 : i32
    return %c0_i32, %c0_i32_0 : i32, i32
  }
  func.func @transform_5(%arg0: i32) -> (i32, i32) {
    %c0_i32 = arith.constant 0 : i32
    %c0_i32_0 = arith.constant 0 : i32
    %c0_i32_1 = arith.constant 0 : i32
    return %c0_i32, %c0_i32_0 : i32, i32
  }
  func.func @transform_6(%arg0: i32) -> (i32, i32) {
    %c0_i32 = arith.constant 0 : i32
    %c0_i32_0 = arith.constant 0 : i32
    %c0_i32_1 = arith.constant 0 : i32
    return %c0_i32, %c0_i32_0 : i32, i32
  }
  func.func @transform_7(%arg0: i32) -> (i32, i32) {
    %c0_i32 = arith.constant 0 : i32
    %c0_i32_0 = arith.constant 0 : i32
    %c0_i32_1 = arith.constant 0 : i32
    return %c0_i32, %c0_i32_0 : i32, i32
  }
  func.func @transform_8(%arg0: i32) -> (i32, i32) {
    %c0_i32 = arith.constant 0 : i32
    %c0_i32_0 = arith.constant 0 : i32
    %c0_i32_1 = arith.constant 0 : i32
    return %c0_i32, %c0_i32_0 : i32, i32
  }
  func.func @transform_9(%arg0: i32) -> (i32, i32) {
    %c0_i32 = arith.constant 0 : i32
    %c0_i32_0 = arith.constant 0 : i32
    return %c0_i32, %arg0 : i32, i32
  }
}

</mosaic_0001>

<bundles_post_ra>
// kernel: _lambda_.1
= control target key start
LH: loop header
LB: loop body
LE: loop exit
PB: predicated region body
PF: predicated region fallthrough
CT: control target
= control target key end

     0   :  { %s10292_s0 = inlined_call_operand.vmem [shape: bf16[32,512], index: 0, kind: input, shape index: {}]   ;;  %s10293_s1 = inlined_call_operand.vmem [shape: bf16[512,32], index: 1, kind: input, shape index: {}]   ;;  %s10294_s2 = inlined_call_operand.hbm [shape: f32[512,1], index: 2, kind: input, shape index: {}]   ;;  %s10295_s3 = inlined_call_operand.hbm [shape: bf16[512,512], index: 3, kind: input, shape index: {}]   ;;  %s10296_s4 = inlined_call_operand.hbm [shape: f32[512,1], index: 4, kind: input, shape index: {}]   ;;  %s10297_s5 = inlined_call_operand.hbm [shape: bf16[512,512], index: 5, kind: input, shape index: {}]   ;;  %s10298_s6 = inlined_call_operand.hbm [shape: f32[512,1], index: 6, kind: input, shape index: {}]   ;;  %s10299_s7 = inlined_call_operand.hbm [shape: f32[512,1], index: 7, kind: input, shape index: {}]   ;;  %s10300_s8 = inlined_call_operand.<no memory space> [shape: f32[1,1], index: 8, kind: input, shape index: {}]   ;;  %s10301_s9 = inlined_call_operand.vmem [shape: f32[1,512], index: 9, kind: output, shape index: {}]  }
   0x1   :  { %v14_v0 = vstv %s10300_s8 }
   0x2   :  { %15 = vst [vmem:[#allocation2] sm:$0x1] %v14_v0 }
   0x3   :  { %16 = vsyncpa [#allocation5], 0 }
   0x4   :  { %17 = vsyncpa [#allocation7], 0 }
   0x5   :  { %18 = vsyncpa [#allocation10], 0 }
   0x6   :  { %19 = vsyncpa [#allocation13], 0  ;;  %s7718_s11 = smov 0   ;;  %s7720_s12 = smov 0  }
   0x7   :  { %s7722_s13 = smov 0  }
   0x8 LB: > { %s6585_s8 = sadd.s32 4294967295, %s7651_s13   ;;  %s7735_s14 = sadd.s32 1, %s7651_s13   ;;  %s7651_s13 = sphi %s7722_s13, %s11150_s13   ;;  %s7647_s12 = sphi %s7720_s12, %s11149_s12   ;;  %s7643_s11 = sphi %s7718_s11, %s11148_s11  }
   0x9   : > { %s29_s15 = ssub.s32 %s7651_s13, %s7735_s14  ;;  %s32_s16 = sadd.s32 1, %s7647_s12 }
   0xa   : > { %p30_p0 = scmp.eq.s32.totalorder %s29_s15, 0  ;;  %p39_p1 = scmp.ne.s32.totalorder %s7647_s12, %s7643_s11 }
   0xb   : > { %p40_p2 = scmp.eq.s32.totalorder %s7651_s13, 0  ;;  %p6587_p3 = scmp.ge.s32.totalorder %s7651_s13, 1 }
   0xc   : > { %s7745_s17 = scalar_select %p30_p0, %s7647_s12, %s32_s16  }
   0xd   : > { %p7747_p4 = por %p40_p2, %p39_p1  ;;  %p250_p5 = scmp.lt.s32.totalorder %s7651_s13, 3 }
   0xe   : > { %p7754_p6 = scmp.eq.s32.totalorder %s6585_s8, 0  ;;  %s7653_s21 = smov [#allocation6]  }
   0xf   : > { %s10479_s18 = scalar_select %p7747_p4, 1, 0 }
  0x10   : > { %s10480_s19 = scalar_select %p7754_p6, 1, 0 }
  0x11   : > { %p7758_p7 = pnand %p6587_p3, %p250_p5  ;;  %s278_s22 = sshll.u32 %s7653_s21, 4  ;;  %s279_s22 = int_to_ptr.vmem [resolvable:$true] %s278_s22 }
  0x12   : > { %s7654_s24 = smov [#allocation9]   ;;  %s7655_s26 = smov [#allocation4]  }
  0x13   : > { %s10481_s20 = scalar_select %p7758_p7, 1, 0 }
  0x14   : > { %p6962_p8 = pneg %p7758_p7  ;;  %s304_s25 = sshll.u32 %s7654_s24, 4  ;;  %s305_s25 = int_to_ptr.vmem [resolvable:$true] %s304_s25 }
  0x15   : > { %s265_s27 = sshll.u32 %s7655_s26, 4  ;;  %s7468_s29 = scalar_lea.vmem %s279_s22, 16384  ;;  %s266_s27 = int_to_ptr.vmem [resolvable:$true] %s265_s27 }
  0x16   : > { %p7766_p9 = pnand %p7754_p6, %p6962_p8  ;;  %p7469_p11 = scmp.ne.s32.totalorder %s279_s22, %s7468_s29 }
  0x17   : > { %p7476_p0 = scmp.lt.s32.totalorder %s279_s22, %s279_s22  ;;  %p7477_p1 = scmp.lt.s32.totalorder %s7468_s29, %s7468_s29 }
  0x18   : > { %p7772_p10 = pneg %p7766_p9 }
  0x19   : > { %p7478_p2 = por %p7477_p1, %p7476_p0 }
  0x1a   : > { %p7471_p12 = pnand %p7469_p11, %p7772_p10 }
  0x1c   : > { %p7472_p13 = pneg %p7471_p12 }
  0x1e   : > { %p7479_p3 = pnand %p7478_p2, %p7472_p13 }
  0x20   : > { %7482 = shalt.err (!%p7479_p3)
}
  0x21   : > { %s7656_s30 = smov 256   ;;  %s7657_s10 = smov 16  }
  0x22   : > { %6968 = dma.hbm_to_vmem [thread:$0]  (!%p7766_p9), %s10295_s3, 16384, %s279_s22, [#allocation7], %s7656_s30, %s7656_s30, %s7657_s10  }
  0x23   : > { %s7494_s21 = scalar_lea.vmem %s305_s25, 16384  ;;  %p7502_p12 = scmp.lt.s32.totalorder %s305_s25, %s305_s25 }
  0x24   : > { %p7495_p5 = scmp.ne.s32.totalorder %s305_s25, %s7494_s21  ;;  %p7503_p6 = scmp.lt.s32.totalorder %s7494_s21, %s7494_s21 }
  0x26   : > { %p7497_p8 = pnand %p7495_p5, %p7772_p10  ;;  %p7504_p7 = por %p7503_p6, %p7502_p12 }
  0x28   : > { %p7498_p11 = pneg %p7497_p8 }
  0x2a   : > { %p7505_p0 = pnand %p7504_p7, %p7498_p11 }
  0x2c   : > { %7508 = shalt.err (!%p7505_p0)
}
  0x2d   : > { %6974 = dma.hbm_to_vmem [thread:$0]  (!%p7766_p9), %s10297_s5, 16384, %s305_s25, [#allocation10], %s7656_s30, %s7656_s30, %s7657_s10  }
  0x2e   : > { %s7520_s29 = scalar_lea.vmem %s266_s27, 8192  ;;  %p7528_p3 = scmp.lt.s32.totalorder %s266_s27, %s266_s27 }
  0x2f   : > { %p7521_p13 = scmp.ne.s32.totalorder %s266_s27, %s7520_s29  ;;  %p7529_p5 = scmp.lt.s32.totalorder %s7520_s29, %s7520_s29 }
  0x31   : > { %p7523_p1 = pnand %p7521_p13, %p7772_p10  ;;  %p7530_p8 = por %p7529_p5, %p7528_p3 }
  0x33   : > { %p7524_p2 = pneg %p7523_p1 }
  0x35   : > { %p7531_p4 = pnand %p7530_p8, %p7524_p2 }
  0x37   : > { %7534 = shalt.err (!%p7531_p4)
}
  0x38   : > { %s7658_s22 = smov 128   ;;  %s7659_s15 = smov 8  }
  0x39   : > { %6965 = dma.hbm_to_vmem [thread:$0]  (!%p7766_p9), %s10294_s2, 8192, %s266_s27, [#allocation5], %s7658_s22, %s7658_s22, %s7659_s15  }
  0x3a   : > { %s7660_s10 = smov [#allocation8]   ;;  %s7661_s21 = smov [#allocation11]  }
  0x3b   : > { %s291_s16 = sshll.u32 %s7660_s10, 4  ;;  %s317_s24 = sshll.u32 %s7661_s21, 4  ;;  %s292_s16 = int_to_ptr.vmem [resolvable:$true] %s291_s16  ;;  %s318_s24 = int_to_ptr.vmem [resolvable:$true] %s317_s24 }
  0x3c   : > { %s7546_s26 = scalar_lea.vmem %s292_s16, 8192  ;;  %p7554_p11 = scmp.lt.s32.totalorder %s292_s16, %s292_s16 }
  0x3d   : > { %p7547_p6 = scmp.ne.s32.totalorder %s292_s16, %s7546_s26  ;;  %p7555_p12 = scmp.lt.s32.totalorder %s7546_s26, %s7546_s26 }
  0x3f   : > { %p7549_p4 = pnand %p7547_p6, %p7772_p10  ;;  %p7556_p0 = por %p7555_p12, %p7554_p11 }
  0x41   : > { %p7550_p7 = pneg %p7549_p4 }
  0x43   : > { %p7557_p13 = pnand %p7556_p0, %p7550_p7 }
  0x45   : > { %7560 = shalt.err (!%p7557_p13)
}
  0x46   : > { %6971 = dma.hbm_to_vmem [thread:$0]  (!%p7766_p9), %s10296_s4, 8192, %s292_s16, [#allocation7], %s7658_s22, %s7658_s22, %s7659_s15  }
  0x47   : > { %s7572_s25 = scalar_lea.vmem %s318_s24, 8192  ;;  %p7580_p5 = scmp.lt.s32.totalorder %s318_s24, %s318_s24 }
  0x48   : > { %p7573_p1 = scmp.ne.s32.totalorder %s318_s24, %s7572_s25  ;;  %p7581_p8 = scmp.lt.s32.totalorder %s7572_s25, %s7572_s25 }
  0x4a   : > { %p7575_p2 = pnand %p7573_p1, %p7772_p10  ;;  %p7582_p6 = por %p7581_p8, %p7580_p5 }
  0x4c   : > { %p7576_p3 = pneg %p7575_p2 }
  0x4e   : > { %p7583_p4 = pnand %p7582_p6, %p7576_p3 }
  0x50   : > { %7586 = shalt.err (!%p7583_p4)
}
  0x51   : > { %6977 = dma.hbm_to_vmem [thread:$0]  (!%p7766_p9), %s10298_s6, 8192, %s318_s24, [#allocation10], %s7658_s22, %s7658_s22, %s7659_s15  }
  0x52   : > { %s7662_s16 = smov [#allocation12]  }
  0x53   : > { %s330_s21 = sshll.u32 %s7662_s16, 4  ;;  %s331_s21 = int_to_ptr.vmem [resolvable:$true] %s330_s21 }
  0x54   : > { %s7598_s26 = scalar_lea.vmem %s331_s21, 8192  ;;  %p7606_p0 = scmp.lt.s32.totalorder %s331_s21, %s331_s21 }
  0x55   : > { %p7599_p7 = scmp.ne.s32.totalorder %s331_s21, %s7598_s26  ;;  %p7607_p13 = scmp.lt.s32.totalorder %s7598_s26, %s7598_s26 }
  0x57   : > { %p7601_p11 = pnand %p7599_p7, %p7772_p10  ;;  %p7608_p1 = por %p7607_p13, %p7606_p0 }
  0x59   : > { %p7602_p12 = pneg %p7601_p11 }
  0x5b   : > { %p7609_p2 = pnand %p7608_p1, %p7602_p12 }
  0x5d   : > { %7612 = shalt.err (!%p7609_p2)
}
  0x5e   : > { %6980 = dma.hbm_to_vmem [thread:$0]  (!%p7766_p9), %s10299_s7, 8192, %s331_s21, [#allocation13], %s7658_s22, %s7658_s22, %s7659_s15  }
  0x5f   : > { %p6594_p3 = scmp.ge.s32.totalorder %s7651_s13, 2 }
  0x60   : > { %p10484_p10 = scmp.ne.s32.totalorder (!%p6594_p3), %s10479_s18, 0 }
  0x61   : > { %343 = sbr.rel (%p6594_p3) target bundleno = 108 (0x6c), region = 48 }
  0x66   : > { %346 = sbr.rel (!%p10484_p10) target bundleno = 108 (0x6c), region = 52  ;;  %s348_s28 = sand.u32 (%p10484_p10), 1, %s7647_s12  }
  0x67   : > { %s6933_s29 = sshll.u32 (%p10484_p10), %s7651_s13, 3  ;;  %s6595_s25 = sshll.u32 (%p10484_p10), %s348_s28, 5 }
  0x68   : > { %s353_s10 = scalar_lea.vmem (%p10484_p10), %s10292_s0, %s6933_s29  ;;  %s350_s16 = scalar_lea.vmem (%p10484_p10), [#allocation3], %s6595_s25 }
  0x69   : > { %v388_v1 = vld [vmem:[%s353_s10] sm:$0xff] (%p10484_p10)  ;;  %v390_v2 = vld [vmem:[%s353_s10 + $0x10] sm:$0xff] (%p10484_p10) }
  0x6a   : > { %v392_v3 = vld [vmem:[%s353_s10 + $0x20] sm:$0xff] (%p10484_p10)  ;;  %389 = vst [vmem:[%s350_s16] sm:$0xff] (%p10484_p10), %v388_v1  ;;  %391 = vst [vmem:[%s350_s16 + $0x8] sm:$0xff] (%p10484_p10), %v390_v2  ;;  %v394_v4 = vld [vmem:[%s353_s10 + $0x30] sm:$0xff] (%p10484_p10) }
  0x6b   : > { %393 = vst [vmem:[%s350_s16 + $0x10] sm:$0xff] %v392_v3  ;;  %395 = vst [vmem:[%s350_s16 + $0x18] sm:$0xff] %v394_v4 }
  0x6c PF: > { %p10485_p9 = scmp.ne.s32.totalorder %s10481_s20, 0 }
  0x6e   : > { %404 = sbr.rel (%p10485_p9) target bundleno = 1473 (0x5c1), region = 90 }
  0x73   : > { %s407_s18 = sand.u32 1, %s7643_s11   ;;  %p10486_p5 = scmp.ne.s32.totalorder %s10480_s19, 0 }
  0x74   : > { %s6599_s22 = sshll.u32 %s407_s18, 5 }
  0x75   : > { %s409_s15 = scalar_lea.vmem [#allocation3], %s6599_s22 }
  0x76   : > { %7626 = dma.done.wait (%p10486_p5), [#allocation5], 8192  }
  0x77   : > { %7628 = vsyncadd (%p10486_p5), [#allocation5], 4294959104 }
  0x78   : > { %7630 = dma.done.wait (%p10486_p5), [#allocation7], 24576  }
  0x79   : > { %7632 = vsyncadd (%p10486_p5), [#allocation7], 4294942720 }
  0x7a   : > { %7634 = dma.done.wait (%p10486_p5), [#allocation10], 24576  }
  0x7b   : > { %7636 = vsyncadd (%p10486_p5), [#allocation10], 4294942720 }
  0x7c   : > { %7638 = dma.done.wait (%p10486_p5), [#allocation13], 8192  }
  0x7d   : > { %7640 = vsyncadd (%p10486_p5), [#allocation13], 4294959104  ;;  %v7663_v5 = vmov 0   ;;  %v586_v6 = vld [vmem:[#allocation4 + $0x170] sm:$0xff]  ;;  %v587_v10 = vld [vmem:[#allocation4 + $0x178] sm:$0xff]  ;;  %vm1104_vm0 = vcmask 261120  }
  0x7e   : > { %7030 = vset.pattern.permute.xlu1 %v7663_v5  ;;  %7029 = vset.pattern.permute.xlu0 %v7663_v5  ;;  %v554_v7 = vld [vmem:[#allocation4 + $0x70] sm:$0xff]  ;;  %v555_v11 = vld [vmem:[#allocation4 + $0x78] sm:$0xff]  ;;  %v7034_v12 = vld [vmem:[%s409_s15 + $0x4] ss:$8 sps:$4 sm:$0xff]   ;;  %s6606_s16 = sshll.u32 %s6585_s8, 1 }
  0x7f   : > { %1233 = vmatprep.mubr.bf16.mxu0 %v7663_v5  ;;  %1393 = vmatprep.mubr.bf16.mxu1 %v7663_v5  ;;  %v7031_v8 = vld [vmem:[%s409_s15 + $0x14] ss:$8 sps:$4 sm:$0xff]   ;;  %v7033_v9 = vld [vmem:[%s409_s15 + $0x10] ss:$8 sps:$4 sm:$0xff]   ;;  %v7036_v13 = vld [vmem:[%s409_s15] ss:$8 sps:$4 sm:$0xff]  }
  0x80   : > { %836 = vperm.xlu1 %7030, %v586_v6   ;;  %676 = vperm.xlu0 %7029, %v554_v7   ;;  %v553_v14 = vld [vmem:[#allocation4 + $0x68] sm:$0xff]  ;;  %v552_v15 = vld [vmem:[#allocation4 + $0x60] sm:$0xff]  ;;  %v551_v20 = vld [vmem:[#allocation4 + $0x58] sm:$0xff]  ;;  %p467_p8 = scmp.lt.s32.totalorder %s6606_s16, 3 }
  0x81   : > { %1213 = vmatprep.subr.bf16.mxu0 %v7031_v8  ;;  %6934 = vmatprep.subr.bf16.mxu1 %v7031_v8  ;;  %v7037_v16 = vld [vmem:[%s10293_s1] sm:$0xff]   ;;  %v585_v18 = vld [vmem:[#allocation4 + $0x168] sm:$0xff]  ;;  %v550_v21 = vld [vmem:[#allocation4 + $0x50] sm:$0xff] }
  0x82   : > { %1214 = vmatpush1.bf16.msra.mxu0 %v7033_v9  ;;  %6936 = vmatpush1.bf16.msra.mxu1 %v7033_v9  ;;  %v7038_v17 = vld [vmem:[%s10293_s1 + $0x80] sm:$0xff]   ;;  %v7039_v22 = vld [vmem:[%s10293_s1 + $0x8] sm:$0xff]   ;;  %v582_v25 = vld [vmem:[#allocation4 + $0x150] sm:$0xff]  ;;  %s11152_s16 = smov (!%p467_p8, %s6606_s16), 3 }
  0x83   : > { %1215 = vmatprep.subr.bf16.mxu0 %v7034_v12  ;;  %6935 = vmatprep.subr.bf16.mxu1 %v7034_v12  ;;  %v584_v19 = vld [vmem:[#allocation4 + $0x160] sm:$0xff]  ;;  %v583_v24 = vld [vmem:[#allocation4 + $0x158] sm:$0xff]  ;;  %v549_v26 = vld [vmem:[#allocation4 + $0x48] sm:$0xff]  ;;  %s469_s15 = scalar_lea.vmem %s10301_s9, %s11152_s16 }
  0x84   : > { %841 = vperm.xlu1 %7030, %v587_v10   ;;  %681 = vperm.xlu0 %7029, %v555_v11   ;;  %v7040_v23 = vld [vmem:[%s10293_s1 + $0x88] sm:$0xff]   ;;  %v7041_v28 = vld [vmem:[%s10293_s1 + $0x10] sm:$0xff]   ;;  %v547_v32 = vld [vmem:[#allocation4 + $0x38] sm:$0xff] }
  0x85   : > { %v548_v27 = vld [vmem:[#allocation4 + $0x40] sm:$0xff]  ;;  %v7042_v29 = vld [vmem:[%s10293_s1 + $0x90] sm:$0xff]   ;;  %v7043_v34 = vld [vmem:[%s10293_s1 + $0x18] sm:$0xff]  }
  0x86   : > { %1216 = vmatpush1.bf16.msra.mxu0 %v7036_v13  ;;  %6937 = vmatpush1.bf16.msra.mxu1 %v7036_v13  ;;  %v581_v30 = vld [vmem:[#allocation4 + $0x148] sm:$0xff]  ;;  %v580_v31 = vld [vmem:[#allocation4 + $0x140] sm:$0xff]  ;;  %v546_v33 = vld [vmem:[#allocation4 + $0x30] sm:$0xff] }
  0x87   : > { %v7044_v35 = vld [vmem:[%s10293_s1 + $0x98] sm:$0xff]   ;;  %v545_v38 = vld [vmem:[#allocation4 + $0x28] sm:$0xff]  ;;  %v544_v39 = vld [vmem:[#allocation4 + $0x20] sm:$0xff] }
  0x88   : > { %671 = vperm.xlu1 %7030, %v553_v14   ;;  %666 = vperm.xlu0 %7029, %v552_v15   ;;  %v579_v36 = vld [vmem:[#allocation4 + $0x138] sm:$0xff]  ;;  %v578_v37 = vld [vmem:[#allocation4 + $0x130] sm:$0xff]  ;;  %v577_v42 = vld [vmem:[#allocation4 + $0x128] sm:$0xff] }
  0x89   : > { %6643 = vmatmul.mubr.msk.bf16.vlgmr.msra.gmra.mxu0 %vm1104_vm0, %v7037_v16  ;;  %6659 = vmatmul.mubr.msk.bf16.vlgmr.msra.gmra.mxu1 %vm1104_vm0, %v7038_v17  ;;  %v7045_v40 = vld [vmem:[%s10293_s1 + $0x20] sm:$0xff]   ;;  %v542_v45 = vld [vmem:[#allocation4 + $0x10] sm:$0xff]  ;;  %v7047_v46 = vld [vmem:[%s10293_s1 + $0x28] sm:$0xff]  }
  0x8a   : > { %1243 = vmatprep.mubr.bf16.mxu0 %v7663_v5  ;;  %1403 = vmatprep.mubr.bf16.mxu1 %v7663_v5  ;;  %v7046_v41 = vld [vmem:[%s10293_s1 + $0xa0] sm:$0xff]   ;;  %v7048_v47 = vld [vmem:[%s10293_s1 + $0xa8] sm:$0xff]   ;;  %v574_v49 = vld [vmem:[#allocation4 + $0x110] sm:$0xff] }
  0x8b   : > { %v576_v43 = vld [vmem:[#allocation4 + $0x120] sm:$0xff]  ;;  %v543_v44 = vld [vmem:[#allocation4 + $0x18] sm:$0xff]  ;;  %v541_v50 = vld [vmem:[#allocation4 + $0x8] sm:$0xff] }
  0x8c   : > { %831 = vperm.xlu1 %7030, %v585_v18   ;;  %826 = vperm.xlu0 %7029, %v584_v19   ;;  %v575_v48 = vld [vmem:[#allocation4 + $0x118] sm:$0xff]  ;;  %v540_v51 = vld [vmem:[#allocation4] sm:$0xff]  ;;  %v7049_v52 = vld [vmem:[%s10293_s1 + $0x30] sm:$0xff]  }
  0x8d   : > { %v7050_v53 = vld [vmem:[%s10293_s1 + $0xb0] sm:$0xff]   ;;  %v572_v55 = vld [vmem:[#allocation4 + $0x100] sm:$0xff]  ;;  %v571_v56 = vld [vmem:[#allocation4 + $0xf8] sm:$0xff] }
  0x8e   : > { %v573_v54 = vld [vmem:[#allocation4 + $0x108] sm:$0xff]  ;;  %v570_v57 = vld [vmem:[#allocation4 + $0xf0] sm:$0xff]  ;;  %v603_v60 = vld [vmem:[#allocation4 + $0x1f8] sm:$0xff] }
  0x8f   : > { %v7051_v58 = vld [vmem:[%s10293_s1 + $0x38] sm:$0xff]   ;;  %v569_v62 = vld [vmem:[#allocation4 + $0xe8] sm:$0xff]  ;;  %v568_v63 = vld [vmem:[#allocation4 + $0xe0] sm:$0xff] }
  0x90   : > { %661 = vperm.xlu1 %7030, %v551_v20   ;;  %656 = vperm.xlu0 %7029, %v550_v21   ;;  %v7052_v59 = vld [vmem:[%s10293_s1 + $0xb8] sm:$0xff]   ;;  %v7053_v0 = vld [vmem:[%s10293_s1 + $0x40] sm:$0xff]   ;;  %v601_v2 = vld [vmem:[#allocation4 + $0x1e8] sm:$0xff] }
  0x91   : > { %6644 = vmatmul.mubr.msk.bf16.gmra.mxu0 %vm1104_vm0, %v7039_v22  ;;  %6660 = vmatmul.mubr.msk.bf16.gmra.mxu1 %vm1104_vm0, %v7040_v23  ;;  %v602_v61 = vld [vmem:[#allocation4 + $0x1f0] sm:$0xff]  ;;  %v7054_v1 = vld [vmem:[%s10293_s1 + $0xc0] sm:$0xff]   ;;  %v7055_v7 = vld [vmem:[%s10293_s1 + $0x48] sm:$0xff]  }
  0x92   : > { %1253 = vmatprep.mubr.bf16.mxu0 %v7663_v5  ;;  %1413 = vmatprep.mubr.bf16.mxu1 %v7663_v5  ;;  %v600_v3 = vld [vmem:[#allocation4 + $0x1e0] sm:$0xff]  ;;  %v567_v4 = vld [vmem:[#allocation4 + $0xd8] sm:$0xff]  ;;  %v566_v6 = vld [vmem:[#allocation4 + $0xd0] sm:$0xff] }
  0x93   : > { %v7056_v8 = vld [vmem:[%s10293_s1 + $0xc8] sm:$0xff]   ;;  %v599_v9 = vld [vmem:[#allocation4 + $0x1d8] sm:$0xff]  ;;  %v598_v10 = vld [vmem:[#allocation4 + $0x1d0] sm:$0xff] }
  0x94   : > { %821 = vperm.xlu1 %7030, %v583_v24   ;;  %816 = vperm.xlu0 %7029, %v582_v25   ;;  %v565_v11 = vld [vmem:[#allocation4 + $0xc8] sm:$0xff]  ;;  %v564_v12 = vld [vmem:[#allocation4 + $0xc0] sm:$0xff]  ;;  %v563_v17 = vld [vmem:[#allocation4 + $0xb8] sm:$0xff] }
  0x95   : > { %v7057_v13 = vld [vmem:[%s10293_s1 + $0x50] sm:$0xff]   ;;  %v596_v16 = vld [vmem:[#allocation4 + $0x1c0] sm:$0xff]  ;;  %v7059_v19 = vld [vmem:[%s10293_s1 + $0x58] sm:$0xff]  }
  0x96   : > { %v7058_v14 = vld [vmem:[%s10293_s1 + $0xd0] sm:$0xff]   ;;  %v7060_v20 = vld [vmem:[%s10293_s1 + $0xd8] sm:$0xff]   ;;  %v560_v24 = vld [vmem:[#allocation4 + $0xa0] sm:$0xff] }
  0x97   : > { %v597_v15 = vld [vmem:[#allocation4 + $0x1c8] sm:$0xff]  ;;  %v562_v18 = vld [vmem:[#allocation4 + $0xb0] sm:$0xff]  ;;  %v595_v21 = vld [vmem:[#allocation4 + $0x1b8] sm:$0xff] }
  0x98   : > { %651 = vperm.xlu1 %7030, %v549_v26   ;;  %646 = vperm.xlu0 %7029, %v548_v27   ;;  %v594_v22 = vld [vmem:[#allocation4 + $0x1b0] sm:$0xff]  ;;  %v561_v23 = vld [vmem:[#allocation4 + $0xa8] sm:$0xff]  ;;  %v7061_v25 = vld [vmem:[%s10293_s1 + $0x60] sm:$0xff]  }
  0x99   : > { %6645 = vmatmul.mubr.msk.bf16.gmra.mxu0 %vm1104_vm0, %v7041_v28  ;;  %6661 = vmatmul.mubr.msk.bf16.gmra.mxu1 %vm1104_vm0, %v7042_v29  ;;  %v7062_v26 = vld [vmem:[%s10293_s1 + $0xe0] sm:$0xff]   ;;  %v593_v27 = vld [vmem:[#allocation4 + $0x1a8] sm:$0xff] }
  0x9a   : > { %1263 = vmatprep.mubr.bf16.mxu0 %v7663_v5  ;;  %1423 = vmatprep.mubr.bf16.mxu1 %v7663_v5  ;;  %v592_v28 = vld [vmem:[#allocation4 + $0x1a0] sm:$0xff]  ;;  %v559_v29 = vld [vmem:[#allocation4 + $0x98] sm:$0xff] }
  0x9c   : > { %811 = vperm.xlu1 %7030, %v581_v30   ;;  %806 = vperm.xlu0 %7029, %v580_v31   ;;  %v558_v30 = vld [vmem:[#allocation4 + $0x90] sm:$0xff]  ;;  %v7063_v31 = vld [vmem:[%s10293_s1 + $0x68] sm:$0xff]  }
  0xa0   : > { %641 = vperm.xlu1 %7030, %v547_v32   ;;  %636 = vperm.xlu0 %7029, %v546_v33   ;;  %v7064_v32 = vld [vmem:[%s10293_s1 + $0xe8] sm:$0xff]   ;;  %v591_v33 = vld [vmem:[#allocation4 + $0x198] sm:$0xff] }
  0xa1   : > { %6646 = vmatmul.mubr.msk.bf16.gmra.mxu0 %vm1104_vm0, %v7043_v34  ;;  %6662 = vmatmul.mubr.msk.bf16.gmra.mxu1 %vm1104_vm0, %v7044_v35  ;;  %v590_v34 = vld [vmem:[#allocation4 + $0x190] sm:$0xff]  ;;  %v557_v35 = vld [vmem:[#allocation4 + $0x88] sm:$0xff] }
  0xa2   : > { %1273 = vmatprep.mubr.bf16.mxu0 %v7663_v5  ;;  %1433 = vmatprep.mubr.bf16.mxu1 %v7663_v5 }
  0xa4   : > { %801 = vperm.xlu1 %7030, %v579_v36   ;;  %796 = vperm.xlu0 %7029, %v578_v37   ;;  %v556_v36 = vld [vmem:[#allocation4 + $0x80] sm:$0xff]  ;;  %v7065_v37 = vld [vmem:[%s10293_s1 + $0x70] sm:$0xff]  }
  0xa8   : > { %631 = vperm.xlu1 %7030, %v545_v38   ;;  %626 = vperm.xlu0 %7029, %v544_v39   ;;  %v7066_v38 = vld [vmem:[%s10293_s1 + $0xf0] sm:$0xff]  }
  0xa9   : > { %6647 = vmatmul.mubr.msk.bf16.gmra.mxu0 %vm1104_vm0, %v7045_v40  ;;  %6663 = vmatmul.mubr.msk.bf16.gmra.mxu1 %vm1104_vm0, %v7046_v41  ;;  %v589_v39 = vld [vmem:[#allocation4 + $0x188] sm:$0xff]  ;;  %v588_v40 = vld [vmem:[#allocation4 + $0x180] sm:$0xff] }
  0xaa   : > { %1283 = vmatprep.mubr.bf16.mxu0 %v7663_v5  ;;  %1443 = vmatprep.mubr.bf16.mxu1 %v7663_v5 }
  0xac   : > { %791 = vperm.xlu1 %7030, %v577_v42   ;;  %786 = vperm.xlu0 %7029, %v576_v43   ;;  %v1875_v43 = vld [vmem:[#allocation8 + $0x8] sm:$0xff] }
  0xb0   : > { %621 = vperm.xlu1 %7030, %v543_v44   ;;  %616 = vperm.xlu0 %7029, %v542_v45   ;;  %v1874_v44 = vld [vmem:[#allocation8] sm:$0xff]  ;;  %v7067_v45 = vld [vmem:[%s10293_s1 + $0x78] sm:$0xff]  }
  0xb1   : > { %6648 = vmatmul.mubr.msk.bf16.gmra.mxu0 %vm1104_vm0, %v7047_v46  ;;  %6664 = vmatmul.mubr.msk.bf16.gmra.mxu1 %vm1104_vm0, %v7048_v47  ;;  %v7068_v46 = vld [vmem:[%s10293_s1 + $0xf8] sm:$0xff]  }
  0xb2   : > { %1293 = vmatprep.mubr.bf16.mxu0 %v7663_v5  ;;  %1453 = vmatprep.mubr.bf16.mxu1 %v7663_v5 }
  0xb4   : > { %781 = vperm.xlu1 %7030, %v575_v48   ;;  %776 = vperm.xlu0 %7029, %v574_v49   ;;  %v1877_v49 = vld [vmem:[#allocation8 + $0x18] sm:$0xff] }
  0xb8   : > { %611 = vperm.xlu1 %7030, %v541_v50   ;;  %606 = vperm.xlu0 %7029, %v540_v51   ;;  %v1876_v50 = vld [vmem:[#allocation8 + $0x10] sm:$0xff] }
  0xb9   : > { %6649 = vmatmul.mubr.msk.bf16.gmra.mxu0 %vm1104_vm0, %v7049_v52  ;;  %6665 = vmatmul.mubr.msk.bf16.gmra.mxu1 %vm1104_vm0, %v7050_v53  ;;  %v1879_v52 = vld [vmem:[#allocation8 + $0x28] sm:$0xff]  ;;  %v1878_v53 = vld [vmem:[#allocation8 + $0x20] sm:$0xff] }
  0xba   : > { %1303 = vmatprep.mubr.bf16.mxu0 %v7663_v5  ;;  %1463 = vmatprep.mubr.bf16.mxu1 %v7663_v5 }
  0xbc   : > { %771 = vperm.xlu1 %7030, %v573_v54   ;;  %766 = vperm.xlu0 %7029, %v572_v55  }
  0xc0   : > { %761 = vperm.xlu1 %7030, %v571_v56   ;;  %756 = vperm.xlu0 %7029, %v570_v57   ;;  %v1881_v56 = vld [vmem:[#allocation8 + $0x38] sm:$0xff]  ;;  %v1880_v57 = vld [vmem:[#allocation8 + $0x30] sm:$0xff] }
  0xc1   : > { %6650 = vmatmul.mubr.msk.bf16.gmra.mxu0 %vm1104_vm0, %v7051_v58  ;;  %6666 = vmatmul.mubr.msk.bf16.gmra.mxu1 %vm1104_vm0, %v7052_v59 }
  0xc2   : > { %1313 = vmatprep.mubr.bf16.mxu0 %v7663_v5  ;;  %1473 = vmatprep.mubr.bf16.mxu1 %v7663_v5 }
  0xc4   : > { %921 = vperm.xlu1 %7030, %v603_v60   ;;  %916 = vperm.xlu0 %7029, %v602_v61   ;;  %v1883_v60 = vld [vmem:[#allocation8 + $0x48] sm:$0xff]  ;;  %v1882_v61 = vld [vmem:[#allocation8 + $0x40] sm:$0xff] }
  0xc8   : > { %751 = vperm.xlu1 %7030, %v569_v62   ;;  %746 = vperm.xlu0 %7029, %v568_v63  }
  0xc9   : > { %6651 = vmatmul.mubr.msk.bf16.gmra.mxu0 %vm1104_vm0, %v7053_v0  ;;  %6667 = vmatmul.mubr.msk.bf16.gmra.mxu1 %vm1104_vm0, %v7054_v1  ;;  %v1885_v0 = vld [vmem:[#allocation8 + $0x58] sm:$0xff]  ;;  %v1884_v1 = vld [vmem:[#allocation8 + $0x50] sm:$0xff] }
  0xca   : > { %1323 = vmatprep.mubr.bf16.mxu0 %v7663_v5  ;;  %1483 = vmatprep.mubr.bf16.mxu1 %v7663_v5 }
  0xcc   : > { %911 = vperm.xlu1 %7030, %v601_v2   ;;  %906 = vperm.xlu0 %7029, %v600_v3  }
  0xd0   : > { %741 = vperm.xlu1 %7030, %v567_v4   ;;  %736 = vperm.xlu0 %7029, %v566_v6   ;;  %v1887_v4 = vld [vmem:[#allocation8 + $0x68] sm:$0xff]  ;;  %v1886_v6 = vld [vmem:[#allocation8 + $0x60] sm:$0xff] }
  0xd1   : > { %6652 = vmatmul.mubr.msk.bf16.gmra.mxu0 %vm1104_vm0, %v7055_v7  ;;  %6668 = vmatmul.mubr.msk.bf16.gmra.mxu1 %vm1104_vm0, %v7056_v8 }
  0xd2   : > { %1333 = vmatprep.mubr.bf16.mxu0 %v7663_v5  ;;  %1493 = vmatprep.mubr.bf16.mxu1 %v7663_v5 }
  0xd4   : > { %901 = vperm.xlu1 %7030, %v599_v9   ;;  %896 = vperm.xlu0 %7029, %v598_v10   ;;  %v1889_v9 = vld [vmem:[#allocation8 + $0x78] sm:$0xff]  ;;  %v1888_v10 = vld [vmem:[#allocation8 + $0x70] sm:$0xff] }
  0xd8   : > { %731 = vperm.xlu1 %7030, %v565_v11   ;;  %726 = vperm.xlu0 %7029, %v564_v12  }
  0xd9   : > { %6653 = vmatmul.mubr.msk.bf16.gmra.mxu0 %vm1104_vm0, %v7057_v13  ;;  %6669 = vmatmul.mubr.msk.bf16.gmra.mxu1 %vm1104_vm0, %v7058_v14  ;;  %v1891_v13 = vld [vmem:[#allocation8 + $0x88] sm:$0xff]  ;;  %v1890_v14 = vld [vmem:[#allocation8 + $0x80] sm:$0xff] }
  0xda   : > { %1343 = vmatprep.mubr.bf16.mxu0 %v7663_v5  ;;  %1503 = vmatprep.mubr.bf16.mxu1 %v7663_v5 }
  0xdc   : > { %891 = vperm.xlu1 %7030, %v597_v15   ;;  %886 = vperm.xlu0 %7029, %v596_v16  }
  0xe0   : > { %721 = vperm.xlu1 %7030, %v563_v17   ;;  %716 = vperm.xlu0 %7029, %v562_v18   ;;  %v1893_v17 = vld [vmem:[#allocation8 + $0x98] sm:$0xff]  ;;  %v1892_v18 = vld [vmem:[#allocation8 + $0x90] sm:$0xff] }
  0xe1   : > { %6654 = vmatmul.mubr.msk.bf16.gmra.mxu0 %vm1104_vm0, %v7059_v19  ;;  %6670 = vmatmul.mubr.msk.bf16.gmra.mxu1 %vm1104_vm0, %v7060_v20 }
  0xe2   : > { %1353 = vmatprep.mubr.bf16.mxu0 %v7663_v5  ;;  %1513 = vmatprep.mubr.bf16.mxu1 %v7663_v5 }
  0xe4   : > { %881 = vperm.xlu1 %7030, %v595_v21   ;;  %876 = vperm.xlu0 %7029, %v594_v22   ;;  %v1895_v21 = vld [vmem:[#allocation8 + $0xa8] sm:$0xff]  ;;  %v1894_v22 = vld [vmem:[#allocation8 + $0xa0] sm:$0xff] }
  0xe8   : > { %711 = vperm.xlu1 %7030, %v561_v23   ;;  %706 = vperm.xlu0 %7029, %v560_v24  }
  0xe9   : > { %6655 = vmatmul.mubr.msk.bf16.gmra.mxu0 %vm1104_vm0, %v7061_v25  ;;  %6671 = vmatmul.mubr.msk.bf16.gmra.mxu1 %vm1104_vm0, %v7062_v26  ;;  %v1897_v25 = vld [vmem:[#allocation8 + $0xb8] sm:$0xff]  ;;  %v1896_v26 = vld [vmem:[#allocation8 + $0xb0] sm:$0xff] }
  0xea   : > { %1363 = vmatprep.mubr.bf16.mxu0 %v7663_v5  ;;  %1523 = vmatprep.mubr.bf16.mxu1 %v7663_v5 }
  0xec   : > { %871 = vperm.xlu1 %7030, %v593_v27   ;;  %866 = vperm.xlu0 %7029, %v592_v28  }
  0xf0   : > { %701 = vperm.xlu1 %7030, %v559_v29   ;;  %696 = vperm.xlu0 %7029, %v558_v30   ;;  %v1899_v29 = vld [vmem:[#allocation8 + $0xc8] sm:$0xff]  ;;  %v1898_v30 = vld [vmem:[#allocation8 + $0xc0] sm:$0xff] }
  0xf1   : > { %6656 = vmatmul.mubr.msk.bf16.gmra.mxu0 %vm1104_vm0, %v7063_v31  ;;  %6672 = vmatmul.mubr.msk.bf16.gmra.mxu1 %vm1104_vm0, %v7064_v32 }
  0xf2   : > { %1373 = vmatprep.mubr.bf16.mxu0 %v7663_v5  ;;  %1533 = vmatprep.mubr.bf16.mxu1 %v7663_v5 }
  0xf4   : > { %861 = vperm.xlu1 %7030, %v591_v33   ;;  %856 = vperm.xlu0 %7029, %v590_v34   ;;  %v1901_v33 = vld [vmem:[#allocation8 + $0xd8] sm:$0xff]  ;;  %v1900_v34 = vld [vmem:[#allocation8 + $0xd0] sm:$0xff] }
  0xf8   : > { %691 = vperm.xlu1 %7030, %v557_v35   ;;  %686 = vperm.xlu0 %7029, %v556_v36  }
  0xf9   : > { %6657 = vmatmul.mubr.msk.bf16.gmra.mxu0 %vm1104_vm0, %v7065_v37  ;;  %6673 = vmatmul.mubr.msk.bf16.gmra.mxu1 %vm1104_vm0, %v7066_v38  ;;  %v1903_v37 = vld [vmem:[#allocation8 + $0xe8] sm:$0xff]  ;;  %v1902_v38 = vld [vmem:[#allocation8 + $0xe0] sm:$0xff] }
  0xfa   : > { %1383 = vmatprep.mubr.bf16.mxu0 %v7663_v5  ;;  %1543 = vmatprep.mubr.bf16.mxu1 %v7663_v5 }
  0xfb   : > { %v8009_v41 = vpop.permute.xlu1 %836  ;;  %v8011_v42 = vpop.permute.xlu0 %676 }
  0xfc   : > { %10487 = vst [vmem:[#allocation18_spill] sm:$0xff] %v8009_v41  ;;  %10488 = vst [vmem:[#allocation19_spill] sm:$0xff] %v8011_v42  ;;  %851 = vperm.xlu1 %7030, %v589_v39   ;;  %846 = vperm.xlu0 %7029, %v588_v40  }
  0xff   : > { %v8021_v47 = vpop.permute.xlu1 %841  ;;  %v8023_v48 = vpop.permute.xlu0 %681 }
 0x100   : > { %10489 = vst [vmem:[#allocation20_spill] sm:$0xff] %v8021_v47  ;;  %10490 = vst [vmem:[#allocation21_spill] sm:$0xff] %v8023_v48  ;;  %1945 = vperm.xlu1 %7030, %v1875_v43   ;;  %1940 = vperm.xlu0 %7029, %v1874_v44   ;;  %v1905_v43 = vld [vmem:[#allocation8 + $0xf8] sm:$0xff]  ;;  %v1904_v44 = vld [vmem:[#allocation8 + $0xf0] sm:$0xff] }
 0x101   : > { %6658 = vmatmul.mubr.msk.bf16.gmra.mxu0 %vm1104_vm0, %v7067_v45  ;;  %6674 = vmatmul.mubr.msk.bf16.gmra.mxu1 %vm1104_vm0, %v7068_v46 }
 0x103   : > { %v8027_v5 = vpop.permute.xlu1 %671  ;;  %v8029_v51 = vpop.permute.xlu0 %666 }
 0x104   : > { %10491 = vst [vmem:[#allocation22_spill] sm:$0xff] %v8027_v5  ;;  %1955 = vperm.xlu1 %7030, %v1877_v49   ;;  %1950 = vperm.xlu0 %7029, %v1876_v50   ;;  %v1907_v49 = vld [vmem:[#allocation8 + $0x108] sm:$0xff]  ;;  %v1906_v50 = vld [vmem:[#allocation8 + $0x100] sm:$0xff] }
 0x107   : > { %v8031_v54 = vpop.permute.xlu1 %831  ;;  %v8033_v55 = vpop.permute.xlu0 %826 }
 0x108   : > { %10492 = vst [vmem:[#allocation23_spill] sm:$0xff] %v8031_v54  ;;  %10493 = vst [vmem:[#allocation24_spill] sm:$0xff] %v8033_v55  ;;  %1965 = vperm.xlu1 %7030, %v1879_v52   ;;  %1960 = vperm.xlu0 %7029, %v1878_v53  }
 0x10b   : > { %v8035_v58 = vpop.permute.xlu1 %661  ;;  %v8037_v59 = vpop.permute.xlu0 %656 }
 0x10c   : > { %1975 = vperm.xlu1 %7030, %v1881_v56   ;;  %1970 = vperm.xlu0 %7029, %v1880_v57   ;;  %v1909_v56 = vld [vmem:[#allocation8 + $0x118] sm:$0xff]  ;;  %v1908_v57 = vld [vmem:[#allocation8 + $0x110] sm:$0xff] }
 0x10f   : > { %v8039_v62 = vpop.permute.xlu1 %821  ;;  %v8041_v63 = vpop.permute.xlu0 %816 }
 0x110   : > { %1985 = vperm.xlu1 %7030, %v1883_v60   ;;  %1980 = vperm.xlu0 %7029, %v1882_v61  }
 0x113   : > { %v8043_v2 = vpop.permute.xlu1 %651  ;;  %v8045_v3 = vpop.permute.xlu0 %646 }
 0x114   : > { %1995 = vperm.xlu1 %7030, %v1885_v0   ;;  %1990 = vperm.xlu0 %7029, %v1884_v1   ;;  %v1920_v0 = vld [vmem:[#allocation8 + $0x170] sm:$0xff]  ;;  %v1910_v1 = vld [vmem:[#allocation8 + $0x120] sm:$0xff] }
 0x117   : > { %v8047_v7 = vpop.permute.xlu1 %811  ;;  %v8049_v8 = vpop.permute.xlu0 %806 }
 0x118   : > { %2005 = vperm.xlu1 %7030, %v1887_v4   ;;  %2000 = vperm.xlu0 %7029, %v1886_v6  }
 0x11b   : > { %v8051_v11 = vpop.permute.xlu1 %641  ;;  %v8053_v12 = vpop.permute.xlu0 %636 }
 0x11c   : > { %2015 = vperm.xlu1 %7030, %v1889_v9   ;;  %2010 = vperm.xlu0 %7029, %v1888_v10   ;;  %v1918_v9 = vld [vmem:[#allocation8 + $0x160] sm:$0xff]  ;;  %v1921_v10 = vld [vmem:[#allocation8 + $0x178] sm:$0xff] }
 0x11f   : > { %v8055_v15 = vpop.permute.xlu1 %801  ;;  %v8057_v16 = vpop.permute.xlu0 %796 }
 0x120   : > { %2025 = vperm.xlu1 %7030, %v1891_v13   ;;  %2020 = vperm.xlu0 %7029, %v1890_v14  }
 0x123   : > { %v8059_v19 = vpop.permute.xlu1 %631  ;;  %v8061_v20 = vpop.permute.xlu0 %626 }
 0x124   : > { %2035 = vperm.xlu1 %7030, %v1893_v17   ;;  %2030 = vperm.xlu0 %7029, %v1892_v18  }
 0x127   : > { %v8063_v23 = vpop.permute.xlu1 %791  ;;  %v8065_v24 = vpop.permute.xlu0 %786 }
 0x128   : > { %2045 = vperm.xlu1 %7030, %v1895_v21   ;;  %2040 = vperm.xlu0 %7029, %v1894_v22  }
 0x12b   : > { %v8067_v27 = vpop.permute.xlu1 %621  ;;  %v8069_v28 = vpop.permute.xlu0 %616 }
 0x12c   : > { %10494 = vst [vmem:[#allocation25_spill] sm:$0xff] %v8069_v28  ;;  %2055 = vperm.xlu1 %7030, %v1897_v25   ;;  %2050 = vperm.xlu0 %7029, %v1896_v26  }
 0x12f   : > { %v8071_v31 = vpop.permute.xlu1 %781  ;;  %v8073_v32 = vpop.permute.xlu0 %776 }
 0x130   : > { %10495 = vst [vmem:[#allocation26_spill] sm:$0xff] %v8073_v32  ;;  %2065 = vperm.xlu1 %7030, %v1899_v29   ;;  %2060 = vperm.xlu0 %7029, %v1898_v30   ;;  %v1916_v29 = vld [vmem:[#allocation8 + $0x150] sm:$0xff]  ;;  %v1919_v30 = vld [vmem:[#allocation8 + $0x168] sm:$0xff] }
 0x133   : > { %v8075_v35 = vpop.permute.xlu1 %611  ;;  %v8077_v36 = vpop.permute.xlu0 %606 }
 0x134   : > { %10496 = vst [vmem:[#allocation27_spill] sm:$0xff] %v8077_v36  ;;  %2075 = vperm.xlu1 %7030, %v1901_v33   ;;  %2070 = vperm.xlu0 %7029, %v1900_v34  }
 0x137   : > { %v8079_v39 = vpop.permute.xlu1 %771  ;;  %v8081_v40 = vpop.permute.xlu0 %766 }
 0x138   : > { %10497 = vst [vmem:[#allocation28_spill] sm:$0xff] %v8081_v40  ;;  %2085 = vperm.xlu1 %7030, %v1903_v37   ;;  %2080 = vperm.xlu0 %7029, %v1902_v38  }
 0x13b   : > { %v8083_v45 = vpop.permute.xlu1 %761  ;;  %v8085_v46 = vpop.permute.xlu0 %756 }
 0x13c   : > { %10498 = vst [vmem:[#allocation29_spill] sm:$0xff] %v8083_v45  ;;  %10499 = vst [vmem:[#allocation30_spill] sm:$0xff] %v8085_v46  ;;  %2095 = vperm.xlu1 %7030, %v1905_v43   ;;  %2090 = vperm.xlu0 %7029, %v1904_v44  }
 0x13f   : > { %v8087_v52 = vpop.permute.xlu1 %921  ;;  %v8089_v53 = vpop.permute.xlu0 %916 }
 0x140   : > { %10500 = vst [vmem:[#allocation31_spill] sm:$0xff] %v8087_v52  ;;  %10501 = vst [vmem:[#allocation32_spill] sm:$0xff] %v8089_v53  ;;  %2105 = vperm.xlu1 %7030, %v1907_v49   ;;  %2100 = vperm.xlu0 %7029, %v1906_v50   ;;  %v1913_v53 = vld [vmem:[#allocation8 + $0x138] sm:$0xff] }
 0x143   : > { %v8091_v60 = vpop.permute.xlu1 %751  ;;  %v8093_v61 = vpop.permute.xlu0 %746 }
 0x144   : > { %10502 = vst [vmem:[#allocation33_spill] sm:$0xff] %v8091_v60  ;;  %10503 = vst [vmem:[#allocation34_spill] sm:$0xff] %v8093_v61  ;;  %2115 = vperm.xlu1 %7030, %v1909_v56   ;;  %2110 = vperm.xlu0 %7029, %v1908_v57   ;;  %v1915_v60 = vld [vmem:[#allocation8 + $0x148] sm:$0xff] }
 0x147   : > { %v8095_v4 = vpop.permute.xlu1 %911  ;;  %v8097_v6 = vpop.permute.xlu0 %906 }
 0x148   : > { %10504 = vst [vmem:[#allocation35_spill] sm:$0xff] %v8095_v4  ;;  %10505 = vst [vmem:[#allocation36_spill] sm:$0xff] %v8097_v6  ;;  %2170 = vperm.xlu1 %7030, %v1920_v0   ;;  %2120 = vperm.xlu0 %7029, %v1910_v1  }
 0x149   : > { %v1235_v13 = vpop.f32.mrf.mxu0  ;;  %v1395_v14 = vpop.f32.mrf.mxu1 }
 0x14a   : > { %v1236_v25 = vadd.f32 %v1235_v13, %v8077_v36  ;;  %v1396_v26 = vadd.f32 %v1395_v14, %v8081_v40 }
 0x14b   : > { %v8099_v17 = vpop.permute.xlu1 %741  ;;  %v8101_v18 = vpop.permute.xlu0 %736 }
 0x14c   : > { %10506 = vst [vmem:[#allocation37_spill] sm:$0xff] %v8099_v17  ;;  %10507 = vst [vmem:[#allocation38_spill] sm:$0xff] %v8101_v18  ;;  %2160 = vperm.xlu1 %7030, %v1918_v9   ;;  %2175 = vperm.xlu0 %7029, %v1921_v10   ;;  %v8103_v21 = vpop.f32.mrf.mxu0  ;;  %v8105_v22 = vpop.f32.mrf.mxu1  ;;  %v1554_v56 = vmax.f32 %v1236_v25, 0.0  ;;  %v1618_v57 = vmax.f32 %v1396_v26, 0.0  ;;  %v1914_v9 = vld [vmem:[#allocation8 + $0x140] sm:$0xff]  ;;  %v1917_v10 = vld [vmem:[#allocation8 + $0x158] sm:$0xff] }
 0x14d   : > { %10508 = vst [vmem:[#allocation39_spill] sm:$0xff] %v8103_v21  ;;  %10509 = vst [vmem:[#allocation40_spill] sm:$0xff] %v8105_v22  ;;  %v1936_v18 = vld [vmem:[#allocation8 + $0x1f0] sm:$0xff] }
 0x14e   : > { %v1239_v33 = vpop.f32.mrf.mxu0  ;;  %v1399_v34 = vpop.f32.mrf.mxu1  ;;  %v7071_v21 = vld [vmem:[#allocation6 + $0x4] ss:$16 sps:$4 sm:$0xff]  }
 0x14f   : > { %v1240_v37 = vadd.f32 %v1239_v33, %v8075_v35  ;;  %v1400_v38 = vadd.f32 %v1399_v34, %v8079_v39  ;;  %v8111_v43 = vpop.permute.xlu1 %901  ;;  %v8113_v44 = vpop.permute.xlu0 %896  ;;  %2930 = vmatprep.mubr.bf16.mxu1 %v7071_v21 }
 0x150   : > { %10510 = vst [vmem:[#allocation41_spill] sm:$0xff] %v8111_v43  ;;  %10511 = vst [vmem:[#allocation42_spill] sm:$0xff] %v8113_v44  ;;  %2150 = vperm.xlu1 %7030, %v1916_v29   ;;  %2165 = vperm.xlu0 %7029, %v1919_v30   ;;  %v8115_v49 = vpop.f32.mrf.mxu0  ;;  %v8117_v50 = vpop.f32.mrf.mxu1  ;;  %v1911_v43 = vld [vmem:[#allocation8 + $0x128] sm:$0xff] }
 0x151   : > { %v1556_v0 = vmax.f32 %v1240_v37, 0.0  ;;  %v1620_v1 = vmax.f32 %v1400_v38, 0.0  ;;  %v1912_v38 = vld [vmem:[#allocation8 + $0x130] sm:$0xff] }
 0x152   : > { %v1245_v13 = vpop.f32.mrf.mxu0  ;;  %v1405_v14 = vpop.f32.mrf.mxu1 }
 0x153   : > { %v8119_v33 = vpack.c.bf16 %v1556_v0, %v1554_v56  ;;  %v8121_v34 = vpack.c.bf16 %v1620_v1, %v1618_v57  ;;  %v8123_v4 = vpop.permute.xlu1 %731  ;;  %v8125_v29 = vpop.permute.xlu0 %726  ;;  %v1246_v26 = vadd.f32 %v1245_v13, %v8069_v28  ;;  %v1406_v37 = vadd.f32 %v1405_v14, %v8073_v32  ;;  %v1926_v28 = vld [vmem:[#allocation8 + $0x1a0] sm:$0xff] }
 0x154   : > { %10514 = vst [vmem:[#allocation45_spill] sm:$0xff] %v8123_v4  ;;  %10515 = vst [vmem:[#allocation46_spill] sm:$0xff] %v8125_v29  ;;  %2140 = vperm.xlu1 %7030, %v1914_v9   ;;  %2155 = vperm.xlu0 %7029, %v1917_v10   ;;  %v8127_v30 = vpop.f32.mrf.mxu0  ;;  %v8129_v25 = vpop.f32.mrf.mxu1 }
 0x155   : > { %10512 = vst [vmem:[#allocation43_spill] sm:$0xff] %v8119_v33  ;;  %10513 = vst [vmem:[#allocation44_spill] sm:$0xff] %v8121_v34  ;;  %v1558_v13 = vmax.f32 %v1246_v26, 0.0  ;;  %v1622_v14 = vmax.f32 %v1406_v37, 0.0 }
 0x156   : > { %10516 = vst [vmem:[#allocation47_spill] sm:$0xff] %v8127_v30  ;;  %10517 = vst [vmem:[#allocation48_spill] sm:$0xff] %v8129_v25  ;;  %v1249_v56 = vpop.f32.mrf.mxu0  ;;  %v1409_v0 = vpop.f32.mrf.mxu1  ;;  %v1927_v30 = vld [vmem:[#allocation8 + $0x1a8] sm:$0xff] }
 0x157   : > { %v1250_v57 = vadd.f32 %v1249_v56, %v8067_v27  ;;  %v1410_v1 = vadd.f32 %v1409_v0, %v8071_v31  ;;  %v8135_v6 = vpop.permute.xlu1 %891  ;;  %v8137_v9 = vpop.permute.xlu0 %886 }
 0x158   : > { %10518 = vst [vmem:[#allocation49_spill] sm:$0xff] %v8135_v6  ;;  %10519 = vst [vmem:[#allocation50_spill] sm:$0xff] %v8137_v9  ;;  %2130 = vperm.xlu1 %7030, %v1912_v38   ;;  %2145 = vperm.xlu0 %7029, %v1915_v60   ;;  %v8139_v10 = vpop.f32.mrf.mxu0  ;;  %v8141_v52 = vpop.f32.mrf.mxu1 }
 0x159   : > { %v1560_v45 = vmax.f32 %v1250_v57, 0.0  ;;  %v1624_v61 = vmax.f32 %v1410_v1, 0.0  ;;  %v1937_v1 = vld [vmem:[#allocation8 + $0x1f8] sm:$0xff] }
 0x15a   : > { %v1255_v46 = vpop.f32.mrf.mxu0  ;;  %v1415_v56 = vpop.f32.mrf.mxu1 }
 0x15b   : > { %v8143_v17 = vpack.c.bf16 %v1560_v45, %v1558_v13  ;;  %v8145_v0 = vpack.c.bf16 %v1624_v61, %v1622_v14  ;;  %v8147_v44 = vpop.permute.xlu1 %721  ;;  %v8149_v38 = vpop.permute.xlu0 %716  ;;  %v1256_v37 = vadd.f32 %v1255_v46, %v8061_v20  ;;  %v1416_v57 = vadd.f32 %v1415_v56, %v8065_v24 }
 0x15c   : > { %10522 = vst [vmem:[#allocation53_spill] sm:$0xff] %v8147_v44  ;;  %10523 = vst [vmem:[#allocation54_spill] sm:$0xff] %v8149_v38  ;;  %2125 = vperm.xlu1 %7030, %v1911_v43   ;;  %2135 = vperm.xlu0 %7029, %v1913_v53   ;;  %v8151_v60 = vpop.f32.mrf.mxu0  ;;  %v8153_v26 = vpop.f32.mrf.mxu1  ;;  %v1935_v44 = vld [vmem:[#allocation8 + $0x1e8] sm:$0xff]  ;;  %v1934_v38 = vld [vmem:[#allocation8 + $0x1e0] sm:$0xff] }
 0x15d   : > { %10520 = vst [vmem:[#allocation51_spill] sm:$0xff] %v8143_v17  ;;  %10521 = vst [vmem:[#allocation52_spill] sm:$0xff] %v8145_v0  ;;  %v1562_v46 = vmax.f32 %v1256_v37, 0.0  ;;  %v1626_v56 = vmax.f32 %v1416_v57, 0.0 }
 0x15e   : > { %v1259_v45 = vpop.f32.mrf.mxu0  ;;  %v1419_v13 = vpop.f32.mrf.mxu1 }
 0x15f   : > { %v1260_v61 = vadd.f32 %v1259_v45, %v8059_v19  ;;  %v1420_v14 = vadd.f32 %v1419_v13, %v8063_v23  ;;  %v8159_v6 = vpop.permute.xlu1 %881  ;;  %v8161_v43 = vpop.permute.xlu0 %876 }
 0x160   : > { %10524 = vst [vmem:[#allocation55_spill] sm:$0xff] %v8159_v6  ;;  %10525 = vst [vmem:[#allocation56_spill] sm:$0xff] %v8161_v43  ;;  %2255 = vperm.xlu1 %7030, %v1937_v1   ;;  %2250 = vperm.xlu0 %7029, %v1936_v18   ;;  %v8163_v53 = vpop.f32.mrf.mxu0  ;;  %v8165_v4 = vpop.f32.mrf.mxu1 }
 0x161   : > { %v1564_v9 = vmax.f32 %v1260_v61, 0.0  ;;  %v1628_v29 = vmax.f32 %v1420_v14, 0.0  ;;  %v1933_v61 = vld [vmem:[#allocation8 + $0x1d8] sm:$0xff]  ;;  %v1932_v14 = vld [vmem:[#allocation8 + $0x1d0] sm:$0xff] }
 0x162   : > { %v8167_v34 = vpop.f32.mrf.mxu0  ;;  %v8169_v45 = vpop.f32.mrf.mxu1 }
 0x163   : > { %v8171_v13 = vpack.c.bf16 %v1564_v9, %v1562_v46  ;;  %v8173_v6 = vpack.c.bf16 %v1628_v29, %v1626_v56  ;;  %v8175_v1 = vpop.permute.xlu1 %711  ;;  %v8177_v18 = vpop.permute.xlu0 %706 }
 0x164   : > { %10528 = vst [vmem:[#allocation59_spill] sm:$0xff] %v8175_v1  ;;  %10529 = vst [vmem:[#allocation60_spill] sm:$0xff] %v8177_v18  ;;  %2245 = vperm.xlu1 %7030, %v1935_v44   ;;  %2240 = vperm.xlu0 %7029, %v1934_v38   ;;  %v8179_v37 = vpop.f32.mrf.mxu0  ;;  %v8181_v57 = vpop.f32.mrf.mxu1  ;;  %v1931_v44 = vld [vmem:[#allocation8 + $0x1c8] sm:$0xff]  ;;  %v1930_v38 = vld [vmem:[#allocation8 + $0x1c0] sm:$0xff] }
 0x165   : > { %10526 = vst [vmem:[#allocation57_spill] sm:$0xff] %v8171_v13  ;;  %10527 = vst [vmem:[#allocation58_spill] sm:$0xff] %v8173_v6  ;;  %v7074_v1 = vld [vmem:[#allocation6 + $0xc] ss:$16 sps:$4 sm:$0xff]  }
 0x166   : > { %v8183_v43 = vpop.f32.mrf.mxu0  ;;  %v8185_v33 = vpop.f32.mrf.mxu1  ;;  %3283 = vmatprep.mubr.bf16.mxu0 %v7074_v1 }
 0x167   : > { %v8187_v9 = vpop.permute.xlu1 %871  ;;  %v8189_v29 = vpop.permute.xlu0 %866 }
 0x168   : > { %10530 = vst [vmem:[#allocation61_spill] sm:$0xff] %v8187_v9  ;;  %10531 = vst [vmem:[#allocation62_spill] sm:$0xff] %v8189_v29  ;;  %2235 = vperm.xlu1 %7030, %v1933_v61   ;;  %2230 = vperm.xlu0 %7029, %v1932_v14   ;;  %v1271_v46 = vpop.f32.mrf.mxu0  ;;  %v8191_v56 = vpop.f32.mrf.mxu1  ;;  %v1929_v61 = vld [vmem:[#allocation8 + $0x1b8] sm:$0xff]  ;;  %v1928_v14 = vld [vmem:[#allocation8 + $0x1b0] sm:$0xff] }
 0x16a   : > { %v8193_v0 = vpop.f32.mrf.mxu0  ;;  %v8195_v17 = vpop.f32.mrf.mxu1 }
 0x16b   : > { %v8197_v6 = vpop.permute.xlu1 %701  ;;  %v8199_v13 = vpop.permute.xlu0 %696 }
 0x16c   : > { %10532 = vst [vmem:[#allocation63_spill] sm:$0xff] %v8197_v6  ;;  %10533 = vst [vmem:[#allocation64_spill] sm:$0xff] %v8199_v13  ;;  %2225 = vperm.xlu1 %7030, %v1931_v44   ;;  %2220 = vperm.xlu0 %7029, %v1930_v38   ;;  %v8201_v22 = vpop.f32.mrf.mxu0  ;;  %v8203_v40 = vpop.f32.mrf.mxu1 }
 0x16e   : > { %v8205_v36 = vpop.f32.mrf.mxu0  ;;  %v8207_v9 = vpop.f32.mrf.mxu1 }
 0x16f   : > { %v8209_v25 = vpop.permute.xlu1 %861  ;;  %v8211_v32 = vpop.permute.xlu0 %856 }
 0x170   : > { %10534 = vst [vmem:[#allocation65_spill] sm:$0xff] %v8209_v25  ;;  %10535 = vst [vmem:[#allocation66_spill] sm:$0xff] %v8211_v32  ;;  %2215 = vperm.xlu1 %7030, %v1929_v61   ;;  %2210 = vperm.xlu0 %7029, %v1928_v14   ;;  %v8213_v44 = vpop.f32.mrf.mxu0  ;;  %v8215_v38 = vpop.f32.mrf.mxu1  ;;  %v1925_v14 = vld [vmem:[#allocation8 + $0x198] sm:$0xff]  ;;  %v1924_v25 = vld [vmem:[#allocation8 + $0x190] sm:$0xff] }
 0x172   : > { %v8217_v29 = vpop.f32.mrf.mxu0  ;;  %v8219_v18 = vpop.f32.mrf.mxu1 }
 0x173   : > { %v8221_v6 = vpop.permute.xlu1 %691  ;;  %v8223_v13 = vpop.permute.xlu0 %686 }
 0x174   : > { %10536 = vst [vmem:[#allocation67_spill] sm:$0xff] %v8221_v6  ;;  %10537 = vst [vmem:[#allocation68_spill] sm:$0xff] %v8223_v13  ;;  %2205 = vperm.xlu1 %7030, %v1927_v30   ;;  %2200 = vperm.xlu0 %7029, %v1926_v28   ;;  %v8225_v21 = vpop.f32.mrf.mxu0  ;;  %v8227_v61 = vpop.f32.mrf.mxu1  ;;  %v1923_v30 = vld [vmem:[#allocation8 + $0x188] sm:$0xff]  ;;  %v1922_v28 = vld [vmem:[#allocation8 + $0x180] sm:$0xff] }
 0x176   : > { %v8229_v32 = vpop.f32.mrf.mxu0  ;;  %v8231_v54 = vpop.f32.mrf.mxu1 }
 0x177   : > { %v8233_v1 = vpop.permute.xlu1 %851  ;;  %v8235_v47 = vpop.permute.xlu0 %846 }
 0x178   : > { %10538 = vst [vmem:[#allocation69_spill] sm:$0xff] %v8233_v1  ;;  %10539 = vst [vmem:[#allocation70_spill] sm:$0xff] %v8235_v47  ;;  %2195 = vperm.xlu1 %7030, %v1925_v14   ;;  %2190 = vperm.xlu0 %7029, %v1924_v25   ;;  %v1291_v6 = vpop.f32.mrf.mxu0  ;;  %v1451_v13 = vpop.f32.mrf.mxu1  ;;  %v8251_v25 = vadd.f32 %v8115_v49, %v8075_v35  ;;  %v8255_v14 = vadd.f32 %v8117_v50, %v8079_v39 }
 0x179   : > { %v8258_v47 = vadd.f32 %v1271_v46, %v8051_v11  ;;  %v8270_v35 = vadd.f32 %v8151_v60, %v8061_v20  ;;  %v8274_v39 = vadd.f32 %v8153_v26, %v8065_v24  ;;  %v8290_v20 = vadd.f32 %v8167_v34, %v8053_v12 }
 0x17a   : > { %v8237_v48 = vpop.f32.mrf.mxu0  ;;  %v8239_v41 = vpop.f32.mrf.mxu1  ;;  %10543 = vst [vmem:[#allocation74_spill] sm:$0xff] %v8251_v25  ;;  %10544 = vst [vmem:[#allocation75_spill] sm:$0xff] %v8255_v14  ;;  %v8294_v24 = vadd.f32 %v8169_v45, %v8057_v16  ;;  %v8314_v26 = vadd.f32 %v8183_v43, %v8051_v11  ;;  %v3927_v45 = vld [vmem:[#allocation11 + $0x18] sm:$0xff]  ;;  %v8335_v11 = vadd.f32 %v8203_v40, %v8049_v8 }
 0x17b   : > { %10540 = vst [vmem:[#allocation71_spill] sm:$0xff] %v8239_v41  ;;  %v8241_v5 = vpop.permute.xlu1 %1945  ;;  %v8243_v42 = vpop.permute.xlu0 %1940  ;;  %v3924_v41 = vld [vmem:[#allocation11] sm:$0xff]  ;;  %10547 = vst [vmem:[#allocation78_spill] sm:$0xff] %v8274_v39  ;;  %v8342_v43 = vadd.f32 %v8205_v36, %v8043_v2  ;;  %v8363_v36 = vadd.f32 %v8217_v29, %v8037_v59  ;;  %v8374_v46 = vadd.f32 %v8225_v21, %v8037_v59  ;;  %v10552_v21 = vld [vmem:[#allocation24_spill] sm:$0xff] }
 0x17c   : > { %10541 = vst [vmem:[#allocation72_spill] sm:$0xff] %v8241_v5  ;;  %10542 = vst [vmem:[#allocation73_spill] sm:$0xff] %v8243_v42  ;;  %2185 = vperm.xlu1 %7030, %v1923_v30   ;;  %2180 = vperm.xlu0 %7029, %v1922_v28   ;;  %v8245_v55 = vpop.f32.mrf.mxu0  ;;  %v8247_v1 = vpop.f32.mrf.mxu1  ;;  %v3925_v5 = vld [vmem:[#allocation11 + $0x8] sm:$0xff]  ;;  %v8262_v30 = vadd.f32 %v8139_v10, %v8067_v27  ;;  %v8266_v28 = vadd.f32 %v8141_v52, %v8071_v31 }
 0x17d   : > { %v8282_v27 = vadd.f32 %v8163_v53, %v8059_v19  ;;  %v8286_v31 = vadd.f32 %v8165_v4, %v8063_v23  ;;  %v8302_v19 = vadd.f32 %v8179_v37, %v8053_v12  ;;  %v8306_v23 = vadd.f32 %v8181_v57, %v8057_v16  ;;  %v3926_v37 = vld [vmem:[#allocation11 + $0x10] sm:$0xff]  ;;  %v10561_v42 = vld [vmem:[#allocation23_spill] sm:$0xff] }
 0x17e   : > { %10545 = vst [vmem:[#allocation76_spill] sm:$0xff] %v8262_v30  ;;  %10546 = vst [vmem:[#allocation77_spill] sm:$0xff] %v8266_v28  ;;  %v8276_v49 = vpop.f32.mrf.mxu0  ;;  %v8278_v50 = vpop.f32.mrf.mxu1  ;;  %v8310_v4 = vadd.f32 %v8191_v56, %v8055_v15  ;;  %v8318_v12 = vadd.f32 %v8185_v33, %v8055_v15  ;;  %v8323_v16 = vadd.f32 %v8193_v0, %v8045_v3  ;;  %v3932_v28 = vld [vmem:[#allocation11 + $0x40] sm:$0xff] }
 0x17f   : > { %v8296_v52 = vpop.permute.xlu1 %1955  ;;  %v8298_v10 = vpop.permute.xlu0 %1950  ;;  %v8338_v15 = vadd.f32 %v1291_v6, %v8035_v58  ;;  %v8367_v57 = vadd.f32 %v8219_v18, %v8041_v63  ;;  %v8378_v56 = vadd.f32 %v8227_v61, %v8041_v63  ;;  %v8382_v29 = vadd.f32 %v8229_v32, %v8035_v58  ;;  %v3929_v18 = vld [vmem:[#allocation11 + $0x28] sm:$0xff]  ;;  %v10569_v39 = vld [vmem:[#allocation69_spill] sm:$0xff] }
 0x180   : > { %10548 = vst [vmem:[#allocation79_spill] sm:$0xff] %v8296_v52  ;;  %10549 = vst [vmem:[#allocation80_spill] sm:$0xff] %v8298_v10  ;;  %3995 = vperm.xlu1 %7030, %v3925_v5   ;;  %3990 = vperm.xlu0 %7029, %v3924_v41   ;;  %v1301_v34 = vpop.f32.mrf.mxu0  ;;  %v1461_v60 = vpop.f32.mrf.mxu1  ;;  %v8327_v41 = vadd.f32 %v8195_v17, %v8049_v8  ;;  %v8331_v5 = vadd.f32 %v8201_v22, %v8045_v3  ;;  %v10554_v61 = vld [vmem:[#allocation19_spill] sm:$0xff]  ;;  %v10555_v22 = vld [vmem:[#allocation22_spill] sm:$0xff] }
 0x181   : > { %v8346_v17 = vadd.f32 %v8207_v9, %v8047_v7  ;;  %v8350_v3 = vadd.f32 %v8213_v44, %v8043_v2  ;;  %v8354_v8 = vadd.f32 %v8215_v38, %v8047_v7  ;;  %v8370_v2 = vadd.f32 %v1451_v13, %v8039_v62  ;;  %v3928_v44 = vld [vmem:[#allocation11 + $0x20] sm:$0xff]  ;;  %v10558_v38 = vld [vmem:[#allocation20_spill] sm:$0xff] }
 0x182   : > { %v1305_v33 = vpop.f32.mrf.mxu0  ;;  %v1465_v0 = vpop.f32.mrf.mxu1  ;;  %v8386_v13 = vadd.f32 %v8231_v54, %v8039_v62  ;;  %v8391_v59 = vadd.f32 %v8237_v48, %v8029_v51  ;;  %v8399_v53 = vadd.f32 %v1301_v34, %v10555_v22  ;;  %v10556_v54 = vld [vmem:[#allocation18_spill] sm:$0xff]  ;;  %v1462_v14 = vadd.f32 %v1461_v60, %v10561_v42  ;;  %v3930_v60 = vld [vmem:[#allocation11 + $0x30] sm:$0xff] }
 0x183   : > { %v8356_v40 = vpop.permute.xlu1 %1965  ;;  %v8358_v6 = vpop.permute.xlu0 %1960  ;;  %v1466_v25 = vadd.f32 %v1465_v0, %v10556_v54  ;;  %v8424_v0 = vadd.f32 %v8278_v50, %v10561_v42 }
 0x184   : > { %10550 = vst [vmem:[#allocation81_spill] sm:$0xff] %v8356_v40  ;;  %10551 = vst [vmem:[#allocation82_spill] sm:$0xff] %v8358_v6  ;;  %4005 = vperm.xlu1 %7030, %v3927_v45   ;;  %4000 = vperm.xlu0 %7029, %v3926_v37   ;;  %v1307_v7 = vpop.f32.mrf.mxu0  ;;  %v1467_v9 = vpop.f32.mrf.mxu1  ;;  %v10553_v45 = vld [vmem:[#allocation71_spill] sm:$0xff]  ;;  %v10557_v40 = vld [vmem:[#allocation21_spill] sm:$0xff] }
 0x185   : > { %v8395_v63 = vadd.f32 %v10553_v45, %v10552_v21  ;;  %v1308_v37 = vadd.f32 %v1307_v7, %v10554_v61  ;;  %v1468_v62 = vadd.f32 %v1467_v9, %v10556_v54  ;;  %v1306_v7 = vadd.f32 %v1305_v33, %v10554_v61 }
 0x186   : > { %v1309_v58 = vpop.f32.mrf.mxu0  ;;  %v1469_v32 = vpop.f32.mrf.mxu1  ;;  %v8420_v33 = vadd.f32 %v8276_v49, %v10555_v22  ;;  %v1645_v49 = vmax.f32 %v1462_v14, 0.0 }
 0x187   : > { %v1310_v6 = vadd.f32 %v1309_v58, %v10557_v40  ;;  %v1470_v52 = vadd.f32 %v1469_v32, %v10558_v38  ;;  %v8404_v10 = vpop.permute.xlu1 %1975  ;;  %v8406_v48 = vpop.permute.xlu0 %1970  ;;  %v1298_v58 = vadd.f32 %v8245_v55, %v8029_v51  ;;  %v1458_v32 = vadd.f32 %v8247_v1, %v10552_v21 }
 0x188   : > { %10559 = vst [vmem:[#allocation24_spill] sm:$0xff] %v8404_v10  ;;  %10560 = vst [vmem:[#allocation71_spill] sm:$0xff] %v8406_v48  ;;  %4015 = vperm.xlu1 %7030, %v3929_v18   ;;  %4010 = vperm.xlu0 %7029, %v3928_v44   ;;  %v1311_v34 = vpop.f32.mrf.mxu0  ;;  %v1471_v9 = vpop.f32.mrf.mxu1  ;;  %v3931_v48 = vld [vmem:[#allocation11 + $0x38] sm:$0xff]  ;;  %v1583_v18 = vmax.f32 %v1308_v37, 0.0  ;;  %v1647_v61 = vmax.f32 %v1468_v62, 0.0  ;;  %v1582_v22 = vmax.f32 %v1306_v7, 0.0 }
 0x189   : > { %v1312_v10 = vadd.f32 %v1311_v34, %v10557_v40  ;;  %v1472_v45 = vadd.f32 %v1471_v9, %v10558_v38  ;;  %v1584_v44 = vmax.f32 %v1310_v6, 0.0  ;;  %v1648_v1 = vmax.f32 %v1470_v52, 0.0  ;;  %v10566_v6 = vld [vmem:[#allocation68_spill] sm:$0xff]  ;;  %v10567_v52 = vld [vmem:[#allocation70_spill] sm:$0xff] }
 0x18a   : > { %v1315_v51 = vpop.f32.mrf.mxu0  ;;  %v1475_v55 = vpop.f32.mrf.mxu1  ;;  %v1581_v34 = vmax.f32 %v8399_v53, 0.0  ;;  %v1646_v9 = vmax.f32 %v1466_v25, 0.0  ;;  %v1643_v30 = vmax.f32 %v1458_v32, 0.0  ;;  %v1580_v14 = vmax.f32 %v8420_v33, 0.0 }
 0x18b   : > { %v1585_v21 = vmax.f32 %v1312_v10, 0.0  ;;  %v1649_v40 = vmax.f32 %v1472_v45, 0.0  ;;  %v8426_v54 = vpop.permute.xlu1 %1985  ;;  %v8428_v38 = vpop.permute.xlu0 %1980  ;;  %v1316_v37 = vadd.f32 %v1315_v51, %v10566_v6  ;;  %v1476_v10 = vadd.f32 %v1475_v55, %v10567_v52 }
 0x18c   : > { %10562 = vst [vmem:[#allocation19_spill] sm:$0xff] %v8426_v54  ;;  %10563 = vst [vmem:[#allocation22_spill] sm:$0xff] %v8428_v38  ;;  %4025 = vperm.xlu1 %7030, %v3931_v48   ;;  %4020 = vperm.xlu0 %7029, %v3930_v60   ;;  %v8431_v42 = vpop.f32.mrf.mxu0  ;;  %v8433_v50 = vpop.f32.mrf.mxu1  ;;  %v3933_v54 = vld [vmem:[#allocation11 + $0x48] sm:$0xff]  ;;  %v1579_v38 = vmax.f32 %v1298_v58, 0.0  ;;  %v1696_v53 = vpack.c.bf16 %v1584_v44, %v1582_v22  ;;  %v1644_v7 = vmax.f32 %v8424_v0, 0.0  ;;  %v1578_v58 = vmax.f32 %v8391_v59, 0.0 }
 0x18d   : > { %10564 = vst [vmem:[#allocation18_spill] sm:$0xff] %v8431_v42  ;;  %10565 = vst [vmem:[#allocation21_spill] sm:$0xff] %v8433_v50  ;;  %v1697_v62 = vpack.c.bf16 %v1585_v21, %v1583_v18  ;;  %v1729_v45 = vpack.c.bf16 %v1649_v40, %v1647_v61  ;;  %v1728_v60 = vpack.c.bf16 %v1648_v1, %v1646_v9  ;;  %v10568_v42 = vld [vmem:[#allocation67_spill] sm:$0xff]  ;;  %v1642_v32 = vmax.f32 %v8395_v63, 0.0  ;;  %v3935_v22 = vld [vmem:[#allocation11 + $0x58] sm:$0xff] }
 0x18e   : > { %v1319_v25 = vpop.f32.mrf.mxu0  ;;  %v1479_v48 = vpop.f32.mrf.mxu1  ;;  %v1695_v44 = vpack.c.bf16 %v1581_v34, %v1579_v38  ;;  %v1727_v55 = vpack.c.bf16 %v1645_v49, %v1643_v30  ;;  %v1586_v61 = vmax.f32 %v1316_v37, 0.0  ;;  %v1650_v1 = vmax.f32 %v1476_v10, 0.0  ;;  %v3934_v9 = vld [vmem:[#allocation11 + $0x50] sm:$0xff] }
 0x18f   : > { %v1320_v50 = vadd.f32 %v1319_v25, %v10568_v42  ;;  %v1480_v51 = vadd.f32 %v1479_v48, %v10569_v39  ;;  %v8441_v6 = vpop.permute.xlu1 %1995  ;;  %v8443_v18 = vpop.permute.xlu0 %1990  ;;  %2898 = vmatprep.subr.bf16.mxu1 %v1697_v62  ;;  %3251 = vmatprep.subr.bf16.mxu0 %v1729_v45  ;;  %v1575_v59 = vmax.f32 %v8374_v46, 0.0  ;;  %v1639_v63 = vmax.f32 %v8378_v56, 0.0  ;;  %v10656_v42 = vld [vmem:[#allocation42_spill] sm:$0xff] }
 0x190   : > { %10570 = vst [vmem:[#allocation20_spill] sm:$0xff] %v8441_v6  ;;  %10571 = vst [vmem:[#allocation23_spill] sm:$0xff] %v8443_v18  ;;  %4035 = vperm.xlu1 %7030, %v3933_v54   ;;  %4030 = vperm.xlu0 %7029, %v3932_v28   ;;  %v8447_v33 = vpop.f32.mrf.mxu0  ;;  %v8449_v0 = vpop.f32.mrf.mxu1  ;;  %v1576_v28 = vmax.f32 %v8382_v29, 0.0  ;;  %v1640_v54 = vmax.f32 %v8386_v13, 0.0  ;;  %v1694_v34 = vpack.c.bf16 %v1580_v14, %v1578_v58  ;;  %v1573_v46 = vmax.f32 %v8350_v3, 0.0  ;;  %v3937_v58 = vld [vmem:[#allocation11 + $0x68] sm:$0xff] }
 0x191   : > { %10572 = vst [vmem:[#allocation83_spill] sm:$0xff] %v8447_v33  ;;  %10573 = vst [vmem:[#allocation84_spill] sm:$0xff] %v8449_v0  ;;  %v1588_v21 = vmax.f32 %v1320_v50, 0.0  ;;  %v1652_v40 = vmax.f32 %v1480_v51, 0.0  ;;  %2899 = vmatpush1.bf16.msra.mxu1 %v1696_v53  ;;  %3252 = vmatpush1.bf16.msra.mxu0 %v1728_v60  ;;  %v1726_v49 = vpack.c.bf16 %v1644_v7, %v1642_v32  ;;  %v1637_v56 = vmax.f32 %v8354_v8, 0.0  ;;  %v10582_v60 = vld [vmem:[#allocation64_spill] sm:$0xff] }
 0x192   : > { %2900 = vmatprep.subr.bf16.mxu1 %v1695_v44  ;;  %3253 = vmatprep.subr.bf16.mxu0 %v1727_v55  ;;  %v1325_v38 = vpop.f32.mrf.mxu0  ;;  %v1485_v30 = vpop.f32.mrf.mxu1  ;;  %v10580_v45 = vmax.f32 %v8338_v15, 0.0  ;;  %v10581_v53 = vmax.f32 %v8370_v2, 0.0  ;;  %v1574_v48 = vmax.f32 %v8363_v36, 0.0  ;;  %v1638_v7 = vmax.f32 %v8367_v57, 0.0  ;;  %v10583_v51 = vld [vmem:[#allocation66_spill] sm:$0xff]  ;;  %v3954_v18 = vld [vmem:[#allocation11 + $0xf0] sm:$0xff] }
 0x193   : > { %v8455_v50 = vpack.c.bf16 %v1588_v21, %v1586_v61  ;;  %v8457_v37 = vpack.c.bf16 %v1652_v40, %v1650_v1  ;;  %v8459_v10 = vpop.permute.xlu1 %2005  ;;  %v8461_v62 = vpop.permute.xlu0 %2000  ;;  %v1326_v3 = vadd.f32 %v1325_v38, %v10582_v60  ;;  %v1486_v8 = vadd.f32 %v1485_v30, %v10583_v51  ;;  %v3936_v32 = vld [vmem:[#allocation11 + $0x60] sm:$0xff]  ;;  %v10584_v21 = vld [vmem:[#allocation63_spill] sm:$0xff] }
 0x194   : > { %10576 = vst [vmem:[#allocation87_spill] sm:$0xff] %v8459_v10  ;;  %10577 = vst [vmem:[#allocation88_spill] sm:$0xff] %v8461_v62  ;;  %4045 = vperm.xlu1 %7030, %v3935_v22   ;;  %4040 = vperm.xlu0 %7029, %v3934_v9   ;;  %v8465_v29 = vpop.f32.mrf.mxu0  ;;  %v8467_v13 = vpop.f32.mrf.mxu1  ;;  %v1693_v14 = vpack.c.bf16 %v10580_v45, %v1575_v59  ;;  %v1725_v25 = vpack.c.bf16 %v10581_v53, %v1639_v63  ;;  %v1571_v44 = vmax.f32 %v8331_v5, 0.0  ;;  %v10585_v22 = vld [vmem:[#allocation65_spill] sm:$0xff]  ;;  %v3961_v33 = vld [vmem:[#allocation11 + $0x128] sm:$0xff] }
 0x195   : > { %10574 = vst [vmem:[#allocation85_spill] sm:$0xff] %v8455_v50  ;;  %10575 = vst [vmem:[#allocation86_spill] sm:$0xff] %v8457_v37  ;;  %2901 = vmatpush1.bf16.msra.mxu1 %v1694_v34  ;;  %3254 = vmatpush1.bf16.msra.mxu0 %v1726_v49  ;;  %v1635_v15 = vmax.f32 %v8335_v11, 0.0  ;;  %v1572_v55 = vmax.f32 %v8342_v43, 0.0  ;;  %v1636_v2 = vmax.f32 %v8346_v17, 0.0  ;;  %v1692_v61 = vpack.c.bf16 %v1576_v28, %v1574_v48  ;;  %v3939_v45 = vld [vmem:[#allocation11 + $0x78] sm:$0xff] }
 0x196   : > { %10578 = vst [vmem:[#allocation89_spill] sm:$0xff] %v8465_v29  ;;  %10579 = vst [vmem:[#allocation90_spill] sm:$0xff] %v8467_v13  ;;  %2902 = vmatprep.subr.bf16.mxu1 %v1693_v14  ;;  %3255 = vmatprep.subr.bf16.mxu0 %v1725_v25  ;;  %v1329_v36 = vpop.f32.mrf.mxu0  ;;  %v1489_v57 = vpop.f32.mrf.mxu1  ;;  %v1724_v1 = vpack.c.bf16 %v1640_v54, %v1638_v7  ;;  %v1570_v5 = vmax.f32 %v8323_v16, 0.0  ;;  %v1634_v11 = vmax.f32 %v8327_v41, 0.0  ;;  %v1590_v38 = vmax.f32 %v1326_v3, 0.0  ;;  %v3938_v14 = vld [vmem:[#allocation11 + $0x70] sm:$0xff] }
 0x197   : > { %v1330_v40 = vadd.f32 %v1329_v36, %v10584_v21  ;;  %v1490_v9 = vadd.f32 %v1489_v57, %v10585_v22  ;;  %v8483_v59 = vpop.permute.xlu1 %2015  ;;  %v8485_v63 = vpop.permute.xlu0 %2010  ;;  %v1691_v28 = vpack.c.bf16 %v1573_v46, %v1571_v44  ;;  %v1723_v54 = vpack.c.bf16 %v1637_v56, %v1635_v15  ;;  %v10658_v51 = vld [vmem:[#allocation30_spill] sm:$0xff]  ;;  %v10659_v29 = vld [vmem:[#allocation32_spill] sm:$0xff] }
 0x198   : > { %10586 = vst [vmem:[#allocation63_spill] sm:$0xff] %v8483_v59  ;;  %10587 = vst [vmem:[#allocation65_spill] sm:$0xff] %v8485_v63  ;;  %4055 = vperm.xlu1 %7030, %v3937_v58   ;;  %4050 = vperm.xlu0 %7029, %v3936_v32   ;;  %v8489_v43 = vpop.f32.mrf.mxu0  ;;  %v8491_v17 = vpop.f32.mrf.mxu1  ;;  %v1654_v30 = vmax.f32 %v1486_v8, 0.0  ;;  %v1567_v16 = vmax.f32 %v8302_v19, 0.0  ;;  %v1631_v41 = vmax.f32 %v8306_v23, 0.0  ;;  %v1568_v53 = vmax.f32 %v8314_v26, 0.0 }
 0x199   : > { %v1592_v34 = vmax.f32 %v1330_v40, 0.0  ;;  %v1656_v49 = vmax.f32 %v1490_v9, 0.0  ;;  %2903 = vmatpush1.bf16.msra.mxu1 %v1692_v61  ;;  %3256 = vmatpush1.bf16.msra.mxu0 %v1724_v1  ;;  %v1632_v25 = vmax.f32 %v8318_v12, 0.0  ;;  %v1690_v48 = vpack.c.bf16 %v1572_v55, %v1570_v5  ;;  %v10596_v61 = vld [vmem:[#allocation60_spill] sm:$0xff]  ;;  %v10597_v1 = vld [vmem:[#allocation62_spill] sm:$0xff]  ;;  %v3941_v40 = vld [vmem:[#allocation11 + $0x88] sm:$0xff] }
 0x19a   : > { %2904 = vmatprep.subr.bf16.mxu1 %v1691_v28  ;;  %3257 = vmatprep.subr.bf16.mxu0 %v1723_v54  ;;  %v1335_v46 = vpop.f32.mrf.mxu0  ;;  %v1495_v56 = vpop.f32.mrf.mxu1  ;;  %v1722_v7 = vpack.c.bf16 %v1636_v2, %v1634_v11  ;;  %v1565_v19 = vmax.f32 %v8282_v27, 0.0  ;;  %v1629_v23 = vmax.f32 %v8286_v31, 0.0  ;;  %v10594_v44 = vmax.f32 %v8258_v47, 0.0  ;;  %v3940_v9 = vld [vmem:[#allocation11 + $0x80] sm:$0xff]  ;;  %v10598_v5 = vld [vmem:[#allocation25_spill] sm:$0xff]  ;;  %v10599_v11 = vld [vmem:[#allocation47_spill] sm:$0xff] }
 0x19b   : > { %v8497_v3 = vpack.c.bf16 %v1592_v34, %v1590_v38  ;;  %v8499_v8 = vpack.c.bf16 %v1656_v49, %v1654_v30  ;;  %v8501_v58 = vpop.permute.xlu1 %2025  ;;  %v8503_v32 = vpop.permute.xlu0 %2020  ;;  %v10595_v55 = vmax.f32 %v8310_v4, 0.0  ;;  %v1566_v36 = vmax.f32 %v8290_v20, 0.0  ;;  %v10600_v47 = vld [vmem:[#allocation26_spill] sm:$0xff]  ;;  %v10601_v54 = vld [vmem:[#allocation48_spill] sm:$0xff]  ;;  %v3957_v63 = vld [vmem:[#allocation11 + $0x108] sm:$0xff] }
 0x19c   : > { %10590 = vst [vmem:[#allocation93_spill] sm:$0xff] %v8501_v58  ;;  %10591 = vst [vmem:[#allocation94_spill] sm:$0xff] %v8503_v32  ;;  %4065 = vperm.xlu1 %7030, %v3939_v45   ;;  %4060 = vperm.xlu0 %7029, %v3938_v14   ;;  %v8507_v26 = vpop.f32.mrf.mxu0  ;;  %v8509_v12 = vpop.f32.mrf.mxu1  ;;  %v1689_v15 = vpack.c.bf16 %v10594_v44, %v1567_v16  ;;  %v1630_v57 = vmax.f32 %v8294_v24, 0.0  ;;  %v1336_v27 = vadd.f32 %v1335_v46, %v10596_v61  ;;  %v10602_v30 = vld [vmem:[#allocation78_spill] sm:$0xff]  ;;  %v10603_v14 = vld [vmem:[#allocation59_spill] sm:$0xff] }
 0x19d   : > { %10588 = vst [vmem:[#allocation91_spill] sm:$0xff] %v8497_v3  ;;  %10589 = vst [vmem:[#allocation92_spill] sm:$0xff] %v8499_v8  ;;  %v1721_v2 = vpack.c.bf16 %v10595_v55, %v1631_v41  ;;  %v1496_v31 = vadd.f32 %v1495_v56, %v10597_v1  ;;  %2905 = vmatpush1.bf16.msra.mxu1 %v1690_v48  ;;  %3258 = vmatpush1.bf16.msra.mxu0 %v1722_v7  ;;  %v1563_v4 = vmax.f32 %v8270_v35, 0.0  ;;  %v10604_v41 = vld [vmem:[#allocation61_spill] sm:$0xff]  ;;  %v10607_v7 = vld [vmem:[#allocation76_spill] sm:$0xff] }
 0x19e   : > { %10592 = vst [vmem:[#allocation95_spill] sm:$0xff] %v8507_v26  ;;  %10593 = vst [vmem:[#allocation96_spill] sm:$0xff] %v8509_v12  ;;  %v1248_v28 = vadd.f32 %v10599_v11, %v10598_v5  ;;  %v1408_v38 = vadd.f32 %v10601_v54, %v10600_v47  ;;  %v1627_v20 = vmax.f32 %v10602_v30, 0.0  ;;  %2906 = vmatprep.subr.bf16.mxu1 %v1689_v15  ;;  %v1339_v24 = vpop.f32.mrf.mxu0  ;;  %v1499_v34 = vpop.f32.mrf.mxu1  ;;  %v1561_v44 = vmax.f32 %v10607_v7, 0.0  ;;  %v10608_v55 = vld [vmem:[#allocation77_spill] sm:$0xff]  ;;  %v3942_v54 = vld [vmem:[#allocation11 + $0x90] sm:$0xff] }
 0x19f   : > { %3259 = vmatprep.subr.bf16.mxu0 %v1721_v2  ;;  %v1688_v49 = vpack.c.bf16 %v1568_v53, %v1566_v36  ;;  %v1720_v45 = vpack.c.bf16 %v1632_v25, %v1630_v57  ;;  %v1340_v16 = vadd.f32 %v1339_v24, %v10603_v14  ;;  %v1500_v46 = vadd.f32 %v1499_v34, %v10604_v41  ;;  %v8527_v56 = vpop.permute.xlu1 %2035  ;;  %v8529_v48 = vpop.permute.xlu0 %2030  ;;  %v3943_v47 = vld [vmem:[#allocation11 + $0x98] sm:$0xff]  ;;  %v10609_v30 = vld [vmem:[#allocation27_spill] sm:$0xff]  ;;  %v10611_v7 = vld [vmem:[#allocation28_spill] sm:$0xff] }
 0x1a0   : > { %10605 = vst [vmem:[#allocation25_spill] sm:$0xff] %v8527_v56  ;;  %10606 = vst [vmem:[#allocation47_spill] sm:$0xff] %v8529_v48  ;;  %v1625_v35 = vmax.f32 %v10608_v55, 0.0  ;;  %4075 = vperm.xlu1 %7030, %v3941_v40   ;;  %4070 = vperm.xlu0 %7029, %v3940_v9   ;;  %v8533_v15 = vpop.f32.mrf.mxu0  ;;  %v8535_v2 = vpop.f32.mrf.mxu1  ;;  %v1687_v53 = vpack.c.bf16 %v1565_v19, %v1563_v4  ;;  %v1719_v25 = vpack.c.bf16 %v1629_v23, %v1627_v20  ;;  %v10610_v24 = vld [vmem:[#allocation39_spill] sm:$0xff]  ;;  %v10612_v40 = vld [vmem:[#allocation40_spill] sm:$0xff] }
 0x1a1   : > { %v1594_v36 = vmax.f32 %v1336_v27, 0.0  ;;  %v1658_v57 = vmax.f32 %v1496_v31, 0.0  ;;  %v1596_v5 = vmax.f32 %v1340_v16, 0.0  ;;  %v1660_v11 = vmax.f32 %v1500_v46, 0.0  ;;  %2907 = vmatpush1.bf16.msra.mxu1 %v1688_v49  ;;  %3260 = vmatpush1.bf16.msra.mxu0 %v1720_v45  ;;  %v10618_v20 = vld [vmem:[#allocation74_spill] sm:$0xff]  ;;  %v10619_v45 = vld [vmem:[#allocation75_spill] sm:$0xff] }
 0x1a2   : > { %v1238_v34 = vadd.f32 %v10610_v24, %v10609_v30  ;;  %v1398_v9 = vadd.f32 %v10612_v40, %v10611_v7  ;;  %v1559_v55 = vmax.f32 %v1248_v28, 0.0  ;;  %v1623_v56 = vmax.f32 %v1408_v38, 0.0  ;;  %2908 = vmatprep.subr.bf16.mxu1 %v1687_v53  ;;  %3261 = vmatprep.subr.bf16.mxu0 %v1719_v25  ;;  %v8541_v19 = vpop.f32.mrf.mxu0  ;;  %v8543_v23 = vpop.f32.mrf.mxu1  ;;  %v3955_v32 = vld [vmem:[#allocation11 + $0xf8] sm:$0xff]  ;;  %v3958_v3 = vld [vmem:[#allocation11 + $0x110] sm:$0xff] }
 0x1a3   : > { %10613 = vst [vmem:[#allocation26_spill] sm:$0xff] %v8541_v19  ;;  %10614 = vst [vmem:[#allocation48_spill] sm:$0xff] %v8543_v23  ;;  %v8545_v27 = vpack.c.bf16 %v1596_v5, %v1594_v36  ;;  %v8547_v31 = vpack.c.bf16 %v1660_v11, %v1658_v57  ;;  %v8549_v4 = vpop.permute.xlu0 %2040  ;;  %v1557_v49 = vmax.f32 %v10618_v20, 0.0  ;;  %v1621_v16 = vmax.f32 %v10619_v45, 0.0  ;;  %v8557_v25 = vpop.permute.xlu1 %2045  ;;  %v10621_v36 = vld [vmem:[#allocation57_spill] sm:$0xff]  ;;  %v10622_v57 = vld [vmem:[#allocation58_spill] sm:$0xff] }
 0x1a4   : > { %10617 = vst [vmem:[#allocation61_spill] sm:$0xff] %v8549_v4  ;;  %4085 = vperm.xlu1 %7030, %v3943_v47   ;;  %4080 = vperm.xlu0 %7029, %v3942_v54   ;;  %v8553_v28 = vpop.f32.mrf.mxu0  ;;  %v8555_v38 = vpop.f32.mrf.mxu1  ;;  %v1685_v46 = vpack.c.bf16 %v1561_v44, %v1559_v55  ;;  %v1717_v53 = vpack.c.bf16 %v1625_v35, %v1623_v56  ;;  %10620 = vst [vmem:[#allocation76_spill] sm:$0xff] %v8557_v25  ;;  %v3945_v5 = vld [vmem:[#allocation11 + $0xa8] sm:$0xff]  ;;  %v3944_v11 = vld [vmem:[#allocation11 + $0xa0] sm:$0xff]  ;;  %v1555_v30 = vmax.f32 %v1238_v34, 0.0 }
 0x1a5   : > { %10615 = vst [vmem:[#allocation78_spill] sm:$0xff] %v8545_v27  ;;  %10616 = vst [vmem:[#allocation59_spill] sm:$0xff] %v8547_v31  ;;  %2909 = vmatpush1.bf16.msra.mxu1 %v10621_v36  ;;  %3262 = vmatpush1.bf16.msra.mxu0 %v10622_v57  ;;  %v1619_v24 = vmax.f32 %v1398_v9, 0.0  ;;  %v10624_v55 = vld [vmem:[#allocation51_spill] sm:$0xff]  ;;  %v10625_v34 = vld [vmem:[#allocation52_spill] sm:$0xff] }
 0x1a6   : > { %2910 = vmatprep.subr.bf16.mxu1 %v1685_v46  ;;  %3263 = vmatprep.subr.bf16.mxu0 %v1717_v53  ;;  %v8561_v47 = vpop.f32.mrf.mxu0  ;;  %v8563_v54 = vpop.f32.mrf.mxu1  ;;  %v1683_v35 = vpack.c.bf16 %v1557_v49, %v1555_v30  ;;  %v3947_v9 = vld [vmem:[#allocation11 + $0xb8] sm:$0xff]  ;;  %v3946_v20 = vld [vmem:[#allocation11 + $0xb0] sm:$0xff]  ;;  %v10627_v36 = vld [vmem:[#allocation43_spill] sm:$0xff] }
 0x1a7   : > { %v1715_v7 = vpack.c.bf16 %v1621_v16, %v1619_v24  ;;  %v8569_v40 = vpop.permute.xlu0 %2050  ;;  %v8577_v53 = vpop.permute.xlu1 %2055  ;;  %v10628_v57 = vld [vmem:[#allocation44_spill] sm:$0xff]  ;;  %v3953_v4 = vld [vmem:[#allocation11 + $0xe8] sm:$0xff]  ;;  %v3959_v8 = vld [vmem:[#allocation11 + $0x118] sm:$0xff] }
 0x1a8   : > { %4095 = vperm.xlu1 %7030, %v3945_v5   ;;  %4090 = vperm.xlu0 %7029, %v3944_v11   ;;  %v8565_v44 = vpop.f32.mrf.mxu0  ;;  %v8567_v56 = vpop.f32.mrf.mxu1  ;;  %10623 = vst [vmem:[#allocation77_spill] sm:$0xff] %v8569_v40  ;;  %10626 = vst [vmem:[#allocation27_spill] sm:$0xff] %v8577_v53  ;;  %v3949_v5 = vld [vmem:[#allocation11 + $0xc8] sm:$0xff]  ;;  %v3948_v11 = vld [vmem:[#allocation11 + $0xc0] sm:$0xff] }
 0x1a9   : > { %2911 = vmatpush1.bf16.msra.mxu1 %v10624_v55  ;;  %3264 = vmatpush1.bf16.msra.mxu0 %v10625_v34  ;;  %v10663_v12 = vld [vmem:[#allocation29_spill] sm:$0xff]  ;;  %v10665_v61 = vld [vmem:[#allocation36_spill] sm:$0xff] }
 0x1aa   : > { %2912 = vmatprep.subr.bf16.mxu1 %v1683_v35  ;;  %3265 = vmatprep.subr.bf16.mxu0 %v1715_v7  ;;  %v8573_v45 = vpop.f32.mrf.mxu0  ;;  %v8575_v46 = vpop.f32.mrf.mxu1  ;;  %v10666_v23 = vld [vmem:[#allocation33_spill] sm:$0xff] }
 0x1ab   : > { %v8589_v35 = vpop.permute.xlu0 %2060  ;;  %v8591_v34 = vpop.permute.xlu1 %2065 }
 0x1ac   : > { %4105 = vperm.xlu1 %7030, %v3947_v9   ;;  %4100 = vperm.xlu0 %7029, %v3946_v20   ;;  %v8579_v49 = vpop.f32.mrf.mxu0  ;;  %v8581_v16 = vpop.f32.mrf.mxu1  ;;  %10629 = vst [vmem:[#allocation39_spill] sm:$0xff] %v8589_v35  ;;  %10630 = vst [vmem:[#allocation28_spill] sm:$0xff] %v8591_v34  ;;  %v3951_v9 = vld [vmem:[#allocation11 + $0xd8] sm:$0xff]  ;;  %v3950_v20 = vld [vmem:[#allocation11 + $0xd0] sm:$0xff] }
 0x1ad   : > { %2913 = vmatpush1.bf16.msra.mxu1 %v10627_v36  ;;  %3266 = vmatpush1.bf16.msra.mxu0 %v10628_v57  ;;  %v3952_v35 = vld [vmem:[#allocation11 + $0xe0] sm:$0xff] }
 0x1ae   : > { %v8585_v30 = vpop.f32.mrf.mxu0  ;;  %v8587_v24 = vpop.f32.mrf.mxu1 }
 0x1af   : > { %v8597_v25 = vpop.permute.xlu0 %2070  ;;  %v8603_v48 = vpop.permute.xlu1 %2075 }
 0x1b0   : > { %4115 = vperm.xlu1 %7030, %v3949_v5   ;;  %4110 = vperm.xlu0 %7029, %v3948_v11   ;;  %v1361_v7 = vpop.f32.mrf.mxu0  ;;  %v1521_v55 = vpop.f32.mrf.mxu1  ;;  %10631 = vst [vmem:[#allocation40_spill] sm:$0xff] %v8597_v25  ;;  %10632 = vst [vmem:[#allocation74_spill] sm:$0xff] %v8603_v48  ;;  %v3956_v48 = vld [vmem:[#allocation11 + $0x100] sm:$0xff] }
 0x1b2   : > { %v8593_v53 = vpop.f32.mrf.mxu0  ;;  %v8595_v36 = vpop.f32.mrf.mxu1 }
 0x1b3   : > { %v8609_v6 = vpop.permute.xlu0 %2080  ;;  %v8611_v62 = vpop.permute.xlu1 %2085 }
 0x1b4   : > { %4125 = vperm.xlu1 %7030, %v3951_v9   ;;  %4120 = vperm.xlu0 %7029, %v3950_v20   ;;  %v1367_v57 = vpop.f32.mrf.mxu0  ;;  %v1527_v40 = vpop.f32.mrf.mxu1  ;;  %10633 = vst [vmem:[#allocation75_spill] sm:$0xff] %v8609_v6  ;;  %10634 = vst [vmem:[#allocation57_spill] sm:$0xff] %v8611_v62 }
 0x1b6   : > { %v8599_v5 = vpop.f32.mrf.mxu0  ;;  %v8601_v11 = vpop.f32.mrf.mxu1 }
 0x1b7   : > { %v8613_v50 = vpop.permute.xlu0 %2090 }
 0x1b8   : > { %4135 = vperm.xlu1 %7030, %v3953_v4   ;;  %4130 = vperm.xlu0 %7029, %v3952_v35   ;;  %v1371_v34 = vpop.f32.mrf.mxu0  ;;  %v1531_v58 = vpop.f32.mrf.mxu1  ;;  %10635 = vst [vmem:[#allocation58_spill] sm:$0xff] %v8613_v50  ;;  %v10640_v50 = vld [vmem:[#allocation54_spill] sm:$0xff] }
 0x1b9   : > { %v8633_v31 = vadd.f32 %v8553_v28, %v10640_v50 }
 0x1ba   : > { %v8605_v9 = vpop.f32.mrf.mxu0  ;;  %v8607_v20 = vpop.f32.mrf.mxu1 }
 0x1bb   : > { %10641 = vst [vmem:[#allocation97_spill] sm:$0xff] %v8633_v31 }
 0x1bc   : > { %4145 = vperm.xlu1 %7030, %v3955_v32   ;;  %4140 = vperm.xlu0 %7029, %v3954_v18   ;;  %v1377_v25 = vpop.f32.mrf.mxu0  ;;  %v1537_v59 = vpop.f32.mrf.mxu1  ;;  %v8617_v32 = vadd.f32 %v8489_v43, %v10584_v21  ;;  %v8621_v18 = vadd.f32 %v8491_v17, %v10585_v22  ;;  %v10642_v21 = vld [vmem:[#allocation56_spill] sm:$0xff]  ;;  %v10645_v17 = vld [vmem:[#allocation53_spill] sm:$0xff] }
 0x1bd   : > { %v8637_v43 = vadd.f32 %v8555_v38, %v10642_v21  ;;  %v8639_v22 = vpop.permute.xlu1 %2095  ;;  %v8643_v27 = vadd.f32 %v8565_v44, %v10645_v17  ;;  %v10651_v38 = vld [vmem:[#allocation50_spill] sm:$0xff]  ;;  %v10654_v44 = vld [vmem:[#allocation49_spill] sm:$0xff] }
 0x1be   : > { %v1379_v4 = vpop.f32.mrf.mxu0  ;;  %v1539_v35 = vpop.f32.mrf.mxu1  ;;  %10636 = vst [vmem:[#allocation51_spill] sm:$0xff] %v8617_v32  ;;  %10637 = vst [vmem:[#allocation52_spill] sm:$0xff] %v8621_v18  ;;  %v8655_v18 = vadd.f32 %v8581_v16, %v10651_v38  ;;  %v8661_v0 = vadd.f32 %v1521_v55, %v10654_v44 }
 0x1bf   : > { %10643 = vst [vmem:[#allocation98_spill] sm:$0xff] %v8637_v43  ;;  %10644 = vst [vmem:[#allocation99_spill] sm:$0xff] %v8639_v22  ;;  %v10653_v22 = vld [vmem:[#allocation45_spill] sm:$0xff]  ;;  %v8677_v43 = vpop.permute.xlu0 %2100 }
 0x1c0   : > { %4155 = vperm.xlu1 %7030, %v3957_v63   ;;  %4150 = vperm.xlu0 %7029, %v3956_v48   ;;  %v1381_v10 = vpop.f32.mrf.mxu0  ;;  %v1541_v37 = vpop.f32.mrf.mxu1  ;;  %v8625_v63 = vadd.f32 %v8533_v15, %v10603_v14  ;;  %v8629_v48 = vadd.f32 %v8535_v2, %v10604_v41  ;;  %10646 = vst [vmem:[#allocation53_spill] sm:$0xff] %v8643_v27  ;;  %v10647_v14 = vld [vmem:[#allocation55_spill] sm:$0xff]  ;;  %v10649_v41 = vld [vmem:[#allocation46_spill] sm:$0xff]  ;;  %10652 = vst [vmem:[#allocation50_spill] sm:$0xff] %v8655_v18 }
 0x1c1   : > { %v8647_v15 = vadd.f32 %v8567_v56, %v10647_v14  ;;  %v8651_v2 = vadd.f32 %v8579_v49, %v10649_v41  ;;  %v8658_v32 = vadd.f32 %v1361_v7, %v10653_v22  ;;  %v10655_v56 = vld [vmem:[#allocation38_spill] sm:$0xff]  ;;  %10661 = vst [vmem:[#allocation45_spill] sm:$0xff] %v8677_v43  ;;  %v1382_v21 = vadd.f32 %v1381_v10, %v10666_v23 }
 0x1c2   : > { %v1385_v6 = vpop.f32.mrf.mxu0  ;;  %v1545_v62 = vpop.f32.mrf.mxu1  ;;  %10638 = vst [vmem:[#allocation43_spill] sm:$0xff] %v8625_v63  ;;  %10639 = vst [vmem:[#allocation44_spill] sm:$0xff] %v8629_v48  ;;  %v8664_v39 = vadd.f32 %v1367_v57, %v10655_v56  ;;  %v3960_v49 = vld [vmem:[#allocation11 + $0x120] sm:$0xff]  ;;  %v10660_v63 = vld [vmem:[#allocation41_spill] sm:$0xff]  ;;  %v1380_v10 = vadd.f32 %v1379_v4, %v10666_v23 }
 0x1c3   : > { %10648 = vst [vmem:[#allocation55_spill] sm:$0xff] %v8647_v15  ;;  %10650 = vst [vmem:[#allocation46_spill] sm:$0xff] %v8651_v2  ;;  %v8675_v55 = vadd.f32 %v1531_v58, %v10660_v63  ;;  %v10662_v57 = vld [vmem:[#allocation34_spill] sm:$0xff]  ;;  %v8685_v58 = vpop.permute.xlu1 %2105  ;;  %v1386_v43 = vadd.f32 %v1385_v6, %v10658_v51  ;;  %v3963_v15 = vld [vmem:[#allocation11 + $0x138] sm:$0xff] }
 0x1c4   : > { %4165 = vperm.xlu1 %7030, %v3959_v8   ;;  %4160 = vperm.xlu0 %7029, %v3958_v3   ;;  %v1387_v28 = vpop.f32.mrf.mxu0  ;;  %v1547_v52 = vpop.f32.mrf.mxu1  ;;  %v8667_v8 = vadd.f32 %v1527_v40, %v10656_v42  ;;  %v10657_v3 = vld [vmem:[#allocation37_spill] sm:$0xff]  ;;  %v1378_v31 = vadd.f32 %v1377_v25, %v10662_v57  ;;  %v10664_v40 = vld [vmem:[#allocation31_spill] sm:$0xff]  ;;  %10668 = vst [vmem:[#allocation49_spill] sm:$0xff] %v8685_v58 }
 0x1c5   : > { %v8670_v13 = vadd.f32 %v1371_v34, %v10657_v3  ;;  %v1388_v16 = vadd.f32 %v1387_v28, %v10658_v51  ;;  %v1548_v60 = vadd.f32 %v1547_v52, %v10659_v29  ;;  %v1538_v34 = vadd.f32 %v1537_v59, %v10665_v61  ;;  %v10667_v28 = vld [vmem:[#allocation35_spill] sm:$0xff]  ;;  %v3962_v59 = vld [vmem:[#allocation11 + $0x130] sm:$0xff]  ;;  %v8697_v51 = vpop.permute.xlu0 %2110 }
 0x1c6   : > { %v1389_v7 = vpop.f32.mrf.mxu0  ;;  %v1549_v48 = vpop.f32.mrf.mxu1  ;;  %v1542_v19 = vadd.f32 %v1541_v37, %v10667_v28  ;;  %v1546_v25 = vadd.f32 %v1545_v62, %v10659_v29  ;;  %v1540_v37 = vadd.f32 %v1539_v35, %v10667_v28  ;;  %v1376_v6 = vadd.f32 %v8605_v9, %v10662_v57  ;;  %10669 = vst [vmem:[#allocation38_spill] sm:$0xff] %v8697_v51  ;;  %v10788_v51 = vld [vmem:[#allocation22_spill] sm:$0xff] }
 0x1c7   : > { %v1390_v1 = vadd.f32 %v1389_v7, %v10663_v12  ;;  %v1550_v26 = vadd.f32 %v1549_v48, %v10664_v40  ;;  %v1536_v62 = vadd.f32 %v8607_v20, %v10665_v61  ;;  %v1613_v29 = vmax.f32 %v1382_v21, 0.0  ;;  %v8703_v21 = vpop.permute.xlu1 %2115 }
 0x1c8   : > { %4175 = vperm.xlu1 %7030, %v3961_v33   ;;  %4170 = vperm.xlu0 %7029, %v3960_v49   ;;  %v1391_v52 = vpop.f32.mrf.mxu0  ;;  %v1551_v50 = vpop.f32.mrf.mxu1  ;;  %v1615_v33 = vmax.f32 %v1388_v16, 0.0  ;;  %v1679_v49 = vmax.f32 %v1548_v60, 0.0  ;;  %v1678_v23 = vmax.f32 %v1546_v25, 0.0  ;;  %v1370_v35 = vadd.f32 %v8599_v5, %v10657_v3  ;;  %10670 = vst [vmem:[#allocation42_spill] sm:$0xff] %v8703_v21  ;;  %v10787_v21 = vld [vmem:[#allocation63_spill] sm:$0xff] }
 0x1c9   : > { %v1392_v7 = vadd.f32 %v1391_v52, %v10663_v12  ;;  %v1552_v48 = vadd.f32 %v1551_v50, %v10664_v40  ;;  %v1616_v27 = vmax.f32 %v1390_v1, 0.0  ;;  %v1680_v18 = vmax.f32 %v1550_v26, 0.0  ;;  %v3965_v1 = vld [vmem:[#allocation11 + $0x148] sm:$0xff]  ;;  %v3964_v26 = vld [vmem:[#allocation11 + $0x140] sm:$0xff]  ;;  %v8717_v52 = vpop.permute.xlu0 %2120 }
 0x1ca   : > { %v1677_v50 = vmax.f32 %v1542_v19, 0.0  ;;  %v1614_v12 = vmax.f32 %v1386_v43, 0.0  ;;  %v1530_v9 = vadd.f32 %v8601_v11, %v10660_v63  ;;  %v1611_v16 = vmax.f32 %v1378_v31, 0.0  ;;  %10671 = vst [vmem:[#allocation37_spill] sm:$0xff] %v8717_v52 }
 0x1cb   : > { %v1617_v2 = vmax.f32 %v1392_v7, 0.0  ;;  %v1681_v58 = vmax.f32 %v1552_v48, 0.0  ;;  %v1675_v61 = vmax.f32 %v1538_v34, 0.0  ;;  %v1612_v20 = vmax.f32 %v1380_v10, 0.0  ;;  %v8725_v7 = vpop.permute.xlu1 %2170  ;;  %v3969_v48 = vld [vmem:[#allocation11 + $0x168] sm:$0xff]  ;;  %v10673_v10 = vld [vmem:[#allocation46_spill] sm:$0xff] }
 0x1cc   : > { %4185 = vperm.xlu1 %7030, %v3963_v15   ;;  %4180 = vperm.xlu0 %7029, %v3962_v59   ;;  %v1676_v19 = vmax.f32 %v1540_v37, 0.0  ;;  %v1712_v15 = vpack.c.bf16 %v1616_v27, %v1614_v12  ;;  %v1744_v57 = vpack.c.bf16 %v1680_v18, %v1678_v23  ;;  %v1609_v43 = vmax.f32 %v8670_v13, 0.0  ;;  %v3967_v27 = vld [vmem:[#allocation11 + $0x158] sm:$0xff]  ;;  %v3966_v18 = vld [vmem:[#allocation11 + $0x150] sm:$0xff]  ;;  %10672 = vst [vmem:[#allocation30_spill] sm:$0xff] %v8725_v7  ;;  %v10677_v12 = vld [vmem:[#allocation54_spill] sm:$0xff] }
 0x1cd   : > { %v1713_v4 = vpack.c.bf16 %v1617_v2, %v1615_v33  ;;  %v1745_v60 = vpack.c.bf16 %v1681_v58, %v1679_v49  ;;  %v1673_v2 = vmax.f32 %v8675_v55, 0.0  ;;  %v1711_v5 = vpack.c.bf16 %v1613_v29, %v1611_v16  ;;  %v10676_v29 = vld [vmem:[#allocation55_spill] sm:$0xff]  ;;  %v10679_v23 = vld [vmem:[#allocation56_spill] sm:$0xff] }
 0x1ce   : > { %v1743_v3 = vpack.c.bf16 %v1677_v50, %v1675_v61  ;;  %v1366_v31 = vadd.f32 %v8593_v53, %v10655_v56  ;;  %v1526_v11 = vadd.f32 %v8595_v36, %v10656_v42  ;;  %v1610_v63 = vmax.f32 %v1376_v6, 0.0  ;;  %v10675_v6 = vld [vmem:[#allocation53_spill] sm:$0xff]  ;;  %v3970_v16 = vld [vmem:[#allocation11 + $0x170] sm:$0xff] }
 0x1cf   : > { %2914 = vmatprep.subr.bf16.mxu1 %v1713_v4  ;;  %3267 = vmatprep.subr.bf16.mxu0 %v1745_v60  ;;  %v1674_v40 = vmax.f32 %v1536_v62, 0.0  ;;  %v1360_v13 = vadd.f32 %v8585_v30, %v10653_v22  ;;  %v1520_v55 = vadd.f32 %v8587_v24, %v10654_v44  ;;  %v1607_v34 = vmax.f32 %v8664_v39, 0.0  ;;  %v10680_v4 = vld [vmem:[#allocation48_spill] sm:$0xff] }
 0x1d0   : > { %4195 = vperm.xlu1 %7030, %v3965_v1   ;;  %4190 = vperm.xlu0 %7029, %v3964_v26   ;;  %v1671_v28 = vmax.f32 %v8667_v8, 0.0  ;;  %v1608_v53 = vmax.f32 %v1370_v35, 0.0  ;;  %v1672_v42 = vmax.f32 %v1530_v9, 0.0  ;;  %v1710_v36 = vpack.c.bf16 %v1612_v20, %v1610_v63  ;;  %v8739_v35 = vpop.permute.xlu0 %2175  ;;  %v3971_v9 = vld [vmem:[#allocation11 + $0x178] sm:$0xff]  ;;  %v10682_v61 = vld [vmem:[#allocation60_spill] sm:$0xff]  ;;  %v10683_v20 = vld [vmem:[#allocation95_spill] sm:$0xff] }
 0x1d1   : > { %2915 = vmatpush2.bf16.msra.mxu1 %v1712_v15  ;;  %3268 = vmatpush2.bf16.msra.mxu0 %v1744_v57  ;;  %v1742_v56 = vpack.c.bf16 %v1676_v19, %v1674_v40  ;;  %v1605_v58 = vmax.f32 %v8658_v32, 0.0  ;;  %v1669_v25 = vmax.f32 %v8661_v0, 0.0  ;;  %v1709_v30 = vpack.c.bf16 %v1609_v43, %v1607_v34  ;;  %v3968_v32 = vld [vmem:[#allocation11 + $0x160] sm:$0xff]  ;;  %10681 = vst [vmem:[#allocation32_spill] sm:$0xff] %v8739_v35  ;;  %v10685_v57 = vld [vmem:[#allocation96_spill] sm:$0xff] }
 0x1d2   : > { %2916 = vmatprep.subr.bf16.mxu1 %v1711_v5  ;;  %3269 = vmatprep.subr.bf16.mxu0 %v1743_v3  ;;  %v1741_v24 = vpack.c.bf16 %v1673_v2, %v1671_v28  ;;  %v1356_v39 = vadd.f32 %v8573_v45, %v10649_v41  ;;  %v1516_v22 = vadd.f32 %v8575_v46, %v10651_v38  ;;  %v1606_v44 = vmax.f32 %v1366_v31, 0.0  ;;  %v10674_v45 = vld [vmem:[#allocation50_spill] sm:$0xff]  ;;  %v10686_v2 = vld [vmem:[#allocation97_spill] sm:$0xff]  ;;  %v10690_v34 = vld [vmem:[#allocation44_spill] sm:$0xff] }
 0x1d3   : > { %v1670_v8 = vmax.f32 %v1526_v11, 0.0  ;;  %v1350_v0 = vadd.f32 %v8561_v47, %v10645_v17  ;;  %v1510_v59 = vadd.f32 %v8563_v54, %v10647_v14  ;;  %v1603_v37 = vmax.f32 %v10673_v10, 0.0  ;;  %v10678_v54 = vld [vmem:[#allocation26_spill] sm:$0xff] }
 0x1d4   : > { %4205 = vperm.xlu1 %7030, %v3967_v27   ;;  %4200 = vperm.xlu0 %7029, %v3966_v18   ;;  %v1667_v41 = vmax.f32 %v10674_v45, 0.0  ;;  %v1604_v46 = vmax.f32 %v1360_v13, 0.0  ;;  %v1668_v38 = vmax.f32 %v1520_v55, 0.0  ;;  %v1708_v33 = vpack.c.bf16 %v1608_v53, %v1606_v44  ;;  %v10684_v15 = vld [vmem:[#allocation62_spill] sm:$0xff]  ;;  %v8747_v18 = vpop.permute.xlu1 %2160  ;;  %v10689_v13 = vld [vmem:[#allocation43_spill] sm:$0xff]  ;;  %v10698_v45 = vld [vmem:[#allocation84_spill] sm:$0xff] }
 0x1d5   : > { %2917 = vmatpush2.bf16.msra.mxu1 %v1710_v36  ;;  %3270 = vmatpush2.bf16.msra.mxu0 %v1742_v56  ;;  %v1740_v49 = vpack.c.bf16 %v1672_v42, %v1670_v8  ;;  %v1601_v62 = vmax.f32 %v10675_v6, 0.0  ;;  %v1665_v50 = vmax.f32 %v10676_v29, 0.0  ;;  %v1707_v47 = vpack.c.bf16 %v1605_v58, %v1603_v37  ;;  %v10687_v3 = vld [vmem:[#allocation98_spill] sm:$0xff]  ;;  %10688 = vst [vmem:[#allocation41_spill] sm:$0xff] %v8747_v18  ;;  %v3973_v58 = vld [vmem:[#allocation11 + $0x188] sm:$0xff]  ;;  %v10697_v37 = vld [vmem:[#allocation69_spill] sm:$0xff] }
 0x1d6   : > { %2918 = vmatprep.subr.bf16.mxu1 %v1709_v30  ;;  %3271 = vmatprep.subr.bf16.mxu0 %v1741_v24  ;;  %v1739_v17 = vpack.c.bf16 %v1669_v25, %v1667_v41  ;;  %v1346_v14 = vadd.f32 %v10678_v54, %v10677_v12  ;;  %v1506_v60 = vadd.f32 %v10680_v4, %v10679_v23  ;;  %v1602_v1 = vmax.f32 %v1356_v39, 0.0  ;;  %v3972_v25 = vld [vmem:[#allocation11 + $0x180] sm:$0xff]  ;;  %v10691_v30 = vld [vmem:[#allocation64_spill] sm:$0xff]  ;;  %v10692_v24 = vld [vmem:[#allocation89_spill] sm:$0xff] }
 0x1d7   : > { %v1666_v26 = vmax.f32 %v1516_v22, 0.0  ;;  %v1338_v19 = vadd.f32 %v10683_v20, %v10682_v61  ;;  %v1498_v43 = vadd.f32 %v10685_v57, %v10684_v15  ;;  %v1599_v5 = vmax.f32 %v10686_v2, 0.0  ;;  %v10693_v22 = vld [vmem:[#allocation66_spill] sm:$0xff]  ;;  %v3975_v12 = vld [vmem:[#allocation11 + $0x198] sm:$0xff]  ;;  %v3974_v54 = vld [vmem:[#allocation11 + $0x190] sm:$0xff] }
 0x1d8   : > { %4215 = vperm.xlu1 %7030, %v3969_v48   ;;  %4210 = vperm.xlu0 %7029, %v3968_v32   ;;  %v1663_v31 = vmax.f32 %v10687_v3, 0.0  ;;  %v1600_v11 = vmax.f32 %v1350_v0, 0.0  ;;  %v1664_v63 = vmax.f32 %v1510_v59, 0.0  ;;  %v1706_v40 = vpack.c.bf16 %v1604_v46, %v1602_v1  ;;  %v10694_v44 = vld [vmem:[#allocation90_spill] sm:$0xff]  ;;  %v10695_v0 = vld [vmem:[#allocation67_spill] sm:$0xff]  ;;  %v10706_v1 = vld [vmem:[#allocation21_spill] sm:$0xff] }
 0x1d9   : > { %2919 = vmatpush2.bf16.msra.mxu1 %v1708_v33  ;;  %3272 = vmatpush2.bf16.msra.mxu0 %v1740_v49  ;;  %v1738_v27 = vpack.c.bf16 %v1668_v38, %v1666_v26  ;;  %v1597_v55 = vmax.f32 %v10689_v13, 0.0  ;;  %v1661_v28 = vmax.f32 %v10690_v34, 0.0  ;;  %v1705_v53 = vpack.c.bf16 %v1601_v62, %v1599_v5  ;;  %v10696_v59 = vld [vmem:[#allocation83_spill] sm:$0xff]  ;;  %v8759_v33 = vpop.permute.xlu0 %2165  ;;  %v10701_v62 = vld [vmem:[#allocation52_spill] sm:$0xff]  ;;  %v10704_v23 = vld [vmem:[#allocation18_spill] sm:$0xff] }
 0x1da   : > { %2920 = vmatprep.subr.bf16.mxu1 %v1707_v47  ;;  %3273 = vmatprep.subr.bf16.mxu0 %v1739_v17  ;;  %v1737_v42 = vpack.c.bf16 %v1665_v50, %v1663_v31  ;;  %v1598_v36 = vmax.f32 %v1346_v14, 0.0  ;;  %v1662_v56 = vmax.f32 %v1506_v60, 0.0  ;;  %v1328_v39 = vadd.f32 %v10692_v24, %v10691_v30  ;;  %10699 = vst [vmem:[#allocation34_spill] sm:$0xff] %v8759_v33  ;;  %v10700_v49 = vld [vmem:[#allocation51_spill] sm:$0xff]  ;;  %v8763_v17 = vpop.permute.xlu1 %2150  ;;  %v10703_v14 = vld [vmem:[#allocation68_spill] sm:$0xff]  ;;  %v10705_v60 = vld [vmem:[#allocation70_spill] sm:$0xff] }
 0x1db   : > { %v1488_v8 = vadd.f32 %v10694_v44, %v10693_v22  ;;  %v1595_v48 = vmax.f32 %v1338_v19, 0.0  ;;  %v1659_v32 = vmax.f32 %v1498_v43, 0.0  ;;  %v1322_v10 = vadd.f32 %v10696_v59, %v10695_v0  ;;  %10702 = vst [vmem:[#allocation29_spill] sm:$0xff] %v8763_v17  ;;  %v10708_v43 = vld [vmem:[#allocation78_spill] sm:$0xff]  ;;  %v10709_v2 = vld [vmem:[#allocation59_spill] sm:$0xff]  ;;  %v3979_v34 = vld [vmem:[#allocation11 + $0x1b8] sm:$0xff] }
 0x1dc   : > { %4225 = vperm.xlu1 %7030, %v3971_v9   ;;  %4220 = vperm.xlu0 %7029, %v3970_v16   ;;  %v1482_v41 = vadd.f32 %v10698_v45, %v10697_v37  ;;  %v1704_v46 = vpack.c.bf16 %v1600_v11, %v1598_v36  ;;  %v1736_v38 = vpack.c.bf16 %v1664_v63, %v1662_v56  ;;  %v1593_v6 = vmax.f32 %v10700_v49, 0.0  ;;  %v3977_v5 = vld [vmem:[#allocation11 + $0x1a8] sm:$0xff]  ;;  %v3976_v3 = vld [vmem:[#allocation11 + $0x1a0] sm:$0xff]  ;;  %v3987_v49 = vld [vmem:[#allocation11 + $0x1f8] sm:$0xff] }
 0x1dd   : > { %2921 = vmatpush2.bf16.msra.mxu1 %v1706_v40  ;;  %3274 = vmatpush2.bf16.msra.mxu0 %v1738_v27  ;;  %v1657_v29 = vmax.f32 %v10701_v62, 0.0  ;;  %v1703_v50 = vpack.c.bf16 %v1597_v55, %v1595_v48  ;;  %v1735_v47 = vpack.c.bf16 %v1661_v28, %v1659_v32  ;;  %v1318_v4 = vadd.f32 %v10704_v23, %v10703_v14  ;;  %v8769_v57 = vpop.permute.xlu0 %2155  ;;  %v10711_v13 = vld [vmem:[#allocation91_spill] sm:$0xff]  ;;  %v10712_v55 = vld [vmem:[#allocation92_spill] sm:$0xff]  ;;  %v3980_v24 = vld [vmem:[#allocation11 + $0x1c0] sm:$0xff] }
 0x1de   : > { %2922 = vmatprep.subr.bf16.mxu1 %v1705_v53  ;;  %3275 = vmatprep.subr.bf16.mxu0 %v1737_v42  ;;  %v1478_v26 = vadd.f32 %v10706_v1, %v10705_v60  ;;  %v1591_v9 = vmax.f32 %v1328_v39, 0.0  ;;  %v1655_v16 = vmax.f32 %v1488_v8, 0.0  ;;  %v1589_v61 = vmax.f32 %v1322_v10, 0.0  ;;  %10707 = vst [vmem:[#allocation31_spill] sm:$0xff] %v8769_v57  ;;  %v8773_v63 = vpop.permute.xlu1 %2140  ;;  %v3978_v28 = vld [vmem:[#allocation11 + $0x1b0] sm:$0xff]  ;;  %v3981_v30 = vld [vmem:[#allocation11 + $0x1c8] sm:$0xff] }
 0x1df   : > { %v1653_v20 = vmax.f32 %v1482_v41, 0.0  ;;  %v1587_v31 = vmax.f32 %v1318_v4, 0.0  ;;  %10710 = vst [vmem:[#allocation36_spill] sm:$0xff] %v8773_v63  ;;  %v7069_v42 = vld [vmem:[#allocation6] ss:$16 sps:$4 sm:$0xff]   ;;  %v3983_v8 = vld [vmem:[#allocation11 + $0x1d8] sm:$0xff] }
 0x1e0   : > { %4235 = vperm.xlu1 %7030, %v3973_v58   ;;  %4230 = vperm.xlu0 %7029, %v3972_v25   ;;  %v1701_v19 = vpack.c.bf16 %v1593_v6, %v1591_v9  ;;  %v1733_v15 = vpack.c.bf16 %v1657_v29, %v1655_v16  ;;  %v1651_v11 = vmax.f32 %v1478_v26, 0.0  ;;  %v7072_v36 = vld [vmem:[#allocation6 + $0x8] ss:$16 sps:$4 sm:$0xff]   ;;  %v10716_v25 = vld [vmem:[#allocation86_spill] sm:$0xff]  ;;  %v7077_v22 = vld [vmem:[#allocation6 + $0x2c] ss:$16 sps:$4 sm:$0xff]  }
 0x1e1   : > { %2923 = vmatpush2.bf16.msra.mxu1 %v1704_v46  ;;  %3276 = vmatpush2.bf16.msra.mxu0 %v1736_v38  ;;  %v1699_v40 = vpack.c.bf16 %v1589_v61, %v1587_v31  ;;  %v8777_v53 = vpop.permute.xlu0 %2145  ;;  %v10715_v58 = vld [vmem:[#allocation85_spill] sm:$0xff]  ;;  %v7075_v39 = vld [vmem:[#allocation6 + $0x24] ss:$16 sps:$4 sm:$0xff]   ;;  %v7079_v0 = vld [vmem:[#allocation6 + $0x20] ss:$16 sps:$4 sm:$0xff]  }
 0x1e2   : > { %2924 = vmatprep.subr.bf16.mxu1 %v1703_v50  ;;  %3277 = vmatprep.subr.bf16.mxu0 %v1735_v47  ;;  %v1731_v27 = vpack.c.bf16 %v1653_v20, %v1651_v11  ;;  %10713 = vst [vmem:[#allocation33_spill] sm:$0xff] %v8777_v53  ;;  %v8779_v56 = vpop.permute.xlu1 %2130  ;;  %v3982_v48 = vld [vmem:[#allocation11 + $0x1d0] sm:$0xff]  ;;  %v7080_v59 = vld [vmem:[#allocation6 + $0x28] ss:$16 sps:$4 sm:$0xff]   ;;  %v3984_v37 = vld [vmem:[#allocation11 + $0x1e0] sm:$0xff] }
 0x1e3   : > { %10714 = vst [vmem:[#allocation35_spill] sm:$0xff] %v8779_v56  ;;  %v3985_v10 = vld [vmem:[#allocation11 + $0x1e8] sm:$0xff]  ;;  %v7081_v45 = vld [vmem:[#allocation6 + $0x44] ss:$16 sps:$4 sm:$0xff]   ;;  %v7085_v62 = vld [vmem:[#allocation6 + $0x40] ss:$16 sps:$4 sm:$0xff]  }
 0x1e4   : > { %4245 = vperm.xlu1 %7030, %v3975_v12   ;;  %4240 = vperm.xlu0 %7029, %v3974_v54   ;;  %v7083_v41 = vld [vmem:[#allocation6 + $0x4c] ss:$16 sps:$4 sm:$0xff]   ;;  %v3986_v6 = vld [vmem:[#allocation11 + $0x1f0] sm:$0xff]  ;;  %v7086_v29 = vld [vmem:[#allocation6 + $0x48] ss:$16 sps:$4 sm:$0xff]  }
 0x1e5   : > { %2925 = vmatpush2.bf16.msra.mxu1 %v10708_v43  ;;  %3278 = vmatpush2.bf16.msra.mxu0 %v10709_v2  ;;  %v8783_v44 = vpop.permute.xlu0 %2135  ;;  %v5783_v47 = vld [vmem:[#allocation12 + $0x8] sm:$0xff]  ;;  %v5782_v12 = vld [vmem:[#allocation12] sm:$0xff]  ;;  %v5785_v4 = vld [vmem:[#allocation12 + $0x18] sm:$0xff] }
 0x1e6   : > { %2926 = vmatprep.subr.bf16.mxu1 %v1701_v19  ;;  %3279 = vmatprep.subr.bf16.mxu0 %v1733_v15  ;;  %10717 = vst [vmem:[#allocation46_spill] sm:$0xff] %v8783_v44  ;;  %v8785_v32 = vpop.permute.xlu1 %2125  ;;  %v7087_v54 = vld [vmem:[#allocation6 + $0x64] ss:$16 sps:$4 sm:$0xff]   ;;  %v7089_v14 = vld [vmem:[#allocation6 + $0x6c] ss:$16 sps:$4 sm:$0xff]  }
 0x1e7   : > { %10718 = vst [vmem:[#allocation50_spill] sm:$0xff] %v8785_v32  ;;  %v5784_v60 = vld [vmem:[#allocation12 + $0x10] sm:$0xff]  ;;  %v7092_v9 = vld [vmem:[#allocation6 + $0x68] ss:$16 sps:$4 sm:$0xff]   ;;  %v5786_v20 = vld [vmem:[#allocation12 + $0x20] sm:$0xff] }
 0x1e8   : > { %4255 = vperm.xlu1 %7030, %v3977_v5   ;;  %4250 = vperm.xlu0 %7029, %v3976_v3   ;;  %v7091_v26 = vld [vmem:[#allocation6 + $0x60] ss:$16 sps:$4 sm:$0xff]   ;;  %v5787_v61 = vld [vmem:[#allocation12 + $0x28] sm:$0xff]  ;;  %v7093_v19 = vld [vmem:[#allocation6 + $0x84] ss:$16 sps:$4 sm:$0xff]  }
 0x1e9   : > { %2927 = vmatpush2.bf16.msra.mxu1 %v10711_v13  ;;  %3280 = vmatpush2.bf16.msra.mxu0 %v10712_v55  ;;  %v8787_v46 = vpop.permute.xlu0 %2250  ;;  %v7095_v15 = vld [vmem:[#allocation6 + $0x8c] ss:$16 sps:$4 sm:$0xff]   ;;  %v5788_v5 = vld [vmem:[#allocation12 + $0x30] sm:$0xff]  ;;  %v7098_v11 = vld [vmem:[#allocation6 + $0x88] ss:$16 sps:$4 sm:$0xff]  }
 0x1ea   : > { %2928 = vmatprep.subr.bf16.mxu1 %v1699_v40  ;;  %3281 = vmatprep.subr.bf16.mxu0 %v1731_v27  ;;  %10719 = vst [vmem:[#allocation53_spill] sm:$0xff] %v8787_v46  ;;  %v8789_v38 = vpop.permute.xlu1 %2255  ;;  %v5789_v2 = vld [vmem:[#allocation12 + $0x38] sm:$0xff]  ;;  %v7097_v31 = vld [vmem:[#allocation6 + $0x80] ss:$16 sps:$4 sm:$0xff]   ;;  %v5791_v40 = vld [vmem:[#allocation12 + $0x48] sm:$0xff] }
 0x1eb   : > { %10720 = vst [vmem:[#allocation55_spill] sm:$0xff] %v8789_v38  ;;  %v5790_v27 = vld [vmem:[#allocation12 + $0x40] sm:$0xff]  ;;  %v7101_v55 = vld [vmem:[#allocation6 + $0xac] ss:$16 sps:$4 sm:$0xff]   ;;  %v10785_v33 = vld [vmem:[#allocation24_spill] sm:$0xff] }
 0x1ec   : > { %4265 = vperm.xlu1 %7030, %v3979_v34   ;;  %4260 = vperm.xlu0 %7029, %v3978_v28   ;;  %v7099_v13 = vld [vmem:[#allocation6 + $0xa4] ss:$16 sps:$4 sm:$0xff]   ;;  %v7260_v38 = vld [vmem:[#allocation6 + $0x3ec] ss:$16 sps:$4 sm:$0xff]  }
 0x1ed   : > { %2929 = vmatpush2.bf16.msra.mxu1 %v10715_v58  ;;  %3282 = vmatpush2.bf16.msra.mxu0 %v10716_v25  ;;  %v8791_v50 = vpop.permute.xlu0 %2240  ;;  %v7103_v58 = vld [vmem:[#allocation6 + $0xa0] ss:$16 sps:$4 sm:$0xff]   ;;  %v7104_v25 = vld [vmem:[#allocation6 + $0xa8] ss:$16 sps:$4 sm:$0xff]  }
 0x1ee   : > { %10721 = vst [vmem:[#allocation54_spill] sm:$0xff] %v8791_v50  ;;  %v8793_v23 = vpop.permute.xlu1 %2245  ;;  %v10782_v18 = vld [vmem:[#allocation81_spill] sm:$0xff]  ;;  %v10784_v56 = vld [vmem:[#allocation71_spill] sm:$0xff] }
 0x1ef   : > { %10722 = vst [vmem:[#allocation26_spill] sm:$0xff] %v8793_v23  ;;  %v7255_v23 = vld [vmem:[#allocation6 + $0x3e0] ss:$16 sps:$4 sm:$0xff]  }
 0x1f0   : > { %2931 = vmatmul.mubr.bf16.vlgmr.msra.gmra.mxu1 %v7069_v42  ;;  %3284 = vmatmul.mubr.bf16.vlgmr.msra.gmra.mxu0 %v7072_v36  ;;  %v5793_v42 = vld [vmem:[#allocation12 + $0x58] sm:$0xff]  ;;  %v5792_v36 = vld [vmem:[#allocation12 + $0x50] sm:$0xff] }
 0x1f1   : > { %4275 = vperm.xlu1 %7030, %v3981_v30   ;;  %4270 = vperm.xlu0 %7029, %v3980_v24   ;;  %v8795_v1 = vpop.permute.xlu0 %2230  ;;  %v5795_v24 = vld [vmem:[#allocation12 + $0x68] sm:$0xff] }
 0x1f2   : > { %2940 = vmatprep.mubr.bf16.mxu1 %v7075_v39  ;;  %3293 = vmatprep.mubr.bf16.mxu0 %v7077_v22  ;;  %10723 = vst [vmem:[#allocation56_spill] sm:$0xff] %v8795_v1  ;;  %v8797_v16 = vpop.permute.xlu1 %2235  ;;  %v5794_v39 = vld [vmem:[#allocation12 + $0x60] sm:$0xff] }
 0x1f3   : > { %10724 = vst [vmem:[#allocation48_spill] sm:$0xff] %v8797_v16  ;;  %v7105_v22 = vld [vmem:[#allocation6 + $0xc4] ss:$16 sps:$4 sm:$0xff]  }
 0x1f4   : > { %v7257_v16 = vld [vmem:[#allocation6 + $0x3e4] ss:$16 sps:$4 sm:$0xff]  }
 0x1f5   : > { %4285 = vperm.xlu1 %7030, %v3983_v8   ;;  %4280 = vperm.xlu0 %7029, %v3982_v48   ;;  %v8799_v43 = vpop.permute.xlu0 %2220  ;;  %v7107_v8 = vld [vmem:[#allocation6 + $0xcc] ss:$16 sps:$4 sm:$0xff]  }
 0x1f6   : > { %10725 = vst [vmem:[#allocation60_spill] sm:$0xff] %v8799_v43  ;;  %v8801_v3 = vpop.permute.xlu1 %2225  ;;  %v7252_v43 = vld [vmem:[#allocation6 + $0x3c8] ss:$16 sps:$4 sm:$0xff]  }
 0x1f7   : > { %10726 = vst [vmem:[#allocation95_spill] sm:$0xff] %v8801_v3 }
 0x1f8   : > { %2941 = vmatmul.mubr.bf16.gmra.mxu1 %v7079_v0  ;;  %3294 = vmatmul.mubr.bf16.gmra.mxu0 %v7080_v59  ;;  %v5797_v0 = vld [vmem:[#allocation12 + $0x78] sm:$0xff]  ;;  %v5796_v59 = vld [vmem:[#allocation12 + $0x70] sm:$0xff] }
 0x1f9   : > { %4295 = vperm.xlu1 %7030, %v3985_v10   ;;  %4290 = vperm.xlu0 %7029, %v3984_v37   ;;  %v8803_v34 = vpop.permute.xlu0 %2210  ;;  %v7109_v37 = vld [vmem:[#allocation6 + $0xc0] ss:$16 sps:$4 sm:$0xff]  }
 0x1fa   : > { %2950 = vmatprep.mubr.bf16.mxu1 %v7081_v45  ;;  %3303 = vmatprep.mubr.bf16.mxu0 %v7083_v41  ;;  %10727 = vst [vmem:[#allocation62_spill] sm:$0xff] %v8803_v34  ;;  %v8805_v28 = vpop.permute.xlu1 %2215  ;;  %v7110_v45 = vld [vmem:[#allocation6 + $0xc8] ss:$16 sps:$4 sm:$0xff]  }
 0x1fb   : > { %10728 = vst [vmem:[#allocation96_spill] sm:$0xff] %v8805_v28  ;;  %v7249_v28 = vld [vmem:[#allocation6 + $0x3c0] ss:$16 sps:$4 sm:$0xff]  }
 0x1fd   : > { %4305 = vperm.xlu1 %7030, %v3987_v49   ;;  %4300 = vperm.xlu0 %7029, %v3986_v6   ;;  %v8807_v30 = vpop.permute.xlu0 %2200  ;;  %v5799_v49 = vld [vmem:[#allocation12 + $0x88] sm:$0xff]  ;;  %v5798_v6 = vld [vmem:[#allocation12 + $0x80] sm:$0xff] }
 0x1fe   : > { %10729 = vst [vmem:[#allocation97_spill] sm:$0xff] %v8807_v30  ;;  %v8809_v48 = vpop.permute.xlu1 %2205  ;;  %v7258_v30 = vld [vmem:[#allocation6 + $0x3e8] ss:$16 sps:$4 sm:$0xff]  }
 0x1ff   : > { %10730 = vst [vmem:[#allocation98_spill] sm:$0xff] %v8809_v48 }
 0x200   : > { %2951 = vmatmul.mubr.bf16.gmra.mxu1 %v7085_v62  ;;  %3304 = vmatmul.mubr.bf16.gmra.mxu0 %v7086_v29  ;;  %v7111_v62 = vld [vmem:[#allocation6 + $0xe4] ss:$16 sps:$4 sm:$0xff]   ;;  %v7113_v29 = vld [vmem:[#allocation6 + $0xec] ss:$16 sps:$4 sm:$0xff]  }
 0x201   : > { %5853 = vperm.xlu1 %7030, %v5783_v47   ;;  %5848 = vperm.xlu0 %7029, %v5782_v12   ;;  %v8811_v10 = vpop.permute.xlu0 %2190  ;;  %v5801_v12 = vld [vmem:[#allocation12 + $0x98] sm:$0xff] }
 0x202   : > { %2960 = vmatprep.mubr.bf16.mxu1 %v7087_v54  ;;  %3313 = vmatprep.mubr.bf16.mxu0 %v7089_v14  ;;  %10731 = vst [vmem:[#allocation43_spill] sm:$0xff] %v8811_v10  ;;  %v8813_v41 = vpop.permute.xlu1 %2195  ;;  %v5800_v54 = vld [vmem:[#allocation12 + $0x90] sm:$0xff] }
 0x203   : > { %10732 = vst [vmem:[#allocation44_spill] sm:$0xff] %v8813_v41 }
 0x205   : > { %5863 = vperm.xlu1 %7030, %v5785_v4   ;;  %5858 = vperm.xlu0 %7029, %v5784_v60   ;;  %v8815_v47 = vpop.permute.xlu0 %2180  ;;  %v7115_v4 = vld [vmem:[#allocation6 + $0xe0] ss:$16 sps:$4 sm:$0xff]   ;;  %v7116_v60 = vld [vmem:[#allocation6 + $0xe8] ss:$16 sps:$4 sm:$0xff]  }
 0x206   : > { %10733 = vst [vmem:[#allocation64_spill] sm:$0xff] %v8815_v47  ;;  %v8817_v14 = vpop.permute.xlu1 %2185 }
 0x207   : > { %10734 = vst [vmem:[#allocation89_spill] sm:$0xff] %v8817_v14  ;;  %v7263_v14 = vld [vmem:[#allocation9 + $0x4] ss:$16 sps:$4 sm:$0xff]  }
 0x208   : > { %2961 = vmatmul.mubr.bf16.gmra.mxu1 %v7091_v26  ;;  %3314 = vmatmul.mubr.bf16.gmra.mxu0 %v7092_v9  ;;  %v5803_v26 = vld [vmem:[#allocation12 + $0xa8] sm:$0xff]  ;;  %v5802_v9 = vld [vmem:[#allocation12 + $0xa0] sm:$0xff] }
 0x209   : > { %5873 = vperm.xlu1 %7030, %v5787_v61   ;;  %5868 = vperm.xlu0 %7029, %v5786_v20   ;;  %v7117_v61 = vld [vmem:[#allocation6 + $0x104] ss:$16 sps:$4 sm:$0xff]   ;;  %v7119_v20 = vld [vmem:[#allocation6 + $0x10c] ss:$16 sps:$4 sm:$0xff]  }
 0x20a   : > { %2970 = vmatprep.mubr.bf16.mxu1 %v7093_v19  ;;  %3323 = vmatprep.mubr.bf16.mxu0 %v7095_v15  ;;  %v8819_v19 = vpop.permute.xlu0 %3990  ;;  %v8821_v15 = vpop.permute.xlu1 %3995 }
 0x20b   : > { %10735 = vst [vmem:[#allocation66_spill] sm:$0xff] %v8819_v19  ;;  %10736 = vst [vmem:[#allocation90_spill] sm:$0xff] %v8821_v15  ;;  %v7251_v15 = vld [vmem:[#allocation6 + $0x3c4] ss:$16 sps:$4 sm:$0xff]   ;;  %v7254_v19 = vld [vmem:[#allocation6 + $0x3cc] ss:$16 sps:$4 sm:$0xff]  }
 0x20d   : > { %5883 = vperm.xlu1 %7030, %v5789_v2   ;;  %5878 = vperm.xlu0 %7029, %v5788_v5   ;;  %v5805_v2 = vld [vmem:[#allocation12 + $0xb8] sm:$0xff]  ;;  %v5804_v5 = vld [vmem:[#allocation12 + $0xb0] sm:$0xff] }
 0x210   : > { %2971 = vmatmul.mubr.bf16.gmra.mxu1 %v7097_v31  ;;  %3324 = vmatmul.mubr.bf16.gmra.mxu0 %v7098_v11  ;;  %v7121_v31 = vld [vmem:[#allocation6 + $0x100] ss:$16 sps:$4 sm:$0xff]   ;;  %v7122_v11 = vld [vmem:[#allocation6 + $0x108] ss:$16 sps:$4 sm:$0xff]  }
 0x211   : > { %5893 = vperm.xlu1 %7030, %v5791_v40   ;;  %5888 = vperm.xlu0 %7029, %v5790_v27   ;;  %v8823_v40 = vpop.permute.xlu0 %4000  ;;  %v5807_v27 = vld [vmem:[#allocation12 + $0xc8] sm:$0xff] }
 0x212   : > { %2980 = vmatprep.mubr.bf16.mxu1 %v7099_v13  ;;  %3333 = vmatprep.mubr.bf16.mxu0 %v7101_v55  ;;  %10737 = vst [vmem:[#allocation67_spill] sm:$0xff] %v8823_v40  ;;  %v5806_v13 = vld [vmem:[#allocation12 + $0xc0] sm:$0xff] }
 0x213   : > { %v7123_v55 = vld [vmem:[#allocation6 + $0x124] ss:$16 sps:$4 sm:$0xff]  }
 0x215   : > { %5903 = vperm.xlu1 %7030, %v5793_v42   ;;  %5898 = vperm.xlu0 %7029, %v5792_v36   ;;  %v7125_v42 = vld [vmem:[#allocation6 + $0x12c] ss:$16 sps:$4 sm:$0xff]   ;;  %v8825_v36 = vpop.permute.xlu1 %4005 }
 0x216   : > { %10738 = vst [vmem:[#allocation83_spill] sm:$0xff] %v8825_v36 }
 0x218   : > { %2981 = vmatmul.mubr.bf16.gmra.mxu1 %v7103_v58  ;;  %3334 = vmatmul.mubr.bf16.gmra.mxu0 %v7104_v25  ;;  %v5809_v58 = vld [vmem:[#allocation12 + $0xd8] sm:$0xff]  ;;  %v5808_v25 = vld [vmem:[#allocation12 + $0xd0] sm:$0xff] }
 0x219   : > { %5913 = vperm.xlu1 %7030, %v5795_v24   ;;  %5908 = vperm.xlu0 %7029, %v5794_v39   ;;  %v8827_v24 = vpop.permute.xlu0 %4010  ;;  %v7127_v39 = vld [vmem:[#allocation6 + $0x120] ss:$16 sps:$4 sm:$0xff]  }
 0x21a   : > { %2990 = vmatprep.mubr.bf16.mxu1 %v7105_v22  ;;  %3343 = vmatprep.mubr.bf16.mxu0 %v7107_v8  ;;  %10739 = vst [vmem:[#allocation69_spill] sm:$0xff] %v8827_v24  ;;  %v7128_v22 = vld [vmem:[#allocation6 + $0x128] ss:$16 sps:$4 sm:$0xff]   ;;  %v8829_v8 = vpop.permute.xlu1 %4015 }
 0x21b   : > { %10740 = vst [vmem:[#allocation84_spill] sm:$0xff] %v8829_v8  ;;  %v7243_v8 = vld [vmem:[#allocation6 + $0x3a0] ss:$16 sps:$4 sm:$0xff]   ;;  %v7246_v24 = vld [vmem:[#allocation6 + $0x3a8] ss:$16 sps:$4 sm:$0xff]  }
 0x21d   : > { %5923 = vperm.xlu1 %7030, %v5797_v0   ;;  %5918 = vperm.xlu0 %7029, %v5796_v59   ;;  %v5811_v0 = vld [vmem:[#allocation12 + $0xe8] sm:$0xff]  ;;  %v5810_v59 = vld [vmem:[#allocation12 + $0xe0] sm:$0xff] }
 0x220   : > { %2991 = vmatmul.mubr.bf16.gmra.mxu1 %v7109_v37  ;;  %3344 = vmatmul.mubr.bf16.gmra.mxu0 %v7110_v45  ;;  %v7129_v37 = vld [vmem:[#allocation6 + $0x144] ss:$16 sps:$4 sm:$0xff]   ;;  %v7131_v45 = vld [vmem:[#allocation6 + $0x14c] ss:$16 sps:$4 sm:$0xff]  }
 0x221   : > { %5933 = vperm.xlu1 %7030, %v5799_v49   ;;  %5928 = vperm.xlu0 %7029, %v5798_v6   ;;  %v8831_v49 = vpop.permute.xlu0 %4020  ;;  %v5813_v6 = vld [vmem:[#allocation12 + $0xf8] sm:$0xff] }
 0x222   : > { %3000 = vmatprep.mubr.bf16.mxu1 %v7111_v62  ;;  %3353 = vmatprep.mubr.bf16.mxu0 %v7113_v29  ;;  %10741 = vst [vmem:[#allocation51_spill] sm:$0xff] %v8831_v49  ;;  %v5812_v62 = vld [vmem:[#allocation12 + $0xf0] sm:$0xff]  ;;  %v8833_v29 = vpop.permute.xlu1 %4025 }
 0x223   : > { %10742 = vst [vmem:[#allocation52_spill] sm:$0xff] %v8833_v29 }
 0x225   : > { %5943 = vperm.xlu1 %7030, %v5801_v12   ;;  %5938 = vperm.xlu0 %7029, %v5800_v54   ;;  %v7133_v12 = vld [vmem:[#allocation6 + $0x140] ss:$16 sps:$4 sm:$0xff]   ;;  %v7134_v54 = vld [vmem:[#allocation6 + $0x148] ss:$16 sps:$4 sm:$0xff]  }
 0x228   : > { %3001 = vmatmul.mubr.bf16.gmra.mxu1 %v7115_v4  ;;  %3354 = vmatmul.mubr.bf16.gmra.mxu0 %v7116_v60  ;;  %v5815_v4 = vld [vmem:[#allocation12 + $0x108] sm:$0xff]  ;;  %v5814_v60 = vld [vmem:[#allocation12 + $0x100] sm:$0xff] }
 0x229   : > { %5953 = vperm.xlu1 %7030, %v5803_v26   ;;  %5948 = vperm.xlu0 %7029, %v5802_v9   ;;  %v7135_v26 = vld [vmem:[#allocation6 + $0x164] ss:$16 sps:$4 sm:$0xff]   ;;  %v7137_v9 = vld [vmem:[#allocation6 + $0x16c] ss:$16 sps:$4 sm:$0xff]  }
 0x22a   : > { %3010 = vmatprep.mubr.bf16.mxu1 %v7117_v61  ;;  %3363 = vmatprep.mubr.bf16.mxu0 %v7119_v20  ;;  %v8835_v61 = vpop.permute.xlu0 %4030  ;;  %v8837_v20 = vpop.permute.xlu1 %4035 }
 0x22b   : > { %10743 = vst [vmem:[#allocation68_spill] sm:$0xff] %v8835_v61  ;;  %10744 = vst [vmem:[#allocation18_spill] sm:$0xff] %v8837_v20 }
 0x22d   : > { %5963 = vperm.xlu1 %7030, %v5805_v2   ;;  %5958 = vperm.xlu0 %7029, %v5804_v5   ;;  %v5817_v2 = vld [vmem:[#allocation12 + $0x118] sm:$0xff]  ;;  %v5816_v5 = vld [vmem:[#allocation12 + $0x110] sm:$0xff] }
 0x230   : > { %3011 = vmatmul.mubr.bf16.gmra.mxu1 %v7121_v31  ;;  %3364 = vmatmul.mubr.bf16.gmra.mxu0 %v7122_v11  ;;  %v7139_v31 = vld [vmem:[#allocation6 + $0x160] ss:$16 sps:$4 sm:$0xff]   ;;  %v7140_v11 = vld [vmem:[#allocation6 + $0x168] ss:$16 sps:$4 sm:$0xff]  }
 0x231   : > { %5973 = vperm.xlu1 %7030, %v5807_v27   ;;  %5968 = vperm.xlu0 %7029, %v5806_v13   ;;  %v8839_v27 = vpop.permute.xlu0 %4040  ;;  %v5819_v13 = vld [vmem:[#allocation12 + $0x128] sm:$0xff] }
 0x232   : > { %3020 = vmatprep.mubr.bf16.mxu1 %v7123_v55  ;;  %3373 = vmatprep.mubr.bf16.mxu0 %v7125_v42  ;;  %10745 = vst [vmem:[#allocation70_spill] sm:$0xff] %v8839_v27  ;;  %v5818_v55 = vld [vmem:[#allocation12 + $0x120] sm:$0xff] }
 0x233   : > { %v7143_v42 = vld [vmem:[#allocation6 + $0x184] ss:$16 sps:$4 sm:$0xff]  }
 0x235   : > { %5983 = vperm.xlu1 %7030, %v5809_v58   ;;  %5978 = vperm.xlu0 %7029, %v5808_v25   ;;  %v7146_v58 = vld [vmem:[#allocation6 + $0x18c] ss:$16 sps:$4 sm:$0xff]   ;;  %v8841_v25 = vpop.permute.xlu1 %4045 }
 0x236   : > { %10746 = vst [vmem:[#allocation21_spill] sm:$0xff] %v8841_v25 }
 0x238   : > { %3021 = vmatmul.mubr.bf16.gmra.mxu1 %v7127_v39  ;;  %3374 = vmatmul.mubr.bf16.gmra.mxu0 %v7128_v22  ;;  %v5821_v39 = vld [vmem:[#allocation12 + $0x138] sm:$0xff]  ;;  %v5820_v22 = vld [vmem:[#allocation12 + $0x130] sm:$0xff] }
 0x239   : > { %5993 = vperm.xlu1 %7030, %v5811_v0   ;;  %5988 = vperm.xlu0 %7029, %v5810_v59   ;;  %v8843_v0 = vpop.permute.xlu0 %4050  ;;  %v7141_v59 = vld [vmem:[#allocation6 + $0x180] ss:$16 sps:$4 sm:$0xff]  }
 0x23a   : > { %3030 = vmatprep.mubr.bf16.mxu1 %v7129_v37  ;;  %3383 = vmatprep.mubr.bf16.mxu0 %v7131_v45  ;;  %10747 = vst [vmem:[#allocation78_spill] sm:$0xff] %v8843_v0  ;;  %v7144_v37 = vld [vmem:[#allocation6 + $0x188] ss:$16 sps:$4 sm:$0xff]   ;;  %v8845_v45 = vpop.permute.xlu1 %4055  ;;  %v10768_v0 = vld [vmem:[#allocation80_spill] sm:$0xff] }
 0x23b   : > { %10748 = vst [vmem:[#allocation59_spill] sm:$0xff] %v8845_v45 }
 0x23d   : > { %6003 = vperm.xlu1 %7030, %v5813_v6   ;;  %5998 = vperm.xlu0 %7029, %v5812_v62   ;;  %v5823_v6 = vld [vmem:[#allocation12 + $0x148] sm:$0xff]  ;;  %v5822_v62 = vld [vmem:[#allocation12 + $0x140] sm:$0xff] }
 0x240   : > { %3031 = vmatmul.mubr.bf16.gmra.mxu1 %v7133_v12  ;;  %3384 = vmatmul.mubr.bf16.gmra.mxu0 %v7134_v54  ;;  %v7149_v12 = vld [vmem:[#allocation6 + $0x1a4] ss:$16 sps:$4 sm:$0xff]   ;;  %v7152_v54 = vld [vmem:[#allocation6 + $0x1ac] ss:$16 sps:$4 sm:$0xff]  }
 0x241   : > { %6013 = vperm.xlu1 %7030, %v5815_v4   ;;  %6008 = vperm.xlu0 %7029, %v5814_v60   ;;  %v8847_v4 = vpop.permute.xlu0 %4060  ;;  %v5825_v60 = vld [vmem:[#allocation12 + $0x158] sm:$0xff] }
 0x242   : > { %3040 = vmatprep.mubr.bf16.mxu1 %v7135_v26  ;;  %3393 = vmatprep.mubr.bf16.mxu0 %v7137_v9  ;;  %10749 = vst [vmem:[#allocation91_spill] sm:$0xff] %v8847_v4  ;;  %v5824_v26 = vld [vmem:[#allocation12 + $0x150] sm:$0xff]  ;;  %v8849_v9 = vpop.permute.xlu1 %4065 }
 0x243   : > { %10750 = vst [vmem:[#allocation92_spill] sm:$0xff] %v8849_v9 }
 0x245   : > { %6023 = vperm.xlu1 %7030, %v5817_v2   ;;  %6018 = vperm.xlu0 %7029, %v5816_v5   ;;  %v7147_v2 = vld [vmem:[#allocation6 + $0x1a0] ss:$16 sps:$4 sm:$0xff]   ;;  %v7150_v5 = vld [vmem:[#allocation6 + $0x1a8] ss:$16 sps:$4 sm:$0xff]  }
 0x248   : > { %3041 = vmatmul.mubr.bf16.gmra.mxu1 %v7139_v31  ;;  %3394 = vmatmul.mubr.bf16.gmra.mxu0 %v7140_v11  ;;  %v5827_v31 = vld [vmem:[#allocation12 + $0x168] sm:$0xff]  ;;  %v5826_v11 = vld [vmem:[#allocation12 + $0x160] sm:$0xff] }
 0x249   : > { %6033 = vperm.xlu1 %7030, %v5819_v13   ;;  %6028 = vperm.xlu0 %7029, %v5818_v55   ;;  %v7155_v13 = vld [vmem:[#allocation6 + $0x1c4] ss:$16 sps:$4 sm:$0xff]   ;;  %v7158_v55 = vld [vmem:[#allocation6 + $0x1cc] ss:$16 sps:$4 sm:$0xff]  }
 0x24a   : > { %3050 = vmatprep.mubr.bf16.mxu1 %v7143_v42  ;;  %3403 = vmatprep.mubr.bf16.mxu0 %v7146_v58  ;;  %v8851_v42 = vpop.permute.xlu0 %4070  ;;  %v8853_v58 = vpop.permute.xlu1 %4075 }
 0x24b   : > { %10751 = vst [vmem:[#allocation85_spill] sm:$0xff] %v8851_v42  ;;  %10752 = vst [vmem:[#allocation86_spill] sm:$0xff] %v8853_v58  ;;  %v7227_v58 = vld [vmem:[#allocation6 + $0x344] ss:$16 sps:$4 sm:$0xff]   ;;  %v7230_v42 = vld [vmem:[#allocation6 + $0x34c] ss:$16 sps:$4 sm:$0xff]  }
 0x24d   : > { %6043 = vperm.xlu1 %7030, %v5821_v39   ;;  %6038 = vperm.xlu0 %7029, %v5820_v22   ;;  %v5829_v39 = vld [vmem:[#allocation12 + $0x178] sm:$0xff]  ;;  %v5828_v22 = vld [vmem:[#allocation12 + $0x170] sm:$0xff] }
 0x250   : > { %3051 = vmatmul.mubr.bf16.gmra.mxu1 %v7141_v59  ;;  %3404 = vmatmul.mubr.bf16.gmra.mxu0 %v7144_v37  ;;  %v7153_v59 = vld [vmem:[#allocation6 + $0x1c0] ss:$16 sps:$4 sm:$0xff]   ;;  %v7156_v37 = vld [vmem:[#allocation6 + $0x1c8] ss:$16 sps:$4 sm:$0xff]  }
 0x251   : > { %6053 = vperm.xlu1 %7030, %v5823_v6   ;;  %6048 = vperm.xlu0 %7029, %v5822_v62   ;;  %v8855_v6 = vpop.permute.xlu0 %4080  ;;  %v5831_v62 = vld [vmem:[#allocation12 + $0x188] sm:$0xff] }
 0x252   : > { %3060 = vmatprep.mubr.bf16.mxu1 %v7149_v12  ;;  %3413 = vmatprep.mubr.bf16.mxu0 %v7152_v54  ;;  %10753 = vst [vmem:[#allocation100_spill] sm:$0xff] %v8855_v6  ;;  %v5830_v12 = vld [vmem:[#allocation12 + $0x180] sm:$0xff] }
 0x253   : > { %v7161_v54 = vld [vmem:[#allocation6 + $0x1e4] ss:$16 sps:$4 sm:$0xff]  }
 0x254   : > { %v7167_v6 = vld [vmem:[#allocation6 + $0x204] ss:$16 sps:$4 sm:$0xff]  }
 0x255   : > { %6063 = vperm.xlu1 %7030, %v5825_v60   ;;  %6058 = vperm.xlu0 %7029, %v5824_v26   ;;  %v7164_v60 = vld [vmem:[#allocation6 + $0x1ec] ss:$16 sps:$4 sm:$0xff]   ;;  %v8857_v26 = vpop.permute.xlu1 %4085 }
 0x256   : > { %10754 = vst [vmem:[#allocation101_spill] sm:$0xff] %v8857_v26  ;;  %v7170_v26 = vld [vmem:[#allocation6 + $0x20c] ss:$16 sps:$4 sm:$0xff]  }
 0x258   : > { %3061 = vmatmul.mubr.bf16.gmra.mxu1 %v7147_v2  ;;  %3414 = vmatmul.mubr.bf16.gmra.mxu0 %v7150_v5  ;;  %v5833_v2 = vld [vmem:[#allocation12 + $0x198] sm:$0xff]  ;;  %v5832_v5 = vld [vmem:[#allocation12 + $0x190] sm:$0xff] }
 0x259   : > { %6073 = vperm.xlu1 %7030, %v5827_v31   ;;  %6068 = vperm.xlu0 %7029, %v5826_v11   ;;  %v8859_v31 = vpop.permute.xlu0 %4090  ;;  %v7159_v11 = vld [vmem:[#allocation6 + $0x1e0] ss:$16 sps:$4 sm:$0xff]  }
 0x25a   : > { %3070 = vmatprep.mubr.bf16.mxu1 %v7155_v13  ;;  %3423 = vmatprep.mubr.bf16.mxu0 %v7158_v55  ;;  %10755 = vst [vmem:[#allocation102_spill] sm:$0xff] %v8859_v31  ;;  %v7162_v13 = vld [vmem:[#allocation6 + $0x1e8] ss:$16 sps:$4 sm:$0xff]   ;;  %v8861_v55 = vpop.permute.xlu1 %4095  ;;  %v7176_v31 = vld [vmem:[#allocation6 + $0x22c] ss:$16 sps:$4 sm:$0xff]  }
 0x25b   : > { %10756 = vst [vmem:[#allocation103_spill] sm:$0xff] %v8861_v55  ;;  %v7173_v55 = vld [vmem:[#allocation6 + $0x224] ss:$16 sps:$4 sm:$0xff]  }
 0x25d   : > { %6083 = vperm.xlu1 %7030, %v5829_v39   ;;  %6078 = vperm.xlu0 %7029, %v5828_v22   ;;  %v5835_v39 = vld [vmem:[#allocation12 + $0x1a8] sm:$0xff]  ;;  %v5834_v22 = vld [vmem:[#allocation12 + $0x1a0] sm:$0xff] }
 0x260   : > { %3071 = vmatmul.mubr.bf16.gmra.mxu1 %v7153_v59  ;;  %3424 = vmatmul.mubr.bf16.gmra.mxu0 %v7156_v37  ;;  %v8863_v59 = vpop.permute.xlu0 %4100  ;;  %v5837_v37 = vld [vmem:[#allocation12 + $0x1b8] sm:$0xff] }
 0x261   : > { %6093 = vperm.xlu1 %7030, %v5831_v62   ;;  %6088 = vperm.xlu0 %7029, %v5830_v12   ;;  %10757 = vst [vmem:[#allocation104_spill] sm:$0xff] %v8863_v59  ;;  %v5836_v62 = vld [vmem:[#allocation12 + $0x1b0] sm:$0xff]  ;;  %v8865_v12 = vpop.permute.xlu1 %4105 }
 0x262   : > { %3080 = vmatprep.mubr.bf16.mxu1 %v7161_v54  ;;  %3433 = vmatprep.mubr.bf16.mxu0 %v7164_v60  ;;  %10758 = vst [vmem:[#allocation105_spill] sm:$0xff] %v8865_v12  ;;  %v7165_v54 = vld [vmem:[#allocation6 + $0x200] ss:$16 sps:$4 sm:$0xff]   ;;  %v7168_v60 = vld [vmem:[#allocation6 + $0x208] ss:$16 sps:$4 sm:$0xff]  }
 0x263   : > { %v5842_v12 = vld [vmem:[#allocation12 + $0x1e0] sm:$0xff] }
 0x264   : > { %v7179_v59 = vld [vmem:[#allocation6 + $0x244] ss:$16 sps:$4 sm:$0xff]  }
 0x265   : > { %6103 = vperm.xlu1 %7030, %v5833_v2   ;;  %6098 = vperm.xlu0 %7029, %v5832_v5   ;;  %v5839_v2 = vld [vmem:[#allocation12 + $0x1c8] sm:$0xff]  ;;  %v5838_v5 = vld [vmem:[#allocation12 + $0x1c0] sm:$0xff] }
 0x268   : > { %3081 = vmatmul.mubr.bf16.gmra.mxu1 %v7159_v11  ;;  %3434 = vmatmul.mubr.bf16.gmra.mxu0 %v7162_v13  ;;  %v8867_v11 = vpop.permute.xlu0 %4110  ;;  %v8869_v13 = vpop.permute.xlu1 %4115 }
 0x269   : > { %6113 = vperm.xlu1 %7030, %v5835_v39   ;;  %6108 = vperm.xlu0 %7029, %v5834_v22   ;;  %10759 = vst [vmem:[#allocation106_spill] sm:$0xff] %v8867_v11  ;;  %10760 = vst [vmem:[#allocation107_spill] sm:$0xff] %v8869_v13  ;;  %v7171_v39 = vld [vmem:[#allocation6 + $0x220] ss:$16 sps:$4 sm:$0xff]   ;;  %v7174_v22 = vld [vmem:[#allocation6 + $0x228] ss:$16 sps:$4 sm:$0xff]  }
 0x26a   : > { %3090 = vmatprep.mubr.bf16.mxu1 %v7167_v6  ;;  %3443 = vmatprep.mubr.bf16.mxu0 %v7170_v26  ;;  %v5841_v6 = vld [vmem:[#allocation12 + $0x1d8] sm:$0xff]  ;;  %v5840_v26 = vld [vmem:[#allocation12 + $0x1d0] sm:$0xff] }
 0x26b   : > { %v7182_v11 = vld [vmem:[#allocation6 + $0x24c] ss:$16 sps:$4 sm:$0xff]  }
 0x26c   : > { %v7188_v13 = vld [vmem:[#allocation6 + $0x26c] ss:$16 sps:$4 sm:$0xff]  }
 0x26d   : > { %6123 = vperm.xlu1 %7030, %v5837_v37   ;;  %6118 = vperm.xlu0 %7029, %v5836_v62   ;;  %v8871_v37 = vpop.permute.xlu0 %4120  ;;  %v5843_v62 = vld [vmem:[#allocation12 + $0x1e8] sm:$0xff] }
 0x26e   : > { %10761 = vst [vmem:[#allocation108_spill] sm:$0xff] %v8871_v37  ;;  %v6432_v37 = vld [vmem:[#allocation2] sm:$0x1] }
 0x270   : > { %3091 = vmatmul.mubr.bf16.gmra.mxu1 %v7165_v54  ;;  %3444 = vmatmul.mubr.bf16.gmra.mxu0 %v7168_v60  ;;  %v8873_v54 = vpop.permute.xlu1 %4125  ;;  %v5845_v60 = vld [vmem:[#allocation12 + $0x1f8] sm:$0xff] }
 0x271   : > { %6133 = vperm.xlu1 %7030, %v5839_v2   ;;  %6128 = vperm.xlu0 %7029, %v5838_v5   ;;  %10762 = vst [vmem:[#allocation109_spill] sm:$0xff] %v8873_v54  ;;  %v5844_v2 = vld [vmem:[#allocation12 + $0x1f0] sm:$0xff]  ;;  %v7180_v5 = vld [vmem:[#allocation6 + $0x248] ss:$16 sps:$4 sm:$0xff]  }
 0x272   : > { %3100 = vmatprep.mubr.bf16.mxu1 %v7173_v55  ;;  %3453 = vmatprep.mubr.bf16.mxu0 %v7176_v31  ;;  %v8875_v31 = vpop.permute.xlu0 %4130  ;;  %v7177_v55 = vld [vmem:[#allocation6 + $0x240] ss:$16 sps:$4 sm:$0xff]  }
 0x273   : > { %10763 = vst [vmem:[#allocation110_spill] sm:$0xff] %v8875_v31 }
 0x275   : > { %6143 = vperm.xlu1 %7030, %v5841_v6   ;;  %6138 = vperm.xlu0 %7029, %v5840_v26   ;;  %v8877_v6 = vpop.permute.xlu1 %4135  ;;  %v7185_v26 = vld [vmem:[#allocation6 + $0x264] ss:$16 sps:$4 sm:$0xff]  }
 0x276   : > { %10764 = vst [vmem:[#allocation111_spill] sm:$0xff] %v8877_v6  ;;  %v7200_v6 = vld [vmem:[#allocation6 + $0x2ac] ss:$16 sps:$4 sm:$0xff]  }
 0x278   : > { %3101 = vmatmul.mubr.bf16.gmra.mxu1 %v7171_v39  ;;  %3454 = vmatmul.mubr.bf16.gmra.mxu0 %v7174_v22  ;;  %v8879_v39 = vpop.permute.xlu0 %4140  ;;  %v7194_v22 = vld [vmem:[#allocation6 + $0x28c] ss:$16 sps:$4 sm:$0xff]  }
 0x279   : > { %6153 = vperm.xlu1 %7030, %v5843_v62   ;;  %6148 = vperm.xlu0 %7029, %v5842_v12   ;;  %10765 = vst [vmem:[#allocation112_spill] sm:$0xff] %v8879_v39  ;;  %v7186_v12 = vld [vmem:[#allocation6 + $0x268] ss:$16 sps:$4 sm:$0xff]   ;;  %v7189_v62 = vld [vmem:[#allocation6 + $0x280] ss:$16 sps:$4 sm:$0xff]  }
 0x27a   : > { %3110 = vmatprep.mubr.bf16.mxu1 %v7179_v59  ;;  %3463 = vmatprep.mubr.bf16.mxu0 %v7182_v11  ;;  %v7183_v59 = vld [vmem:[#allocation6 + $0x260] ss:$16 sps:$4 sm:$0xff]   ;;  %v7191_v11 = vld [vmem:[#allocation6 + $0x284] ss:$16 sps:$4 sm:$0xff]  }
 0x27d   : > { %6163 = vperm.xlu1 %7030, %v5845_v60   ;;  %6158 = vperm.xlu0 %7029, %v5844_v2   ;;  %v7192_v60 = vld [vmem:[#allocation6 + $0x288] ss:$16 sps:$4 sm:$0xff]   ;;  %v7197_v2 = vld [vmem:[#allocation6 + $0x2a4] ss:$16 sps:$4 sm:$0xff]  }
 0x280   : > { %3111 = vmatmul.mubr.bf16.gmra.mxu1 %v7177_v55  ;;  %3464 = vmatmul.mubr.bf16.gmra.mxu0 %v7180_v5  ;;  %v7195_v55 = vld [vmem:[#allocation6 + $0x2a0] ss:$16 sps:$4 sm:$0xff]   ;;  %v7203_v5 = vld [vmem:[#allocation6 + $0x2c4] ss:$16 sps:$4 sm:$0xff]  }
 0x281   : > { %6435 = vperm.xlu0 %7029, %v6432_v37   ;;  %3120 = vmatprep.mubr.bf16.mxu1 %v7185_v26  ;;  %v7198_v37 = vld [vmem:[#allocation6 + $0x2a8] ss:$16 sps:$4 sm:$0xff]   ;;  %v7201_v26 = vld [vmem:[#allocation6 + $0x2c0] ss:$16 sps:$4 sm:$0xff]  }
 0x282   : > { %3473 = vmatprep.mubr.bf16.mxu0 %v7188_v13  ;;  %v7206_v13 = vld [vmem:[#allocation6 + $0x2cc] ss:$16 sps:$4 sm:$0xff]  }
 0x288   : > { %3121 = vmatmul.mubr.bf16.gmra.mxu1 %v7183_v59  ;;  %3474 = vmatmul.mubr.bf16.gmra.mxu0 %v7186_v12  ;;  %v7204_v59 = vld [vmem:[#allocation6 + $0x2c8] ss:$16 sps:$4 sm:$0xff]   ;;  %v7209_v12 = vld [vmem:[#allocation6 + $0x2e4] ss:$16 sps:$4 sm:$0xff]  }
 0x289   : > { %3130 = vmatprep.mubr.bf16.mxu1 %v7191_v11  ;;  %3483 = vmatprep.mubr.bf16.mxu0 %v7194_v22  ;;  %v7212_v11 = vld [vmem:[#allocation6 + $0x2ec] ss:$16 sps:$4 sm:$0xff]   ;;  %v7207_v22 = vld [vmem:[#allocation6 + $0x2e0] ss:$16 sps:$4 sm:$0xff]  }
 0x290   : > { %3131 = vmatmul.mubr.bf16.gmra.mxu1 %v7189_v62  ;;  %3484 = vmatmul.mubr.bf16.gmra.mxu0 %v7192_v60  ;;  %v7210_v62 = vld [vmem:[#allocation6 + $0x2e8] ss:$16 sps:$4 sm:$0xff]   ;;  %v7215_v60 = vld [vmem:[#allocation6 + $0x304] ss:$16 sps:$4 sm:$0xff]  }
 0x291   : > { %3140 = vmatprep.mubr.bf16.mxu1 %v7197_v2  ;;  %3493 = vmatprep.mubr.bf16.mxu0 %v7200_v6  ;;  %v7218_v6 = vld [vmem:[#allocation6 + $0x30c] ss:$16 sps:$4 sm:$0xff]   ;;  %v7213_v2 = vld [vmem:[#allocation6 + $0x300] ss:$16 sps:$4 sm:$0xff]  }
 0x298   : > { %3141 = vmatmul.mubr.bf16.gmra.mxu1 %v7195_v55  ;;  %3494 = vmatmul.mubr.bf16.gmra.mxu0 %v7198_v37  ;;  %v7216_v55 = vld [vmem:[#allocation6 + $0x308] ss:$16 sps:$4 sm:$0xff]   ;;  %v7221_v37 = vld [vmem:[#allocation6 + $0x324] ss:$16 sps:$4 sm:$0xff]  }
 0x299   : > { %3150 = vmatprep.mubr.bf16.mxu1 %v7203_v5  ;;  %3503 = vmatprep.mubr.bf16.mxu0 %v7206_v13  ;;  %v7224_v5 = vld [vmem:[#allocation6 + $0x32c] ss:$16 sps:$4 sm:$0xff]  }
 0x2a0   : > { %3151 = vmatmul.mubr.bf16.gmra.mxu1 %v7201_v26  ;;  %3504 = vmatmul.mubr.bf16.gmra.mxu0 %v7204_v59  ;;  %v10766_v26 = vld [vmem:[#allocation73_spill] sm:$0xff] }
 0x2a1   : > { %3160 = vmatprep.mubr.bf16.mxu1 %v7209_v12  ;;  %3513 = vmatprep.mubr.bf16.mxu0 %v7212_v11 }
 0x2a8   : > { %3161 = vmatmul.mubr.bf16.gmra.mxu1 %v7207_v22  ;;  %3514 = vmatmul.mubr.bf16.gmra.mxu0 %v7210_v62  ;;  %v7219_v62 = vld [vmem:[#allocation6 + $0x320] ss:$16 sps:$4 sm:$0xff]  }
 0x2a9   : > { %3170 = vmatprep.mubr.bf16.mxu1 %v7215_v60  ;;  %3523 = vmatprep.mubr.bf16.mxu0 %v7218_v6  ;;  %v7222_v60 = vld [vmem:[#allocation6 + $0x328] ss:$16 sps:$4 sm:$0xff]  }
 0x2b0   : > { %3171 = vmatmul.mubr.bf16.gmra.mxu1 %v7213_v2  ;;  %3524 = vmatmul.mubr.bf16.gmra.mxu0 %v7216_v55  ;;  %v2932_v13 = vpop.f32.mrf.mxu1  ;;  %v3285_v39 = vpop.f32.mrf.mxu0  ;;  %v10767_v2 = vld [vmem:[#allocation72_spill] sm:$0xff] }
 0x2b1   : > { %3180 = vmatprep.mubr.bf16.mxu1 %v7221_v37  ;;  %3533 = vmatprep.mubr.bf16.mxu0 %v7224_v5  ;;  %v2933_v59 = vadd.f32 %v2932_v13, %v10766_v26 }
 0x2b2   : > { %v2934_v12 = vpop.f32.mrf.mxu1  ;;  %v3287_v11 = vpop.f32.mrf.mxu0 }
 0x2b3   : > { %v3286_v31 = vadd.f32 %v3285_v39, %v2933_v59  ;;  %v2935_v22 = vadd.f32 %v2934_v12, %v10766_v26 }
 0x2b4   : > { %v2936_v6 = vpop.f32.mrf.mxu1  ;;  %v3289_v54 = vpop.f32.mrf.mxu0 }
 0x2b5   : > { %v3288_v9 = vadd.f32 %v3287_v11, %v2935_v22  ;;  %v2937_v55 = vadd.f32 %v2936_v6, %v10767_v2  ;;  %v3604_v26 = vmax.f32 %v3286_v31, 0.0 }
 0x2b6   : > { %v2938_v4 = vpop.f32.mrf.mxu1  ;;  %v3291_v45 = vpop.f32.mrf.mxu0 }
 0x2b7   : > { %v3290_v37 = vadd.f32 %v3289_v54, %v2937_v55  ;;  %v2939_v5 = vadd.f32 %v2938_v4, %v10767_v2  ;;  %v3605_v27 = vmax.f32 %v3288_v9, 0.0 }
 0x2b8   : > { %3181 = vmatmul.mubr.bf16.gmra.mxu1 %v7219_v62  ;;  %3534 = vmatmul.mubr.bf16.gmra.mxu0 %v7222_v60  ;;  %v2942_v13 = vpop.f32.mrf.mxu1  ;;  %v3295_v39 = vpop.f32.mrf.mxu0  ;;  %v7225_v62 = vld [vmem:[#allocation6 + $0x340] ss:$16 sps:$4 sm:$0xff]   ;;  %v7228_v60 = vld [vmem:[#allocation6 + $0x348] ss:$16 sps:$4 sm:$0xff]  }
 0x2b9   : > { %3190 = vmatprep.mubr.bf16.mxu1 %v7227_v58  ;;  %3543 = vmatprep.mubr.bf16.mxu0 %v7230_v42  ;;  %v3606_v59 = vmax.f32 %v3290_v37, 0.0  ;;  %v3292_v12 = vadd.f32 %v3291_v45, %v2939_v5  ;;  %v2943_v25 = vadd.f32 %v2942_v13, %v10768_v0  ;;  %v7233_v58 = vld [vmem:[#allocation6 + $0x364] ss:$16 sps:$4 sm:$0xff]   ;;  %v7236_v42 = vld [vmem:[#allocation6 + $0x36c] ss:$16 sps:$4 sm:$0xff]  }
 0x2ba   : > { %v2944_v11 = vpop.f32.mrf.mxu1  ;;  %v3297_v22 = vpop.f32.mrf.mxu0  ;;  %v10770_v37 = vld [vmem:[#allocation79_spill] sm:$0xff] }
 0x2bb   : > { %v8886_v6 = vpack.c.bf16 %v3606_v59, %v3604_v26  ;;  %v3607_v20 = vmax.f32 %v3292_v12, 0.0  ;;  %v3296_v54 = vadd.f32 %v3295_v39, %v2943_v25  ;;  %v2945_v4 = vadd.f32 %v2944_v11, %v10768_v0  ;;  %v10772_v11 = vld [vmem:[#allocation82_spill] sm:$0xff] }
 0x2bc   : > { %v2946_v2 = vpop.f32.mrf.mxu1  ;;  %v3299_v55 = vpop.f32.mrf.mxu0 }
 0x2bd   : > { %10769 = vst [vmem:[#allocation73_spill] sm:$0xff] %v8886_v6  ;;  %v3298_v31 = vadd.f32 %v3297_v22, %v2945_v4  ;;  %v2947_v45 = vadd.f32 %v2946_v2, %v10770_v37  ;;  %v8890_v5 = vpack.c.bf16 %v3607_v20, %v3605_v27  ;;  %v3608_v39 = vmax.f32 %v3296_v54, 0.0  ;;  %v7242_v54 = vld [vmem:[#allocation6 + $0x38c] ss:$16 sps:$4 sm:$0xff]  }
 0x2be   : > { %v2948_v9 = vpop.f32.mrf.mxu1  ;;  %v3301_v13 = vpop.f32.mrf.mxu0 }
 0x2bf   : > { %10771 = vst [vmem:[#allocation72_spill] sm:$0xff] %v8890_v5  ;;  %v3300_v61 = vadd.f32 %v3299_v55, %v2947_v45  ;;  %v2949_v26 = vadd.f32 %v2948_v9, %v10770_v37  ;;  %v3609_v27 = vmax.f32 %v3298_v31, 0.0  ;;  %v10789_v5 = vld [vmem:[#allocation20_spill] sm:$0xff] }
 0x2c0   : > { %3191 = vmatmul.mubr.bf16.gmra.mxu1 %v7225_v62  ;;  %3544 = vmatmul.mubr.bf16.gmra.mxu0 %v7228_v60  ;;  %v2952_v25 = vpop.f32.mrf.mxu1  ;;  %v3305_v0 = vpop.f32.mrf.mxu0  ;;  %v7231_v62 = vld [vmem:[#allocation6 + $0x360] ss:$16 sps:$4 sm:$0xff]   ;;  %v7234_v60 = vld [vmem:[#allocation6 + $0x368] ss:$16 sps:$4 sm:$0xff]  }
 0x2c1   : > { %3200 = vmatprep.mubr.bf16.mxu1 %v7233_v58  ;;  %3553 = vmatprep.mubr.bf16.mxu0 %v7236_v42  ;;  %v3610_v59 = vmax.f32 %v3300_v61, 0.0  ;;  %v3302_v12 = vadd.f32 %v3301_v13, %v2949_v26  ;;  %v2953_v22 = vadd.f32 %v2952_v25, %v10772_v11  ;;  %v7239_v61 = vld [vmem:[#allocation6 + $0x384] ss:$16 sps:$4 sm:$0xff]  }
 0x2c2   : > { %v8894_v4 = vpop.f32.mrf.mxu1  ;;  %v8896_v20 = vpop.f32.mrf.mxu0 }
 0x2c3   : > { %10773 = vst [vmem:[#allocation80_spill] sm:$0xff] %v8896_v20  ;;  %v8898_v2 = vpack.c.bf16 %v3610_v59, %v3608_v39  ;;  %v3611_v55 = vmax.f32 %v3302_v12, 0.0  ;;  %v8900_v37 = vadd.f32 %v3305_v0, %v2953_v22  ;;  %v7237_v39 = vld [vmem:[#allocation6 + $0x380] ss:$16 sps:$4 sm:$0xff]   ;;  %v7240_v59 = vld [vmem:[#allocation6 + $0x388] ss:$16 sps:$4 sm:$0xff]  }
 0x2c4   : > { %v8902_v45 = vpop.f32.mrf.mxu1  ;;  %v8904_v58 = vpop.f32.mrf.mxu0 }
 0x2c5   : > { %10774 = vst [vmem:[#allocation79_spill] sm:$0xff] %v8898_v2  ;;  %10775 = vst [vmem:[#allocation82_spill] sm:$0xff] %v8900_v37  ;;  %v8906_v42 = vpack.c.bf16 %v3611_v55, %v3609_v27  ;;  %v7245_v27 = vld [vmem:[#allocation6 + $0x3a4] ss:$16 sps:$4 sm:$0xff]   ;;  %v7248_v55 = vld [vmem:[#allocation6 + $0x3ac] ss:$16 sps:$4 sm:$0xff]  }
 0x2c6   : > { %10776 = vst [vmem:[#allocation113_spill] sm:$0xff] %v8904_v58  ;;  %v8908_v9 = vpop.f32.mrf.mxu1  ;;  %v8910_v13 = vpop.f32.mrf.mxu0  ;;  %v10790_v37 = vld [vmem:[#allocation19_spill] sm:$0xff] }
 0x2c7   : > { %10777 = vst [vmem:[#allocation114_spill] sm:$0xff] %v8906_v42  ;;  %10778 = vst [vmem:[#allocation115_spill] sm:$0xff] %v8910_v13  ;;  %v8950_v44 = vadd.f32 %v8908_v9, %v10782_v18 }
 0x2c8   : > { %3201 = vmatmul.mubr.bf16.gmra.mxu1 %v7231_v62  ;;  %3554 = vmatmul.mubr.bf16.gmra.mxu0 %v7234_v60  ;;  %v8912_v31 = vpop.f32.mrf.mxu1  ;;  %v8914_v26 = vpop.f32.mrf.mxu0 }
 0x2c9   : > { %10779 = vst [vmem:[#allocation116_spill] sm:$0xff] %v8914_v26  ;;  %3210 = vmatprep.mubr.bf16.mxu1 %v7239_v61  ;;  %3563 = vmatprep.mubr.bf16.mxu0 %v7242_v54 }
 0x2ca   : > { %v8916_v25 = vpop.f32.mrf.mxu1  ;;  %v8918_v0 = vpop.f32.mrf.mxu0 }
 0x2cb   : > { %v8954_v32 = vadd.f32 %v8916_v25, %v10784_v56 }
 0x2cc   : > { %v8920_v12 = vpop.f32.mrf.mxu1  ;;  %v8922_v22 = vpop.f32.mrf.mxu0 }
 0x2ce   : > { %v8924_v62 = vpop.f32.mrf.mxu1  ;;  %v8926_v60 = vpop.f32.mrf.mxu0 }
 0x2d0   : > { %3211 = vmatmul.mubr.bf16.gmra.mxu1 %v7237_v39  ;;  %3564 = vmatmul.mubr.bf16.gmra.mxu0 %v7240_v59  ;;  %v8928_v61 = vpop.f32.mrf.mxu1  ;;  %v8930_v54 = vpop.f32.mrf.mxu0 }
 0x2d1   : > { %3220 = vmatprep.mubr.bf16.mxu1 %v7245_v27  ;;  %3573 = vmatprep.mubr.bf16.mxu0 %v7248_v55 }
 0x2d2   : > { %v2974_v29 = vpop.f32.mrf.mxu1  ;;  %v8932_v49 = vpop.f32.mrf.mxu0 }
 0x2d3   : > { %v2975_v6 = vadd.f32 %v2974_v29, %v10788_v51 }
 0x2d4   : > { %v2976_v36 = vpop.f32.mrf.mxu1  ;;  %v8934_v40 = vpop.f32.mrf.mxu0 }
 0x2d5   : > { %v2977_v58 = vadd.f32 %v2976_v36, %v10790_v37 }
 0x2d6   : > { %v2978_v48 = vpop.f32.mrf.mxu1  ;;  %v8936_v34 = vpop.f32.mrf.mxu0 }
 0x2d8   : > { %3221 = vmatmul.mubr.bf16.gmra.mxu1 %v7243_v8  ;;  %3574 = vmatmul.mubr.bf16.gmra.mxu0 %v7246_v24  ;;  %v8938_v39 = vpop.f32.mrf.mxu1  ;;  %v8940_v59 = vpop.f32.mrf.mxu0 }
 0x2d9   : > { %3230 = vmatprep.mubr.bf16.mxu1 %v7251_v15  ;;  %3583 = vmatprep.mubr.bf16.mxu0 %v7254_v19 }
 0x2da   : > { %v2984_v27 = vpop.f32.mrf.mxu1  ;;  %v8942_v55 = vpop.f32.mrf.mxu0 }
 0x2dc   : > { %v2986_v3 = vpop.f32.mrf.mxu1  ;;  %v8944_v1 = vpop.f32.mrf.mxu0 }
 0x2de   : > { %v2988_v50 = vpop.f32.mrf.mxu1  ;;  %v3341_v46 = vpop.f32.mrf.mxu0 }
 0x2df   : > { %v2989_v25 = vadd.f32 %v2988_v50, %v10789_v5 }
 0x2e0   : > { %3231 = vmatmul.mubr.bf16.gmra.mxu1 %v7249_v28  ;;  %3584 = vmatmul.mubr.bf16.gmra.mxu0 %v7252_v43  ;;  %v2992_v24 = vpop.f32.mrf.mxu1  ;;  %v3345_v8 = vpop.f32.mrf.mxu0  ;;  %v10780_v28 = vld [vmem:[#allocation87_spill] sm:$0xff] }
 0x2e1   : > { %3240 = vmatprep.mubr.bf16.mxu1 %v7257_v16  ;;  %3593 = vmatprep.mubr.bf16.mxu0 %v7260_v38  ;;  %v10781_v16 = vld [vmem:[#allocation65_spill] sm:$0xff]  ;;  %10783 = vst [vmem:[#allocation87_spill] sm:$0xff] %v8950_v44  ;;  %v3342_v36 = vadd.f32 %v3341_v46, %v2989_v25 }
 0x2e2   : > { %v2994_v15 = vpop.f32.mrf.mxu1  ;;  %v3347_v19 = vpop.f32.mrf.mxu0 }
 0x2e4   : > { %v2996_v41 = vpop.f32.mrf.mxu1  ;;  %v3349_v10 = vpop.f32.mrf.mxu0 }
 0x2e5   : > { %v2997_v2 = vadd.f32 %v2996_v41, %v10780_v28  ;;  %v2987_v41 = vadd.f32 %v2986_v3, %v10789_v5 }
 0x2e6   : > { %v2998_v47 = vpop.f32.mrf.mxu1  ;;  %v3351_v17 = vpop.f32.mrf.mxu0 }
 0x2e7   : > { %v2999_v43 = vadd.f32 %v2998_v47, %v10780_v28  ;;  %v2969_v47 = vadd.f32 %v8924_v62, %v10785_v33  ;;  %v10791_v62 = vld [vmem:[#allocation23_spill] sm:$0xff] }
 0x2e8   : > { %3241 = vmatmul.mubr.bf16.gmra.mxu1 %v7255_v23  ;;  %3594 = vmatmul.mubr.bf16.gmra.mxu0 %v7258_v30  ;;  %v3002_v53 = vpop.f32.mrf.mxu1  ;;  %v3355_v57 = vpop.f32.mrf.mxu0 }
 0x2e9   : > { %4980 = vmatprep.mubr.bf16.mxu1 %v7263_v14  ;;  %v3003_v23 = vadd.f32 %v3002_v53, %v10781_v16  ;;  %v8959_v14 = vadd.f32 %v8920_v12, %v10785_v33  ;;  %v3352_v53 = vadd.f32 %v3351_v17, %v2999_v43  ;;  %v2979_v33 = vadd.f32 %v2978_v48, %v10790_v37  ;;  %v10792_v43 = vld [vmem:[#allocation94_spill] sm:$0xff] }
 0x2ea   : > { %v3004_v63 = vpop.f32.mrf.mxu1  ;;  %v3357_v35 = vpop.f32.mrf.mxu0 }
 0x2eb   : > { %v3005_v38 = vadd.f32 %v3004_v63, %v10781_v16  ;;  %v10786_v63 = vld [vmem:[#allocation88_spill] sm:$0xff]  ;;  %v3356_v29 = vadd.f32 %v3355_v57, %v3003_v23  ;;  %v2983_v57 = vadd.f32 %v8938_v39, %v10791_v62 }
 0x2ec   : > { %v3006_v30 = vpop.f32.mrf.mxu1  ;;  %v3359_v7 = vpop.f32.mrf.mxu0  ;;  %v2995_v52 = vadd.f32 %v2994_v15, %v10786_v63  ;;  %v2985_v15 = vadd.f32 %v2984_v27, %v10791_v62 }
 0x2ed   : > { %v3007_v9 = vadd.f32 %v3006_v30, %v10787_v21  ;;  %v3358_v12 = vadd.f32 %v3357_v35, %v3005_v38  ;;  %v2993_v30 = vadd.f32 %v2992_v24, %v10786_v63  ;;  %v3350_v35 = vadd.f32 %v3349_v10, %v2997_v2  ;;  %v10794_v2 = vld [vmem:[#allocation93_spill] sm:$0xff] }
 0x2ee   : > { %v3008_v16 = vpop.f32.mrf.mxu1  ;;  %v3361_v42 = vpop.f32.mrf.mxu0  ;;  %v3348_v17 = vadd.f32 %v3347_v19, %v2995_v52  ;;  %v3338_v3 = vadd.f32 %v8942_v55, %v2985_v15  ;;  %v3632_v5 = vmax.f32 %v3356_v29, 0.0  ;;  %v3332_v19 = vadd.f32 %v8936_v34, %v2979_v33 }
 0x2ef   : > { %v3360_v26 = vadd.f32 %v3359_v7, %v3007_v9  ;;  %v3009_v20 = vadd.f32 %v3008_v16, %v10787_v21  ;;  %v3631_v7 = vmax.f32 %v3352_v53, 0.0  ;;  %v3633_v48 = vmax.f32 %v3358_v12, 0.0 }
 0x2f0   : > { %v3012_v13 = vpop.f32.mrf.mxu1  ;;  %v3365_v50 = vpop.f32.mrf.mxu0  ;;  %v3346_v52 = vadd.f32 %v3345_v8, %v2993_v30  ;;  %v3629_v46 = vmax.f32 %v3348_v17, 0.0  ;;  %v3630_v23 = vmax.f32 %v3350_v35, 0.0  ;;  %v8989_v55 = vadd.f32 %v8926_v60, %v2969_v47  ;;  %v10797_v60 = vld [vmem:[#allocation47_spill] sm:$0xff] }
 0x2f1   : > { %v3362_v28 = vadd.f32 %v3361_v42, %v3009_v20  ;;  %v3013_v44 = vadd.f32 %v3012_v13, %v10792_v43  ;;  %v3634_v38 = vmax.f32 %v3360_v26, 0.0  ;;  %v3627_v8 = vmax.f32 %v3342_v36, 0.0 }
 0x2f2   : > { %v3014_v21 = vpop.f32.mrf.mxu1  ;;  %v3367_v9 = vpop.f32.mrf.mxu0  ;;  %v3745_v16 = vpack.c.bf16 %v3631_v7, %v3629_v46  ;;  %v2973_v12 = vadd.f32 %v8928_v61, %v10788_v51  ;;  %v3328_v34 = vadd.f32 %v8932_v49, %v2975_v6  ;;  %v3628_v33 = vmax.f32 %v3346_v52, 0.0 }
 0x2f3   : > { %v3635_v37 = vmax.f32 %v3362_v28, 0.0  ;;  %v3366_v27 = vadd.f32 %v3365_v50, %v3013_v44  ;;  %v3015_v24 = vadd.f32 %v3014_v21, %v10792_v43  ;;  %v3340_v44 = vadd.f32 %v8944_v1, %v2987_v41 }
 0x2f4   : > { %v3016_v20 = vpop.f32.mrf.mxu1  ;;  %v3369_v42 = vpop.f32.mrf.mxu0  ;;  %v3746_v63 = vpack.c.bf16 %v3634_v38, %v3632_v5  ;;  %v3336_v1 = vadd.f32 %v8940_v59, %v2983_v57  ;;  %v3625_v30 = vmax.f32 %v3338_v3, 0.0  ;;  %v3330_v41 = vadd.f32 %v8934_v40, %v2977_v58  ;;  %v10802_v3 = vld [vmem:[#allocation87_spill] sm:$0xff] }
 0x2f5   : > { %v8979_v10 = vadd.f32 %v3367_v9, %v3015_v24  ;;  %v3017_v13 = vadd.f32 %v3016_v20, %v10794_v2  ;;  %v3747_v26 = vpack.c.bf16 %v3635_v37, %v3633_v48  ;;  %v3636_v29 = vmax.f32 %v3366_v27, 0.0  ;;  %v10800_v27 = vld [vmem:[#allocation25_spill] sm:$0xff] }
 0x2f6   : > { %v8984_v25 = vpop.f32.mrf.mxu1  ;;  %v8986_v39 = vpop.f32.mrf.mxu0  ;;  %v3623_v17 = vmax.f32 %v3332_v19, 0.0  ;;  %v3626_v28 = vmax.f32 %v3340_v44, 0.0  ;;  %v3744_v43 = vpack.c.bf16 %v3630_v23, %v3628_v33  ;;  %v3743_v36 = vpack.c.bf16 %v3627_v8, %v3625_v30  ;;  %v10806_v23 = vld [vmem:[#allocation61_spill] sm:$0xff] }
 0x2f7   : > { %10793 = vst [vmem:[#allocation65_spill] sm:$0xff] %v8979_v10  ;;  %10795 = vst [vmem:[#allocation81_spill] sm:$0xff] %v8984_v25  ;;  %v3370_v53 = vadd.f32 %v3369_v42, %v3017_v13  ;;  %4948 = vmatprep.subr.bf16.mxu1 %v3747_v26  ;;  %v2955_v35 = vadd.f32 %v8894_v4, %v10772_v11  ;;  %v2963_v7 = vadd.f32 %v8912_v31, %v10784_v56  ;;  %v10804_v42 = vld [vmem:[#allocation80_spill] sm:$0xff]  ;;  %v10807_v8 = vld [vmem:[#allocation113_spill] sm:$0xff] }
 0x2f8   : > { %10796 = vst [vmem:[#allocation71_spill] sm:$0xff] %v8986_v39  ;;  %v3022_v62 = vpop.f32.mrf.mxu1  ;;  %v3375_v15 = vpop.f32.mrf.mxu0  ;;  %4949 = vmatpush1.bf16.msra.mxu1 %v3746_v63  ;;  %v3326_v38 = vadd.f32 %v8930_v54, %v2973_v12  ;;  %v3624_v40 = vmax.f32 %v3336_v1, 0.0  ;;  %v3318_v9 = vadd.f32 %v8918_v0, %v8954_v32  ;;  %v3621_v48 = vmax.f32 %v3328_v34, 0.0  ;;  %v10803_v32 = vld [vmem:[#allocation115_spill] sm:$0xff]  ;;  %v10805_v13 = vld [vmem:[#allocation116_spill] sm:$0xff] }
 0x2f9   : > { %v3638_v50 = vmax.f32 %v3370_v53, 0.0  ;;  %v3023_v47 = vadd.f32 %v3022_v62, %v10797_v60  ;;  %4950 = vmatprep.subr.bf16.mxu1 %v3745_v16  ;;  %v2957_v11 = vadd.f32 %v8902_v45, %v10782_v18  ;;  %v3320_v56 = vadd.f32 %v8922_v22, %v8959_v14  ;;  %v10825_v10 = vld [vmem:[#allocation27_spill] sm:$0xff] }
 0x2fa   : > { %v3024_v51 = vpop.f32.mrf.mxu1  ;;  %v3377_v61 = vpop.f32.mrf.mxu0  ;;  %v3622_v4 = vmax.f32 %v3330_v41, 0.0  ;;  %v3742_v31 = vpack.c.bf16 %v3626_v28, %v3624_v40  ;;  %v3312_v0 = vadd.f32 %v10803_v32, %v10802_v3  ;;  %v3619_v52 = vmax.f32 %v8989_v55, 0.0  ;;  %v10827_v39 = vld [vmem:[#allocation99_spill] sm:$0xff] }
 0x2fb   : > { %v8997_v49 = vpack.c.bf16 %v3638_v50, %v3636_v29  ;;  %v3376_v6 = vadd.f32 %v3375_v15, %v3023_v47  ;;  %v3025_v59 = vadd.f32 %v3024_v51, %v10797_v60  ;;  %v3741_v20 = vpack.c.bf16 %v3623_v17, %v3621_v48  ;;  %v10813_v51 = vld [vmem:[#allocation82_spill] sm:$0xff] }
 0x2fc   : > { %v3026_v58 = vpop.f32.mrf.mxu1  ;;  %v3379_v21 = vpop.f32.mrf.mxu0  ;;  %4951 = vmatpush1.bf16.msra.mxu1 %v3744_v43  ;;  %v3308_v46 = vadd.f32 %v10804_v42, %v2955_v35  ;;  %v3316_v18 = vadd.f32 %v10805_v13, %v2963_v7  ;;  %v3620_v45 = vmax.f32 %v3326_v38, 0.0  ;;  %v3617_v14 = vmax.f32 %v3318_v9, 0.0 }
 0x2fd   : > { %10798 = vst [vmem:[#allocation24_spill] sm:$0xff] %v8997_v49  ;;  %v9007_v37 = vadd.f32 %v3377_v61, %v3025_v59  ;;  %v3027_v24 = vadd.f32 %v3026_v58, %v10800_v27  ;;  %4952 = vmatprep.subr.bf16.mxu1 %v3743_v36  ;;  %v3640_v19 = vmax.f32 %v3376_v6, 0.0  ;;  %v3310_v53 = vadd.f32 %v10807_v8, %v2957_v11  ;;  %v10815_v58 = vld [vmem:[#allocation114_spill] sm:$0xff]  ;;  %v10816_v11 = vld [vmem:[#allocation79_spill] sm:$0xff] }
 0x2fe   : > { %v9014_v54 = vpop.f32.mrf.mxu1  ;;  %v9016_v57 = vpop.f32.mrf.mxu0  ;;  %v3618_v16 = vmax.f32 %v3320_v56, 0.0  ;;  %v3740_v55 = vpack.c.bf16 %v3622_v4, %v3620_v45  ;;  %v3615_v1 = vmax.f32 %v3312_v0, 0.0  ;;  %v3739_v15 = vpack.c.bf16 %v3619_v52, %v3617_v14  ;;  %v10817_v56 = vld [vmem:[#allocation72_spill] sm:$0xff]  ;;  %v10818_v0 = vld [vmem:[#allocation73_spill] sm:$0xff] }
 0x2ff   : > { %10799 = vst [vmem:[#allocation88_spill] sm:$0xff] %v9007_v37  ;;  %10801 = vst [vmem:[#allocation63_spill] sm:$0xff] %v9016_v57  ;;  %v3380_v5 = vadd.f32 %v3379_v21, %v3027_v24  ;;  %v3616_v30 = vmax.f32 %v3316_v18, 0.0  ;;  %v3613_v60 = vmax.f32 %v3308_v46, 0.0  ;;  %v3614_v47 = vmax.f32 %v3310_v53, 0.0 }
 0x300   : > { %v3032_v26 = vpop.f32.mrf.mxu1  ;;  %v3385_v22 = vpop.f32.mrf.mxu0  ;;  %4953 = vmatpush1.bf16.msra.mxu1 %v3742_v31  ;;  %v3612_v61 = vmax.f32 %v10813_v51, 0.0 }
 0x301   : > { %v3642_v44 = vmax.f32 %v3380_v5, 0.0  ;;  %v3033_v63 = vadd.f32 %v3032_v26, %v10806_v23  ;;  %4954 = vmatprep.subr.bf16.mxu1 %v3741_v20  ;;  %v3738_v41 = vpack.c.bf16 %v3618_v16, %v3616_v30  ;;  %v3737_v43 = vpack.c.bf16 %v3615_v1, %v3613_v60  ;;  %v10819_v30 = vld [vmem:[#allocation57_spill] sm:$0xff] }
 0x302   : > { %v9025_v12 = vpop.f32.mrf.mxu1  ;;  %v9027_v34 = vpop.f32.mrf.mxu0  ;;  %v3736_v36 = vpack.c.bf16 %v3614_v47, %v3612_v61  ;;  %v9072_v61 = vadd.f32 %v9014_v54, %v10800_v27  ;;  %v10828_v54 = vld [vmem:[#allocation39_spill] sm:$0xff] }
 0x303   : > { %10808 = vst [vmem:[#allocation22_spill] sm:$0xff] %v9027_v34  ;;  %v9029_v33 = vpack.c.bf16 %v3642_v44, %v3640_v19  ;;  %v9031_v62 = vadd.f32 %v3385_v22, %v3033_v63 }
 0x304   : > { %v9033_v29 = vpop.f32.mrf.mxu1  ;;  %v9035_v50 = vpop.f32.mrf.mxu0  ;;  %4955 = vmatpush1.bf16.msra.mxu1 %v3740_v55  ;;  %10821 = vst [vmem:[#allocation25_spill] sm:$0xff] %v9072_v61 }
 0x305   : > { %10809 = vst [vmem:[#allocation20_spill] sm:$0xff] %v9029_v33  ;;  %10810 = vst [vmem:[#allocation19_spill] sm:$0xff] %v9031_v62  ;;  %4956 = vmatprep.subr.bf16.mxu1 %v3739_v15 }
 0x306   : > { %10811 = vst [vmem:[#allocation23_spill] sm:$0xff] %v9035_v50  ;;  %v3038_v17 = vpop.f32.mrf.mxu1  ;;  %v9037_v28 = vpop.f32.mrf.mxu0 }
 0x307   : > { %10812 = vst [vmem:[#allocation94_spill] sm:$0xff] %v9037_v28 }
 0x308   : > { %v9040_v6 = vpop.f32.mrf.mxu1  ;;  %v9042_v59 = vpop.f32.mrf.mxu0  ;;  %4957 = vmatpush1.bf16.msra.mxu1 %v3738_v41 }
 0x309   : > { %10814 = vst [vmem:[#allocation47_spill] sm:$0xff] %v9042_v59  ;;  %4958 = vmatprep.subr.bf16.mxu1 %v3737_v43  ;;  %v10820_v43 = vld [vmem:[#allocation58_spill] sm:$0xff] }
 0x30a   : > { %v3044_v35 = vpop.f32.mrf.mxu1  ;;  %v9044_v7 = vpop.f32.mrf.mxu0 }
 0x30c   : > { %v3046_v38 = vpop.f32.mrf.mxu1  ;;  %v9046_v40 = vpop.f32.mrf.mxu0  ;;  %4959 = vmatpush1.bf16.msra.mxu1 %v3736_v36  ;;  %v10822_v36 = vld [vmem:[#allocation76_spill] sm:$0xff] }
 0x30d   : > { %4960 = vmatprep.subr.bf16.mxu1 %v10815_v58  ;;  %v9075_v58 = vadd.f32 %v3038_v17, %v10822_v36  ;;  %v10829_v17 = vld [vmem:[#allocation74_spill] sm:$0xff] }
 0x30e   : > { %v3048_v21 = vpop.f32.mrf.mxu1  ;;  %v9049_v9 = vpop.f32.mrf.mxu0 }
 0x30f   : > { %10823 = vst [vmem:[#allocation87_spill] sm:$0xff] %v9075_v58  ;;  %v3049_v37 = vadd.f32 %v3048_v21, %v10825_v10  ;;  %v10831_v21 = vld [vmem:[#allocation40_spill] sm:$0xff] }
 0x310   : > { %v9051_v48 = vpop.f32.mrf.mxu1  ;;  %v9053_v24 = vpop.f32.mrf.mxu0  ;;  %4961 = vmatpush1.bf16.msra.mxu1 %v10816_v11  ;;  %v10824_v11 = vld [vmem:[#allocation77_spill] sm:$0xff] }
 0x311   : > { %4962 = vmatprep.subr.bf16.mxu1 %v10817_v56  ;;  %v9078_v56 = vadd.f32 %v3044_v35, %v10824_v11 }
 0x312   : > { %v3054_v4 = vpop.f32.mrf.mxu1  ;;  %v9057_v31 = vpop.f32.mrf.mxu0 }
 0x313   : > { %v3055_v50 = vadd.f32 %v3054_v4, %v10828_v54 }
 0x314   : > { %v3056_v3 = vpop.f32.mrf.mxu1  ;;  %v9059_v32 = vpop.f32.mrf.mxu0  ;;  %4963 = vmatpush1.bf16.msra.mxu1 %v10818_v0 }
 0x316   : > { %v3058_v52 = vpop.f32.mrf.mxu1  ;;  %v9062_v5 = vpop.f32.mrf.mxu0 }
 0x318   : > { %v3062_v20 = vpop.f32.mrf.mxu1  ;;  %v9064_v42 = vpop.f32.mrf.mxu0 }
 0x31a   : > { %v3064_v46 = vpop.f32.mrf.mxu1  ;;  %v3417_v13 = vpop.f32.mrf.mxu0 }
 0x31c   : > { %v3066_v18 = vpop.f32.mrf.mxu1  ;;  %v9066_v45 = vpop.f32.mrf.mxu0 }
 0x31e   : > { %v3068_v26 = vpop.f32.mrf.mxu1  ;;  %v3421_v22 = vpop.f32.mrf.mxu0 }
 0x31f   : > { %v3069_v57 = vadd.f32 %v3068_v26, %v10829_v17 }
 0x320   : > { %v3072_v14 = vpop.f32.mrf.mxu1  ;;  %v3425_v19 = vpop.f32.mrf.mxu0 }
 0x322   : > { %v3074_v44 = vpop.f32.mrf.mxu1  ;;  %v3427_v63 = vpop.f32.mrf.mxu0 }
 0x324   : > { %v3076_v8 = vpop.f32.mrf.mxu1  ;;  %v3429_v53 = vpop.f32.mrf.mxu0 }
 0x325   : > { %v3077_v35 = vadd.f32 %v3076_v8, %v10819_v30  ;;  %v3067_v8 = vadd.f32 %v3066_v18, %v10829_v17 }
 0x326   : > { %v3078_v16 = vpop.f32.mrf.mxu1  ;;  %v3431_v55 = vpop.f32.mrf.mxu0 }
 0x327   : > { %v3079_v60 = vadd.f32 %v3078_v16, %v10819_v30  ;;  %v9082_v16 = vadd.f32 %v3046_v38, %v10825_v10 }
 0x328   : > { %v3082_v1 = vpop.f32.mrf.mxu1  ;;  %v3435_v15 = vpop.f32.mrf.mxu0 }
 0x329   : > { %v3083_v0 = vadd.f32 %v3082_v1, %v10820_v43  ;;  %v3432_v61 = vadd.f32 %v3431_v55, %v3079_v60  ;;  %v10832_v60 = vld [vmem:[#allocation45_spill] sm:$0xff] }
 0x32a   : > { %v3084_v47 = vpop.f32.mrf.mxu1  ;;  %v3437_v41 = vpop.f32.mrf.mxu0 }
 0x32b   : > { %v3085_v51 = vadd.f32 %v3084_v47, %v10820_v43  ;;  %v10826_v47 = vld [vmem:[#allocation75_spill] sm:$0xff]  ;;  %v10830_v43 = vld [vmem:[#allocation28_spill] sm:$0xff]  ;;  %v3436_v4 = vadd.f32 %v3435_v15, %v3083_v0  ;;  %v3063_v15 = vadd.f32 %v3062_v20, %v10831_v21 }
 0x32c   : > { %v3086_v49 = vpop.f32.mrf.mxu1  ;;  %v3439_v33 = vpop.f32.mrf.mxu0  ;;  %v3075_v62 = vadd.f32 %v3074_v44, %v10826_v47  ;;  %v3057_v34 = vadd.f32 %v3056_v3, %v10830_v43  ;;  %v3059_v10 = vadd.f32 %v3058_v52, %v10830_v43  ;;  %v3065_v44 = vadd.f32 %v3064_v46, %v10831_v21 }
 0x32d   : > { %v3087_v27 = vadd.f32 %v3086_v49, %v10827_v39  ;;  %v3438_v25 = vadd.f32 %v3437_v41, %v3085_v51  ;;  %v3073_v49 = vadd.f32 %v3072_v14, %v10826_v47  ;;  %v3422_v3 = vadd.f32 %v3421_v22, %v3069_v57  ;;  %v10834_v57 = vld [vmem:[#allocation49_spill] sm:$0xff] }
 0x32e   : > { %v3088_v59 = vpop.f32.mrf.mxu1  ;;  %v3441_v1 = vpop.f32.mrf.mxu0  ;;  %v3428_v55 = vadd.f32 %v3427_v63, %v3075_v62  ;;  %v3430_v41 = vadd.f32 %v3429_v53, %v3077_v35  ;;  %v3418_v0 = vadd.f32 %v3417_v13, %v3065_v44  ;;  %v3664_v18 = vmax.f32 %v3436_v4, 0.0 }
 0x32f   : > { %v3440_v38 = vadd.f32 %v3439_v33, %v3087_v27  ;;  %v3089_v2 = vadd.f32 %v3088_v59, %v10827_v39  ;;  %v3663_v33 = vmax.f32 %v3432_v61, 0.0  ;;  %v3665_v52 = vmax.f32 %v3438_v25, 0.0 }
 0x330   : > { %v3092_v28 = vpop.f32.mrf.mxu1  ;;  %v3445_v26 = vpop.f32.mrf.mxu0  ;;  %v3426_v47 = vadd.f32 %v3425_v19, %v3073_v49  ;;  %v3661_v63 = vmax.f32 %v3428_v55, 0.0  ;;  %v3412_v61 = vadd.f32 %v9062_v5, %v3059_v10  ;;  %v3420_v25 = vadd.f32 %v9066_v45, %v3067_v8 }
 0x331   : > { %v3442_v30 = vadd.f32 %v3441_v1, %v3089_v2  ;;  %v3093_v58 = vadd.f32 %v3092_v28, %v10832_v60  ;;  %v3666_v51 = vmax.f32 %v3440_v38, 0.0  ;;  %v9109_v13 = vadd.f32 %v9049_v9, %v3049_v37  ;;  %v10837_v37 = vld [vmem:[#allocation38_spill] sm:$0xff] }
 0x332   : > { %v3094_v39 = vpop.f32.mrf.mxu1  ;;  %v3447_v59 = vpop.f32.mrf.mxu0  ;;  %v3659_v19 = vmax.f32 %v3422_v3, 0.0  ;;  %v3761_v43 = vpack.c.bf16 %v3663_v33, %v3661_v63  ;;  %v3053_v38 = vadd.f32 %v9051_v48, %v10828_v54  ;;  %v3408_v5 = vadd.f32 %v9057_v31, %v3055_v50  ;;  %v10845_v63 = vld [vmem:[#allocation81_spill] sm:$0xff] }
 0x333   : > { %v3667_v27 = vmax.f32 %v3442_v30, 0.0  ;;  %v3446_v46 = vadd.f32 %v3445_v26, %v3093_v58  ;;  %v3095_v14 = vadd.f32 %v3094_v39, %v10832_v60  ;;  %v3662_v58 = vmax.f32 %v3430_v41, 0.0 }
 0x334   : > { %v3096_v62 = vpop.f32.mrf.mxu1  ;;  %v3449_v2 = vpop.f32.mrf.mxu0  ;;  %v3762_v17 = vpack.c.bf16 %v3666_v51, %v3664_v18  ;;  %v3416_v45 = vadd.f32 %v9064_v42, %v3063_v15  ;;  %v3660_v10 = vmax.f32 %v3426_v47, 0.0  ;;  %v3657_v49 = vmax.f32 %v3418_v0, 0.0  ;;  %v10842_v0 = vld [vmem:[#allocation87_spill] sm:$0xff] }
 0x335   : > { %v9099_v28 = vadd.f32 %v3447_v59, %v3095_v14  ;;  %v3097_v22 = vadd.f32 %v3096_v62, %v10834_v57  ;;  %v3763_v53 = vpack.c.bf16 %v3667_v27, %v3665_v52  ;;  %v3668_v4 = vmax.f32 %v3446_v46, 0.0  ;;  %v10840_v46 = vld [vmem:[#allocation42_spill] sm:$0xff] }
 0x336   : > { %v9104_v35 = vpop.f32.mrf.mxu1  ;;  %v9106_v20 = vpop.f32.mrf.mxu0  ;;  %v3410_v8 = vadd.f32 %v9059_v32, %v3057_v34  ;;  %v3655_v55 = vmax.f32 %v3412_v61, 0.0  ;;  %v3658_v30 = vmax.f32 %v3420_v25, 0.0  ;;  %v3760_v60 = vpack.c.bf16 %v3662_v58, %v3660_v10 }
 0x337   : > { %10833 = vst [vmem:[#allocation115_spill] sm:$0xff] %v9099_v28  ;;  %10835 = vst [vmem:[#allocation80_spill] sm:$0xff] %v9104_v35  ;;  %v3450_v1 = vadd.f32 %v3449_v2, %v3097_v22  ;;  %4964 = vmatprep.subr.bf16.mxu1 %v3763_v53  ;;  %v3759_v3 = vpack.c.bf16 %v3659_v19, %v3657_v49  ;;  %v3035_v41 = vadd.f32 %v9025_v12, %v10806_v23  ;;  %v10844_v2 = vld [vmem:[#allocation93_spill] sm:$0xff]  ;;  %v10847_v53 = vld [vmem:[#allocation47_spill] sm:$0xff] }
 0x338   : > { %10836 = vst [vmem:[#allocation116_spill] sm:$0xff] %v9106_v20  ;;  %v3102_v21 = vpop.f32.mrf.mxu1  ;;  %v3455_v44 = vpop.f32.mrf.mxu0  ;;  %4965 = vmatpush2.bf16.msra.mxu1 %v3762_v17  ;;  %v3043_v33 = vadd.f32 %v9040_v6, %v10824_v11  ;;  %v3406_v51 = vadd.f32 %v9053_v24, %v3053_v38  ;;  %v3656_v34 = vmax.f32 %v3416_v45, 0.0  ;;  %v3398_v59 = vadd.f32 %v9044_v7, %v9078_v56  ;;  %v10843_v7 = vld [vmem:[#allocation94_spill] sm:$0xff]  ;;  %v10850_v38 = vld [vmem:[#allocation63_spill] sm:$0xff]  ;;  %v10872_v20 = vld [vmem:[#allocation32_spill] sm:$0xff] }
 0x339   : > { %v3670_v26 = vmax.f32 %v3450_v1, 0.0  ;;  %v3103_v9 = vadd.f32 %v3102_v21, %v10837_v37  ;;  %4966 = vmatprep.subr.bf16.mxu1 %v3761_v43  ;;  %v3653_v52 = vmax.f32 %v3408_v5, 0.0  ;;  %v3037_v23 = vadd.f32 %v9033_v29, %v10822_v36  ;;  %v10846_v29 = vld [vmem:[#allocation22_spill] sm:$0xff]  ;;  %v10848_v1 = vld [vmem:[#allocation37_spill] sm:$0xff]  ;;  %v10851_v45 = vld [vmem:[#allocation23_spill] sm:$0xff] }
 0x33a   : > { %v3104_v48 = vpop.f32.mrf.mxu1  ;;  %v3457_v54 = vpop.f32.mrf.mxu0  ;;  %v3400_v12 = vadd.f32 %v9046_v40, %v9082_v16  ;;  %v3654_v6 = vmax.f32 %v3410_v8, 0.0  ;;  %v3758_v24 = vpack.c.bf16 %v3658_v30, %v3656_v34  ;;  %v3392_v56 = vadd.f32 %v10843_v7, %v10842_v0  ;;  %v7275_v28 = vld [vmem:[#allocation9 + $0x84] ss:$16 sps:$4 sm:$0xff]   ;;  %v10875_v35 = vld [vmem:[#allocation33_spill] sm:$0xff] }
 0x33b   : > { %v9117_v50 = vpack.c.bf16 %v3670_v26, %v3668_v4  ;;  %v3456_v31 = vadd.f32 %v3455_v44, %v3103_v9  ;;  %v3105_v42 = vadd.f32 %v3104_v48, %v10837_v37  ;;  %v3651_v47 = vmax.f32 %v9109_v13, 0.0  ;;  %v10849_v13 = vld [vmem:[#allocation25_spill] sm:$0xff] }
 0x33c   : > { %v3106_v32 = vpop.f32.mrf.mxu1  ;;  %v3459_v39 = vpop.f32.mrf.mxu0  ;;  %4967 = vmatpush2.bf16.msra.mxu1 %v3760_v60  ;;  %v3757_v62 = vpack.c.bf16 %v3655_v55, %v3653_v52  ;;  %v3019_v22 = vadd.f32 %v10845_v63, %v10844_v2  ;;  %v3388_v36 = vadd.f32 %v10846_v29, %v3035_v41  ;;  %v3396_v40 = vadd.f32 %v10847_v53, %v3043_v33  ;;  %v10857_v41 = vld [vmem:[#allocation71_spill] sm:$0xff]  ;;  %v10862_v53 = vld [vmem:[#allocation20_spill] sm:$0xff] }
 0x33d   : > { %10838 = vst [vmem:[#allocation61_spill] sm:$0xff] %v9117_v50  ;;  %v9127_v27 = vadd.f32 %v3457_v54, %v3105_v42  ;;  %v3107_v14 = vadd.f32 %v3106_v32, %v10840_v46  ;;  %4968 = vmatprep.subr.bf16.mxu1 %v3759_v3  ;;  %v3652_v16 = vmax.f32 %v3406_v51, 0.0  ;;  %v3649_v58 = vmax.f32 %v3398_v59, 0.0  ;;  %v10858_v32 = vld [vmem:[#allocation19_spill] sm:$0xff] }
 0x33e   : > { %v9134_v11 = vpop.f32.mrf.mxu1  ;;  %v9136_v15 = vpop.f32.mrf.mxu0  ;;  %v3672_v17 = vmax.f32 %v3456_v31, 0.0  ;;  %v3382_v5 = vadd.f32 %v10850_v38, %v10849_v13  ;;  %v3390_v10 = vadd.f32 %v10851_v45, %v3037_v23  ;;  %v3650_v21 = vmax.f32 %v3400_v12, 0.0  ;;  %v10869_v50 = vld [vmem:[#allocation35_spill] sm:$0xff] }
 0x33f   : > { %10839 = vst [vmem:[#allocation113_spill] sm:$0xff] %v9127_v27  ;;  %10841 = vst [vmem:[#allocation82_spill] sm:$0xff] %v9136_v15  ;;  %v3460_v18 = vadd.f32 %v3459_v39, %v3107_v14  ;;  %v3756_v44 = vpack.c.bf16 %v3654_v6, %v3652_v16  ;;  %v3647_v26 = vmax.f32 %v3392_v56, 0.0  ;;  %v3755_v8 = vpack.c.bf16 %v3651_v47, %v3649_v58  ;;  %v10860_v14 = vld [vmem:[#allocation88_spill] sm:$0xff]  ;;  %v10870_v27 = vld [vmem:[#allocation46_spill] sm:$0xff] }
 0x340   : > { %v3112_v61 = vpop.f32.mrf.mxu1  ;;  %v3465_v25 = vpop.f32.mrf.mxu0  ;;  %4969 = vmatpush2.bf16.msra.mxu1 %v3758_v24  ;;  %v3648_v55 = vmax.f32 %v3396_v40, 0.0  ;;  %v3645_v48 = vmax.f32 %v3388_v36, 0.0  ;;  %v3646_v54 = vmax.f32 %v3390_v10, 0.0  ;;  %v3372_v33 = vadd.f32 %v10857_v41, %v3019_v22 }
 0x341   : > { %v3674_v19 = vmax.f32 %v3460_v18, 0.0  ;;  %v3113_v43 = vadd.f32 %v3112_v61, %v10848_v1  ;;  %4970 = vmatprep.subr.bf16.mxu1 %v3757_v62  ;;  %v3643_v51 = vmax.f32 %v3382_v5, 0.0  ;;  %v3644_v39 = vmax.f32 %v10858_v32, 0.0  ;;  %v10861_v18 = vld [vmem:[#allocation65_spill] sm:$0xff]  ;;  %v7261_v61 = vld [vmem:[#allocation9] ss:$16 sps:$4 sm:$0xff]  }
 0x342   : > { %v9149_v49 = vpop.f32.mrf.mxu1  ;;  %v9151_v4 = vpop.f32.mrf.mxu0  ;;  %v3754_v31 = vpack.c.bf16 %v3650_v21, %v3648_v55  ;;  %v3753_v34 = vpack.c.bf16 %v3647_v26, %v3645_v48  ;;  %v3641_v23 = vmax.f32 %v10860_v14, 0.0  ;;  %v3639_v0 = vmax.f32 %v3372_v33, 0.0  ;;  %v7269_v55 = vld [vmem:[#allocation9 + $0x44] ss:$16 sps:$4 sm:$0xff]  }
 0x343   : > { %10852 = vst [vmem:[#allocation114_spill] sm:$0xff] %v9151_v4  ;;  %v9153_v37 = vpack.c.bf16 %v3674_v19, %v3672_v17  ;;  %v9155_v9 = vadd.f32 %v3465_v25, %v3113_v43  ;;  %v3752_v12 = vpack.c.bf16 %v3646_v54, %v3644_v39  ;;  %v3637_v62 = vmax.f32 %v10861_v18, 0.0  ;;  %v10863_v17 = vld [vmem:[#allocation24_spill] sm:$0xff]  ;;  %v7314_v43 = vld [vmem:[#allocation9 + $0xc] ss:$16 sps:$4 sm:$0xff]   ;;  %v10864_v18 = vld [vmem:[#allocation34_spill] sm:$0xff] }
 0x344   : > { %v9157_v30 = vpop.f32.mrf.mxu1  ;;  %v9159_v60 = vpop.f32.mrf.mxu0  ;;  %4971 = vmatpush2.bf16.msra.mxu1 %v3756_v44  ;;  %v3751_v7 = vpack.c.bf16 %v3643_v51, %v3641_v23  ;;  %v7266_v19 = vld [vmem:[#allocation9 + $0x24] ss:$16 sps:$4 sm:$0xff]   ;;  %5333 = vmatprep.mubr.bf16.mxu0 %v7314_v43  ;;  %v7264_v44 = vld [vmem:[#allocation9 + $0x20] ss:$16 sps:$4 sm:$0xff]   ;;  %v9207_v43 = vadd.f32 %v9134_v11, %v10840_v46  ;;  %v10871_v46 = vld [vmem:[#allocation41_spill] sm:$0xff] }
 0x345   : > { %10853 = vst [vmem:[#allocation79_spill] sm:$0xff] %v9153_v37  ;;  %10854 = vst [vmem:[#allocation72_spill] sm:$0xff] %v9155_v9  ;;  %4972 = vmatprep.subr.bf16.mxu1 %v3755_v8  ;;  %v3749_v22 = vpack.c.bf16 %v3639_v0, %v3637_v62  ;;  %v7272_v14 = vld [vmem:[#allocation9 + $0x64] ss:$16 sps:$4 sm:$0xff]  }
 0x346   : > { %10855 = vst [vmem:[#allocation73_spill] sm:$0xff] %v9159_v60  ;;  %v9161_v42 = vpop.f32.mrf.mxu1  ;;  %v9163_v3 = vpop.f32.mrf.mxu0  ;;  %10866 = vst [vmem:[#allocation76_spill] sm:$0xff] %v9207_v43  ;;  %v10874_v43 = vld [vmem:[#allocation31_spill] sm:$0xff] }
 0x347   : > { %10856 = vst [vmem:[#allocation57_spill] sm:$0xff] %v9163_v3 }
 0x348   : > { %v9167_v59 = vpop.f32.mrf.mxu1  ;;  %v9169_v52 = vpop.f32.mrf.mxu0  ;;  %4973 = vmatpush2.bf16.msra.mxu1 %v3754_v31 }
 0x349   : > { %10859 = vst [vmem:[#allocation58_spill] sm:$0xff] %v9169_v52  ;;  %4974 = vmatprep.subr.bf16.mxu1 %v3753_v34  ;;  %v7267_v34 = vld [vmem:[#allocation9 + $0x40] ss:$16 sps:$4 sm:$0xff]  }
 0x34a   : > { %v3124_v6 = vpop.f32.mrf.mxu1  ;;  %v9172_v24 = vpop.f32.mrf.mxu0 }
 0x34c   : > { %v9174_v56 = vpop.f32.mrf.mxu1  ;;  %v9176_v47 = vpop.f32.mrf.mxu0  ;;  %4975 = vmatpush2.bf16.msra.mxu1 %v3752_v12 }
 0x34d   : > { %4976 = vmatprep.subr.bf16.mxu1 %v3751_v7 }
 0x34e   : > { %v3128_v2 = vpop.f32.mrf.mxu1  ;;  %v9179_v63 = vpop.f32.mrf.mxu0 }
 0x34f   : > { %v3129_v9 = vadd.f32 %v3128_v2, %v10870_v27 }
 0x350   : > { %v9181_v29 = vpop.f32.mrf.mxu1  ;;  %v9183_v36 = vpop.f32.mrf.mxu0  ;;  %4977 = vmatpush2.bf16.msra.mxu1 %v10862_v53 }
 0x351   : > { %4978 = vmatprep.subr.bf16.mxu1 %v3749_v22 }
 0x352   : > { %v3134_v40 = vpop.f32.mrf.mxu1  ;;  %v9186_v16 = vpop.f32.mrf.mxu0 }
 0x354   : > { %v3136_v25 = vpop.f32.mrf.mxu1  ;;  %v9188_v58 = vpop.f32.mrf.mxu0  ;;  %4979 = vmatpush2.bf16.msra.mxu1 %v10863_v17 }
 0x355   : > { %v9228_v57 = vadd.f32 %v3136_v25, %v10875_v35 }
 0x356   : > { %v3138_v13 = vpop.f32.mrf.mxu1  ;;  %v9191_v38 = vpop.f32.mrf.mxu0 }
 0x357   : > { %4981 = vmatmul.mubr.bf16.vlgmr.msra.gmra.mxu1 %v7261_v61  ;;  %v10865_v61 = vld [vmem:[#allocation30_spill] sm:$0xff]  ;;  %v3139_v2 = vadd.f32 %v3138_v13, %v10875_v35 }
 0x358   : > { %v9193_v5 = vpop.f32.mrf.mxu1  ;;  %v9195_v45 = vpop.f32.mrf.mxu0  ;;  %4990 = vmatprep.mubr.bf16.mxu1 %v7266_v19  ;;  %v7270_v19 = vld [vmem:[#allocation9 + $0x60] ss:$16 sps:$4 sm:$0xff]  }
 0x35a   : > { %v3144_v10 = vpop.f32.mrf.mxu1  ;;  %v9197_v21 = vpop.f32.mrf.mxu0 }
 0x35c   : > { %v3146_v26 = vpop.f32.mrf.mxu1  ;;  %v9199_v8 = vpop.f32.mrf.mxu0 }
 0x35e   : > { %v3148_v48 = vpop.f32.mrf.mxu1  ;;  %v3501_v54 = vpop.f32.mrf.mxu0 }
 0x35f   : > { %4991 = vmatmul.mubr.bf16.gmra.mxu1 %v7264_v44  ;;  %v10867_v44 = vld [vmem:[#allocation50_spill] sm:$0xff] }
 0x360   : > { %v3152_v31 = vpop.f32.mrf.mxu1  ;;  %v9201_v41 = vpop.f32.mrf.mxu0  ;;  %5000 = vmatprep.mubr.bf16.mxu1 %v7269_v55  ;;  %v9211_v55 = vadd.f32 %v9161_v42, %v10867_v44  ;;  %v10873_v42 = vld [vmem:[#allocation36_spill] sm:$0xff] }
 0x361   : > { %v3135_v15 = vadd.f32 %v3134_v40, %v10873_v42  ;;  %v3153_v40 = vadd.f32 %v3152_v31, %v10871_v46 }
 0x362   : > { %v3154_v33 = vpop.f32.mrf.mxu1  ;;  %v3507_v51 = vpop.f32.mrf.mxu0  ;;  %10868 = vst [vmem:[#allocation77_spill] sm:$0xff] %v9211_v55 }
 0x363   : > { %v3155_v11 = vadd.f32 %v3154_v33, %v10871_v46 }
 0x364   : > { %v3156_v32 = vpop.f32.mrf.mxu1  ;;  %v3509_v39 = vpop.f32.mrf.mxu0 }
 0x365   : > { %v3157_v52 = vadd.f32 %v3156_v32, %v10864_v18 }
 0x366   : > { %v3158_v23 = vpop.f32.mrf.mxu1  ;;  %v3511_v12 = vpop.f32.mrf.mxu0 }
 0x367   : > { %5001 = vmatmul.mubr.bf16.gmra.mxu1 %v7267_v34  ;;  %v3159_v62 = vadd.f32 %v3158_v23, %v10864_v18  ;;  %v9214_v34 = vadd.f32 %v3124_v6, %v10869_v50  ;;  %v3149_v6 = vadd.f32 %v3148_v48, %v10874_v43  ;;  %v3508_v18 = vadd.f32 %v3507_v51, %v3155_v11 }
 0x368   : > { %v3162_v0 = vpop.f32.mrf.mxu1  ;;  %v3515_v7 = vpop.f32.mrf.mxu0  ;;  %5010 = vmatprep.mubr.bf16.mxu1 %v7272_v14 }
 0x369   : > { %v3163_v14 = vadd.f32 %v3162_v0, %v10865_v61  ;;  %v3512_v0 = vadd.f32 %v3511_v12, %v3159_v62  ;;  %v3147_v12 = vadd.f32 %v3146_v26, %v10874_v43  ;;  %v10877_v62 = vld [vmem:[#allocation64_spill] sm:$0xff]  ;;  %v10878_v43 = vld [vmem:[#allocation89_spill] sm:$0xff] }
 0x36a   : > { %v3164_v22 = vpop.f32.mrf.mxu1  ;;  %v3517_v53 = vpop.f32.mrf.mxu0 }
 0x36b   : > { %v3165_v17 = vadd.f32 %v3164_v22, %v10865_v61  ;;  %v9219_v22 = vadd.f32 %v9174_v56, %v10870_v27  ;;  %v3516_v48 = vadd.f32 %v3515_v7, %v3163_v14  ;;  %v7273_v14 = vld [vmem:[#allocation9 + $0x80] ss:$16 sps:$4 sm:$0xff]  }
 0x36c   : > { %v3166_v37 = vpop.f32.mrf.mxu1  ;;  %v3519_v23 = vpop.f32.mrf.mxu0 }
 0x36d   : > { %v3167_v60 = vadd.f32 %v3166_v37, %v10872_v20  ;;  %v3518_v56 = vadd.f32 %v3517_v53, %v3165_v17  ;;  %v10876_v37 = vld [vmem:[#allocation29_spill] sm:$0xff]  ;;  %v3510_v17 = vadd.f32 %v3509_v39, %v3157_v52  ;;  %v3696_v51 = vmax.f32 %v3516_v48, 0.0  ;;  %v7278_v39 = vld [vmem:[#allocation9 + $0xa4] ss:$16 sps:$4 sm:$0xff]  }
 0x36e   : > { %v3168_v61 = vpop.f32.mrf.mxu1  ;;  %v3521_v4 = vpop.f32.mrf.mxu0  ;;  %v3145_v33 = vadd.f32 %v3144_v10, %v10876_v37 }
 0x36f   : > { %v3520_v3 = vadd.f32 %v3519_v23, %v3167_v60  ;;  %v3169_v27 = vadd.f32 %v3168_v61, %v10872_v20  ;;  %5011 = vmatmul.mubr.bf16.gmra.mxu1 %v7270_v19  ;;  %v3502_v60 = vadd.f32 %v3501_v54, %v3149_v6  ;;  %v3695_v20 = vmax.f32 %v3512_v0, 0.0 }
 0x370   : > { %v3172_v55 = vpop.f32.mrf.mxu1  ;;  %v3525_v32 = vpop.f32.mrf.mxu0  ;;  %5020 = vmatprep.mubr.bf16.mxu1 %v7275_v28  ;;  %v3697_v13 = vmax.f32 %v3518_v56, 0.0  ;;  %v3143_v28 = vadd.f32 %v9193_v5, %v10876_v37  ;;  %v3498_v26 = vadd.f32 %v9197_v21, %v3145_v33  ;;  %v3492_v6 = vadd.f32 %v9191_v38, %v3139_v2 }
 0x371   : > { %v3522_v25 = vadd.f32 %v3521_v4, %v3169_v27  ;;  %v3173_v53 = vadd.f32 %v3172_v55, %v10877_v62  ;;  %v3698_v19 = vmax.f32 %v3520_v3, 0.0  ;;  %v3506_v4 = vadd.f32 %v9201_v41, %v3153_v40 }
 0x372   : > { %v3174_v23 = vpop.f32.mrf.mxu1  ;;  %v3527_v35 = vpop.f32.mrf.mxu0  ;;  %v3693_v3 = vmax.f32 %v3508_v18, 0.0  ;;  %v3500_v0 = vadd.f32 %v9199_v8, %v3147_v12  ;;  %v3694_v61 = vmax.f32 %v3510_v17, 0.0  ;;  %v9251_v41 = vadd.f32 %v9179_v63, %v3129_v9  ;;  %v10882_v18 = vld [vmem:[#allocation43_spill] sm:$0xff] }
 0x373   : > { %v3699_v10 = vmax.f32 %v3522_v25, 0.0  ;;  %v3175_v31 = vadd.f32 %v3174_v23, %v10877_v62  ;;  %v3526_v7 = vadd.f32 %v3525_v32, %v3173_v53  ;;  %v3778_v5 = vpack.c.bf16 %v3698_v19, %v3696_v51  ;;  %v7276_v19 = vld [vmem:[#allocation9 + $0xa0] ss:$16 sps:$4 sm:$0xff]  }
 0x374   : > { %v3176_v54 = vpop.f32.mrf.mxu1  ;;  %v3529_v52 = vpop.f32.mrf.mxu0  ;;  %v3691_v27 = vmax.f32 %v3502_v60, 0.0  ;;  %v3777_v33 = vpack.c.bf16 %v3695_v20, %v3693_v3  ;;  %v3133_v40 = vadd.f32 %v9181_v29, %v10873_v42  ;;  %v3488_v38 = vadd.f32 %v9186_v16, %v3135_v15 }
 0x375   : > { %v3177_v55 = vadd.f32 %v3176_v54, %v10878_v43  ;;  %v9242_v46 = vadd.f32 %v3527_v35, %v3175_v31  ;;  %v3779_v11 = vpack.c.bf16 %v3699_v10, %v3697_v13  ;;  %v3496_v8 = vadd.f32 %v9195_v45, %v3143_v28  ;;  %v7281_v31 = vld [vmem:[#allocation9 + $0xc4] ss:$16 sps:$4 sm:$0xff]   ;;  %v10887_v54 = vld [vmem:[#allocation77_spill] sm:$0xff] }
 0x376   : > { %v9246_v56 = vpop.f32.mrf.mxu1  ;;  %v9248_v21 = vpop.f32.mrf.mxu0  ;;  %v3692_v2 = vmax.f32 %v3506_v4, 0.0  ;;  %v3689_v12 = vmax.f32 %v3498_v26, 0.0  ;;  %v3700_v9 = vmax.f32 %v3526_v7, 0.0  ;;  %v3490_v62 = vadd.f32 %v9188_v58, %v9228_v57  ;;  %v10884_v28 = vld [vmem:[#allocation44_spill] sm:$0xff] }
 0x377   : > { %10879 = vst [vmem:[#allocation27_spill] sm:$0xff] %v9242_v46  ;;  %10880 = vst [vmem:[#allocation75_spill] sm:$0xff] %v9246_v56  ;;  %v3530_v37 = vadd.f32 %v3529_v52, %v3177_v55  ;;  %5021 = vmatmul.mubr.bf16.gmra.mxu1 %v7273_v14  ;;  %5301 = vmatprep.subr.bf16.mxu0 %v3779_v11  ;;  %v3687_v53 = vmax.f32 %v3492_v6, 0.0  ;;  %v3690_v29 = vmax.f32 %v3500_v0, 0.0  ;;  %v3688_v58 = vmax.f32 %v3496_v8, 0.0  ;;  %v10889_v55 = vld [vmem:[#allocation49_spill] sm:$0xff] }
 0x378   : > { %10881 = vst [vmem:[#allocation99_spill] sm:$0xff] %v9248_v21  ;;  %v3182_v48 = vpop.f32.mrf.mxu1  ;;  %5302 = vmatpush1.bf16.msra.mxu0 %v3778_v5  ;;  %v3535_v32 = vpop.f32.mrf.mxu0  ;;  %5030 = vmatprep.mubr.bf16.mxu1 %v7278_v39  ;;  %v3776_v42 = vpack.c.bf16 %v3694_v61, %v3692_v2  ;;  %v3775_v20 = vpack.c.bf16 %v3691_v27, %v3689_v12  ;;  %v3685_v14 = vmax.f32 %v3488_v38, 0.0  ;;  %v3683_v52 = vmax.f32 %v9251_v41, 0.0  ;;  %v10890_v11 = vld [vmem:[#allocation80_spill] sm:$0xff]  ;;  %v10895_v8 = vld [vmem:[#allocation82_spill] sm:$0xff] }
 0x379   : > { %v3702_v63 = vmax.f32 %v3530_v37, 0.0  ;;  %v3183_v25 = vadd.f32 %v3182_v48, %v10882_v18  ;;  %5303 = vmatprep.subr.bf16.mxu0 %v3777_v33  ;;  %v3115_v23 = vadd.f32 %v9149_v49, %v10848_v1  ;;  %v3123_v35 = vadd.f32 %v9167_v59, %v10869_v50  ;;  %v10894_v38 = vld [vmem:[#allocation76_spill] sm:$0xff]  ;;  %v10896_v48 = vld [vmem:[#allocation73_spill] sm:$0xff] }
 0x37a   : > { %v3184_v15 = vpop.f32.mrf.mxu1  ;;  %v3537_v16 = vpop.f32.mrf.mxu0  ;;  %v3486_v57 = vadd.f32 %v9183_v36, %v3133_v40  ;;  %v3478_v7 = vadd.f32 %v9172_v24, %v9214_v34  ;;  %v3117_v1 = vadd.f32 %v9157_v30, %v10867_v44  ;;  %v3480_v50 = vadd.f32 %v9176_v47, %v9219_v22  ;;  %v10888_v24 = vld [vmem:[#allocation57_spill] sm:$0xff]  ;;  %v10891_v44 = vld [vmem:[#allocation114_spill] sm:$0xff] }
 0x37b   : > { %v9260_v45 = vpack.c.bf16 %v3702_v63, %v3700_v9  ;;  %v3185_v60 = vadd.f32 %v3184_v15, %v10882_v18  ;;  %v3536_v17 = vadd.f32 %v3535_v32, %v3183_v25  ;;  %v3686_v49 = vmax.f32 %v3490_v62, 0.0  ;;  %v10892_v47 = vld [vmem:[#allocation58_spill] sm:$0xff]  ;;  %v10893_v40 = vld [vmem:[#allocation97_spill] sm:$0xff] }
 0x37c   : > { %v3186_v13 = vpop.f32.mrf.mxu1  ;;  %5304 = vmatpush1.bf16.msra.mxu0 %v3776_v42  ;;  %v3539_v10 = vpop.f32.mrf.mxu0  ;;  %v3774_v59 = vpack.c.bf16 %v3690_v29, %v3688_v58  ;;  %v3472_v34 = vadd.f32 %v10888_v24, %v10887_v54  ;;  %v3773_v3 = vpack.c.bf16 %v3687_v53, %v3685_v14  ;;  %v3099_v30 = vadd.f32 %v10890_v11, %v10889_v55  ;;  %v7279_v42 = vld [vmem:[#allocation9 + $0xc0] ss:$16 sps:$4 sm:$0xff]   ;;  %v7287_v11 = vld [vmem:[#allocation9 + $0x104] ss:$16 sps:$4 sm:$0xff]  }
 0x37d   : > { %10883 = vst [vmem:[#allocation39_spill] sm:$0xff] %v9260_v45  ;;  %v3187_v26 = vadd.f32 %v3186_v13, %v10884_v28  ;;  %v9271_v4 = vadd.f32 %v3537_v16, %v3185_v60  ;;  %5305 = vmatprep.subr.bf16.mxu0 %v3775_v20  ;;  %v3468_v6 = vadd.f32 %v10891_v44, %v3115_v23  ;;  %v3684_v0 = vmax.f32 %v3486_v57, 0.0  ;;  %v10902_v58 = vld [vmem:[#allocation116_spill] sm:$0xff] }
 0x37e   : > { %v9277_v36 = vpop.f32.mrf.mxu1  ;;  %v9279_v51 = vpop.f32.mrf.mxu0  ;;  %v3476_v22 = vadd.f32 %v10892_v47, %v3123_v35  ;;  %v3681_v27 = vmax.f32 %v3478_v7, 0.0  ;;  %v3704_v37 = vmax.f32 %v3536_v17, 0.0  ;;  %v3462_v2 = vadd.f32 %v10895_v8, %v10894_v38  ;;  %v7284_v17 = vld [vmem:[#allocation9 + $0xe4] ss:$16 sps:$4 sm:$0xff]   ;;  %v10908_v38 = vld [vmem:[#allocation61_spill] sm:$0xff] }
 0x37f   : > { %10885 = vst [vmem:[#allocation74_spill] sm:$0xff] %v9271_v4  ;;  %10886 = vst [vmem:[#allocation28_spill] sm:$0xff] %v9279_v51  ;;  %v3540_v39 = vadd.f32 %v3539_v10, %v3187_v26  ;;  %5031 = vmatmul.mubr.bf16.gmra.mxu1 %v7276_v19  ;;  %v3470_v32 = vadd.f32 %v10896_v48, %v3117_v1  ;;  %v3682_v12 = vmax.f32 %v3480_v50, 0.0  ;;  %v3679_v25 = vmax.f32 %v3472_v34, 0.0  ;;  %v10903_v7 = vld [vmem:[#allocation72_spill] sm:$0xff]  ;;  %v10905_v50 = vld [vmem:[#allocation113_spill] sm:$0xff] }
 0x380   : > { %v3192_v61 = vpop.f32.mrf.mxu1  ;;  %5306 = vmatpush1.bf16.msra.mxu0 %v3774_v59  ;;  %v3545_v5 = vpop.f32.mrf.mxu0  ;;  %5040 = vmatprep.mubr.bf16.mxu1 %v7281_v31  ;;  %v3772_v9 = vpack.c.bf16 %v3686_v49, %v3684_v0  ;;  %v3771_v29 = vpack.c.bf16 %v3683_v52, %v3681_v27  ;;  %v3680_v15 = vmax.f32 %v3476_v22, 0.0  ;;  %v3677_v20 = vmax.f32 %v3468_v6, 0.0  ;;  %v7299_v45 = vld [vmem:[#allocation9 + $0x184] ss:$16 sps:$4 sm:$0xff]   ;;  %v10912_v4 = vld [vmem:[#allocation55_spill] sm:$0xff] }
 0x381   : > { %v3706_v33 = vmax.f32 %v3540_v39, 0.0  ;;  %v3193_v41 = vadd.f32 %v3192_v61, %v10893_v40  ;;  %5307 = vmatprep.subr.bf16.mxu0 %v3773_v3  ;;  %v3678_v19 = vmax.f32 %v3470_v32, 0.0  ;;  %v3452_v13 = vadd.f32 %v10902_v58, %v3099_v30  ;;  %v7282_v39 = vld [vmem:[#allocation9 + $0xe0] ss:$16 sps:$4 sm:$0xff]   ;;  %v10906_v30 = vld [vmem:[#allocation115_spill] sm:$0xff] }
 0x382   : > { %v9292_v63 = vpop.f32.mrf.mxu1  ;;  %v9294_v18 = vpop.f32.mrf.mxu0  ;;  %v3770_v23 = vpack.c.bf16 %v3682_v12, %v3680_v15  ;;  %v3675_v10 = vmax.f32 %v3462_v2, 0.0  ;;  %v3769_v31 = vpack.c.bf16 %v3679_v25, %v3677_v20  ;;  %v3676_v14 = vmax.f32 %v10903_v7, 0.0  ;;  %v10907_v61 = vld [vmem:[#allocation79_spill] sm:$0xff]  ;;  %v7290_v2 = vld [vmem:[#allocation9 + $0x124] ss:$16 sps:$4 sm:$0xff]  }
 0x383   : > { %10897 = vst [vmem:[#allocation40_spill] sm:$0xff] %v9294_v18  ;;  %v9296_v62 = vpack.c.bf16 %v3706_v33, %v3704_v37  ;;  %v9298_v53 = vadd.f32 %v3545_v5, %v3193_v41  ;;  %v3673_v49 = vmax.f32 %v10905_v50, 0.0  ;;  %v3671_v34 = vmax.f32 %v3452_v13, 0.0  ;;  %v7285_v33 = vld [vmem:[#allocation9 + $0x100] ss:$16 sps:$4 sm:$0xff]  }
 0x384   : > { %v9300_v16 = vpop.f32.mrf.mxu1  ;;  %5308 = vmatpush1.bf16.msra.mxu0 %v3772_v9  ;;  %v9302_v60 = vpop.f32.mrf.mxu0  ;;  %v3768_v59 = vpack.c.bf16 %v3678_v19, %v3676_v14  ;;  %v3669_v44 = vmax.f32 %v10906_v30, 0.0  ;;  %v7293_v20 = vld [vmem:[#allocation9 + $0x144] ss:$16 sps:$4 sm:$0xff]   ;;  %v7291_v7 = vld [vmem:[#allocation9 + $0x140] ss:$16 sps:$4 sm:$0xff]  }
 0x385   : > { %10898 = vst [vmem:[#allocation45_spill] sm:$0xff] %v9296_v62  ;;  %10899 = vst [vmem:[#allocation38_spill] sm:$0xff] %v9298_v53  ;;  %5309 = vmatprep.subr.bf16.mxu0 %v3771_v29  ;;  %v3767_v52 = vpack.c.bf16 %v3675_v10, %v3673_v49  ;;  %v7296_v49 = vld [vmem:[#allocation9 + $0x164] ss:$16 sps:$4 sm:$0xff]  }
 0x386   : > { %10900 = vst [vmem:[#allocation42_spill] sm:$0xff] %v9302_v60  ;;  %v9304_v35 = vpop.f32.mrf.mxu1  ;;  %v9306_v57 = vpop.f32.mrf.mxu0  ;;  %v3765_v22 = vpack.c.bf16 %v3671_v34, %v3669_v44  ;;  %v10909_v44 = vld [vmem:[#allocation26_spill] sm:$0xff]  ;;  %v10914_v18 = vld [vmem:[#allocation56_spill] sm:$0xff] }
 0x387   : > { %10901 = vst [vmem:[#allocation87_spill] sm:$0xff] %v9306_v57  ;;  %5041 = vmatmul.mubr.bf16.gmra.mxu1 %v7279_v42  ;;  %v7288_v42 = vld [vmem:[#allocation9 + $0x120] ss:$16 sps:$4 sm:$0xff]   ;;  %v10915_v57 = vld [vmem:[#allocation95_spill] sm:$0xff] }
 0x388   : > { %v9310_v26 = vpop.f32.mrf.mxu1  ;;  %5310 = vmatpush1.bf16.msra.mxu0 %v3770_v23  ;;  %v9312_v1 = vpop.f32.mrf.mxu0  ;;  %5050 = vmatprep.mubr.bf16.mxu1 %v7284_v17  ;;  %v10911_v62 = vld [vmem:[#allocation54_spill] sm:$0xff] }
 0x389   : > { %10904 = vst [vmem:[#allocation94_spill] sm:$0xff] %v9312_v1  ;;  %5311 = vmatprep.subr.bf16.mxu0 %v3769_v31 }
 0x38a   : > { %v9315_v54 = vpop.f32.mrf.mxu1  ;;  %v9317_v24 = vpop.f32.mrf.mxu0 }
 0x38c   : > { %v9319_v3 = vpop.f32.mrf.mxu1  ;;  %5312 = vmatpush1.bf16.msra.mxu0 %v3768_v59  ;;  %v9321_v55 = vpop.f32.mrf.mxu0 }
 0x38d   : > { %5313 = vmatprep.subr.bf16.mxu0 %v3767_v52 }
 0x38e   : > { %v9324_v6 = vpop.f32.mrf.mxu1  ;;  %v9326_v47 = vpop.f32.mrf.mxu0 }
 0x38f   : > { %5051 = vmatmul.mubr.bf16.gmra.mxu1 %v7282_v39 }
 0x390   : > { %v9328_v0 = vpop.f32.mrf.mxu1  ;;  %5314 = vmatpush1.bf16.msra.mxu0 %v10907_v61  ;;  %v9331_v5 = vpop.f32.mrf.mxu0  ;;  %5060 = vmatprep.mubr.bf16.mxu1 %v7287_v11  ;;  %v10910_v61 = vld [vmem:[#allocation53_spill] sm:$0xff] }
 0x391   : > { %5315 = vmatprep.subr.bf16.mxu0 %v3765_v22 }
 0x392   : > { %v9333_v27 = vpop.f32.mrf.mxu1  ;;  %v9335_v37 = vpop.f32.mrf.mxu0 }
 0x394   : > { %v9337_v41 = vpop.f32.mrf.mxu1  ;;  %5316 = vmatpush1.bf16.msra.mxu0 %v10908_v38  ;;  %v9340_v8 = vpop.f32.mrf.mxu0  ;;  %v7294_v38 = vld [vmem:[#allocation9 + $0x160] ss:$16 sps:$4 sm:$0xff]  }
 0x396   : > { %v3218_v48 = vpop.f32.mrf.mxu1  ;;  %v9342_v32 = vpop.f32.mrf.mxu0 }
 0x397   : > { %5061 = vmatmul.mubr.bf16.gmra.mxu1 %v7285_v33 }
 0x398   : > { %v3222_v12 = vpop.f32.mrf.mxu1  ;;  %v9344_v9 = vpop.f32.mrf.mxu0  ;;  %5070 = vmatprep.mubr.bf16.mxu1 %v7290_v2 }
 0x39a   : > { %v3224_v25 = vpop.f32.mrf.mxu1  ;;  %v9346_v29 = vpop.f32.mrf.mxu0 }
 0x39c   : > { %v3226_v15 = vpop.f32.mrf.mxu1  ;;  %v9348_v17 = vpop.f32.mrf.mxu0 }
 0x39e   : > { %v3228_v19 = vpop.f32.mrf.mxu1  ;;  %v3581_v23 = vpop.f32.mrf.mxu0 }
 0x39f   : > { %5071 = vmatmul.mubr.bf16.gmra.mxu1 %v7288_v42 }
 0x3a0   : > { %v3232_v58 = vpop.f32.mrf.mxu1  ;;  %v3585_v13 = vpop.f32.mrf.mxu0  ;;  %5080 = vmatprep.mubr.bf16.mxu1 %v7293_v20 }
 0x3a2   : > { %v3234_v10 = vpop.f32.mrf.mxu1  ;;  %v3587_v31 = vpop.f32.mrf.mxu0 }
 0x3a3   : > { %v3235_v46 = vadd.f32 %v3234_v10, %v10911_v62  ;;  %v3225_v10 = vadd.f32 %v3224_v25, %v10914_v18 }
 0x3a4   : > { %v3236_v14 = vpop.f32.mrf.mxu1  ;;  %v3589_v50 = vpop.f32.mrf.mxu0 }
 0x3a5   : > { %v3588_v1 = vadd.f32 %v3587_v31, %v3235_v46 }
 0x3a6   : > { %v3238_v59 = vpop.f32.mrf.mxu1  ;;  %v3591_v34 = vpop.f32.mrf.mxu0 }
 0x3a7   : > { %5081 = vmatmul.mubr.bf16.gmra.mxu1 %v7291_v7  ;;  %v3239_v22 = vadd.f32 %v3238_v59, %v10909_v44  ;;  %v10913_v7 = vld [vmem:[#allocation48_spill] sm:$0xff] }
 0x3a8   : > { %v3242_v52 = vpop.f32.mrf.mxu1  ;;  %v3595_v39 = vpop.f32.mrf.mxu0  ;;  %5090 = vmatprep.mubr.bf16.mxu1 %v7296_v49  ;;  %v3229_v21 = vadd.f32 %v3228_v19, %v10913_v7  ;;  %v3237_v49 = vadd.f32 %v3236_v14, %v10909_v44  ;;  %v3219_v19 = vadd.f32 %v3218_v48, %v10915_v57  ;;  %v3227_v14 = vadd.f32 %v3226_v15, %v10913_v7 }
 0x3a9   : > { %v3243_v2 = vadd.f32 %v3242_v52, %v10910_v61  ;;  %v3592_v56 = vadd.f32 %v3591_v34, %v3239_v22  ;;  %v3233_v52 = vadd.f32 %v3232_v58, %v10911_v62  ;;  %v3223_v62 = vadd.f32 %v3222_v12, %v10914_v18 }
 0x3aa   : > { %v3244_v11 = vpop.f32.mrf.mxu1  ;;  %v3597_v30 = vpop.f32.mrf.mxu0  ;;  %v3590_v44 = vadd.f32 %v3589_v50, %v3237_v49  ;;  %v3725_v48 = vmax.f32 %v3588_v1, 0.0  ;;  %v3217_v15 = vadd.f32 %v9337_v41, %v10915_v57  ;;  %v3572_v12 = vadd.f32 %v9342_v32, %v3219_v19  ;;  %v10918_v57 = vld [vmem:[#allocation62_spill] sm:$0xff] }
 0x3ab   : > { %v3245_v33 = vadd.f32 %v3244_v11, %v10910_v61  ;;  %v3596_v61 = vadd.f32 %v3595_v39, %v3243_v2  ;;  %v3727_v22 = vmax.f32 %v3592_v56, 0.0  ;;  %v3586_v58 = vadd.f32 %v3585_v13, %v3233_v52 }
 0x3ac   : > { %v3246_v42 = vpop.f32.mrf.mxu1  ;;  %v3599_v20 = vpop.f32.mrf.mxu0  ;;  %v3580_v56 = vadd.f32 %v9348_v17, %v3227_v14  ;;  %v3205_v41 = vadd.f32 %v9315_v54, %v10918_v57  ;;  %v3570_v50 = vadd.f32 %v9340_v8, %v3217_v15  ;;  %v3719_v7 = vmax.f32 %v3572_v12, 0.0 }
 0x3ad   : > { %v3247_v53 = vadd.f32 %v3246_v42, %v10912_v4  ;;  %v3598_v43 = vadd.f32 %v3597_v30, %v3245_v33  ;;  %v3582_v30 = vadd.f32 %v3581_v23, %v3229_v21  ;;  %v3728_v39 = vmax.f32 %v3596_v61, 0.0  ;;  %v10916_v33 = vld [vmem:[#allocation60_spill] sm:$0xff] }
 0x3ae   : > { %v3248_v51 = vpop.f32.mrf.mxu1  ;;  %v3601_v60 = vpop.f32.mrf.mxu0  ;;  %v3215_v46 = vadd.f32 %v9333_v27, %v10916_v33  ;;  %v10917_v23 = vld [vmem:[#allocation96_spill] sm:$0xff]  ;;  %v3793_v27 = vpack.c.bf16 %v3727_v22, %v3725_v48  ;;  %v3213_v1 = vadd.f32 %v9328_v0, %v10916_v33  ;;  %v3724_v31 = vmax.f32 %v3586_v58, 0.0  ;;  %v10919_v0 = vld [vmem:[#allocation98_spill] sm:$0xff] }
 0x3af   : > { %v3249_v59 = vadd.f32 %v3248_v51, %v10912_v4  ;;  %v3600_v11 = vadd.f32 %v3599_v20, %v3247_v53  ;;  %5091 = vmatmul.mubr.bf16.gmra.mxu1 %v7294_v38  ;;  %v3729_v4 = vmax.f32 %v3598_v43, 0.0  ;;  %v7297_v53 = vld [vmem:[#allocation9 + $0x180] ss:$16 sps:$4 sm:$0xff]   ;;  %v3726_v43 = vmax.f32 %v3590_v44, 0.0 }
 0x3b0   : > { %5100 = vmatprep.mubr.bf16.mxu1 %v7299_v45  ;;  %v7302_v45 = vld [vmem:[#allocation9 + $0x1a4] ss:$16 sps:$4 sm:$0xff]   ;;  %v3209_v18 = vadd.f32 %v9324_v6, %v10917_v23  ;;  %v3723_v13 = vmax.f32 %v3582_v30, 0.0  ;;  %v3568_v17 = vadd.f32 %v9335_v37, %v3215_v46  ;;  %v3207_v32 = vadd.f32 %v9319_v3, %v10917_v23  ;;  %v7303_v33 = vld [vmem:[#allocation9 + $0x1c0] ss:$16 sps:$4 sm:$0xff]  }
 0x3b1   : > { %v3602_v42 = vadd.f32 %v3601_v60, %v3249_v59  ;;  %v3730_v34 = vmax.f32 %v3600_v11, 0.0  ;;  %v3578_v60 = vadd.f32 %v9346_v29, %v3225_v10  ;;  %v3576_v29 = vadd.f32 %v9344_v9, %v3223_v62  ;;  %v7300_v59 = vld [vmem:[#allocation9 + $0x1a0] ss:$16 sps:$4 sm:$0xff]   ;;  %v7305_v3 = vld [vmem:[#allocation9 + $0x1c4] ss:$16 sps:$4 sm:$0xff]  }
 0x3b2   : > { %v3722_v38 = vmax.f32 %v3580_v56, 0.0  ;;  %v3792_v2 = vpack.c.bf16 %v3726_v43, %v3724_v31  ;;  %v3199_v9 = vadd.f32 %v9304_v35, %v10919_v0  ;;  %v3562_v20 = vadd.f32 %v9326_v47, %v3209_v18  ;;  %v10926_v62 = vld [vmem:[#allocation28_spill] sm:$0xff]  ;;  %v10927_v56 = vld [vmem:[#allocation99_spill] sm:$0xff]  ;;  %v10928_v18 = vld [vmem:[#allocation38_spill] sm:$0xff] }
 0x3b3   : > { %v3731_v51 = vmax.f32 %v3602_v42, 0.0  ;;  %v3794_v21 = vpack.c.bf16 %v3730_v34, %v3728_v39  ;;  %v3721_v6 = vmax.f32 %v3578_v60, 0.0  ;;  %v3203_v54 = vadd.f32 %v9310_v26, %v10918_v57  ;;  %v10922_v34 = vld [vmem:[#allocation40_spill] sm:$0xff] }
 0x3b4   : > { %v3566_v37 = vadd.f32 %v9331_v5, %v3213_v1  ;;  %v3720_v11 = vmax.f32 %v3576_v29, 0.0  ;;  %v3195_v8 = vadd.f32 %v9292_v63, %v10893_v40  ;;  %v3558_v52 = vadd.f32 %v9317_v24, %v3205_v41  ;;  %v10920_v5 = vld [vmem:[#allocation87_spill] sm:$0xff]  ;;  %v10921_v40 = vld [vmem:[#allocation94_spill] sm:$0xff] }
 0x3b5   : > { %v3795_v25 = vpack.c.bf16 %v3731_v51, %v3729_v4  ;;  %v3791_v49 = vpack.c.bf16 %v3723_v13, %v3721_v6  ;;  %v3717_v61 = vmax.f32 %v3568_v17, 0.0  ;;  %v3197_v35 = vadd.f32 %v9300_v16, %v10919_v0  ;;  %v7308_v60 = vld [vmem:[#allocation9 + $0x1e4] ss:$16 sps:$4 sm:$0xff]   ;;  %v7306_v57 = vld [vmem:[#allocation9 + $0x1e0] ss:$16 sps:$4 sm:$0xff]   ;;  %v10930_v17 = vld [vmem:[#allocation27_spill] sm:$0xff] }
 0x3b6   : > { %v3560_v47 = vadd.f32 %v9321_v55, %v3207_v32  ;;  %v3718_v10 = vmax.f32 %v3570_v50, 0.0  ;;  %v3790_v42 = vpack.c.bf16 %v3722_v38, %v3720_v11  ;;  %v3189_v26 = vadd.f32 %v9277_v36, %v10884_v28  ;;  %v10923_v55 = vld [vmem:[#allocation42_spill] sm:$0xff]  ;;  %v10925_v28 = vld [vmem:[#allocation75_spill] sm:$0xff]  ;;  %v10931_v50 = vld [vmem:[#allocation45_spill] sm:$0xff] }
 0x3b7   : > { %5101 = vmatmul.mubr.bf16.gmra.mxu1 %v7297_v53  ;;  %5317 = vmatprep.subr.bf16.mxu0 %v3795_v25  ;;  %v3552_v19 = vadd.f32 %v10920_v5, %v3199_v9  ;;  %v3715_v14 = vmax.f32 %v3562_v20, 0.0  ;;  %v3789_v44 = vpack.c.bf16 %v3719_v7, %v3717_v61  ;;  %v3556_v63 = vadd.f32 %v10921_v40, %v3203_v54  ;;  %v10924_v53 = vld [vmem:[#allocation89_spill] sm:$0xff]  ;;  %v10929_v13 = vld [vmem:[#allocation74_spill] sm:$0xff]  ;;  %v10932_v0 = vld [vmem:[#allocation39_spill] sm:$0xff] }
 0x3b8   : > { %5318 = vmatpush2.bf16.msra.mxu0 %v3794_v21  ;;  %5110 = vmatprep.mubr.bf16.mxu1 %v7302_v45  ;;  %v3716_v24 = vmax.f32 %v3566_v37, 0.0  ;;  %v3548_v30 = vadd.f32 %v10922_v34, %v3195_v8  ;;  %v3713_v16 = vmax.f32 %v3558_v52, 0.0  ;;  %v3550_v22 = vadd.f32 %v10923_v55, %v3197_v35  ;;  %v7311_v41 = vld [vmem:[#allocation9 + $0x204] ss:$16 sps:$4 sm:$0xff]   ;;  %v7309_v38 = vld [vmem:[#allocation9 + $0x200] ss:$16 sps:$4 sm:$0xff]  }
 0x3b9   : > { %5319 = vmatprep.subr.bf16.mxu0 %v3793_v27  ;;  %v3714_v4 = vmax.f32 %v3560_v47, 0.0  ;;  %v3179_v36 = vadd.f32 %v10925_v28, %v10924_v53  ;;  %v3542_v58 = vadd.f32 %v10926_v62, %v3189_v26  ;;  %v3711_v39 = vmax.f32 %v3552_v19, 0.0  ;;  %v7317_v9 = vld [vmem:[#allocation9 + $0x224] ss:$16 sps:$4 sm:$0xff]   ;;  %v7320_v20 = vld [vmem:[#allocation9 + $0x2c] ss:$16 sps:$4 sm:$0xff]  }
 0x3ba   : > { %v3788_v51 = vpack.c.bf16 %v3718_v10, %v3716_v24  ;;  %v3787_v45 = vpack.c.bf16 %v3715_v14, %v3713_v16  ;;  %v3712_v46 = vmax.f32 %v3556_v63, 0.0  ;;  %v3709_v48 = vmax.f32 %v3548_v30, 0.0  ;;  %v7315_v7 = vld [vmem:[#allocation9 + $0x220] ss:$16 sps:$4 sm:$0xff]   ;;  %v7326_v54 = vld [vmem:[#allocation9 + $0x4c] ss:$16 sps:$4 sm:$0xff]  }
 0x3bb   : > { %v3710_v25 = vmax.f32 %v3550_v22, 0.0  ;;  %v3532_v43 = vadd.f32 %v10927_v56, %v3179_v36  ;;  %v3707_v21 = vmax.f32 %v3542_v58, 0.0  ;;  %v3708_v12 = vmax.f32 %v10928_v18, 0.0  ;;  %v7321_v37 = vld [vmem:[#allocation9 + $0x240] ss:$16 sps:$4 sm:$0xff]  }
 0x3bc   : > { %5320 = vmatpush2.bf16.msra.mxu0 %v3792_v2  ;;  %v3786_v15 = vpack.c.bf16 %v3714_v4, %v3712_v46  ;;  %v3785_v23 = vpack.c.bf16 %v3711_v39, %v3709_v48  ;;  %v3705_v27 = vmax.f32 %v10929_v13, 0.0  ;;  %v3701_v6 = vmax.f32 %v10930_v17, 0.0  ;;  %v7312_v2 = vld [vmem:[#allocation9 + $0x8] ss:$16 sps:$4 sm:$0xff]   ;;  %v7332_v8 = vld [vmem:[#allocation9 + $0x6c] ss:$16 sps:$4 sm:$0xff]  }
 0x3bd   : > { %5321 = vmatprep.subr.bf16.mxu0 %v3791_v49  ;;  %v3784_v1 = vpack.c.bf16 %v3710_v25, %v3708_v12  ;;  %v3703_v29 = vmax.f32 %v3532_v43, 0.0  ;;  %v7318_v49 = vld [vmem:[#allocation9 + $0x28] ss:$16 sps:$4 sm:$0xff]   ;;  %v7327_v52 = vld [vmem:[#allocation9 + $0x260] ss:$16 sps:$4 sm:$0xff]  }
 0x3be   : > { %v3783_v31 = vpack.c.bf16 %v3707_v21, %v3705_v27  ;;  %v7324_v11 = vld [vmem:[#allocation9 + $0x48] ss:$16 sps:$4 sm:$0xff]   ;;  %v7335_v35 = vld [vmem:[#allocation9 + $0x284] ss:$16 sps:$4 sm:$0xff]   ;;  %v7338_v47 = vld [vmem:[#allocation9 + $0x8c] ss:$16 sps:$4 sm:$0xff]  }
 0x3bf   : > { %5111 = vmatmul.mubr.bf16.gmra.mxu1 %v7300_v59  ;;  %v3781_v32 = vpack.c.bf16 %v3703_v29, %v3701_v6  ;;  %v7323_v59 = vld [vmem:[#allocation9 + $0x244] ss:$16 sps:$4 sm:$0xff]   ;;  %v7330_v61 = vld [vmem:[#allocation9 + $0x68] ss:$16 sps:$4 sm:$0xff]   ;;  %v7333_v10 = vld [vmem:[#allocation9 + $0x280] ss:$16 sps:$4 sm:$0xff]  }
 0x3c0   : > { %5322 = vmatpush2.bf16.msra.mxu0 %v3790_v42  ;;  %5120 = vmatprep.mubr.bf16.mxu1 %v7305_v3  ;;  %v7329_v3 = vld [vmem:[#allocation9 + $0x264] ss:$16 sps:$4 sm:$0xff]   ;;  %v7336_v42 = vld [vmem:[#allocation9 + $0x88] ss:$16 sps:$4 sm:$0xff]   ;;  %v7344_v5 = vld [vmem:[#allocation9 + $0xac] ss:$16 sps:$4 sm:$0xff]  }
 0x3c1   : > { %5323 = vmatprep.subr.bf16.mxu0 %v3789_v44  ;;  %v7341_v26 = vld [vmem:[#allocation9 + $0x2a4] ss:$16 sps:$4 sm:$0xff]   ;;  %v7339_v19 = vld [vmem:[#allocation9 + $0x2a0] ss:$16 sps:$4 sm:$0xff]   ;;  %v7342_v14 = vld [vmem:[#allocation9 + $0xa8] ss:$16 sps:$4 sm:$0xff]  }
 0x3c2   : > { %v7347_v44 = vld [vmem:[#allocation9 + $0x2c4] ss:$16 sps:$4 sm:$0xff]   ;;  %v7350_v40 = vld [vmem:[#allocation9 + $0xcc] ss:$16 sps:$4 sm:$0xff]   ;;  %v7345_v63 = vld [vmem:[#allocation9 + $0x2c0] ss:$16 sps:$4 sm:$0xff]  }
 0x3c3   : > { %v7348_v24 = vld [vmem:[#allocation9 + $0xc8] ss:$16 sps:$4 sm:$0xff]   ;;  %v7353_v34 = vld [vmem:[#allocation9 + $0x2e4] ss:$16 sps:$4 sm:$0xff]   ;;  %v7356_v30 = vld [vmem:[#allocation9 + $0xec] ss:$16 sps:$4 sm:$0xff]  }
 0x3c4   : > { %5324 = vmatpush2.bf16.msra.mxu0 %v3788_v51  ;;  %v7351_v16 = vld [vmem:[#allocation9 + $0x2e0] ss:$16 sps:$4 sm:$0xff]   ;;  %v7354_v55 = vld [vmem:[#allocation9 + $0xe8] ss:$16 sps:$4 sm:$0xff]   ;;  %v7359_v22 = vld [vmem:[#allocation9 + $0x304] ss:$16 sps:$4 sm:$0xff]  }
 0x3c5   : > { %5325 = vmatprep.subr.bf16.mxu0 %v3787_v45  ;;  %v7362_v4 = vld [vmem:[#allocation9 + $0x10c] ss:$16 sps:$4 sm:$0xff]   ;;  %v7357_v51 = vld [vmem:[#allocation9 + $0x300] ss:$16 sps:$4 sm:$0xff]   ;;  %v7360_v53 = vld [vmem:[#allocation9 + $0x108] ss:$16 sps:$4 sm:$0xff]  }
 0x3c6   : > { %v7365_v28 = vld [vmem:[#allocation9 + $0x324] ss:$16 sps:$4 sm:$0xff]   ;;  %v7368_v36 = vld [vmem:[#allocation9 + $0x12c] ss:$16 sps:$4 sm:$0xff]   ;;  %v7363_v45 = vld [vmem:[#allocation9 + $0x320] ss:$16 sps:$4 sm:$0xff]  }
 0x3c7   : > { %5121 = vmatmul.mubr.bf16.gmra.mxu1 %v7303_v33  ;;  %v7366_v33 = vld [vmem:[#allocation9 + $0x128] ss:$16 sps:$4 sm:$0xff]   ;;  %v7371_v46 = vld [vmem:[#allocation9 + $0x344] ss:$16 sps:$4 sm:$0xff]   ;;  %v7369_v43 = vld [vmem:[#allocation9 + $0x340] ss:$16 sps:$4 sm:$0xff]  }
 0x3c8   : > { %5326 = vmatpush2.bf16.msra.mxu0 %v3786_v15  ;;  %5130 = vmatprep.mubr.bf16.mxu1 %v7308_v60  ;;  %v7374_v60 = vld [vmem:[#allocation9 + $0x14c] ss:$16 sps:$4 sm:$0xff]   ;;  %v7372_v21 = vld [vmem:[#allocation9 + $0x148] ss:$16 sps:$4 sm:$0xff]   ;;  %v7375_v29 = vld [vmem:[#allocation9 + $0x360] ss:$16 sps:$4 sm:$0xff]  }
 0x3c9   : > { %5327 = vmatprep.subr.bf16.mxu0 %v3785_v23  ;;  %v7377_v23 = vld [vmem:[#allocation9 + $0x364] ss:$16 sps:$4 sm:$0xff]   ;;  %v7380_v18 = vld [vmem:[#allocation9 + $0x16c] ss:$16 sps:$4 sm:$0xff]  }
 0x3cc   : > { %5328 = vmatpush2.bf16.msra.mxu0 %v3784_v1 }
 0x3cd   : > { %5329 = vmatprep.subr.bf16.mxu0 %v3783_v31  ;;  %v7378_v31 = vld [vmem:[#allocation9 + $0x168] ss:$16 sps:$4 sm:$0xff]  }
 0x3cf   : > { %5131 = vmatmul.mubr.bf16.gmra.mxu1 %v7306_v57  ;;  %v7383_v57 = vld [vmem:[#allocation9 + $0x384] ss:$16 sps:$4 sm:$0xff]  }
 0x3d0   : > { %5330 = vmatpush2.bf16.msra.mxu0 %v10931_v50  ;;  %5140 = vmatprep.mubr.bf16.mxu1 %v7311_v41  ;;  %v7386_v41 = vld [vmem:[#allocation9 + $0x18c] ss:$16 sps:$4 sm:$0xff]  }
 0x3d1   : > { %5331 = vmatprep.subr.bf16.mxu0 %v3781_v32 }
 0x3d4   : > { %5332 = vmatpush2.bf16.msra.mxu0 %v10932_v0  ;;  %v7389_v0 = vld [vmem:[#allocation9 + $0x3a4] ss:$16 sps:$4 sm:$0xff]  }
 0x3d7   : > { %5141 = vmatmul.mubr.bf16.gmra.mxu1 %v7309_v38  ;;  %5334 = vmatmul.mubr.bf16.vlgmr.msra.gmra.mxu0 %v7312_v2  ;;  %v7381_v38 = vld [vmem:[#allocation9 + $0x380] ss:$16 sps:$4 sm:$0xff]   ;;  %v7384_v2 = vld [vmem:[#allocation9 + $0x188] ss:$16 sps:$4 sm:$0xff]  }
 0x3d8   : > { %5150 = vmatprep.mubr.bf16.mxu1 %v7317_v9  ;;  %5343 = vmatprep.mubr.bf16.mxu0 %v7320_v20  ;;  %v7392_v9 = vld [vmem:[#allocation9 + $0x1ac] ss:$16 sps:$4 sm:$0xff]  }
 0x3df   : > { %5151 = vmatmul.mubr.bf16.gmra.mxu1 %v7315_v7  ;;  %5344 = vmatmul.mubr.bf16.gmra.mxu0 %v7318_v49  ;;  %v9442_v49 = vpop.permute.xlu1 %4145 }
 0x3e0   : > { %5160 = vmatprep.mubr.bf16.mxu1 %v7323_v59  ;;  %5353 = vmatprep.mubr.bf16.mxu0 %v7326_v54  ;;  %10933 = vst [vmem:[#allocation93_spill] sm:$0xff] %v9442_v49 }
 0x3e7   : > { %5161 = vmatmul.mubr.bf16.gmra.mxu1 %v7321_v37  ;;  %5354 = vmatmul.mubr.bf16.gmra.mxu0 %v7324_v11  ;;  %v7387_v37 = vld [vmem:[#allocation9 + $0x3a0] ss:$16 sps:$4 sm:$0xff]   ;;  %v7390_v11 = vld [vmem:[#allocation9 + $0x1a8] ss:$16 sps:$4 sm:$0xff]  }
 0x3e8   : > { %5170 = vmatprep.mubr.bf16.mxu1 %v7329_v3  ;;  %5363 = vmatprep.mubr.bf16.mxu0 %v7332_v8  ;;  %v9448_v3 = vpop.permute.xlu0 %4150  ;;  %v7395_v8 = vld [vmem:[#allocation9 + $0x3c4] ss:$16 sps:$4 sm:$0xff]  }
 0x3e9   : > { %10934 = vst [vmem:[#allocation81_spill] sm:$0xff] %v9448_v3 }
 0x3ef   : > { %5171 = vmatmul.mubr.bf16.gmra.mxu1 %v7327_v52  ;;  %5364 = vmatmul.mubr.bf16.gmra.mxu0 %v7330_v61  ;;  %v7398_v52 = vld [vmem:[#allocation9 + $0x1cc] ss:$16 sps:$4 sm:$0xff]  }
 0x3f0   : > { %5180 = vmatprep.mubr.bf16.mxu1 %v7335_v35  ;;  %5373 = vmatprep.mubr.bf16.mxu0 %v7338_v47  ;;  %v9452_v35 = vpop.permute.xlu1 %4155 }
 0x3f1   : > { %10935 = vst [vmem:[#allocation22_spill] sm:$0xff] %v9452_v35  ;;  %v7428_v35 = vld [vmem:[#allocation9 + $0x2ec] ss:$16 sps:$4 sm:$0xff]  }
 0x3f7   : > { %5181 = vmatmul.mubr.bf16.gmra.mxu1 %v7333_v10  ;;  %5374 = vmatmul.mubr.bf16.gmra.mxu0 %v7336_v42  ;;  %v9458_v42 = vpop.permute.xlu0 %4160 }
 0x3f8   : > { %5190 = vmatprep.mubr.bf16.mxu1 %v7341_v26  ;;  %5383 = vmatprep.mubr.bf16.mxu0 %v7344_v5  ;;  %10936 = vst [vmem:[#allocation47_spill] sm:$0xff] %v9458_v42  ;;  %v7393_v5 = vld [vmem:[#allocation9 + $0x3c0] ss:$16 sps:$4 sm:$0xff]  }
 0x3ff   : > { %5191 = vmatmul.mubr.bf16.gmra.mxu1 %v7339_v19  ;;  %5384 = vmatmul.mubr.bf16.gmra.mxu0 %v7342_v14  ;;  %v7396_v19 = vld [vmem:[#allocation9 + $0x1c8] ss:$16 sps:$4 sm:$0xff]   ;;  %v9462_v14 = vpop.permute.xlu1 %4165 }
 0x400   : > { %5200 = vmatprep.mubr.bf16.mxu1 %v7347_v44  ;;  %5393 = vmatprep.mubr.bf16.mxu0 %v7350_v40  ;;  %10937 = vst [vmem:[#allocation37_spill] sm:$0xff] %v9462_v14  ;;  %v7401_v44 = vld [vmem:[#allocation9 + $0x3e4] ss:$16 sps:$4 sm:$0xff]   ;;  %v7404_v40 = vld [vmem:[#allocation9 + $0x1ec] ss:$16 sps:$4 sm:$0xff]  }
 0x407   : > { %5201 = vmatmul.mubr.bf16.gmra.mxu1 %v7345_v63  ;;  %5394 = vmatmul.mubr.bf16.gmra.mxu0 %v7348_v24 }
 0x408   : > { %5210 = vmatprep.mubr.bf16.mxu1 %v7353_v34  ;;  %5403 = vmatprep.mubr.bf16.mxu0 %v7356_v30  ;;  %v9468_v34 = vpop.permute.xlu0 %4170 }
 0x409   : > { %10938 = vst [vmem:[#allocation25_spill] sm:$0xff] %v9468_v34 }
 0x40f   : > { %5211 = vmatmul.mubr.bf16.gmra.mxu1 %v7351_v16  ;;  %5404 = vmatmul.mubr.bf16.gmra.mxu0 %v7354_v55  ;;  %v9472_v16 = vpop.permute.xlu1 %4175 }
 0x410   : > { %5220 = vmatprep.mubr.bf16.mxu1 %v7359_v22  ;;  %5413 = vmatprep.mubr.bf16.mxu0 %v7362_v4  ;;  %10939 = vst [vmem:[#allocation63_spill] sm:$0xff] %v9472_v16  ;;  %v7399_v22 = vld [vmem:[#allocation9 + $0x3e0] ss:$16 sps:$4 sm:$0xff]   ;;  %v7402_v4 = vld [vmem:[#allocation9 + $0x1e8] ss:$16 sps:$4 sm:$0xff]  }
 0x411   : > { %v7425_v16 = vld [vmem:[#allocation9 + $0x2cc] ss:$16 sps:$4 sm:$0xff]  }
 0x417   : > { %v9408_v62 = vpop.f32.mrf.mxu1  ;;  %5221 = vmatmul.mubr.bf16.gmra.mxu1 %v7357_v51  ;;  %5414 = vmatmul.mubr.bf16.gmra.mxu0 %v7360_v53  ;;  %v7407_v51 = vld [vmem:[#allocation9 + $0x20c] ss:$16 sps:$4 sm:$0xff]  }
 0x418   : > { %5230 = vmatprep.mubr.bf16.mxu1 %v7365_v28  ;;  %5423 = vmatprep.mubr.bf16.mxu0 %v7368_v36  ;;  %v9478_v28 = vpop.permute.xlu0 %4180 }
 0x419   : > { %v9410_v58 = vpop.f32.mrf.mxu1  ;;  %10940 = vst [vmem:[#allocation23_spill] sm:$0xff] %v9478_v28 }
 0x41b   : > { %v9412_v39 = vpop.f32.mrf.mxu1 }
 0x41d   : > { %v9414_v48 = vpop.f32.mrf.mxu1 }
 0x41f   : > { %v9416_v25 = vpop.f32.mrf.mxu1  ;;  %5231 = vmatmul.mubr.bf16.gmra.mxu1 %v7363_v45  ;;  %5424 = vmatmul.mubr.bf16.gmra.mxu0 %v7366_v33  ;;  %v9482_v45 = vpop.permute.xlu1 %4185 }
 0x420   : > { %5240 = vmatprep.mubr.bf16.mxu1 %v7371_v46  ;;  %5433 = vmatprep.mubr.bf16.mxu0 %v7374_v60  ;;  %10941 = vst [vmem:[#allocation71_spill] sm:$0xff] %v9482_v45  ;;  %v7405_v60 = vld [vmem:[#allocation9 + $0x208] ss:$16 sps:$4 sm:$0xff]  }
 0x421   : > { %v9418_v15 = vpop.f32.mrf.mxu1 }
 0x423   : > { %v9420_v56 = vpop.f32.mrf.mxu1 }
 0x425   : > { %v9422_v12 = vpop.f32.mrf.mxu1 }
 0x427   : > { %v9424_v13 = vpop.f32.mrf.mxu1  ;;  %5241 = vmatmul.mubr.bf16.gmra.mxu1 %v7369_v43  ;;  %5434 = vmatmul.mubr.bf16.gmra.mxu0 %v7372_v21  ;;  %v9488_v43 = vpop.permute.xlu0 %4190  ;;  %v7410_v21 = vld [vmem:[#allocation9 + $0x22c] ss:$16 sps:$4 sm:$0xff]  }
 0x428   : > { %5250 = vmatprep.mubr.bf16.mxu1 %v7377_v23  ;;  %5443 = vmatprep.mubr.bf16.mxu0 %v7380_v18  ;;  %10942 = vst [vmem:[#allocation19_spill] sm:$0xff] %v9488_v43  ;;  %v9492_v18 = vpop.permute.xlu1 %4195  ;;  %v7422_v43 = vld [vmem:[#allocation9 + $0x2ac] ss:$16 sps:$4 sm:$0xff]  }
 0x429   : > { %v9426_v27 = vpop.f32.mrf.mxu1  ;;  %10943 = vst [vmem:[#allocation88_spill] sm:$0xff] %v9492_v18 }
 0x42b   : > { %v9428_v1 = vpop.f32.mrf.mxu1 }
 0x42d   : > { %v9430_v17 = vpop.f32.mrf.mxu1 }
 0x42f   : > { %v9432_v6 = vpop.f32.mrf.mxu1  ;;  %5251 = vmatmul.mubr.bf16.gmra.mxu1 %v7375_v29  ;;  %5444 = vmatmul.mubr.bf16.gmra.mxu0 %v7378_v31 }
 0x430   : > { %5260 = vmatprep.mubr.bf16.mxu1 %v7383_v57  ;;  %5453 = vmatprep.mubr.bf16.mxu0 %v7386_v41  ;;  %v9498_v57 = vpop.permute.xlu0 %4200 }
 0x431   : > { %v9434_v32 = vpop.f32.mrf.mxu1  ;;  %10944 = vst [vmem:[#allocation65_spill] sm:$0xff] %v9498_v57 }
 0x433   : > { %v9436_v50 = vpop.f32.mrf.mxu1 }
 0x435   : > { %v9438_v20 = vpop.f32.mrf.mxu1 }
 0x437   : > { %v9440_v7 = vpop.f32.mrf.mxu1  ;;  %5261 = vmatmul.mubr.bf16.gmra.mxu1 %v7381_v38  ;;  %5454 = vmatmul.mubr.bf16.gmra.mxu0 %v7384_v2  ;;  %v7408_v38 = vld [vmem:[#allocation9 + $0x228] ss:$16 sps:$4 sm:$0xff]   ;;  %v9502_v2 = vpop.permute.xlu1 %4205 }
 0x438   : > { %5270 = vmatprep.mubr.bf16.mxu1 %v7389_v0  ;;  %5463 = vmatprep.mubr.bf16.mxu0 %v7392_v9  ;;  %10945 = vst [vmem:[#allocation20_spill] sm:$0xff] %v9502_v2  ;;  %v7413_v0 = vld [vmem:[#allocation9 + $0x24c] ss:$16 sps:$4 sm:$0xff]  }
 0x439   : > { %v9444_v59 = vpop.f32.mrf.mxu1 }
 0x43b   : > { %v9446_v54 = vpop.f32.mrf.mxu1 }
 0x43d   : > { %v9450_v61 = vpop.f32.mrf.mxu1 }
 0x43f   : > { %v9454_v47 = vpop.f32.mrf.mxu1  ;;  %5271 = vmatmul.mubr.bf16.gmra.mxu1 %v7387_v37  ;;  %5464 = vmatmul.mubr.bf16.gmra.mxu0 %v7390_v11  ;;  %v9508_v11 = vpop.permute.xlu0 %4210 }
 0x440   : > { %5280 = vmatprep.mubr.bf16.mxu1 %v7395_v8  ;;  %5473 = vmatprep.mubr.bf16.mxu0 %v7398_v52  ;;  %10946 = vst [vmem:[#allocation24_spill] sm:$0xff] %v9508_v11  ;;  %v9512_v52 = vpop.permute.xlu1 %4215 }
 0x441   : > { %v9456_v10 = vpop.f32.mrf.mxu1  ;;  %10947 = vst [vmem:[#allocation34_spill] sm:$0xff] %v9512_v52  ;;  %v7419_v52 = vld [vmem:[#allocation9 + $0x28c] ss:$16 sps:$4 sm:$0xff]  }
 0x443   : > { %v9460_v26 = vpop.f32.mrf.mxu1 }
 0x445   : > { %v9464_v63 = vpop.f32.mrf.mxu1 }
 0x447   : > { %v9466_v24 = vpop.f32.mrf.mxu1  ;;  %5281 = vmatmul.mubr.bf16.gmra.mxu1 %v7393_v5  ;;  %5474 = vmatmul.mubr.bf16.gmra.mxu0 %v7396_v19  ;;  %v7411_v19 = vld [vmem:[#allocation9 + $0x248] ss:$16 sps:$4 sm:$0xff]  }
 0x448   : > { %5290 = vmatprep.mubr.bf16.mxu1 %v7401_v44  ;;  %5483 = vmatprep.mubr.bf16.mxu0 %v7404_v40  ;;  %v7416_v44 = vld [vmem:[#allocation9 + $0x26c] ss:$16 sps:$4 sm:$0xff]  }
 0x449   : > { %v9470_v30 = vpop.f32.mrf.mxu1 }
 0x44b   : > { %v9474_v55 = vpop.f32.mrf.mxu1 }
 0x44d   : > { %v9476_v53 = vpop.f32.mrf.mxu1 }
 0x44f   : > { %v9480_v36 = vpop.f32.mrf.mxu1  ;;  %5291 = vmatmul.mubr.bf16.gmra.mxu1 %v7399_v22  ;;  %5484 = vmatmul.mubr.bf16.gmra.mxu0 %v7402_v4  ;;  %v9518_v22 = vpop.permute.xlu0 %4220 }
 0x450   : > { %5493 = vmatprep.mubr.bf16.mxu0 %v7407_v51  ;;  %10948 = vst [vmem:[#allocation30_spill] sm:$0xff] %v9518_v22  ;;  %v9522_v51 = vpop.permute.xlu1 %4225  ;;  %v7417_v22 = vld [vmem:[#allocation9 + $0x288] ss:$16 sps:$4 sm:$0xff]  }
 0x451   : > { %v9484_v33 = vpop.f32.mrf.mxu1  ;;  %10949 = vst [vmem:[#allocation50_spill] sm:$0xff] %v9522_v51 }
 0x453   : > { %v9486_v46 = vpop.f32.mrf.mxu1 }
 0x454   : > { %v9532_v2 = vpop.permute.xlu1 %4235 }
 0x455   : > { %v9490_v23 = vpop.f32.mrf.mxu1  ;;  %10952 = vst [vmem:[#allocation41_spill] sm:$0xff] %v9532_v2 }
 0x457   : > { %v9494_v29 = vpop.f32.mrf.mxu1  ;;  %5494 = vmatmul.mubr.bf16.gmra.mxu0 %v7405_v60 }
 0x458   : > { %5503 = vmatprep.mubr.bf16.mxu0 %v7410_v21  ;;  %v9542_v18 = vpop.permute.xlu1 %4245 }
 0x459   : > { %v9496_v31 = vpop.f32.mrf.mxu1  ;;  %10957 = vst [vmem:[#allocation29_spill] sm:$0xff] %v9542_v18 }
 0x45b   : > { %v9500_v41 = vpop.f32.mrf.mxu1 }
 0x45d   : > { %v9504_v9 = vpop.f32.mrf.mxu1 }
 0x45f   : > { %v9506_v37 = vpop.f32.mrf.mxu1  ;;  %5504 = vmatmul.mubr.bf16.gmra.mxu0 %v7408_v38  ;;  %v7414_v38 = vld [vmem:[#allocation9 + $0x268] ss:$16 sps:$4 sm:$0xff]  }
 0x460   : > { %5513 = vmatprep.mubr.bf16.mxu0 %v7413_v0  ;;  %v9528_v0 = vpop.permute.xlu0 %4230 }
 0x461   : > { %v9510_v8 = vpop.f32.mrf.mxu1  ;;  %10950 = vst [vmem:[#allocation35_spill] sm:$0xff] %v9528_v0 }
 0x463   : > { %v9514_v5 = vpop.f32.mrf.mxu1 }
 0x464   : > { %v9538_v51 = vpop.permute.xlu0 %4240 }
 0x465   : > { %v9516_v40 = vpop.f32.mrf.mxu1  ;;  %10955 = vst [vmem:[#allocation31_spill] sm:$0xff] %v9538_v51  ;;  %v7420_v51 = vld [vmem:[#allocation9 + $0x2a8] ss:$16 sps:$4 sm:$0xff]  }
 0x467   : > { %v9520_v4 = vpop.f32.mrf.mxu1  ;;  %5514 = vmatmul.mubr.bf16.gmra.mxu0 %v7411_v19 }
 0x468   : > { %5523 = vmatprep.mubr.bf16.mxu0 %v7416_v44  ;;  %v9548_v2 = vpop.permute.xlu0 %4250 }
 0x469   : > { %v9524_v60 = vpop.f32.mrf.mxu1  ;;  %10960 = vst [vmem:[#allocation44_spill] sm:$0xff] %v9548_v2  ;;  %v7423_v2 = vld [vmem:[#allocation9 + $0x2c8] ss:$16 sps:$4 sm:$0xff]  }
 0x46b   : > { %v9526_v21 = vpop.f32.mrf.mxu1 }
 0x46c   : > { %v9558_v18 = vpop.permute.xlu0 %4260 }
 0x46d   : > { %v9530_v11 = vpop.f32.mrf.mxu1  ;;  %10965 = vst [vmem:[#allocation114_spill] sm:$0xff] %v9558_v18  ;;  %v7426_v18 = vld [vmem:[#allocation9 + $0x2e8] ss:$16 sps:$4 sm:$0xff]  }
 0x46e   : > { %10951 = vst [vmem:[#allocation46_spill] sm:$0xff] %v9530_v11  ;;  %v10995_v11 = vld [vmem:[#allocation69_spill] sm:$0xff] }
 0x46f   : > { %v9534_v57 = vpop.f32.mrf.mxu1  ;;  %5524 = vmatmul.mubr.bf16.gmra.mxu0 %v7414_v38 }
 0x470   : > { %10953 = vst [vmem:[#allocation32_spill] sm:$0xff] %v9534_v57  ;;  %5533 = vmatprep.mubr.bf16.mxu0 %v7419_v52  ;;  %v9552_v52 = vpop.permute.xlu1 %4255 }
 0x471   : > { %v9536_v19 = vpop.f32.mrf.mxu1  ;;  %10962 = vst [vmem:[#allocation57_spill] sm:$0xff] %v9552_v52  ;;  %v9568_v52 = vpop.permute.xlu0 %4270 }
 0x472   : > { %10954 = vst [vmem:[#allocation36_spill] sm:$0xff] %v9536_v19  ;;  %10970 = vst [vmem:[#allocation73_spill] sm:$0xff] %v9568_v52 }
 0x473   : > { %v9540_v44 = vpop.f32.mrf.mxu1 }
 0x474   : > { %10956 = vst [vmem:[#allocation33_spill] sm:$0xff] %v9540_v44  ;;  %v9562_v42 = vpop.permute.xlu1 %4265 }
 0x475   : > { %v9544_v0 = vpop.f32.mrf.mxu1  ;;  %10967 = vst [vmem:[#allocation97_spill] sm:$0xff] %v9562_v42  ;;  %v9578_v42 = vpop.permute.xlu0 %4280 }
 0x476   : > { %10958 = vst [vmem:[#allocation64_spill] sm:$0xff] %v9544_v0  ;;  %10975 = vst [vmem:[#allocation79_spill] sm:$0xff] %v9578_v42  ;;  %v7429_v42 = vld [vmem:[#allocation9 + $0x308] ss:$16 sps:$4 sm:$0xff]   ;;  %v7437_v0 = vld [vmem:[#allocation9 + $0x34c] ss:$16 sps:$4 sm:$0xff]  }
 0x477   : > { %v9546_v45 = vpop.f32.mrf.mxu1  ;;  %5534 = vmatmul.mubr.bf16.gmra.mxu0 %v7417_v22 }
 0x478   : > { %10959 = vst [vmem:[#allocation43_spill] sm:$0xff] %v9546_v45  ;;  %5543 = vmatprep.mubr.bf16.mxu0 %v7422_v43  ;;  %v9572_v49 = vpop.permute.xlu1 %4275 }
 0x479   : > { %v9550_v38 = vpop.f32.mrf.mxu1  ;;  %10972 = vst [vmem:[#allocation72_spill] sm:$0xff] %v9572_v49  ;;  %v9588_v49 = vpop.permute.xlu0 %4290 }
 0x47a   : > { %10961 = vst [vmem:[#allocation77_spill] sm:$0xff] %v9550_v38  ;;  %10980 = vst [vmem:[#allocation55_spill] sm:$0xff] %v9588_v49 }
 0x47b   : > { %v9554_v28 = vpop.f32.mrf.mxu1 }
 0x47c   : > { %10963 = vst [vmem:[#allocation49_spill] sm:$0xff] %v9554_v28 }
 0x47d   : > { %v9556_v34 = vpop.f32.mrf.mxu1 }
 0x47e   : > { %10964 = vst [vmem:[#allocation80_spill] sm:$0xff] %v9556_v34 }
 0x47f   : > { %v9560_v14 = vpop.f32.mrf.mxu1  ;;  %5544 = vmatmul.mubr.bf16.gmra.mxu0 %v7420_v51 }
 0x480   : > { %10966 = vst [vmem:[#allocation58_spill] sm:$0xff] %v9560_v14  ;;  %5553 = vmatprep.mubr.bf16.mxu0 %v7425_v16 }
 0x481   : > { %v9564_v22 = vpop.f32.mrf.mxu1 }
 0x482   : > { %10968 = vst [vmem:[#allocation76_spill] sm:$0xff] %v9564_v22  ;;  %v7431_v22 = vld [vmem:[#allocation9 + $0x30c] ss:$16 sps:$4 sm:$0xff]  }
 0x483   : > { %v9566_v43 = vpop.f32.mrf.mxu1 }
 0x484   : > { %10969 = vst [vmem:[#allocation82_spill] sm:$0xff] %v9566_v43  ;;  %v9582_v43 = vpop.permute.xlu1 %4285 }
 0x485   : > { %v9570_v3 = vpop.f32.mrf.mxu1  ;;  %10977 = vst [vmem:[#allocation26_spill] sm:$0xff] %v9582_v43  ;;  %v9598_v43 = vpop.permute.xlu0 %4300 }
 0x486   : > { %10971 = vst [vmem:[#allocation116_spill] sm:$0xff] %v9570_v3  ;;  %10985 = vst [vmem:[#allocation96_spill] sm:$0xff] %v9598_v43  ;;  %v10986_v3 = vld [vmem:[#allocation66_spill] sm:$0xff] }
 0x487   : > { %v9574_v34 = vpop.f32.mrf.mxu1  ;;  %5554 = vmatmul.mubr.bf16.gmra.mxu0 %v7423_v2 }
 0x488   : > { %10973 = vst [vmem:[#allocation113_spill] sm:$0xff] %v9574_v34  ;;  %5563 = vmatprep.mubr.bf16.mxu0 %v7428_v35  ;;  %v9592_v35 = vpop.permute.xlu1 %4295 }
 0x489   : > { %v9576_v51 = vpop.f32.mrf.mxu1  ;;  %10982 = vst [vmem:[#allocation56_spill] sm:$0xff] %v9592_v35  ;;  %v4985_v35 = vadd.f32 %v9410_v58, %v10986_v3  ;;  %v5849_v58 = vpop.permute.xlu0 %5848 }
 0x48a   : > { %10974 = vst [vmem:[#allocation115_spill] sm:$0xff] %v9576_v51 }
 0x48b   : > { %v9580_v16 = vpop.f32.mrf.mxu1 }
 0x48c   : > { %10976 = vst [vmem:[#allocation61_spill] sm:$0xff] %v9580_v16  ;;  %v7434_v16 = vld [vmem:[#allocation9 + $0x32c] ss:$16 sps:$4 sm:$0xff]  }
 0x48d   : > { %v9584_v52 = vpop.f32.mrf.mxu1 }
 0x48e   : > { %10978 = vst [vmem:[#allocation53_spill] sm:$0xff] %v9584_v52  ;;  %v4983_v52 = vadd.f32 %v9408_v62, %v10986_v3  ;;  %v7432_v62 = vld [vmem:[#allocation9 + $0x328] ss:$16 sps:$4 sm:$0xff]  }
 0x48f   : > { %v9586_v14 = vpop.f32.mrf.mxu1  ;;  %5564 = vmatmul.mubr.bf16.gmra.mxu0 %v7426_v18 }
 0x490   : > { %10979 = vst [vmem:[#allocation54_spill] sm:$0xff] %v9586_v14  ;;  %5573 = vmatprep.mubr.bf16.mxu0 %v7431_v22  ;;  %v9604_v22 = vpop.permute.xlu1 %4305 }
 0x491   : > { %v9590_v2 = vpop.f32.mrf.mxu1  ;;  %10988 = vst [vmem:[#allocation98_spill] sm:$0xff] %v9604_v22 }
 0x492   : > { %10981 = vst [vmem:[#allocation48_spill] sm:$0xff] %v9590_v2 }
 0x493   : > { %v9594_v51 = vpop.f32.mrf.mxu1 }
 0x494   : > { %10983 = vst [vmem:[#allocation95_spill] sm:$0xff] %v9594_v51 }
 0x495   : > { %v9596_v34 = vpop.f32.mrf.mxu1 }
 0x496   : > { %10984 = vst [vmem:[#allocation60_spill] sm:$0xff] %v9596_v34  ;;  %v10990_v34 = vld [vmem:[#allocation90_spill] sm:$0xff] }
 0x497   : > { %v9602_v14 = vpop.f32.mrf.mxu1  ;;  %v5335_v18 = vpop.f32.mrf.mxu0  ;;  %5574 = vmatmul.mubr.bf16.gmra.mxu0 %v7429_v42  ;;  %v4987_v43 = vadd.f32 %v9412_v39, %v10990_v34 }
 0x498   : > { %10987 = vst [vmem:[#allocation62_spill] sm:$0xff] %v9602_v14  ;;  %v5336_v49 = vadd.f32 %v5335_v18, %v4983_v52  ;;  %5583 = vmatprep.mubr.bf16.mxu0 %v7434_v16  ;;  %v4989_v14 = vadd.f32 %v9414_v48, %v10990_v34  ;;  %v10992_v52 = vld [vmem:[#allocation67_spill] sm:$0xff]  ;;  %v5854_v39 = vpop.permute.xlu1 %5853 }
 0x499   : > { %v9608_v51 = vpop.f32.mrf.mxu1  ;;  %v5337_v2 = vpop.f32.mrf.mxu0  ;;  %v4993_v16 = vadd.f32 %v9416_v25, %v10992_v52  ;;  %v4995_v34 = vadd.f32 %v9418_v15, %v10992_v52  ;;  %v7440_v52 = vld [vmem:[#allocation9 + $0x36c] ss:$16 sps:$4 sm:$0xff]  }
 0x49a   : > { %10989 = vst [vmem:[#allocation87_spill] sm:$0xff] %v9608_v51  ;;  %v5338_v28 = vadd.f32 %v5337_v2, %v4985_v35  ;;  %v5654_v42 = vmax.f32 %v5336_v49, 0.0 }
 0x49b   : > { %v5339_v38 = vpop.f32.mrf.mxu0  ;;  %v9614_v45 = vpop.f32.mrf.mxu1 }
 0x49c   : > { %10991 = vst [vmem:[#allocation94_spill] sm:$0xff] %v9614_v45  ;;  %v5340_v22 = vadd.f32 %v5339_v38, %v4987_v43  ;;  %v5655_v18 = vmax.f32 %v5338_v28, 0.0  ;;  %v6166_v35 = vmul.f32 %v5849_v58, %v5654_v42  ;;  %v10994_v38 = vld [vmem:[#allocation83_spill] sm:$0xff]  ;;  %v5859_v45 = vpop.permute.xlu0 %5858 }
 0x49d   : > { %v5341_v3 = vpop.f32.mrf.mxu0  ;;  %v9618_v57 = vpop.f32.mrf.mxu1  ;;  %v4997_v43 = vadd.f32 %v9420_v56, %v10994_v38 }
 0x49e   : > { %v5656_v51 = vmax.f32 %v5340_v22, 0.0  ;;  %v5342_v44 = vadd.f32 %v5341_v3, %v4989_v14  ;;  %10993 = vst [vmem:[#allocation40_spill] sm:$0xff] %v9618_v57  ;;  %v6167_v28 = vmul.f32 %v5849_v58, %v5655_v18 }
 0x49f   : > { %v5345_v2 = vpop.f32.mrf.mxu0  ;;  %5584 = vmatmul.mubr.bf16.gmra.mxu0 %v7432_v62 }
 0x4a0   : > { %v6168_v19 = vmul.f32 %v5854_v39, %v5656_v51  ;;  %v5657_v48 = vmax.f32 %v5342_v44, 0.0  ;;  %v5346_v49 = vadd.f32 %v5345_v2, %v4993_v16  ;;  %5593 = vmatprep.mubr.bf16.mxu0 %v7437_v0  ;;  %v7435_v51 = vld [vmem:[#allocation9 + $0x348] ss:$16 sps:$4 sm:$0xff]   ;;  %v4999_v44 = vadd.f32 %v9422_v12, %v10994_v38  ;;  %v9626_v0 = vpop.f32.mrf.mxu1 }
 0x4a1   : > { %v5347_v25 = vpop.f32.mrf.mxu0 }
 0x4a2   : > { %v6294_v22 = vadd.f32 %v6168_v19, %v6166_v35  ;;  %v6169_v14 = vmul.f32 %v5854_v39, %v5657_v48  ;;  %v5658_v3 = vmax.f32 %v5346_v49, 0.0  ;;  %v5348_v62 = vadd.f32 %v5347_v25, %v4995_v34  ;;  %v5864_v35 = vpop.permute.xlu1 %5863  ;;  %v9630_v34 = vpop.f32.mrf.mxu1 }
 0x4a3   : > { %v5349_v42 = vpop.f32.mrf.mxu0  ;;  %v5003_v19 = vadd.f32 %v9424_v13, %v10995_v11 }
 0x4a4   : > { %v6363_v16 = vadd.f32 %v6169_v14, %v6167_v28  ;;  %v6170_v2 = vmul.f32 %v5859_v45, %v5658_v3  ;;  %v5350_v15 = vadd.f32 %v5349_v42, %v4997_v43  ;;  %v5659_v57 = vmax.f32 %v5348_v62, 0.0  ;;  %v10996_v3 = vld [vmem:[#allocation84_spill] sm:$0xff] }
 0x4a5   : > { %v5351_v56 = vpop.f32.mrf.mxu0  ;;  %v5005_v43 = vadd.f32 %v9426_v27, %v10995_v11  ;;  %v5007_v13 = vadd.f32 %v9428_v1, %v10996_v3  ;;  %v7443_v11 = vld [vmem:[#allocation9 + $0x38c] ss:$16 sps:$4 sm:$0xff]  }
 0x4a6   : > { %v6295_v58 = vadd.f32 %v6294_v22, %v6170_v2  ;;  %v5660_v18 = vmax.f32 %v5350_v15, 0.0  ;;  %v5352_v39 = vadd.f32 %v5351_v56, %v4999_v44  ;;  %v6171_v48 = vmul.f32 %v5859_v45, %v5659_v57  ;;  %v5869_v45 = vpop.permute.xlu0 %5868  ;;  %v7438_v44 = vld [vmem:[#allocation9 + $0x368] ss:$16 sps:$4 sm:$0xff]   ;;  %v9638_v15 = vpop.f32.mrf.mxu1 }
 0x4a7   : > { %v5355_v49 = vpop.f32.mrf.mxu0  ;;  %5594 = vmatmul.mubr.bf16.gmra.mxu0 %v7435_v51  ;;  %v5009_v2 = vadd.f32 %v9430_v17, %v10996_v3 }
 0x4a8   : > { %v6172_v12 = vmul.f32 %v5864_v35, %v5660_v18  ;;  %v5661_v38 = vmax.f32 %v5352_v39, 0.0  ;;  %v5356_v25 = vadd.f32 %v5355_v49, %v5003_v19  ;;  %5603 = vmatprep.mubr.bf16.mxu0 %v7440_v52  ;;  %v6364_v28 = vadd.f32 %v6363_v16, %v6171_v48  ;;  %v10997_v18 = vld [vmem:[#allocation51_spill] sm:$0xff]  ;;  %v5874_v48 = vpop.permute.xlu1 %5873 }
 0x4a9   : > { %v5357_v14 = vpop.f32.mrf.mxu0  ;;  %v5013_v1 = vadd.f32 %v9432_v6, %v10997_v18 }
 0x4aa   : > { %v6296_v22 = vadd.f32 %v6295_v58, %v6172_v12  ;;  %v6173_v62 = vmul.f32 %v5864_v35, %v5661_v38  ;;  %v5662_v42 = vmax.f32 %v5356_v25, 0.0  ;;  %v5358_v57 = vadd.f32 %v5357_v14, %v5005_v43  ;;  %v9642_v38 = vpop.f32.mrf.mxu1 }
 0x4ab   : > { %v5359_v51 = vpop.f32.mrf.mxu0 }
 0x4ac   : > { %v6365_v52 = vadd.f32 %v6364_v28, %v6173_v62  ;;  %v6174_v56 = vmul.f32 %v5869_v45, %v5662_v42  ;;  %v5360_v27 = vadd.f32 %v5359_v51, %v5007_v13  ;;  %v5663_v16 = vmax.f32 %v5358_v57, 0.0  ;;  %v10998_v13 = vld [vmem:[#allocation52_spill] sm:$0xff] }
 0x4ad   : > { %v5361_v19 = vpop.f32.mrf.mxu0  ;;  %v5015_v28 = vadd.f32 %v9434_v32, %v10997_v18  ;;  %v5017_v6 = vadd.f32 %v9436_v50, %v10998_v13  ;;  %v10999_v18 = vld [vmem:[#allocation68_spill] sm:$0xff] }
 0x4ae   : > { %v6297_v58 = vadd.f32 %v6296_v22, %v6174_v56  ;;  %v5664_v39 = vmax.f32 %v5360_v27, 0.0  ;;  %v5362_v35 = vadd.f32 %v5361_v19, %v5009_v2  ;;  %v6175_v49 = vmul.f32 %v5869_v45, %v5663_v16  ;;  %v5879_v45 = vpop.permute.xlu0 %5878  ;;  %v9650_v56 = vpop.f32.mrf.mxu1 }
 0x4af   : > { %v5365_v12 = vpop.f32.mrf.mxu0  ;;  %5604 = vmatmul.mubr.bf16.gmra.mxu0 %v7438_v44  ;;  %v7441_v44 = vld [vmem:[#allocation9 + $0x388] ss:$16 sps:$4 sm:$0xff]   ;;  %v5019_v2 = vadd.f32 %v9438_v20, %v10998_v13  ;;  %v5023_v50 = vadd.f32 %v9440_v7, %v10999_v18 }
 0x4b0   : > { %v6176_v17 = vmul.f32 %v5874_v48, %v5664_v39  ;;  %v5665_v25 = vmax.f32 %v5362_v35, 0.0  ;;  %v5366_v43 = vadd.f32 %v5365_v12, %v5013_v1  ;;  %5613 = vmatprep.mubr.bf16.mxu0 %v7443_v11  ;;  %v6366_v14 = vadd.f32 %v6365_v52, %v6175_v49  ;;  %v7446_v52 = vld [vmem:[#allocation9 + $0x3ac] ss:$16 sps:$4 sm:$0xff]   ;;  %v5884_v35 = vpop.permute.xlu1 %5883  ;;  %v9654_v12 = vpop.f32.mrf.mxu1 }
 0x4b1   : > { %v5367_v3 = vpop.f32.mrf.mxu0 }
 0x4b2   : > { %v6298_v22 = vadd.f32 %v6297_v58, %v6176_v17  ;;  %v6177_v62 = vmul.f32 %v5874_v48, %v5665_v25  ;;  %v5666_v42 = vmax.f32 %v5366_v43, 0.0  ;;  %v5368_v57 = vadd.f32 %v5367_v3, %v5015_v28  ;;  %v11000_v3 = vld [vmem:[#allocation18_spill] sm:$0xff] }
 0x4b3   : > { %v5369_v51 = vpop.f32.mrf.mxu0  ;;  %v5025_v43 = vadd.f32 %v9444_v59, %v10999_v18  ;;  %v5027_v7 = vadd.f32 %v9446_v54, %v11000_v3 }
 0x4b4   : > { %v6367_v27 = vadd.f32 %v6366_v14, %v6177_v62  ;;  %v6178_v11 = vmul.f32 %v5879_v45, %v5666_v42  ;;  %v5370_v32 = vadd.f32 %v5369_v51, %v5017_v6  ;;  %v5667_v16 = vmax.f32 %v5368_v57, 0.0  ;;  %v5889_v62 = vpop.permute.xlu0 %5888  ;;  %v7444_v57 = vld [vmem:[#allocation9 + $0x3a8] ss:$16 sps:$4 sm:$0xff]  }
 0x4b5   : > { %v5371_v19 = vpop.f32.mrf.mxu0  ;;  %v5029_v51 = vadd.f32 %v9450_v61, %v11000_v3 }
 0x4b6   : > { %v6299_v1 = vadd.f32 %v6298_v22, %v6178_v11  ;;  %v5668_v58 = vmax.f32 %v5370_v32, 0.0  ;;  %v5372_v39 = vadd.f32 %v5371_v19, %v5019_v2  ;;  %v6179_v48 = vmul.f32 %v5879_v45, %v5667_v16  ;;  %v11001_v16 = vld [vmem:[#allocation70_spill] sm:$0xff] }
 0x4b7   : > { %v5375_v49 = vpop.f32.mrf.mxu0  ;;  %5614 = vmatmul.mubr.bf16.gmra.mxu0 %v7441_v44  ;;  %v9662_v44 = vpop.f32.mrf.mxu1  ;;  %v5033_v54 = vadd.f32 %v9454_v47, %v11001_v16 }
 0x4b8   : > { %v6180_v20 = vmul.f32 %v5884_v35, %v5668_v58  ;;  %v5669_v17 = vmax.f32 %v5372_v39, 0.0  ;;  %v5376_v25 = vadd.f32 %v5375_v49, %v5023_v50  ;;  %5623 = vmatprep.mubr.bf16.mxu0 %v7446_v52  ;;  %v6368_v28 = vadd.f32 %v6367_v27, %v6179_v48  ;;  %v7449_v27 = vld [vmem:[#allocation9 + $0x3cc] ss:$16 sps:$4 sm:$0xff]  }
 0x4b9   : > { %v5377_v14 = vpop.f32.mrf.mxu0 }
 0x4ba   : > { %v6300_v13 = vadd.f32 %v6299_v1, %v6180_v20  ;;  %v6181_v6 = vmul.f32 %v5884_v35, %v5669_v17  ;;  %v5670_v22 = vmax.f32 %v5376_v25, 0.0  ;;  %v5378_v42 = vadd.f32 %v5377_v14, %v5025_v43  ;;  %v5894_v1 = vpop.permute.xlu1 %5893  ;;  %v9666_v35 = vpop.f32.mrf.mxu1  ;;  %v11002_v43 = vld [vmem:[#allocation21_spill] sm:$0xff] }
 0x4bb   : > { %v5379_v45 = vpop.f32.mrf.mxu0  ;;  %v5035_v20 = vadd.f32 %v9456_v10, %v11001_v16  ;;  %v5037_v47 = vadd.f32 %v9460_v26, %v11002_v43 }
 0x4bc   : > { %v6369_v2 = vadd.f32 %v6368_v28, %v6181_v6  ;;  %v6182_v11 = vmul.f32 %v5889_v62, %v5670_v22  ;;  %v5380_v59 = vadd.f32 %v5379_v45, %v5027_v7  ;;  %v5671_v32 = vmax.f32 %v5378_v42, 0.0  ;;  %v5899_v7 = vpop.permute.xlu0 %5898  ;;  %v7447_v22 = vld [vmem:[#allocation9 + $0x3c8] ss:$16 sps:$4 sm:$0xff]   ;;  %v9674_v42 = vpop.f32.mrf.mxu1 }
 0x4bd   : > { %v5381_v52 = vpop.f32.mrf.mxu0 }
 0x4be   : > { %v6301_v19 = vadd.f32 %v6300_v13, %v6182_v11  ;;  %v5672_v18 = vmax.f32 %v5380_v59, 0.0  ;;  %v5382_v50 = vadd.f32 %v5381_v52, %v5029_v51  ;;  %v6183_v58 = vmul.f32 %v5889_v62, %v5671_v32  ;;  %v7452_v51 = vld [vmem:[#allocation9 + $0x3ec] ss:$16 sps:$4 sm:$0xff]   ;;  %v11003_v59 = vld [vmem:[#allocation78_spill] sm:$0xff]  ;;  %v5904_v16 = vpop.permute.xlu1 %5903 }
 0x4bf   : > { %v5385_v39 = vpop.f32.mrf.mxu0  ;;  %5624 = vmatmul.mubr.bf16.gmra.mxu0 %v7444_v57  ;;  %v5039_v62 = vadd.f32 %v9464_v63, %v11002_v43  ;;  %v5043_v26 = vadd.f32 %v9466_v24, %v11003_v59 }
 0x4c0   : > { %v6184_v61 = vmul.f32 %v5894_v1, %v5672_v18  ;;  %v5673_v48 = vmax.f32 %v5382_v50, 0.0  ;;  %v5386_v49 = vadd.f32 %v5385_v39, %v5033_v54  ;;  %5633 = vmatprep.mubr.bf16.mxu0 %v7449_v27  ;;  %v6370_v17 = vadd.f32 %v6369_v2, %v6183_v58  ;;  %v9678_v18 = vpop.f32.mrf.mxu1 }
 0x4c1   : > { %v5387_v25 = vpop.f32.mrf.mxu0  ;;  %v5045_v58 = vadd.f32 %v9470_v30, %v11003_v59 }
 0x4c2   : > { %v6302_v28 = vadd.f32 %v6301_v19, %v6184_v61  ;;  %v6185_v14 = vmul.f32 %v5894_v1, %v5673_v48  ;;  %v5674_v3 = vmax.f32 %v5386_v49, 0.0  ;;  %v5388_v13 = vadd.f32 %v5387_v25, %v5035_v20  ;;  %v11004_v48 = vld [vmem:[#allocation59_spill] sm:$0xff]  ;;  %v5909_v25 = vpop.permute.xlu0 %5908 }
 0x4c3   : > { %v5389_v6 = vpop.f32.mrf.mxu0  ;;  %v5047_v24 = vadd.f32 %v9474_v55, %v11004_v48 }
 0x4c4   : > { %v6371_v45 = vadd.f32 %v6370_v17, %v6185_v14  ;;  %v6186_v57 = vmul.f32 %v5899_v7, %v5674_v3  ;;  %v5390_v10 = vadd.f32 %v5389_v6, %v5037_v47  ;;  %v5675_v2 = vmax.f32 %v5388_v13, 0.0  ;;  %v9686_v3 = vpop.f32.mrf.mxu1 }
 0x4c5   : > { %v5391_v11 = vpop.f32.mrf.mxu0  ;;  %v5049_v14 = vadd.f32 %v9476_v53, %v11004_v48 }
 0x4c6   : > { %v6303_v27 = vadd.f32 %v6302_v28, %v6186_v57  ;;  %v5676_v32 = vmax.f32 %v5390_v10, 0.0  ;;  %v5392_v52 = vadd.f32 %v5391_v11, %v5039_v62  ;;  %v6187_v54 = vmul.f32 %v5899_v7, %v5675_v2  ;;  %v7450_v28 = vld [vmem:[#allocation9 + $0x3e8] ss:$16 sps:$4 sm:$0xff]   ;;  %v9690_v59 = vpop.f32.mrf.mxu1 }
 0x4c7   : > { %v5395_v19 = vpop.f32.mrf.mxu0  ;;  %5634 = vmatmul.mubr.bf16.gmra.mxu0 %v7447_v22  ;;  %v11005_v62 = vld [vmem:[#allocation91_spill] sm:$0xff] }
 0x4c8   : > { %v6188_v63 = vmul.f32 %v5904_v16, %v5676_v32  ;;  %v5677_v50 = vmax.f32 %v5392_v52, 0.0  ;;  %v5396_v1 = vadd.f32 %v5395_v19, %v5043_v26  ;;  %5643 = vmatprep.mubr.bf16.mxu0 %v7452_v51  ;;  %v6372_v39 = vadd.f32 %v6371_v45, %v6187_v54  ;;  %v5914_v51 = vpop.permute.xlu1 %5913  ;;  %v11006_v54 = vld [vmem:[#allocation92_spill] sm:$0xff]  ;;  %v9698_v48 = vpop.f32.mrf.mxu1 }
 0x4c9   : > { %v5397_v61 = vpop.f32.mrf.mxu0  ;;  %v5053_v55 = vadd.f32 %v9480_v36, %v11005_v62  ;;  %v5055_v32 = vadd.f32 %v9484_v33, %v11005_v62  ;;  %v5057_v36 = vadd.f32 %v9486_v46, %v11006_v54 }
 0x4ca   : > { %v6304_v49 = vadd.f32 %v6303_v27, %v6188_v63  ;;  %v6189_v20 = vmul.f32 %v5904_v16, %v5677_v50  ;;  %v5678_v17 = vmax.f32 %v5396_v1, 0.0  ;;  %v5398_v43 = vadd.f32 %v5397_v61, %v5045_v58  ;;  %v5919_v1 = vpop.permute.xlu0 %5918 }
 0x4cb   : > { %v5399_v47 = vpop.f32.mrf.mxu0  ;;  %v5059_v61 = vadd.f32 %v9490_v23, %v11006_v54 }
 0x4cc   : > { %v6373_v7 = vadd.f32 %v6372_v39, %v6189_v20  ;;  %v6190_v13 = vmul.f32 %v5909_v25, %v5678_v17  ;;  %v5400_v30 = vadd.f32 %v5399_v47, %v5047_v24  ;;  %v5679_v6 = vmax.f32 %v5398_v43, 0.0 }
 0x4cd   : > { %v5401_v22 = vpop.f32.mrf.mxu0 }
 0x4ce   : > { %v6305_v45 = vadd.f32 %v6304_v49, %v6190_v13  ;;  %v5680_v57 = vmax.f32 %v5400_v30, 0.0  ;;  %v5402_v10 = vadd.f32 %v5401_v22, %v5049_v14  ;;  %v6191_v2 = vmul.f32 %v5909_v25, %v5679_v6  ;;  %v11007_v25 = vld [vmem:[#allocation85_spill] sm:$0xff]  ;;  %v5924_v14 = vpop.permute.xlu1 %5923  ;;  %v9702_v30 = vpop.f32.mrf.mxu1 }
 0x4cf   : > { %v5405_v11 = vpop.f32.mrf.mxu0  ;;  %5644 = vmatmul.mubr.bf16.gmra.mxu0 %v7450_v28  ;;  %v5063_v43 = vadd.f32 %v9494_v29, %v11007_v25  ;;  %v5065_v62 = vadd.f32 %v9496_v31, %v11007_v25 }
 0x4d0   : > { %v6192_v53 = vmul.f32 %v5914_v51, %v5680_v57  ;;  %v5681_v26 = vmax.f32 %v5402_v10, 0.0  ;;  %v5406_v27 = vadd.f32 %v5405_v11, %v5053_v55  ;;  %v6374_v52 = vadd.f32 %v6373_v7, %v6191_v2  ;;  %v11008_v57 = vld [vmem:[#allocation86_spill] sm:$0xff]  ;;  %v5929_v11 = vpop.permute.xlu0 %5928 }
 0x4d1   : > { %v5407_v16 = vpop.f32.mrf.mxu0  ;;  %v5067_v10 = vadd.f32 %v9500_v41, %v11008_v57 }
 0x4d2   : > { %v6306_v19 = vadd.f32 %v6305_v45, %v6192_v53  ;;  %v6193_v63 = vmul.f32 %v5914_v51, %v5681_v26  ;;  %v5682_v50 = vmax.f32 %v5406_v27, 0.0  ;;  %v5408_v58 = vadd.f32 %v5407_v16, %v5055_v32  ;;  %v9710_v32 = vpop.f32.mrf.mxu1 }
 0x4d3   : > { %v5409_v39 = vpop.f32.mrf.mxu0  ;;  %v5069_v27 = vadd.f32 %v9504_v9, %v11008_v57  ;;  %v11011_v57 = vld [vmem:[#allocation102_spill] sm:$0xff] }
 0x4d4   : > { %v6375_v24 = vadd.f32 %v6374_v52, %v6193_v63  ;;  %v6194_v49 = vmul.f32 %v5919_v1, %v5682_v50  ;;  %v5410_v20 = vadd.f32 %v5409_v39, %v5057_v36  ;;  %v5683_v33 = vmax.f32 %v5408_v58, 0.0  ;;  %v5934_v58 = vpop.permute.xlu1 %5933 }
 0x4d5   : > { %v5411_v17 = vpop.f32.mrf.mxu0 }
 0x4d6   : > { %v6307_v46 = vadd.f32 %v6306_v19, %v6194_v49  ;;  %v5684_v47 = vmax.f32 %v5410_v20, 0.0  ;;  %v5412_v28 = vadd.f32 %v5411_v17, %v5059_v61  ;;  %v6195_v7 = vmul.f32 %v5919_v1, %v5683_v33  ;;  %v11009_v19 = vld [vmem:[#allocation100_spill] sm:$0xff] }
 0x4d7   : > { %v5415_v13 = vpop.f32.mrf.mxu0  ;;  %v5073_v63 = vadd.f32 %v9506_v37, %v11009_v19  ;;  %v5075_v33 = vadd.f32 %v9510_v8, %v11009_v19 }
 0x4d8   : > { %v6196_v6 = vmul.f32 %v5924_v14, %v5684_v47  ;;  %v5685_v23 = vmax.f32 %v5412_v28, 0.0  ;;  %v5416_v22 = vadd.f32 %v5415_v13, %v5063_v43  ;;  %v6376_v55 = vadd.f32 %v6375_v24, %v6195_v7  ;;  %v9714_v24 = vpop.f32.mrf.mxu1  ;;  %v11010_v43 = vld [vmem:[#allocation101_spill] sm:$0xff] }
 0x4d9   : > { %v5417_v45 = vpop.f32.mrf.mxu0 }
 0x4da   : > { %v6308_v29 = vadd.f32 %v6307_v46, %v6196_v6  ;;  %v6197_v51 = vmul.f32 %v5924_v14, %v5685_v23  ;;  %v5686_v2 = vmax.f32 %v5416_v22, 0.0  ;;  %v5418_v53 = vadd.f32 %v5417_v45, %v5065_v62  ;;  %v5939_v14 = vpop.permute.xlu0 %5938  ;;  %v9722_v23 = vpop.f32.mrf.mxu1 }
 0x4db   : > { %v5419_v26 = vpop.f32.mrf.mxu0  ;;  %v5077_v46 = vadd.f32 %v9514_v5, %v11010_v43  ;;  %v5079_v6 = vadd.f32 %v9516_v40, %v11010_v43  ;;  %v11015_v43 = vld [vmem:[#allocation32_spill] sm:$0xff] }
 0x4dc   : > { %v6377_v52 = vadd.f32 %v6376_v55, %v6197_v51  ;;  %v6198_v16 = vmul.f32 %v5929_v11, %v5686_v2  ;;  %v5420_v54 = vadd.f32 %v5419_v26, %v5067_v10  ;;  %v5687_v31 = vmax.f32 %v5418_v53, 0.0  ;;  %v5944_v2 = vpop.permute.xlu1 %5943  ;;  %v9726_v26 = vpop.f32.mrf.mxu1 }
 0x4dd   : > { %v5421_v36 = vpop.f32.mrf.mxu0  ;;  %v5083_v10 = vadd.f32 %v9520_v4, %v11011_v57 }
 0x4de   : > { %v6309_v41 = vadd.f32 %v6308_v29, %v6198_v16  ;;  %v5688_v50 = vmax.f32 %v5420_v54, 0.0  ;;  %v5422_v1 = vadd.f32 %v5421_v36, %v5069_v27  ;;  %v6199_v39 = vmul.f32 %v5929_v11, %v5687_v31  ;;  %v11012_v36 = vld [vmem:[#allocation103_spill] sm:$0xff] }
 0x4df   : > { %v5425_v61 = vpop.f32.mrf.mxu0  ;;  %v5085_v16 = vadd.f32 %v9524_v60, %v11011_v57  ;;  %v5087_v19 = vadd.f32 %v9526_v21, %v11012_v36 }
 0x4e0   : > { %v6200_v49 = vmul.f32 %v5934_v58, %v5688_v50  ;;  %v5689_v9 = vmax.f32 %v5422_v1, 0.0  ;;  %v5426_v20 = vadd.f32 %v5425_v61, %v5073_v63  ;;  %v6378_v17 = vadd.f32 %v6377_v52, %v6199_v39  ;;  %v5949_v50 = vpop.permute.xlu0 %5948  ;;  %v11013_v39 = vld [vmem:[#allocation46_spill] sm:$0xff] }
 0x4e1   : > { %v5427_v25 = vpop.f32.mrf.mxu0  ;;  %v5089_v61 = vadd.f32 %v11013_v39, %v11012_v36 }
 0x4e2   : > { %v6310_v37 = vadd.f32 %v6309_v41, %v6200_v49  ;;  %v6201_v47 = vmul.f32 %v5934_v58, %v5689_v9  ;;  %v5690_v28 = vmax.f32 %v5426_v20, 0.0  ;;  %v5428_v7 = vadd.f32 %v5427_v25, %v5075_v33  ;;  %v9734_v49 = vpop.f32.mrf.mxu1  ;;  %v11014_v25 = vld [vmem:[#allocation104_spill] sm:$0xff] }
 0x4e3   : > { %v5429_v13 = vpop.f32.mrf.mxu0 }
 0x4e4   : > { %v6379_v22 = vadd.f32 %v6378_v17, %v6201_v47  ;;  %v6202_v62 = vmul.f32 %v5939_v14, %v5690_v28  ;;  %v5430_v55 = vadd.f32 %v5429_v13, %v5077_v46  ;;  %v5691_v8 = vmax.f32 %v5428_v7, 0.0  ;;  %v5954_v28 = vpop.permute.xlu1 %5953  ;;  %v9738_v13 = vpop.f32.mrf.mxu1 }
 0x4e5   : > { %v5431_v45 = vpop.f32.mrf.mxu0  ;;  %v5093_v46 = vadd.f32 %v11015_v43, %v11014_v25 }
 0x4e6   : > { %v6311_v5 = vadd.f32 %v6310_v37, %v6202_v62  ;;  %v5692_v29 = vmax.f32 %v5430_v55, 0.0  ;;  %v5432_v51 = vadd.f32 %v5431_v45, %v5079_v6  ;;  %v6203_v11 = vmul.f32 %v5939_v14, %v5691_v8  ;;  %v11016_v55 = vld [vmem:[#allocation36_spill] sm:$0xff] }
 0x4e7   : > { %v5435_v53 = vpop.f32.mrf.mxu0  ;;  %v5095_v8 = vadd.f32 %v11016_v55, %v11014_v25 }
 0x4e8   : > { %v6204_v27 = vmul.f32 %v5944_v2, %v5692_v29  ;;  %v5693_v40 = vmax.f32 %v5432_v51, 0.0  ;;  %v5436_v52 = vadd.f32 %v5435_v53, %v5083_v10  ;;  %v6380_v54 = vadd.f32 %v6379_v22, %v6203_v11  ;;  %v11017_v10 = vld [vmem:[#allocation105_spill] sm:$0xff]  ;;  %v5959_v53 = vpop.permute.xlu0 %5958 }
 0x4e9   : > { %v5437_v31 = vpop.f32.mrf.mxu0 }
 0x4ea   : > { %v6312_v4 = vadd.f32 %v6311_v5, %v6204_v27  ;;  %v6205_v63 = vmul.f32 %v5944_v2, %v5693_v40  ;;  %v5694_v41 = vmax.f32 %v5436_v52, 0.0  ;;  %v5438_v1 = vadd.f32 %v5437_v31, %v5085_v16  ;;  %v11018_v5 = vld [vmem:[#allocation33_spill] sm:$0xff]  ;;  %v11019_v52 = vld [vmem:[#allocation64_spill] sm:$0xff] }
 0x4eb   : > { %v5439_v58 = vpop.f32.mrf.mxu0  ;;  %v5097_v29 = vadd.f32 %v11018_v5, %v11017_v10  ;;  %v5099_v16 = vadd.f32 %v11019_v52, %v11017_v10 }
 0x4ec   : > { %v6381_v9 = vadd.f32 %v6380_v54, %v6205_v63  ;;  %v6206_v20 = vmul.f32 %v5949_v50, %v5694_v41  ;;  %v5440_v33 = vadd.f32 %v5439_v58, %v5087_v19  ;;  %v5695_v60 = vmax.f32 %v5438_v1, 0.0  ;;  %v9746_v54 = vpop.f32.mrf.mxu1  ;;  %v11020_v41 = vld [vmem:[#allocation106_spill] sm:$0xff]  ;;  %v5969_v55 = vpop.permute.xlu0 %5968 }
 0x4ed   : > { %v5441_v17 = vpop.f32.mrf.mxu0 }
 0x4ee   : > { %v6313_v21 = vadd.f32 %v6312_v4, %v6206_v20  ;;  %v5696_v37 = vmax.f32 %v5440_v33, 0.0  ;;  %v5442_v47 = vadd.f32 %v5441_v17, %v5089_v61  ;;  %v6207_v14 = vmul.f32 %v5949_v50, %v5695_v60  ;;  %v11021_v50 = vld [vmem:[#allocation43_spill] sm:$0xff]  ;;  %v9750_v60 = vpop.f32.mrf.mxu1 }
 0x4ef   : > { %v5445_v7 = vpop.f32.mrf.mxu0  ;;  %v5103_v1 = vadd.f32 %v11021_v50, %v11020_v41 }
 0x4f0   : > { %v6208_v6 = vmul.f32 %v5954_v28, %v5696_v37  ;;  %v5697_v22 = vmax.f32 %v5442_v47, 0.0  ;;  %v5446_v62 = vadd.f32 %v5445_v7, %v5093_v46  ;;  %v6382_v45 = vadd.f32 %v6381_v9, %v6207_v14  ;;  %v5964_v9 = vpop.permute.xlu1 %5963  ;;  %v11022_v46 = vld [vmem:[#allocation77_spill] sm:$0xff]  ;;  %v9758_v5 = vpop.f32.mrf.mxu1 }
 0x4f1   : > { %v5447_v57 = vpop.f32.mrf.mxu0  ;;  %v11024_v14 = vld [vmem:[#allocation49_spill] sm:$0xff] }
 0x4f2   : > { %v6314_v51 = vadd.f32 %v6313_v21, %v6208_v6  ;;  %v6209_v2 = vmul.f32 %v5954_v28, %v5697_v22  ;;  %v5698_v11 = vmax.f32 %v5446_v62, 0.0  ;;  %v5448_v27 = vadd.f32 %v5447_v57, %v5095_v8  ;;  %v11023_v28 = vld [vmem:[#allocation107_spill] sm:$0xff]  ;;  %v11025_v57 = vld [vmem:[#allocation80_spill] sm:$0xff] }
 0x4f3   : > { %v5449_v40 = vpop.f32.mrf.mxu0  ;;  %v5105_v21 = vadd.f32 %v11022_v46, %v11020_v41  ;;  %v5107_v7 = vadd.f32 %v11024_v14, %v11023_v28  ;;  %v5109_v10 = vadd.f32 %v11025_v57, %v11023_v28  ;;  %v9762_v41 = vpop.f32.mrf.mxu1  ;;  %v11031_v14 = vld [vmem:[#allocation116_spill] sm:$0xff]  ;;  %v11032_v57 = vld [vmem:[#allocation110_spill] sm:$0xff] }
 0x4f4   : > { %v6383_v31 = vadd.f32 %v6382_v45, %v6209_v2  ;;  %v6210_v36 = vmul.f32 %v5959_v53, %v5698_v11  ;;  %v5450_v19 = vadd.f32 %v5449_v40, %v5097_v29  ;;  %v5699_v4 = vmax.f32 %v5448_v27, 0.0  ;;  %v11026_v27 = vld [vmem:[#allocation108_spill] sm:$0xff]  ;;  %v11027_v40 = vld [vmem:[#allocation58_spill] sm:$0xff] }
 0x4f5   : > { %v5451_v63 = vpop.f32.mrf.mxu0  ;;  %v5113_v52 = vadd.f32 %v11027_v40, %v11026_v27 }
 0x4f6   : > { %v6315_v58 = vadd.f32 %v6314_v51, %v6210_v36  ;;  %v5700_v39 = vmax.f32 %v5450_v19, 0.0  ;;  %v5452_v61 = vadd.f32 %v5451_v63, %v5099_v16  ;;  %v6211_v20 = vmul.f32 %v5959_v53, %v5699_v4  ;;  %v5974_v19 = vpop.permute.xlu1 %5973 }
 0x4f7   : > { %v5455_v33 = vpop.f32.mrf.mxu0 }
 0x4f8   : > { %v6212_v17 = vmul.f32 %v5964_v9, %v5700_v39  ;;  %v5701_v25 = vmax.f32 %v5452_v61, 0.0  ;;  %v5456_v43 = vadd.f32 %v5455_v33, %v5103_v1  ;;  %v6384_v37 = vadd.f32 %v6383_v31, %v6211_v20  ;;  %v11028_v39 = vld [vmem:[#allocation76_spill] sm:$0xff]  ;;  %v11029_v33 = vld [vmem:[#allocation109_spill] sm:$0xff] }
 0x4f9   : > { %v5457_v47 = vpop.f32.mrf.mxu0  ;;  %v5115_v61 = vadd.f32 %v11028_v39, %v11026_v27 }
 0x4fa   : > { %v6316_v6 = vadd.f32 %v6315_v58, %v6212_v17  ;;  %v6213_v22 = vmul.f32 %v5964_v9, %v5701_v25  ;;  %v5702_v62 = vmax.f32 %v5456_v43, 0.0  ;;  %v5458_v8 = vadd.f32 %v5457_v47, %v5105_v21  ;;  %v11030_v17 = vld [vmem:[#allocation82_spill] sm:$0xff] }
 0x4fb   : > { %v5459_v45 = vpop.f32.mrf.mxu0  ;;  %v5117_v25 = vadd.f32 %v11030_v17, %v11029_v33 }
 0x4fc   : > { %v6385_v29 = vadd.f32 %v6384_v37, %v6213_v22  ;;  %v6214_v51 = vmul.f32 %v5969_v55, %v5702_v62  ;;  %v5460_v2 = vadd.f32 %v5459_v45, %v5107_v7  ;;  %v5703_v11 = vmax.f32 %v5458_v8, 0.0  ;;  %v5979_v37 = vpop.permute.xlu0 %5978 }
 0x4fd   : > { %v5461_v53 = vpop.f32.mrf.mxu0  ;;  %v5119_v7 = vadd.f32 %v11031_v14, %v11029_v33 }
 0x4fe   : > { %v6317_v16 = vadd.f32 %v6316_v6, %v6214_v51  ;;  %v5704_v31 = vmax.f32 %v5460_v2, 0.0  ;;  %v5462_v36 = vadd.f32 %v5461_v53, %v5109_v10  ;;  %v6215_v4 = vmul.f32 %v5969_v55, %v5703_v11  ;;  %v9770_v6 = vpop.f32.mrf.mxu1  ;;  %v11033_v10 = vld [vmem:[#allocation113_spill] sm:$0xff]  ;;  %v5984_v53 = vpop.permute.xlu1 %5983 }
 0x4ff   : > { %v5465_v63 = vpop.f32.mrf.mxu0 }
 0x500   : > { %v6216_v50 = vmul.f32 %v5974_v19, %v5704_v31  ;;  %v5705_v1 = vmax.f32 %v5462_v36, 0.0  ;;  %v5466_v58 = vadd.f32 %v5465_v63, %v5113_v52  ;;  %v6386_v9 = vadd.f32 %v6385_v29, %v6215_v4  ;;  %v9774_v52 = vpop.f32.mrf.mxu1  ;;  %v5989_v33 = vpop.permute.xlu0 %5988 }
 0x501   : > { %v5467_v20 = vpop.f32.mrf.mxu0  ;;  %v5123_v29 = vadd.f32 %v11033_v10, %v11032_v57 }
 0x502   : > { %v6318_v43 = vadd.f32 %v6317_v16, %v6216_v50  ;;  %v6217_v46 = vmul.f32 %v5974_v19, %v5705_v1  ;;  %v5706_v21 = vmax.f32 %v5466_v58, 0.0  ;;  %v5468_v47 = vadd.f32 %v5467_v20, %v5115_v61  ;;  %v11034_v19 = vld [vmem:[#allocation115_spill] sm:$0xff]  ;;  %v11036_v58 = vld [vmem:[#allocation61_spill] sm:$0xff]  ;;  %v5994_v10 = vpop.permute.xlu1 %5993 }
 0x503   : > { %v5469_v28 = vpop.f32.mrf.mxu0  ;;  %v5125_v4 = vadd.f32 %v11034_v19, %v11032_v57  ;;  %v11035_v1 = vld [vmem:[#allocation111_spill] sm:$0xff]  ;;  %v11041_v19 = vld [vmem:[#allocation93_spill] sm:$0xff] }
 0x504   : > { %v6387_v22 = vadd.f32 %v6386_v9, %v6217_v46  ;;  %v6218_v62 = vmul.f32 %v5979_v37, %v5706_v21  ;;  %v5470_v55 = vadd.f32 %v5469_v28, %v5117_v25  ;;  %v5707_v8 = vmax.f32 %v5468_v47, 0.0  ;;  %v9782_v21 = vpop.f32.mrf.mxu1 }
 0x505   : > { %v5471_v45 = vpop.f32.mrf.mxu0  ;;  %v5127_v39 = vadd.f32 %v11036_v58, %v11035_v1 }
 0x506   : > { %v6319_v51 = vadd.f32 %v6318_v43, %v6218_v62  ;;  %v5708_v2 = vmax.f32 %v5470_v55, 0.0  ;;  %v5472_v11 = vadd.f32 %v5471_v45, %v5119_v7  ;;  %v6219_v27 = vmul.f32 %v5979_v37, %v5707_v8  ;;  %v11037_v43 = vld [vmem:[#allocation53_spill] sm:$0xff]  ;;  %v11039_v62 = vld [vmem:[#allocation54_spill] sm:$0xff] }
 0x507   : > { %v5475_v40 = vpop.f32.mrf.mxu0  ;;  %v5129_v46 = vadd.f32 %v11037_v43, %v11035_v1 }
 0x508   : > { %v6220_v16 = vmul.f32 %v5984_v53, %v5708_v2  ;;  %v5709_v31 = vmax.f32 %v5472_v11, 0.0  ;;  %v5476_v36 = vadd.f32 %v5475_v40, %v5123_v29  ;;  %v6388_v63 = vadd.f32 %v6387_v22, %v6219_v27  ;;  %v11038_v22 = vld [vmem:[#allocation112_spill] sm:$0xff]  ;;  %v9786_v2 = vpop.f32.mrf.mxu1 }
 0x509   : > { %v5477_v50 = vpop.f32.mrf.mxu0  ;;  %v5133_v55 = vadd.f32 %v11039_v62, %v11038_v22  ;;  %v11040_v40 = vld [vmem:[#allocation48_spill] sm:$0xff] }
 0x50a   : > { %v6320_v61 = vadd.f32 %v6319_v51, %v6220_v16  ;;  %v6221_v9 = vmul.f32 %v5984_v53, %v5709_v31  ;;  %v5710_v20 = vmax.f32 %v5476_v36, 0.0  ;;  %v5478_v17 = vadd.f32 %v5477_v50, %v5125_v4  ;;  %v11042_v4 = vld [vmem:[#allocation95_spill] sm:$0xff] }
 0x50b   : > { %v5479_v25 = vpop.f32.mrf.mxu0  ;;  %v5135_v16 = vadd.f32 %v11040_v40, %v11038_v22 }
 0x50c   : > { %v6389_v37 = vadd.f32 %v6388_v63, %v6221_v9  ;;  %v6222_v47 = vmul.f32 %v5989_v33, %v5710_v20  ;;  %v5480_v28 = vadd.f32 %v5479_v25, %v5127_v39  ;;  %v5711_v14 = vmax.f32 %v5478_v17, 0.0  ;;  %v5999_v39 = vpop.permute.xlu0 %5998  ;;  %v11043_v20 = vld [vmem:[#allocation60_spill] sm:$0xff]  ;;  %v9794_v17 = vpop.f32.mrf.mxu1 }
 0x50d   : > { %v5481_v7 = vpop.f32.mrf.mxu0  ;;  %v5137_v63 = vadd.f32 %v11042_v4, %v11041_v19 }
 0x50e   : > { %v6321_v8 = vadd.f32 %v6320_v61, %v6222_v47  ;;  %v5712_v45 = vmax.f32 %v5480_v28, 0.0  ;;  %v5482_v57 = vadd.f32 %v5481_v7, %v5129_v46  ;;  %v6223_v29 = vmul.f32 %v5989_v33, %v5711_v14  ;;  %v11044_v28 = vld [vmem:[#allocation81_spill] sm:$0xff]  ;;  %v11045_v14 = vld [vmem:[#allocation62_spill] sm:$0xff] }
 0x50f   : > { %v5485_v51 = vpop.f32.mrf.mxu0  ;;  %v5139_v33 = vadd.f32 %v11043_v20, %v11041_v19  ;;  %v5143_v7 = vadd.f32 %v11045_v14, %v11044_v28 }
 0x510   : > { %v6224_v11 = vmul.f32 %v5994_v10, %v5712_v45  ;;  %v5713_v53 = vmax.f32 %v5482_v57, 0.0  ;;  %v5486_v27 = vadd.f32 %v5485_v51, %v5133_v55  ;;  %v6390_v31 = vadd.f32 %v6389_v37, %v6223_v29 }
 0x511   : > { %v5487_v36 = vpop.f32.mrf.mxu0 }
 0x512   : > { %v6322_v50 = vadd.f32 %v6321_v8, %v6224_v11  ;;  %v6225_v1 = vmul.f32 %v5994_v10, %v5713_v53  ;;  %v5714_v58 = vmax.f32 %v5486_v27, 0.0  ;;  %v5488_v61 = vadd.f32 %v5487_v36, %v5135_v16  ;;  %v6004_v8 = vpop.permute.xlu1 %6003  ;;  %v9798_v10 = vpop.f32.mrf.mxu1 }
 0x513   : > { %v5489_v9 = vpop.f32.mrf.mxu0  ;;  %v9800_v36 = vpop.permute.xlu0 %6008 }
 0x514   : > { %v6391_v25 = vadd.f32 %v6390_v31, %v6225_v1  ;;  %v6226_v43 = vmul.f32 %v5999_v39, %v5714_v58  ;;  %v5490_v46 = vadd.f32 %v5489_v9, %v5137_v63  ;;  %v5715_v47 = vmax.f32 %v5488_v61, 0.0  ;;  %v9802_v4 = vpop.f32.mrf.mxu1 }
 0x515   : > { %v5491_v37 = vpop.f32.mrf.mxu0 }
 0x516   : > { %v6323_v22 = vadd.f32 %v6322_v50, %v6226_v43  ;;  %v5716_v62 = vmax.f32 %v5490_v46, 0.0  ;;  %v5492_v55 = vadd.f32 %v5491_v37, %v5139_v33  ;;  %v6227_v45 = vmul.f32 %v5999_v39, %v5715_v47  ;;  %v9813_v61 = vpop.f32.mrf.mxu1 }
 0x517   : > { %v5495_v57 = vpop.f32.mrf.mxu0 }
 0x518   : > { %v6228_v29 = vmul.f32 %v6004_v8, %v5716_v62  ;;  %v5717_v51 = vmax.f32 %v5492_v55, 0.0  ;;  %v5496_v11 = vadd.f32 %v5495_v57, %v5143_v7  ;;  %v6392_v53 = vadd.f32 %v6391_v25, %v6227_v45  ;;  %v9819_v33 = vpop.f32.mrf.mxu1 }
 0x519   : > { %v5497_v27 = vpop.f32.mrf.mxu0  ;;  %11046 = vst [vmem:[#allocation42_spill] sm:$0xff] %v9819_v33  ;;  %v11073_v33 = vld [vmem:[#allocation47_spill] sm:$0xff] }
 0x51a   : > { %v6324_v40 = vadd.f32 %v6323_v22, %v6228_v29  ;;  %v6229_v16 = vmul.f32 %v6004_v8, %v5717_v51  ;;  %v5718_v31 = vmax.f32 %v5496_v11, 0.0  ;;  %v9825_v46 = vpop.f32.mrf.mxu1 }
 0x51b   : > { %v5499_v19 = vpop.f32.mrf.mxu0  ;;  %11047 = vst [vmem:[#allocation89_spill] sm:$0xff] %v9825_v46 }
 0x51c   : > { %v9804_v63 = vadd.f32 %v6392_v53, %v6229_v16  ;;  %v6230_v50 = vmul.f32 %v9800_v36, %v5718_v31  ;;  %v9831_v14 = vpop.f32.mrf.mxu1  ;;  %v9857_v16 = vpop.permute.xlu1 %6013 }
 0x51d   : > { %v9807_v1 = vpop.f32.mrf.mxu0  ;;  %11048 = vst [vmem:[#allocation75_spill] sm:$0xff] %v9831_v14 }
 0x51e   : > { %v9809_v58 = vadd.f32 %v6324_v40, %v6230_v50  ;;  %v9837_v62 = vpop.f32.mrf.mxu1  ;;  %v9861_v50 = vpop.permute.xlu0 %6018 }
 0x51f   : > { %v9811_v39 = vpop.f32.mrf.mxu0  ;;  %11049 = vst [vmem:[#allocation28_spill] sm:$0xff] %v9837_v62 }
 0x520   : > { %v9843_v45 = vpop.f32.mrf.mxu1  ;;  %v9869_v46 = vpop.permute.xlu1 %6023 }
 0x521   : > { %v9815_v9 = vpop.f32.mrf.mxu0  ;;  %11052 = vst [vmem:[#allocation74_spill] sm:$0xff] %v9843_v45  ;;  %11063 = vst [vmem:[#allocation52_spill] sm:$0xff] %v9869_v46 }
 0x522   : > { %v9849_v51 = vpop.f32.mrf.mxu1 }
 0x523   : > { %v9817_v20 = vpop.f32.mrf.mxu0  ;;  %11055 = vst [vmem:[#allocation39_spill] sm:$0xff] %v9849_v51 }
 0x524   : > { %v9855_v40 = vpop.f32.mrf.mxu1 }
 0x525   : > { %v9821_v25 = vpop.f32.mrf.mxu0  ;;  %11058 = vst [vmem:[#allocation67_spill] sm:$0xff] %v9855_v40 }
 0x526   : > { %v9865_v45 = vpop.f32.mrf.mxu1 }
 0x527   : > { %v9823_v43 = vpop.f32.mrf.mxu0  ;;  %11061 = vst [vmem:[#allocation84_spill] sm:$0xff] %v9865_v45 }
 0x529   : > { %v9827_v47 = vpop.f32.mrf.mxu0 }
 0x52b   : > { %v9829_v37 = vpop.f32.mrf.mxu0 }
 0x52d   : > { %v9833_v7 = vpop.f32.mrf.mxu0 }
 0x52f   : > { %v9835_v22 = vpop.f32.mrf.mxu0 }
 0x531   : > { %v9839_v55 = vpop.f32.mrf.mxu0 }
 0x532   : > { %11050 = vst [vmem:[#allocation99_spill] sm:$0xff] %v9839_v55 }
 0x533   : > { %v9841_v8 = vpop.f32.mrf.mxu0 }
 0x534   : > { %11051 = vst [vmem:[#allocation38_spill] sm:$0xff] %v9841_v8  ;;  %v11071_v8 = vld [vmem:[#allocation94_spill] sm:$0xff] }
 0x535   : > { %v9845_v57 = vpop.f32.mrf.mxu0 }
 0x536   : > { %11053 = vst [vmem:[#allocation27_spill] sm:$0xff] %v9845_v57 }
 0x537   : > { %v9847_v29 = vpop.f32.mrf.mxu0 }
 0x538   : > { %11054 = vst [vmem:[#allocation45_spill] sm:$0xff] %v9847_v29 }
 0x539   : > { %v9851_v11 = vpop.f32.mrf.mxu0 }
 0x53a   : > { %11056 = vst [vmem:[#allocation66_spill] sm:$0xff] %v9851_v11  ;;  %v9873_v11 = vpop.f32.mrf.mxu1 }
 0x53b   : > { %v9853_v53 = vpop.f32.mrf.mxu0  ;;  %11065 = vst [vmem:[#allocation18_spill] sm:$0xff] %v9873_v11  ;;  %v9891_v11 = vpop.permute.xlu1 %6033 }
 0x53c   : > { %11057 = vst [vmem:[#allocation90_spill] sm:$0xff] %v9853_v53  ;;  %v9875_v53 = vpop.permute.xlu0 %6028  ;;  %v9889_v46 = vpop.f32.mrf.mxu1  ;;  %11075 = vst [vmem:[#allocation91_spill] sm:$0xff] %v9891_v11 }
 0x53d   : > { %v9859_v31 = vpop.f32.mrf.mxu0  ;;  %11066 = vst [vmem:[#allocation70_spill] sm:$0xff] %v9875_v53  ;;  %11074 = vst [vmem:[#allocation59_spill] sm:$0xff] %v9889_v46 }
 0x53e   : > { %11059 = vst [vmem:[#allocation83_spill] sm:$0xff] %v9859_v31  ;;  %v11069_v31 = vld [vmem:[#allocation87_spill] sm:$0xff] }
 0x53f   : > { %v9863_v62 = vpop.f32.mrf.mxu0  ;;  %v5145_v57 = vadd.f32 %v11069_v31, %v11044_v28 }
 0x540   : > { %11060 = vst [vmem:[#allocation69_spill] sm:$0xff] %v9863_v62  ;;  %v11070_v62 = vld [vmem:[#allocation22_spill] sm:$0xff]  ;;  %v9909_v11 = vpop.permute.xlu0 %6038 }
 0x541   : > { %v9867_v14 = vpop.f32.mrf.mxu0  ;;  %v5147_v45 = vadd.f32 %v11071_v8, %v11070_v62  ;;  %v11077_v8 = vld [vmem:[#allocation25_spill] sm:$0xff] }
 0x542   : > { %11062 = vst [vmem:[#allocation51_spill] sm:$0xff] %v9867_v14  ;;  %v11072_v14 = vld [vmem:[#allocation40_spill] sm:$0xff]  ;;  %v5163_v31 = vadd.f32 %v9650_v56, %v11077_v8 }
 0x543   : > { %v9871_v51 = vpop.f32.mrf.mxu0  ;;  %v5149_v55 = vadd.f32 %v11072_v14, %v11070_v62  ;;  %v11079_v62 = vld [vmem:[#allocation63_spill] sm:$0xff] }
 0x544   : > { %11064 = vst [vmem:[#allocation68_spill] sm:$0xff] %v9871_v51  ;;  %v5153_v51 = vadd.f32 %v9626_v0, %v11073_v33  ;;  %v5165_v0 = vadd.f32 %v9654_v12, %v11077_v8  ;;  %v5167_v46 = vadd.f32 %v9662_v44, %v11079_v62  ;;  %v5500_v12 = vadd.f32 %v5499_v19, %v5147_v45 }
 0x545   : > { %v9877_v40 = vpop.f32.mrf.mxu0 }
 0x546   : > { %11067 = vst [vmem:[#allocation21_spill] sm:$0xff] %v9877_v40  ;;  %v5155_v40 = vadd.f32 %v9630_v34, %v11073_v33  ;;  %v5169_v34 = vadd.f32 %v9666_v35, %v11079_v62  ;;  %v5498_v33 = vadd.f32 %v5497_v27, %v5145_v57  ;;  %v11082_v35 = vld [vmem:[#allocation19_spill] sm:$0xff]  ;;  %v5506_v62 = vadd.f32 %v9811_v39, %v5153_v51 }
 0x547   : > { %v9879_v29 = vpop.f32.mrf.mxu0  ;;  %v9929_v27 = vadd.f32 %v9698_v48, %v11082_v35  ;;  %v5502_v48 = vadd.f32 %v9807_v1, %v5149_v55  ;;  %v11086_v1 = vld [vmem:[#allocation24_spill] sm:$0xff]  ;;  %v5720_v55 = vmax.f32 %v5500_v12, 0.0 }
 0x548   : > { %11068 = vst [vmem:[#allocation78_spill] sm:$0xff] %v9879_v29  ;;  %v11076_v29 = vld [vmem:[#allocation37_spill] sm:$0xff]  ;;  %v9969_v39 = vadd.f32 %v9746_v54, %v11086_v1  ;;  %v5508_v51 = vadd.f32 %v9815_v9, %v5155_v40  ;;  %v11088_v54 = vld [vmem:[#allocation30_spill] sm:$0xff]  ;;  %v5722_v40 = vmax.f32 %v5506_v62, 0.0 }
 0x549   : > { %v5157_v53 = vadd.f32 %v9638_v15, %v11076_v29  ;;  %v5159_v28 = vadd.f32 %v9642_v38, %v11076_v29  ;;  %v9901_v14 = vpop.f32.mrf.mxu0  ;;  %v11080_v15 = vld [vmem:[#allocation23_spill] sm:$0xff]  ;;  %v9989_v12 = vadd.f32 %v9770_v6, %v11088_v54 }
 0x54a   : > { %11078 = vst [vmem:[#allocation92_spill] sm:$0xff] %v9901_v14  ;;  %v5173_v38 = vadd.f32 %v9674_v42, %v11080_v15  ;;  %v9915_v56 = vadd.f32 %v9678_v18, %v11080_v15  ;;  %v11081_v29 = vld [vmem:[#allocation71_spill] sm:$0xff]  ;;  %v9933_v42 = vadd.f32 %v9702_v30, %v11082_v35  ;;  %v11083_v18 = vld [vmem:[#allocation88_spill] sm:$0xff]  ;;  %v9965_v35 = vpop.permute.xlu1 %6043 }
 0x54b   : > { %v9919_v14 = vadd.f32 %v9686_v3, %v11081_v29  ;;  %v9921_v8 = vpop.f32.mrf.mxu0  ;;  %v9925_v44 = vadd.f32 %v9690_v59, %v11081_v29  ;;  %v9937_v57 = vadd.f32 %v9710_v32, %v11083_v18  ;;  %v9939_v3 = vpop.f32.mrf.mxu1  ;;  %v9943_v19 = vadd.f32 %v9714_v24, %v11083_v18  ;;  %v11084_v59 = vld [vmem:[#allocation65_spill] sm:$0xff]  ;;  %v11085_v15 = vld [vmem:[#allocation20_spill] sm:$0xff] }
 0x54c   : > { %v9947_v45 = vadd.f32 %v9722_v23, %v11084_v59  ;;  %v9955_v32 = vadd.f32 %v9726_v26, %v11084_v59  ;;  %v9959_v29 = vadd.f32 %v9734_v49, %v11085_v15  ;;  %v9963_v24 = vadd.f32 %v9738_v13, %v11085_v15  ;;  %v11087_v13 = vld [vmem:[#allocation34_spill] sm:$0xff] }
 0x54d   : > { %v9951_v30 = vpop.f32.mrf.mxu0  ;;  %v5719_v23 = vmax.f32 %v5498_v33, 0.0  ;;  %v5510_v26 = vadd.f32 %v9817_v20, %v5157_v53  ;;  %v9977_v49 = vadd.f32 %v9750_v60, %v11086_v1  ;;  %v9981_v33 = vadd.f32 %v9758_v5, %v11087_v13  ;;  %v9991_v9 = vpop.f32.mrf.mxu1  ;;  %v11090_v1 = vld [vmem:[#allocation50_spill] sm:$0xff] }
 0x54e   : > { %v9985_v59 = vadd.f32 %v9762_v41, %v11087_v13  ;;  %11089 = vst [vmem:[#allocation85_spill] sm:$0xff] %v9991_v9  ;;  %v9993_v20 = vpop.permute.xlu0 %6048  ;;  %v5721_v53 = vmax.f32 %v5502_v48, 0.0  ;;  %v5512_v60 = vadd.f32 %v9821_v25, %v5159_v28  ;;  %v5516_v15 = vadd.f32 %v9823_v43, %v5163_v31  ;;  %v11097_v9 = vld [vmem:[#allocation31_spill] sm:$0xff] }
 0x54f   : > { %v9973_v18 = vpop.f32.mrf.mxu0  ;;  %v10001_v41 = vadd.f32 %v9774_v52, %v11088_v54  ;;  %v10005_v6 = vadd.f32 %v9782_v21, %v11090_v1  ;;  %v10009_v13 = vadd.f32 %v9786_v2, %v11090_v1  ;;  %v6231_v48 = vmul.f32 %v9800_v36, %v5719_v23  ;;  %v11091_v52 = vld [vmem:[#allocation35_spill] sm:$0xff]  ;;  %v11092_v2 = vld [vmem:[#allocation41_spill] sm:$0xff]  ;;  %v10028_v36 = vpop.f32.mrf.mxu1 }
 0x550   : > { %v6232_v25 = vmul.f32 %v9857_v16, %v5720_v55  ;;  %v5723_v28 = vmax.f32 %v5508_v51, 0.0  ;;  %v5724_v43 = vmax.f32 %v5510_v26, 0.0  ;;  %v5518_v31 = vadd.f32 %v9827_v47, %v5165_v0  ;;  %11094 = vst [vmem:[#allocation100_spill] sm:$0xff] %v10028_v36  ;;  %v10031_v55 = vpop.permute.xlu1 %6053 }
 0x551   : > { %v9997_v5 = vpop.f32.mrf.mxu0  ;;  %v10018_v54 = vadd.f32 %v9794_v17, %v11091_v52  ;;  %v10022_v21 = vadd.f32 %v9798_v10, %v11091_v52  ;;  %v10026_v1 = vadd.f32 %v9802_v4, %v11092_v2  ;;  %v5520_v23 = vadd.f32 %v9829_v37, %v5167_v46 }
 0x552   : > { %v6233_v47 = vmul.f32 %v9857_v16, %v5721_v53  ;;  %v6234_v0 = vmul.f32 %v9861_v50, %v5722_v40  ;;  %v5725_v17 = vmax.f32 %v5512_v60, 0.0  ;;  %v5726_v51 = vmax.f32 %v5516_v15, 0.0  ;;  %v10044_v37 = vpop.permute.xlu0 %6058  ;;  %v11096_v40 = vld [vmem:[#allocation52_spill] sm:$0xff] }
 0x553   : > { %v10014_v62 = vpop.f32.mrf.mxu0  ;;  %11093 = vst [vmem:[#allocation86_spill] sm:$0xff] %v10026_v1  ;;  %v10039_v10 = vadd.f32 %v9813_v61, %v11092_v2  ;;  %v6394_v4 = vadd.f32 %v9804_v63, %v6231_v48  ;;  %v5522_v52 = vadd.f32 %v9833_v7, %v5169_v34  ;;  %v5526_v46 = vadd.f32 %v9835_v22, %v5173_v38  ;;  %v11098_v61 = vld [vmem:[#allocation42_spill] sm:$0xff]  ;;  %v10055_v63 = vpop.f32.mrf.mxu1  ;;  %v11101_v22 = vld [vmem:[#allocation99_spill] sm:$0xff] }
 0x554   : > { %v6326_v16 = vadd.f32 %v9809_v58, %v6232_v25  ;;  %v6235_v53 = vmul.f32 %v9861_v50, %v5723_v28  ;;  %v6236_v60 = vmul.f32 %v11096_v40, %v5724_v43  ;;  %v5727_v15 = vmax.f32 %v5518_v31, 0.0  ;;  %11100 = vst [vmem:[#allocation103_spill] sm:$0xff] %v10055_v63  ;;  %v11102_v38 = vld [vmem:[#allocation38_spill] sm:$0xff] }
 0x555   : > { %v10035_v26 = vpop.f32.mrf.mxu0  ;;  %11095 = vst [vmem:[#allocation101_spill] sm:$0xff] %v10039_v10  ;;  %v10053_v2 = vadd.f32 %v11098_v61, %v11097_v9  ;;  %v5728_v7 = vmax.f32 %v5520_v23, 0.0  ;;  %v5528_v34 = vadd.f32 %v11101_v22, %v9915_v56  ;;  %v5530_v58 = vadd.f32 %v11102_v38, %v9919_v14  ;;  %v11103_v28 = vld [vmem:[#allocation70_spill] sm:$0xff]  ;;  %v11105_v23 = vld [vmem:[#allocation45_spill] sm:$0xff]  ;;  %v10069_v56 = vpop.permute.xlu1 %6063 }
 0x556   : > { %v6395_v48 = vadd.f32 %v6394_v4, %v6233_v47  ;;  %v6327_v50 = vadd.f32 %v6326_v16, %v6234_v0  ;;  %v6237_v25 = vmul.f32 %v11096_v40, %v5725_v17  ;;  %v6238_v43 = vmul.f32 %v11103_v28, %v5726_v51  ;;  %v11106_v14 = vld [vmem:[#allocation89_spill] sm:$0xff]  ;;  %v10083_v22 = vpop.permute.xlu0 %6068 }
 0x557   : > { %v10049_v36 = vpop.f32.mrf.mxu0  ;;  %11099 = vst [vmem:[#allocation102_spill] sm:$0xff] %v10053_v2  ;;  %v5729_v10 = vmax.f32 %v5522_v52, 0.0  ;;  %v5730_v61 = vmax.f32 %v5526_v46, 0.0  ;;  %v11104_v2 = vld [vmem:[#allocation27_spill] sm:$0xff]  ;;  %v5536_v1 = vadd.f32 %v11105_v23, %v9929_v27  ;;  %v10073_v47 = vadd.f32 %v11106_v14, %v11097_v9  ;;  %v10078_v52 = vpop.f32.mrf.mxu1  ;;  %v11109_v27 = vld [vmem:[#allocation66_spill] sm:$0xff]  ;;  %v11110_v38 = vld [vmem:[#allocation29_spill] sm:$0xff] }
 0x558   : > { %v5532_v63 = vadd.f32 %v11104_v2, %v9925_v44  ;;  %v6396_v0 = vadd.f32 %v6395_v48, %v6235_v53  ;;  %v6328_v17 = vadd.f32 %v6327_v50, %v6236_v60  ;;  %v6239_v51 = vmul.f32 %v11103_v28, %v5727_v15  ;;  %11107 = vst [vmem:[#allocation46_spill] sm:$0xff] %v10078_v52  ;;  %v11108_v46 = vld [vmem:[#allocation91_spill] sm:$0xff]  ;;  %v11112_v15 = vld [vmem:[#allocation90_spill] sm:$0xff] }
 0x559   : > { %v10063_v31 = vpop.f32.mrf.mxu0  ;;  %v6240_v16 = vmul.f32 %v11108_v46, %v5728_v7  ;;  %v5731_v44 = vmax.f32 %v5528_v34, 0.0  ;;  %v5732_v40 = vmax.f32 %v5530_v58, 0.0  ;;  %v5538_v2 = vadd.f32 %v11109_v27, %v9933_v42  ;;  %v11111_v9 = vld [vmem:[#allocation75_spill] sm:$0xff]  ;;  %v11113_v42 = vld [vmem:[#allocation28_spill] sm:$0xff] }
 0x55a   : > { %v10087_v23 = vadd.f32 %v11111_v9, %v11110_v38  ;;  %v6397_v53 = vadd.f32 %v6396_v0, %v6237_v25  ;;  %v6329_v60 = vadd.f32 %v6328_v17, %v6238_v43  ;;  %v5540_v48 = vadd.f32 %v11112_v15, %v9937_v57  ;;  %v11114_v9 = vld [vmem:[#allocation83_spill] sm:$0xff]  ;;  %v11115_v43 = vld [vmem:[#allocation69_spill] sm:$0xff]  ;;  %v10105_v17 = vpop.f32.mrf.mxu1 }
 0x55b   : > { %v10076_v4 = vpop.f32.mrf.mxu0  ;;  %v6241_v7 = vmul.f32 %v11108_v46, %v5729_v10  ;;  %v6242_v34 = vmul.f32 %v9909_v11, %v5730_v61  ;;  %v5733_v58 = vmax.f32 %v5532_v63, 0.0  ;;  %v5734_v28 = vmax.f32 %v5536_v1, 0.0  ;;  %11116 = vst [vmem:[#allocation104_spill] sm:$0xff] %v10105_v17  ;;  %v10109_v46 = vpop.permute.xlu1 %6073  ;;  %v11119_v15 = vld [vmem:[#allocation51_spill] sm:$0xff] }
 0x55c   : > { %v10097_v14 = vadd.f32 %v11113_v42, %v11110_v38  ;;  %v6398_v27 = vadd.f32 %v6397_v53, %v6239_v51  ;;  %v5542_v25 = vadd.f32 %v11114_v9, %v9943_v19  ;;  %v5546_v0 = vadd.f32 %v11115_v43, %v9947_v45  ;;  %v11117_v38 = vld [vmem:[#allocation44_spill] sm:$0xff]  ;;  %v11118_v51 = vld [vmem:[#allocation74_spill] sm:$0xff] }
 0x55d   : > { %v10091_v50 = vpop.f32.mrf.mxu0  ;;  %v6330_v10 = vadd.f32 %v6329_v60, %v6240_v16  ;;  %v6243_v61 = vmul.f32 %v9909_v11, %v5731_v44  ;;  %v6244_v1 = vmul.f32 %v9965_v35, %v5732_v40  ;;  %v5735_v63 = vmax.f32 %v5538_v2, 0.0  ;;  %v11120_v42 = vld [vmem:[#allocation68_spill] sm:$0xff]  ;;  %v10123_v2 = vpop.permute.xlu0 %6078 }
 0x55e   : > { %v10113_v53 = vadd.f32 %v11118_v51, %v11117_v38  ;;  %v5736_v19 = vmax.f32 %v5540_v48, 0.0  ;;  %v5548_v45 = vadd.f32 %v11119_v15, %v9955_v32  ;;  %v5550_v9 = vadd.f32 %v11120_v42, %v9959_v29  ;;  %v11121_v48 = vld [vmem:[#allocation21_spill] sm:$0xff]  ;;  %v11122_v32 = vld [vmem:[#allocation78_spill] sm:$0xff]  ;;  %v11123_v29 = vld [vmem:[#allocation39_spill] sm:$0xff] }
 0x55f   : > { %v10103_v57 = vpop.f32.mrf.mxu0  ;;  %v6399_v16 = vadd.f32 %v6398_v27, %v6241_v7  ;;  %v6331_v11 = vadd.f32 %v6330_v10, %v6242_v34  ;;  %v6245_v44 = vmul.f32 %v9965_v35, %v5733_v58  ;;  %v6246_v40 = vmul.f32 %v9993_v20, %v5734_v28  ;;  %v10135_v34 = vpop.f32.mrf.mxu1  ;;  %v11125_v42 = vld [vmem:[#allocation57_spill] sm:$0xff] }
 0x560   : > { %v5737_v60 = vmax.f32 %v5542_v25, 0.0  ;;  %v5738_v51 = vmax.f32 %v5546_v0, 0.0  ;;  %v5552_v17 = vadd.f32 %v11121_v48, %v9963_v24  ;;  %v5556_v15 = vadd.f32 %v11122_v32, %v9969_v39  ;;  %v11124_v24 = vld [vmem:[#allocation92_spill] sm:$0xff]  ;;  %v11126_v48 = vld [vmem:[#allocation67_spill] sm:$0xff] }
 0x561   : > { %v10119_v43 = vpop.f32.mrf.mxu0  ;;  %v10133_v7 = vadd.f32 %v11123_v29, %v11117_v38  ;;  %v6400_v35 = vadd.f32 %v6399_v16, %v6243_v61  ;;  %v6332_v58 = vadd.f32 %v6331_v11, %v6244_v1  ;;  %v6247_v28 = vmul.f32 %v9993_v20, %v5735_v63  ;;  %v10149_v1 = vpop.permute.xlu1 %6083 }
 0x562   : > { %v6248_v27 = vmul.f32 %v10031_v55, %v5736_v19  ;;  %v5739_v25 = vmax.f32 %v5548_v45, 0.0  ;;  %v5740_v0 = vmax.f32 %v5550_v9, 0.0  ;;  %v5558_v10 = vadd.f32 %v11124_v24, %v9977_v49  ;;  %v11127_v9 = vld [vmem:[#allocation84_spill] sm:$0xff]  ;;  %v10159_v11 = vpop.f32.mrf.mxu1 }
 0x563   : > { %v10129_v52 = vpop.f32.mrf.mxu0  ;;  %v10145_v32 = vadd.f32 %v11126_v48, %v11125_v42  ;;  %v6401_v38 = vadd.f32 %v6400_v35, %v6245_v44  ;;  %v6333_v29 = vadd.f32 %v6332_v58, %v6246_v40  ;;  %v5560_v61 = vadd.f32 %v9921_v8, %v9981_v33  ;;  %v11128_v35 = vld [vmem:[#allocation114_spill] sm:$0xff] }
 0x564   : > { %v6249_v20 = vmul.f32 %v10031_v55, %v5737_v60  ;;  %v6250_v63 = vmul.f32 %v10044_v37, %v5738_v51  ;;  %v5741_v19 = vmax.f32 %v5552_v17, 0.0  ;;  %v5742_v45 = vmax.f32 %v5556_v15, 0.0  ;;  %v10165_v55 = vpop.permute.xlu0 %6088  ;;  %v11129_v58 = vld [vmem:[#allocation18_spill] sm:$0xff] }
 0x565   : > { %v10141_v39 = vpop.f32.mrf.mxu0  ;;  %v10157_v16 = vadd.f32 %v11127_v9, %v11125_v42  ;;  %v6402_v44 = vadd.f32 %v6401_v38, %v6247_v28  ;;  %v5562_v8 = vadd.f32 %v9951_v30, %v9985_v59  ;;  %v5566_v33 = vadd.f32 %v9973_v18, %v9989_v12 }
 0x566   : > { %v6334_v40 = vadd.f32 %v6333_v29, %v6248_v27  ;;  %v6251_v17 = vmul.f32 %v10044_v37, %v5739_v25  ;;  %v6252_v60 = vmul.f32 %v10069_v56, %v5740_v0  ;;  %v5743_v51 = vmax.f32 %v5558_v10, 0.0  ;;  %v10183_v0 = vpop.f32.mrf.mxu1 }
 0x567   : > { %v10153_v49 = vpop.f32.mrf.mxu0  ;;  %v10173_v24 = vadd.f32 %v11129_v58, %v11128_v35  ;;  %v5744_v28 = vmax.f32 %v5560_v61, 0.0  ;;  %v5568_v30 = vadd.f32 %v9997_v5, %v10001_v41  ;;  %v5570_v18 = vadd.f32 %v10014_v62, %v10005_v6  ;;  %v6094_v41 = vpop.permute.xlu1 %6093  ;;  %v11130_v6 = vld [vmem:[#allocation59_spill] sm:$0xff] }
 0x568   : > { %v6403_v59 = vadd.f32 %v6402_v44, %v6249_v20  ;;  %v6335_v12 = vadd.f32 %v6334_v40, %v6250_v63  ;;  %v6253_v37 = vmul.f32 %v10069_v56, %v5741_v19  ;;  %v6254_v27 = vmul.f32 %v10083_v22, %v5742_v45  ;;  %v11132_v44 = vld [vmem:[#allocation86_spill] sm:$0xff] }
 0x569   : > { %v10169_v15 = vpop.f32.mrf.mxu0  ;;  %v5745_v10 = vmax.f32 %v5562_v8, 0.0  ;;  %v5746_v42 = vmax.f32 %v5566_v33, 0.0  ;;  %v5572_v48 = vadd.f32 %v10035_v26, %v10009_v13  ;;  %v5576_v5 = vadd.f32 %v10049_v36, %v10018_v54  ;;  %v10199_v26 = vpop.permute.xlu0 %6098  ;;  %v11131_v54 = vld [vmem:[#allocation97_spill] sm:$0xff] }
 0x56a   : > { %v10191_v62 = vadd.f32 %v11130_v6, %v11128_v35  ;;  %v6404_v56 = vadd.f32 %v6403_v59, %v6251_v17  ;;  %v6336_v38 = vadd.f32 %v6335_v12, %v6252_v60  ;;  %v6255_v29 = vmul.f32 %v10083_v22, %v5743_v51  ;;  %v10207_v33 = vpop.f32.mrf.mxu1  ;;  %v11134_v35 = vld [vmem:[#allocation101_spill] sm:$0xff] }
 0x56b   : > { %v10181_v25 = vpop.f32.mrf.mxu0  ;;  %v6256_v20 = vmul.f32 %v10109_v46, %v5744_v28  ;;  %v5747_v63 = vmax.f32 %v5568_v30, 0.0  ;;  %v5748_v19 = vmax.f32 %v5570_v18, 0.0  ;;  %v5578_v13 = vadd.f32 %v10063_v31, %v10022_v21  ;;  %v11133_v31 = vld [vmem:[#allocation85_spill] sm:$0xff]  ;;  %v11135_v28 = vld [vmem:[#allocation102_spill] sm:$0xff] }
 0x56c   : > { %v10203_v36 = vadd.f32 %v9939_v3, %v11131_v54  ;;  %v6405_v45 = vadd.f32 %v6404_v56, %v6253_v37  ;;  %v6337_v9 = vadd.f32 %v6336_v38, %v6254_v27  ;;  %v5580_v22 = vadd.f32 %v10076_v4, %v11132_v44  ;;  %v6104_v37 = vpop.permute.xlu1 %6103  ;;  %v11136_v27 = vld [vmem:[#allocation73_spill] sm:$0xff] }
 0x56d   : > { %v10194_v61 = vpop.f32.mrf.mxu0  ;;  %v6257_v40 = vmul.f32 %v10109_v46, %v5745_v10  ;;  %v6258_v17 = vmul.f32 %v10123_v2, %v5746_v42  ;;  %v5749_v60 = vmax.f32 %v5572_v48, 0.0  ;;  %v5750_v21 = vmax.f32 %v5576_v5, 0.0  ;;  %v11137_v10 = vld [vmem:[#allocation100_spill] sm:$0xff] }
 0x56e   : > { %v10213_v51 = vadd.f32 %v11133_v31, %v11131_v54  ;;  %v6406_v3 = vadd.f32 %v6405_v45, %v6255_v29  ;;  %v5582_v58 = vadd.f32 %v10091_v50, %v11134_v35  ;;  %v5586_v4 = vadd.f32 %v10103_v57, %v11135_v28  ;;  %v10227_v57 = vpop.f32.mrf.mxu1 }
 0x56f   : > { %v5605_v8 = vpop.f32.mrf.mxu0  ;;  %v6338_v18 = vadd.f32 %v6337_v9, %v6256_v20  ;;  %v6259_v59 = vmul.f32 %v10123_v2, %v5747_v63  ;;  %v6260_v46 = vmul.f32 %v10149_v1, %v5748_v19  ;;  %v5751_v12 = vmax.f32 %v5578_v13, 0.0  ;;  %v6109_v20 = vpop.permute.xlu0 %6108 }
 0x570   : > { %v5263_v42 = vadd.f32 %v11137_v10, %v11136_v27  ;;  %v5752_v48 = vmax.f32 %v5580_v22, 0.0  ;;  %v5588_v5 = vadd.f32 %v10119_v43, %v10073_v47  ;;  %v5590_v50 = vadd.f32 %v10129_v52, %v10087_v23  ;;  %v11138_v52 = vld [vmem:[#allocation103_spill] sm:$0xff] }
 0x571   : > { %v5607_v30 = vpop.f32.mrf.mxu0  ;;  %v6407_v56 = vadd.f32 %v6406_v3, %v6257_v40  ;;  %v6339_v38 = vadd.f32 %v6338_v18, %v6258_v17  ;;  %v6261_v2 = vmul.f32 %v10149_v1, %v5749_v60  ;;  %v6262_v29 = vmul.f32 %v10165_v55, %v5750_v21  ;;  %v11139_v60 = vld [vmem:[#allocation72_spill] sm:$0xff]  ;;  %v10242_v21 = vpop.f32.mrf.mxu1 }
 0x572   : > { %v5753_v63 = vmax.f32 %v5582_v58, 0.0  ;;  %v5754_v19 = vmax.f32 %v5586_v4, 0.0  ;;  %v5592_v13 = vadd.f32 %v10141_v39, %v10097_v14  ;;  %v5596_v47 = vadd.f32 %v10153_v49, %v10113_v53  ;;  %v11140_v14 = vld [vmem:[#allocation46_spill] sm:$0xff]  ;;  %v6114_v3 = vpop.permute.xlu1 %6113 }
 0x573   : > { %v5609_v6 = vpop.f32.mrf.mxu0  ;;  %v5265_v23 = vadd.f32 %v11138_v52, %v11136_v27  ;;  %v6408_v54 = vadd.f32 %v6407_v56, %v6259_v59  ;;  %v6340_v45 = vadd.f32 %v6339_v38, %v6260_v46  ;;  %v6263_v9 = vmul.f32 %v10165_v55, %v5751_v12  ;;  %v6119_v12 = vpop.permute.xlu0 %6118 }
 0x574   : > { %v6264_v1 = vmul.f32 %v6094_v41, %v5752_v48  ;;  %v5755_v44 = vmax.f32 %v5588_v5, 0.0  ;;  %v5756_v22 = vmax.f32 %v5590_v50, 0.0  ;;  %v5598_v40 = vadd.f32 %v10169_v15, %v10133_v7  ;;  %v11141_v7 = vld [vmem:[#allocation104_spill] sm:$0xff]  ;;  %v11142_v48 = vld [vmem:[#allocation79_spill] sm:$0xff]  ;;  %v10255_v50 = vpop.f32.mrf.mxu1 }
 0x575   : > { %v5611_v43 = vpop.f32.mrf.mxu0  ;;  %v5267_v39 = vadd.f32 %v11140_v14, %v11139_v60  ;;  %v6409_v53 = vadd.f32 %v6408_v54, %v6261_v2  ;;  %v6341_v49 = vadd.f32 %v6340_v45, %v6262_v29  ;;  %v5600_v31 = vadd.f32 %v10181_v25, %v10145_v32 }
 0x576   : > { %v6265_v35 = vmul.f32 %v6094_v41, %v5753_v63  ;;  %v6266_v55 = vmul.f32 %v10199_v26, %v5754_v19  ;;  %v5757_v58 = vmax.f32 %v5592_v13, 0.0  ;;  %v5758_v28 = vmax.f32 %v5596_v47, 0.0  ;;  %v6124_v47 = vpop.permute.xlu1 %6123 }
 0x577   : > { %v5615_v17 = vpop.f32.mrf.mxu0  ;;  %v5269_v15 = vadd.f32 %v11141_v7, %v11139_v60  ;;  %v6410_v18 = vadd.f32 %v6409_v53, %v6263_v9  ;;  %v5602_v59 = vadd.f32 %v10194_v61, %v10157_v16  ;;  %v5606_v46 = vadd.f32 %v5605_v8, %v10173_v24  ;;  %v11144_v7 = vld [vmem:[#allocation55_spill] sm:$0xff] }
 0x578   : > { %v6342_v27 = vadd.f32 %v6341_v49, %v6264_v1  ;;  %v6267_v32 = vmul.f32 %v10199_v26, %v5755_v44  ;;  %v6268_v25 = vmul.f32 %v6104_v37, %v5756_v22  ;;  %v5759_v41 = vmax.f32 %v5598_v40, 0.0  ;;  %v6129_v1 = vpop.permute.xlu0 %6128  ;;  %v11143_v44 = vld [vmem:[#allocation26_spill] sm:$0xff] }
 0x579   : > { %v5617_v4 = vpop.f32.mrf.mxu0  ;;  %v5273_v5 = vadd.f32 %v10135_v34, %v11142_v48  ;;  %v5760_v56 = vmax.f32 %v5600_v31, 0.0  ;;  %v5608_v38 = vadd.f32 %v5607_v30, %v10191_v62  ;;  %v5610_v2 = vadd.f32 %v5609_v6, %v10203_v36  ;;  %v5288_v30 = vpop.f32.mrf.mxu1 }
 0x57a   : > { %v6411_v16 = vadd.f32 %v6410_v18, %v6265_v35  ;;  %v6343_v61 = vadd.f32 %v6342_v27, %v6266_v55  ;;  %v6269_v24 = vmul.f32 %v6104_v37, %v5757_v58  ;;  %v6270_v8 = vmul.f32 %v6109_v20, %v5758_v28 }
 0x57b   : > { %v5619_v10 = vpop.f32.mrf.mxu0  ;;  %v5761_v63 = vmax.f32 %v5602_v59, 0.0  ;;  %v5762_v26 = vmax.f32 %v5606_v46, 0.0  ;;  %v5612_v19 = vadd.f32 %v5611_v43, %v10213_v51  ;;  %v5616_v13 = vadd.f32 %v5615_v17, %v5263_v42 }
 0x57c   : > { %v5275_v34 = vadd.f32 %v10159_v11, %v11142_v48  ;;  %v6412_v52 = vadd.f32 %v6411_v16, %v6267_v32  ;;  %v6344_v54 = vadd.f32 %v6343_v61, %v6268_v25  ;;  %v6271_v45 = vmul.f32 %v6109_v20, %v5759_v41 }
 0x57d   : > { %v5621_v29 = vpop.f32.mrf.mxu0  ;;  %v6272_v36 = vmul.f32 %v6114_v3, %v5760_v56  ;;  %v5763_v6 = vmax.f32 %v5608_v38, 0.0  ;;  %v5764_v9 = vmax.f32 %v5610_v2, 0.0  ;;  %v5618_v37 = vadd.f32 %v5617_v4, %v5265_v23  ;;  %v5292_v23 = vpop.f32.mrf.mxu1 }
 0x57e   : > { %v5277_v22 = vadd.f32 %v10183_v0, %v11143_v44  ;;  %v6413_v40 = vadd.f32 %v6412_v52, %v6269_v24  ;;  %v6345_v51 = vadd.f32 %v6344_v54, %v6270_v8  ;;  %v5620_v42 = vadd.f32 %v5619_v10, %v5267_v39  ;;  %v6134_v4 = vpop.permute.xlu1 %6133 }
 0x57f   : > { %v5625_v62 = vpop.f32.mrf.mxu0  ;;  %v6273_v17 = vmul.f32 %v6114_v3, %v5761_v63  ;;  %v6274_v60 = vmul.f32 %v6119_v12, %v5762_v26  ;;  %v5765_v11 = vmax.f32 %v5612_v19, 0.0  ;;  %v5766_v14 = vmax.f32 %v5616_v13, 0.0  ;;  %v5294_v56 = vpop.f32.mrf.mxu1  ;;  %v11145_v63 = vld [vmem:[#allocation56_spill] sm:$0xff] }
 0x580   : > { %v5279_v20 = vadd.f32 %v10207_v33, %v11143_v44  ;;  %v6414_v53 = vadd.f32 %v6413_v40, %v6271_v45  ;;  %v5622_v49 = vadd.f32 %v5621_v29, %v5269_v15  ;;  %v5626_v31 = vadd.f32 %v5625_v62, %v5273_v5  ;;  %v6139_v15 = vpop.permute.xlu0 %6138 }
 0x581   : > { %v5627_v43 = vpop.f32.mrf.mxu0  ;;  %v6346_v55 = vadd.f32 %v6345_v51, %v6272_v36  ;;  %v6275_v58 = vmul.f32 %v6119_v12, %v5763_v6  ;;  %v6276_v28 = vmul.f32 %v6124_v47, %v5764_v9  ;;  %v5767_v0 = vmax.f32 %v5618_v37, 0.0  ;;  %v5296_v6 = vpop.f32.mrf.mxu1 }
 0x582   : > { %v5283_v39 = vadd.f32 %v10227_v57, %v11144_v7  ;;  %v5768_v3 = vmax.f32 %v5620_v42, 0.0  ;;  %v5628_v18 = vadd.f32 %v5627_v43, %v5275_v34  ;;  %v6415_v27 = vadd.f32 %v6414_v53, %v6273_v17  ;;  %v11146_v42 = vld [vmem:[#allocation96_spill] sm:$0xff] }
 0x583   : > { %v5629_v35 = vpop.f32.mrf.mxu0  ;;  %v6347_v32 = vadd.f32 %v6346_v55, %v6274_v60  ;;  %v6277_v33 = vmul.f32 %v6124_v47, %v5765_v11  ;;  %v6278_v25 = vmul.f32 %v6129_v1, %v5766_v14  ;;  %v5285_v41 = vadd.f32 %v10242_v21, %v11144_v7  ;;  %v6144_v21 = vpop.permute.xlu1 %6143 }
 0x584   : > { %v5630_v59 = vadd.f32 %v5629_v35, %v5277_v22  ;;  %v5769_v10 = vmax.f32 %v5622_v49, 0.0  ;;  %v5770_v12 = vmax.f32 %v5626_v31, 0.0  ;;  %v6416_v38 = vadd.f32 %v6415_v27, %v6275_v58  ;;  %v5298_v31 = vpop.f32.mrf.mxu1 }
 0x585   : > { %v5631_v46 = vpop.f32.mrf.mxu0  ;;  %v6348_v2 = vadd.f32 %v6347_v32, %v6276_v28  ;;  %v6279_v57 = vmul.f32 %v6129_v1, %v5767_v0  ;;  %v6280_v61 = vmul.f32 %v6134_v4, %v5768_v3  ;;  %v5771_v24 = vmax.f32 %v5628_v18, 0.0  ;;  %v6149_v1 = vpop.permute.xlu0 %6148 }
 0x586   : > { %v5632_v48 = vadd.f32 %v5631_v46, %v5279_v20  ;;  %v5772_v8 = vmax.f32 %v5630_v59, 0.0  ;;  %v5287_v26 = vadd.f32 %v10255_v50, %v11145_v63  ;;  %v6417_v19 = vadd.f32 %v6416_v38, %v6277_v33 }
 0x587   : > { %v5635_v5 = vpop.f32.mrf.mxu0  ;;  %v6349_v13 = vadd.f32 %v6348_v2, %v6278_v25  ;;  %v6281_v34 = vmul.f32 %v6134_v4, %v5769_v10  ;;  %v6282_v52 = vmul.f32 %v6139_v15, %v5770_v12  ;;  %v5289_v36 = vadd.f32 %v5288_v30, %v11145_v63  ;;  %v6154_v58 = vpop.permute.xlu1 %6153 }
 0x588   : > { %v5636_v16 = vadd.f32 %v5635_v5, %v5283_v39  ;;  %v5773_v54 = vmax.f32 %v5632_v48, 0.0  ;;  %v6418_v9 = vadd.f32 %v6417_v19, %v6279_v57  ;;  %v6283_v22 = vmul.f32 %v6139_v15, %v5771_v24  ;;  %v11147_v39 = vld [vmem:[#allocation98_spill] sm:$0xff] }
 0x589   : > { %v5637_v29 = vpop.f32.mrf.mxu0  ;;  %v6350_v44 = vadd.f32 %v6349_v13, %v6280_v61  ;;  %v6284_v40 = vmul.f32 %v6144_v21, %v5772_v8  ;;  %v5293_v43 = vadd.f32 %v5292_v23, %v11146_v42  ;;  %v5295_v30 = vadd.f32 %v5294_v56, %v11146_v42  ;;  %v6159_v46 = vpop.permute.xlu0 %6158 }
 0x58a   : > { %v5638_v47 = vadd.f32 %v5637_v29, %v5285_v41  ;;  %v5774_v45 = vmax.f32 %v5636_v16, 0.0  ;;  %v6419_v11 = vadd.f32 %v6418_v9, %v6281_v34  ;;  %v6285_v20 = vmul.f32 %v6144_v21, %v5773_v54 }
 0x58b   : > { %v5639_v62 = vpop.f32.mrf.mxu0  ;;  %v6351_v14 = vadd.f32 %v6350_v44, %v6282_v52  ;;  %v5297_v3 = vadd.f32 %v5296_v6, %v11147_v39  ;;  %v5299_v27 = vadd.f32 %v5298_v31, %v11147_v39  ;;  %v6164_v16 = vpop.permute.xlu1 %6163  ;;  %v6438_v63 = vlaneseq }
 0x58c   : > { %v5640_v37 = vadd.f32 %v5639_v62, %v5287_v26  ;;  %v5775_v51 = vmax.f32 %v5638_v47, 0.0  ;;  %v6286_v53 = vmul.f32 %v6149_v1, %v5774_v45  ;;  %v6420_v28 = vadd.f32 %v6419_v11, %v6283_v22 }
 0x58d   : > { %v5641_v50 = vpop.f32.mrf.mxu0  ;;  %v6352_v0 = vadd.f32 %v6351_v14, %v6284_v40  ;;  %v6439_v34 = vshrl.u32 %v6438_v63, 7  ;;  %vm6466_vm1 = vcmp.lt.s32.totalorder %v6438_v63, 256 }
 0x58e   : > { %v5776_v17 = vmax.f32 %v5640_v37, 0.0  ;;  %v5642_v60 = vadd.f32 %v5641_v50, %v5289_v36  ;;  %v6287_v4 = vmul.f32 %v6149_v1, %v5775_v51  ;;  %v6421_v32 = vadd.f32 %v6420_v28, %v6285_v20  ;;  %v6436_v37 = vpop.permute.xlu0 %6435 }
 0x58f   : > { %v5645_v49 = vpop.f32.mrf.mxu0  ;;  %v6353_v33 = vadd.f32 %v6352_v0, %v6286_v53  ;;  %v6440_v36 = vsub.s32 0, %v6439_v34 }
 0x590   : > { %v5777_v35 = vmax.f32 %v5642_v60, 0.0  ;;  %v5646_v55 = vadd.f32 %v5645_v49, %v5293_v43  ;;  %v6288_v23 = vmul.f32 %v6154_v58, %v5776_v17  ;;  %v6422_v48 = vadd.f32 %v6421_v32, %v6287_v4 }
 0x591   : > { %v5647_v7 = vpop.f32.mrf.mxu0  ;;  %v6441_v22 = vrot.slane %v6436_v37, %v6440_v36  ;;  %v7664_v17 = vmov 1966171168  }
 0x592   : > { %v5778_v18 = vmax.f32 %v5646_v55, 0.0  ;;  %v5648_v59 = vadd.f32 %v5647_v7, %v5295_v30  ;;  %v6289_v15 = vmul.f32 %v6154_v58, %v5777_v35  ;;  %v6354_v56 = vadd.f32 %v6353_v33, %v6288_v23 }
 0x593   : > { %v5649_v25 = vpop.f32.mrf.mxu0  ;;  %v6450_v60 = vunpack.c.l.s4 %v7664_v17 }
 0x594   : > { %v6290_v41 = vmul.f32 %v6159_v46, %v5778_v18  ;;  %v5779_v10 = vmax.f32 %v5648_v59, 0.0  ;;  %v5650_v12 = vadd.f32 %v5649_v25, %v5297_v3  ;;  %v6423_v61 = vadd.f32 %v6422_v48, %v6289_v15 }
 0x595   : > { %v5651_v5 = vpop.f32.mrf.mxu0  ;;  %v6451_v11 = vunpack.c.0.s8 %v6450_v60 }
 0x596   : > { %v6291_v38 = vmul.f32 %v6159_v46, %v5779_v10  ;;  %v5780_v2 = vmax.f32 %v5650_v12, 0.0  ;;  %v5652_v57 = vadd.f32 %v5651_v5, %v5299_v27  ;;  %v6355_v24 = vadd.f32 %v6354_v56, %v6290_v41 }
 0x597   : > { %v6454_v20 = vsub.s32 %v6451_v11, %v6439_v34 }
 0x598   : > { %v6292_v8 = vmul.f32 %v6164_v16, %v5780_v2  ;;  %v5781_v29 = vmax.f32 %v5652_v57, 0.0  ;;  %v6424_v26 = vadd.f32 %v6423_v61, %v6291_v38 }
 0x59a   : > { %v6356_v19 = vadd.f32 %v6355_v24, %v6292_v8  ;;  %v6293_v13 = vmul.f32 %v6164_v16, %v5781_v29 }
 0x59c   : > { %v6357_v47 = vrot.slane %v6356_v19, 4  ;;  %v6425_v21 = vadd.f32 %v6424_v26, %v6293_v13 }
 0x59e   : > { %v6358_v52 = vadd.f32 %v6357_v47, %v6356_v19  ;;  %v6426_v54 = vrot.slane %v6425_v21, 4 }
 0x5a0   : > { %v6359_v45 = vrot.slane %v6358_v52, 2  ;;  %v6427_v62 = vadd.f32 %v6426_v54, %v6425_v21 }
 0x5a2   : > { %v6360_v6 = vadd.f32 %v6359_v45, %v6358_v52  ;;  %v6428_v9 = vrot.slane %v6427_v62, 2 }
 0x5a4   : > { %v6361_v1 = vrot.slane %v6360_v6, 1  ;;  %v6429_v44 = vadd.f32 %v6428_v9, %v6427_v62 }
 0x5a6   : > { %v6362_v40 = vadd.f32 %v6361_v1, %v6360_v6  ;;  %v6430_v51 = vrot.slane %v6429_v44, 1 }
 0x5a8   : > { %v6442_v50 = vadd.f32 %v6441_v22, %v6362_v40  ;;  %v6431_v42 = vadd.f32 %v6430_v51, %v6429_v44 }
 0x5aa   : > { %v6443_v43 = vadd.f32 %v6441_v22, %v6431_v42  ;;  %7453 = vtanh.f32 %v6442_v50 }
 0x5ac   : > { %7455 = vtanh.f32 %v6443_v43 }
 0x5b7   : > { %v7454_v14 = vpop.eup %7453 }
 0x5b9   : > { %v7456_v53 = vpop.eup %7455 }
 0x5ba   : > { %v6448_v49 = vcombine.low %v7454_v14, %v7456_v53 }
 0x5bc   : > { %v6455_v30 = vrot.slane %v6448_v49, %v6454_v20 }
 0x5be   : > { %v6462_v31 = vrot.slane %v6455_v30, %v6454_v20 }
 0x5c0   : > { %6468 = vst.msk [vmem:[%s469_s15] sm:$0x3] %vm6466_vm1, %v6462_v31 }
 0x5c1 PF: > { %p22_p6 = scmp.ge.s32.totalorder %s7735_s14, 4   ;;  %s11148_s11 = smov %s7647_s12 }
 0x5c2   : > { %s11149_s12 = smov %s7745_s17  ;;  %s11150_s13 = smov %s7735_s14 }
 0x5c3   :  { %24 = sbr.rel (!%p22_p6) target bundleno = 8 (0x8), region = 154 }
 0x5c8   :  { %6489 = vsyncpa [#allocation5], 1 }
 0x5c9   :  { %6491 = vsyncpa [#allocation5 + $0x1], 1 }
 0x5ca   :  { %6492 = vsyncpa [#allocation7], 1 }
 0x5cb   :  { %6493 = vsyncpa [#allocation10], 1 }
 0x5cc   :  { %6494 = vsyncpa [#allocation13], 1 }

</bundles_post_ra>
